<compile_context>
chip_gen: v5e
topology: v5e:2x2
jax: 0.10.0
libtpu: 0.0.40
codegen_flags: <defaults>
</compile_context>

<pallas_src>
import math

import jax
import jax.numpy as jnp
from jax.experimental import pallas as pl
from jax.experimental.pallas import tpu as pltpu


_GELU_C = math.sqrt(2.0 / math.pi)


def _gelu_tanh(x):
    # TODO(synk): torch nn.GELU() defaults to the exact erf formulation; erf has
    # no reliable Mosaic lowering, so the standard tanh approximation is used
    # here (and in the pure-JAX reference) -- max abs deviation ~3e-4.
    c = jnp.asarray(_GELU_C, dtype=x.dtype)
    a = jnp.asarray(0.044715, dtype=x.dtype)
    half = jnp.asarray(0.5, dtype=x.dtype)
    one = jnp.asarray(1.0, dtype=x.dtype)
    return half * x * (one + jnp.tanh(c * (x + a * (x * x * x))))


def _bf16_vpu_ok():
    # bf16 VPU/EUP exists on v6e/v7x but not v5e and older: keep GELU math in
    # f32 there (bf16 would only be upcast anyway).
    try:
        kind = jax.devices()[0].device_kind.lower()
    except Exception:
        return False
    return not any(tag in kind for tag in ("v2", "v3", "v4", "v5"))


def _pick_row_block(H, W):
    # Smallest divisor of H giving >= 128 matmul rows (good MXU fill), with a
    # multiple-of-8 row count for the lane-dense output block.  Bounding the
    # block keeps the (rows, 4*dim) GELU intermediate small at any resolution
    # and gives every TensorCore several pipelined grid steps.
    best = None
    for rb in range(1, H + 1):
        if H % rb:
            continue
        if (rb * W) % 8:
            continue
        best = rb
        if rb * W >= 128:
            break
    return best if best is not None else H


def make_local_convnext_kernel(H, W, C, Wp, RB, eps, gelu_dtype):
    M = RB * W  # rows handled per grid step

    def kernel(xp_ref, wdw_ref, bdw_ref, w1_ref, b1_ref, w2_ref, b2_ref, o_ref):
        # xp_ref:  (H+6, Wp, C)  zero-padded NHWC image (VMEM resident per n)
        # wdw_ref: (49, C)       depthwise weights, tap-major
        # bdw_ref: (1, C)
        # w1_ref:  (C, 4C) bf16  (LayerNorm affine folded in)
        # b1_ref:  (1, 4C) f32
        # w2_ref:  (4C, C) bf16  (layer scale gamma folded in)
        # b2_ref:  (1, C)  f32
        # o_ref:   (M, C)        lane-dense output rows for this block
        r = pl.program_id(1)
        row0 = r * RB  # first output row of this block

        # ---- depthwise 7x7 conv on RB output rows --------------------------
        # Aligned row-slab loads + static XLU sublane rolls instead of 49
        # sublane-misaligned slices.
        acc = None
        for dy in range(7):
            slab = xp_ref[pl.ds(row0 + dy, RB), :, :]            # (RB, Wp, C)
            for dx in range(7):
                if dx == 0:
                    shifted = slab
                else:
                    shifted = pltpu.roll(slab, Wp - dx, axis=1)   # XLU rotate
                tap = shifted[:, :W, :]                           # aligned slice
                if dy == 3 and dx == 3:
                    # Centre tap == un-padded input rows: stash the residual in
                    # o_ref now so it is not pinned in vregs through the MLP.
                    o_ref[...] = tap.reshape(M, C)
                term = tap * wdw_ref[dy * 7 + dx:dy * 7 + dx + 1, :]
                acc = term if acc is None else acc + term

        y = acc.reshape(M, C) + bdw_ref[...]                      # (M, C) f32

        # ---- LayerNorm over channels (affine folded into w1'/b1') -----------
        mu = jnp.mean(y, axis=-1, keepdims=True)
        d = y - mu
        var = jnp.mean(d * d, axis=-1, keepdims=True)
        yn = d * jax.lax.rsqrt(var + eps)

        # ---- pwconv1 -> GELU -> pwconv2 (bf16 MXU operands, f32 accum) ------
        h = jnp.dot(yn.astype(jnp.bfloat16), w1_ref[...],
                    preferred_element_type=jnp.float32) + b1_ref[...]
        g = _gelu_tanh(h.astype(gelu_dtype))
        y2 = jnp.dot(g.astype(jnp.bfloat16), w2_ref[...],
                     preferred_element_type=jnp.float32) + b2_ref[...]

        # ---- residual (already in o_ref) + scaled branch (gamma folded) -----
        o_ref[...] = o_ref[...] + y2

    return kernel


def local_convnext_pallas(x, w_dw, b_dw, ln_w, ln_b, w1, b1, w2, b2, gamma,
                          eps=1e-6):
    """x: (N, C, H, W) f32.  w_dw: (C, 7, 7).  w1: (C, 4C).  w2: (4C, C).
    Per-channel vectors are 1-D of size C (or 4C for b1).  Returns (N, C, H, W)."""
    N, C, H, W = x.shape
    hidden = w1.shape[1]
    HW = H * W
    RB = _pick_row_block(H, W)
    n_rb = H // RB
    M = RB * W
    Hp = H + 6
    Wp = ((W + 6 + 7) // 8) * 8           # pad W-axis to a sublane multiple

    f32 = jnp.float32

    # NCHW -> NHWC + spatial zero padding (wrapper-side layout plumbing).
    # TODO(synk): on v5e at large H*W this padded HBM copy doubles input traffic;
    # could instead DMA the unpadded image and zero the halo into a VMEM scratch.
    x_nhwc = jnp.transpose(x, (0, 2, 3, 1)).astype(f32)
    x_pad = jnp.pad(x_nhwc, ((0, 0), (3, 3), (3, Wp - W - 3), (0, 0)))

    # Depthwise weights tap-major (49, C), channels on lanes.
    wdw2 = jnp.transpose(w_dw, (1, 2, 0)).reshape(49, C).astype(f32)

    # Fold LayerNorm affine into pwconv1 and the layer scale into pwconv2,
    # then cast the matmul weights to bf16 (MXU-native).
    w1f = w1.astype(f32) * ln_w.astype(f32)[:, None]
    b1f = ln_b.astype(f32) @ w1.astype(f32) + b1.astype(f32)
    w2f = w2.astype(f32) * gamma.astype(f32)[None, :]
    b2f = b2.astype(f32) * gamma.astype(f32)

    vec = lambda v: v.reshape(1, -1).astype(f32)

    gelu_dtype = jnp.bfloat16 if _bf16_vpu_ok() else jnp.float32
    kernel = make_local_convnext_kernel(H, W, C, Wp, RB, float(eps), gelu_dtype)

    # Constants live fully in VMEM, single-buffered.
    vmem_resident = pl.BlockSpec(memory_space=pltpu.MemorySpace.VMEM)

    # VMEM limit sized from actual buffers (+ generous headroom), not a blanket.
    in_block = Hp * Wp * C * 4
    out_block = M * C * 4
    consts = (49 * C + C + hidden + C) * 4 + 2 * C * hidden * 2
    inter = M * hidden * 4 * 3 + M * C * 4 * 4
    vmem_limit = int(min(2 * in_block + 2 * out_block + consts + inter + (8 << 20),
                         100 * 1024 * 1024))

    out = pl.pallas_call(
        kernel,
        out_shape=jax.ShapeDtypeStruct((N, HW, C), f32),
        grid_spec=pltpu.PrefetchScalarGridSpec(
            num_scalar_prefetch=0,
            grid=(N, n_rb),
            in_specs=[
                pl.BlockSpec((None, Hp, Wp, C), lambda n, r: (n, 0, 0, 0)),
                vmem_resident,   # dw weights (49, C)
                vmem_resident,   # dw bias    (1, C)
                vmem_resident,   # w1' bf16   (C, 4C)
                vmem_resident,   # b1' f32    (1, 4C)
                vmem_resident,   # w2' bf16   (4C, C)
                vmem_resident,   # b2' f32    (1, C)
            ],
            out_specs=pl.BlockSpec((None, M, C), lambda n, r: (n, r, 0)),
        ),
        compiler_params=pltpu.CompilerParams(
            dimension_semantics=("parallel", "parallel"),
            vmem_limit_bytes=vmem_limit,
        ),
    )(x_pad, wdw2, vec(b_dw), w1f.astype(jnp.bfloat16), vec(b1f),
      w2f.astype(jnp.bfloat16), vec(b2f))

    # (N, H*W, C) -> (N, H, W, C) -> NCHW.
    return jnp.transpose(out.reshape(N, H, W, C), (0, 3, 1, 2))


def local_convnext_reference(x, w_dw, b_dw, ln_w, ln_b, w1, b1, w2, b2, gamma,
                             eps=1e-6):
    """Pure-JAX f32/HIGHEST reference mirroring the PyTorch forward."""
    N, C, H, W = x.shape
    hp = jax.lax.Precision.HIGHEST
    y = jax.lax.conv_general_dilated(
        x, w_dw[:, None, :, :], window_strides=(1, 1),
        padding=((3, 3), (3, 3)),
        dimension_numbers=("NCHW", "OIHW", "NCHW"),
        feature_group_count=C, precision=hp)
    y = y + b_dw[None, :, None, None]
    y = jnp.transpose(y, (0, 2, 3, 1))                 # N H W C
    mu = jnp.mean(y, axis=-1, keepdims=True)
    var = jnp.mean((y - mu) ** 2, axis=-1, keepdims=True)
    y = (y - mu) * jax.lax.rsqrt(var + eps)
    y = y * ln_w + ln_b
    y = jnp.einsum("nhwc,cf->nhwf", y, w1, precision=hp) + b1
    y = _gelu_tanh(y)
    y = jnp.einsum("nhwf,fc->nhwc", y, w2, precision=hp) + b2
    y = y * gamma
    y = jnp.transpose(y, (0, 3, 1, 2))                 # N C H W
    return x + y


if __name__ == "__main__":
    # ConvNeXt-block-friendly small shapes: batch=2, dim=128 (lane-dense),
    # spatial 16x16, hidden = 4*dim = 512.
    N, C, H, W = 2, 128, 16, 16
    hidden = 4 * C
    eps = 1e-6

    key = jax.random.PRNGKey(0)
    ks = jax.random.split(key, 10)

    x = jax.random.normal(ks[0], (N, C, H, W), dtype=jnp.float32)

    kb = 1.0 / math.sqrt(7 * 7)                 # torch depthwise-conv init bound
    w_dw = jax.random.uniform(ks[1], (C, 7, 7), jnp.float32, -kb, kb)
    b_dw = jax.random.uniform(ks[2], (C,), jnp.float32, -kb, kb)

    ln_w = 1.0 + 0.1 * jax.random.normal(ks[3], (C,), dtype=jnp.float32)
    ln_b = 0.1 * jax.random.normal(ks[4], (C,), dtype=jnp.float32)

    b1k = 1.0 / math.sqrt(C)
    w1 = jax.random.uniform(ks[5], (C, hidden), jnp.float32, -b1k, b1k)   # pre-transposed
    b1 = jax.random.uniform(ks[6], (hidden,), jnp.float32, -b1k, b1k)
    b2k = 1.0 / math.sqrt(hidden)
    w2 = jax.random.uniform(ks[7], (hidden, C), jnp.float32, -b2k, b2k)   # pre-transposed
    b2 = jax.random.uniform(ks[8], (C,), jnp.float32, -b2k, b2k)

    # Module initialises gamma to 1e-6*ones; random values exercise the same math
    # with a non-trivial numerical check.
    gamma = jax.random.uniform(ks[9], (C,), jnp.float32, 0.5, 1.5)

    y = local_convnext_pallas(x, w_dw, b_dw, ln_w, ln_b, w1, b1, w2, b2, gamma,
                              eps=eps)
    y = jax.block_until_ready(y)

    y_ref = local_convnext_reference(x, w_dw, b_dw, ln_w, ln_b, w1, b1, w2, b2,
                                     gamma, eps=eps)

    assert y.shape == x.shape
    # bf16 MXU operands (K up to 512) => loosened tolerance vs the f32 reference.
    max_err = float(jnp.max(jnp.abs(y - y_ref)))
    assert jnp.allclose(y, y_ref, atol=2e-2, rtol=2e-2), (
        f"mismatch vs reference (max abs err {max_err:.3e})")

    print("KERNEL_OK")
</pallas_src>

<mosaic_0001>
module attributes {stable_mosaic.version = 11 : i64} {
  func.func @kernel(%arg0: i32, %arg1: i32, %arg2: memref<1x22x24x128xf32, #tpu.memory_space<vmem>>, %arg3: memref<49x128xf32, #tpu.memory_space<vmem>>, %arg4: memref<1x128xf32, #tpu.memory_space<vmem>>, %arg5: memref<128x512xbf16, #tpu.memory_space<vmem>>, %arg6: memref<1x512xf32, #tpu.memory_space<vmem>>, %arg7: memref<512x128xbf16, #tpu.memory_space<vmem>>, %arg8: memref<1x128xf32, #tpu.memory_space<vmem>>, %arg9: memref<1x128x128xf32, #tpu.memory_space<vmem>>) attributes {dimension_semantics = [#tpu.dimension_semantics<parallel>, #tpu.dimension_semantics<parallel>], iteration_bounds = array<i64: 2, 2>, scalar_prefetch = 0 : i64, scratch_operands = 0 : i64, tpu.core_type = #tpu.core_type<tc>, window_params = [{transform_indices = @transform_0, window_bounds = array<i64: 1, 22, 24, 128>}, {pipeline_mode = #tpu.pipeline_mode<synchronous>, transform_indices = @transform_1, window_bounds = array<i64: 49, 128>}, {pipeline_mode = #tpu.pipeline_mode<synchronous>, transform_indices = @transform_2, window_bounds = array<i64: 1, 128>}, {pipeline_mode = #tpu.pipeline_mode<synchronous>, transform_indices = @transform_3, window_bounds = array<i64: 128, 512>}, {pipeline_mode = #tpu.pipeline_mode<synchronous>, transform_indices = @transform_4, window_bounds = array<i64: 1, 512>}, {pipeline_mode = #tpu.pipeline_mode<synchronous>, transform_indices = @transform_5, window_bounds = array<i64: 512, 128>}, {pipeline_mode = #tpu.pipeline_mode<synchronous>, transform_indices = @transform_6, window_bounds = array<i64: 1, 128>}, {transform_indices = @transform_7, window_bounds = array<i64: 1, 128, 128>}]} {
    %c8_i32 = arith.constant 8 : i32
    %0 = arith.muli %arg1, %c8_i32 : i32
    %c0_i32 = arith.constant 0 : i32
    %1 = arith.addi %0, %c0_i32 : i32
    %c0 = arith.constant 0 : index
    %2 = arith.index_cast %1 : i32 to index
    %c0_0 = arith.constant 0 : index
    %c0_1 = arith.constant 0 : index
    %3 = vector.load %arg2[%c0, %2, %c0_0, %c0_1] : memref<1x22x24x128xf32, #tpu.memory_space<vmem>>, vector<1x8x24x128xf32>
    %4 = vector.shape_cast %3 : vector<1x8x24x128xf32> to vector<8x24x128xf32>
    %5 = vector.extract_strided_slice %4 {offsets = [0, 0, 0], sizes = [8, 16, 128], strides = [1, 1, 1]} : vector<8x24x128xf32> to vector<8x16x128xf32>
    %c0_2 = arith.constant 0 : index
    %c0_3 = arith.constant 0 : index
    %6 = vector.load %arg3[%c0_2, %c0_3] : memref<49x128xf32, #tpu.memory_space<vmem>>, vector<1x128xf32>
    %7 = vector.shape_cast %6 : vector<1x128xf32> to vector<1x1x128xf32>
    %8 = vector.broadcast %7 : vector<1x1x128xf32> to vector<8x16x128xf32>
    %9 = arith.mulf %5, %8 : vector<8x16x128xf32>
    %c23_i32 = arith.constant 23 : i32
    %10 = tpu.dynamic_rotate %4 by %c23_i32 dim 1 : vector<8x24x128xf32>, i32 -> vector<8x24x128xf32>
    %11 = vector.extract_strided_slice %10 {offsets = [0, 0, 0], sizes = [8, 16, 128], strides = [1, 1, 1]} : vector<8x24x128xf32> to vector<8x16x128xf32>
    %c1 = arith.constant 1 : index
    %c0_4 = arith.constant 0 : index
    %12 = vector.load %arg3[%c1, %c0_4] : memref<49x128xf32, #tpu.memory_space<vmem>>, vector<1x128xf32>
    %13 = vector.shape_cast %12 : vector<1x128xf32> to vector<1x1x128xf32>
    %14 = vector.broadcast %13 : vector<1x1x128xf32> to vector<8x16x128xf32>
    %15 = arith.mulf %11, %14 : vector<8x16x128xf32>
    %16 = arith.addf %9, %15 : vector<8x16x128xf32>
    %c22_i32 = arith.constant 22 : i32
    %17 = tpu.dynamic_rotate %4 by %c22_i32 dim 1 : vector<8x24x128xf32>, i32 -> vector<8x24x128xf32>
    %18 = vector.extract_strided_slice %17 {offsets = [0, 0, 0], sizes = [8, 16, 128], strides = [1, 1, 1]} : vector<8x24x128xf32> to vector<8x16x128xf32>
    %c2 = arith.constant 2 : index
    %c0_5 = arith.constant 0 : index
    %19 = vector.load %arg3[%c2, %c0_5] : memref<49x128xf32, #tpu.memory_space<vmem>>, vector<1x128xf32>
    %20 = vector.shape_cast %19 : vector<1x128xf32> to vector<1x1x128xf32>
    %21 = vector.broadcast %20 : vector<1x1x128xf32> to vector<8x16x128xf32>
    %22 = arith.mulf %18, %21 : vector<8x16x128xf32>
    %23 = arith.addf %16, %22 : vector<8x16x128xf32>
    %c21_i32 = arith.constant 21 : i32
    %24 = tpu.dynamic_rotate %4 by %c21_i32 dim 1 : vector<8x24x128xf32>, i32 -> vector<8x24x128xf32>
    %25 = vector.extract_strided_slice %24 {offsets = [0, 0, 0], sizes = [8, 16, 128], strides = [1, 1, 1]} : vector<8x24x128xf32> to vector<8x16x128xf32>
    %c3 = arith.constant 3 : index
    %c0_6 = arith.constant 0 : index
    %26 = vector.load %arg3[%c3, %c0_6] : memref<49x128xf32, #tpu.memory_space<vmem>>, vector<1x128xf32>
    %27 = vector.shape_cast %26 : vector<1x128xf32> to vector<1x1x128xf32>
    %28 = vector.broadcast %27 : vector<1x1x128xf32> to vector<8x16x128xf32>
    %29 = arith.mulf %25, %28 : vector<8x16x128xf32>
    %30 = arith.addf %23, %29 : vector<8x16x128xf32>
    %c20_i32 = arith.constant 20 : i32
    %31 = tpu.dynamic_rotate %4 by %c20_i32 dim 1 : vector<8x24x128xf32>, i32 -> vector<8x24x128xf32>
    %32 = vector.extract_strided_slice %31 {offsets = [0, 0, 0], sizes = [8, 16, 128], strides = [1, 1, 1]} : vector<8x24x128xf32> to vector<8x16x128xf32>
    %c4 = arith.constant 4 : index
    %c0_7 = arith.constant 0 : index
    %33 = vector.load %arg3[%c4, %c0_7] : memref<49x128xf32, #tpu.memory_space<vmem>>, vector<1x128xf32>
    %34 = vector.shape_cast %33 : vector<1x128xf32> to vector<1x1x128xf32>
    %35 = vector.broadcast %34 : vector<1x1x128xf32> to vector<8x16x128xf32>
    %36 = arith.mulf %32, %35 : vector<8x16x128xf32>
    %37 = arith.addf %30, %36 : vector<8x16x128xf32>
    %c19_i32 = arith.constant 19 : i32
    %38 = tpu.dynamic_rotate %4 by %c19_i32 dim 1 : vector<8x24x128xf32>, i32 -> vector<8x24x128xf32>
    %39 = vector.extract_strided_slice %38 {offsets = [0, 0, 0], sizes = [8, 16, 128], strides = [1, 1, 1]} : vector<8x24x128xf32> to vector<8x16x128xf32>
    %c5 = arith.constant 5 : index
    %c0_8 = arith.constant 0 : index
    %40 = vector.load %arg3[%c5, %c0_8] : memref<49x128xf32, #tpu.memory_space<vmem>>, vector<1x128xf32>
    %41 = vector.shape_cast %40 : vector<1x128xf32> to vector<1x1x128xf32>
    %42 = vector.broadcast %41 : vector<1x1x128xf32> to vector<8x16x128xf32>
    %43 = arith.mulf %39, %42 : vector<8x16x128xf32>
    %44 = arith.addf %37, %43 : vector<8x16x128xf32>
    %c18_i32 = arith.constant 18 : i32
    %45 = tpu.dynamic_rotate %4 by %c18_i32 dim 1 : vector<8x24x128xf32>, i32 -> vector<8x24x128xf32>
    %46 = vector.extract_strided_slice %45 {offsets = [0, 0, 0], sizes = [8, 16, 128], strides = [1, 1, 1]} : vector<8x24x128xf32> to vector<8x16x128xf32>
    %c6 = arith.constant 6 : index
    %c0_9 = arith.constant 0 : index
    %47 = vector.load %arg3[%c6, %c0_9] : memref<49x128xf32, #tpu.memory_space<vmem>>, vector<1x128xf32>
    %48 = vector.shape_cast %47 : vector<1x128xf32> to vector<1x1x128xf32>
    %49 = vector.broadcast %48 : vector<1x1x128xf32> to vector<8x16x128xf32>
    %50 = arith.mulf %46, %49 : vector<8x16x128xf32>
    %51 = arith.addf %44, %50 : vector<8x16x128xf32>
    %c1_i32 = arith.constant 1 : i32
    %52 = arith.addi %0, %c1_i32 : i32
    %c0_10 = arith.constant 0 : index
    %53 = arith.index_cast %52 : i32 to index
    %c0_11 = arith.constant 0 : index
    %c0_12 = arith.constant 0 : index
    %54 = vector.load %arg2[%c0_10, %53, %c0_11, %c0_12] : memref<1x22x24x128xf32, #tpu.memory_space<vmem>>, vector<1x8x24x128xf32>
    %55 = vector.shape_cast %54 : vector<1x8x24x128xf32> to vector<8x24x128xf32>
    %56 = vector.extract_strided_slice %55 {offsets = [0, 0, 0], sizes = [8, 16, 128], strides = [1, 1, 1]} : vector<8x24x128xf32> to vector<8x16x128xf32>
    %c7 = arith.constant 7 : index
    %c0_13 = arith.constant 0 : index
    %57 = vector.load %arg3[%c7, %c0_13] : memref<49x128xf32, #tpu.memory_space<vmem>>, vector<1x128xf32>
    %58 = vector.shape_cast %57 : vector<1x128xf32> to vector<1x1x128xf32>
    %59 = vector.broadcast %58 : vector<1x1x128xf32> to vector<8x16x128xf32>
    %60 = arith.mulf %56, %59 : vector<8x16x128xf32>
    %61 = arith.addf %51, %60 : vector<8x16x128xf32>
    %c23_i32_14 = arith.constant 23 : i32
    %62 = tpu.dynamic_rotate %55 by %c23_i32_14 dim 1 : vector<8x24x128xf32>, i32 -> vector<8x24x128xf32>
    %63 = vector.extract_strided_slice %62 {offsets = [0, 0, 0], sizes = [8, 16, 128], strides = [1, 1, 1]} : vector<8x24x128xf32> to vector<8x16x128xf32>
    %c8 = arith.constant 8 : index
    %c0_15 = arith.constant 0 : index
    %64 = vector.load %arg3[%c8, %c0_15] : memref<49x128xf32, #tpu.memory_space<vmem>>, vector<1x128xf32>
    %65 = vector.shape_cast %64 : vector<1x128xf32> to vector<1x1x128xf32>
    %66 = vector.broadcast %65 : vector<1x1x128xf32> to vector<8x16x128xf32>
    %67 = arith.mulf %63, %66 : vector<8x16x128xf32>
    %68 = arith.addf %61, %67 : vector<8x16x128xf32>
    %c22_i32_16 = arith.constant 22 : i32
    %69 = tpu.dynamic_rotate %55 by %c22_i32_16 dim 1 : vector<8x24x128xf32>, i32 -> vector<8x24x128xf32>
    %70 = vector.extract_strided_slice %69 {offsets = [0, 0, 0], sizes = [8, 16, 128], strides = [1, 1, 1]} : vector<8x24x128xf32> to vector<8x16x128xf32>
    %c9 = arith.constant 9 : index
    %c0_17 = arith.constant 0 : index
    %71 = vector.load %arg3[%c9, %c0_17] : memref<49x128xf32, #tpu.memory_space<vmem>>, vector<1x128xf32>
    %72 = vector.shape_cast %71 : vector<1x128xf32> to vector<1x1x128xf32>
    %73 = vector.broadcast %72 : vector<1x1x128xf32> to vector<8x16x128xf32>
    %74 = arith.mulf %70, %73 : vector<8x16x128xf32>
    %75 = arith.addf %68, %74 : vector<8x16x128xf32>
    %c21_i32_18 = arith.constant 21 : i32
    %76 = tpu.dynamic_rotate %55 by %c21_i32_18 dim 1 : vector<8x24x128xf32>, i32 -> vector<8x24x128xf32>
    %77 = vector.extract_strided_slice %76 {offsets = [0, 0, 0], sizes = [8, 16, 128], strides = [1, 1, 1]} : vector<8x24x128xf32> to vector<8x16x128xf32>
    %c10 = arith.constant 10 : index
    %c0_19 = arith.constant 0 : index
    %78 = vector.load %arg3[%c10, %c0_19] : memref<49x128xf32, #tpu.memory_space<vmem>>, vector<1x128xf32>
    %79 = vector.shape_cast %78 : vector<1x128xf32> to vector<1x1x128xf32>
    %80 = vector.broadcast %79 : vector<1x1x128xf32> to vector<8x16x128xf32>
    %81 = arith.mulf %77, %80 : vector<8x16x128xf32>
    %82 = arith.addf %75, %81 : vector<8x16x128xf32>
    %c20_i32_20 = arith.constant 20 : i32
    %83 = tpu.dynamic_rotate %55 by %c20_i32_20 dim 1 : vector<8x24x128xf32>, i32 -> vector<8x24x128xf32>
    %84 = vector.extract_strided_slice %83 {offsets = [0, 0, 0], sizes = [8, 16, 128], strides = [1, 1, 1]} : vector<8x24x128xf32> to vector<8x16x128xf32>
    %c11 = arith.constant 11 : index
    %c0_21 = arith.constant 0 : index
    %85 = vector.load %arg3[%c11, %c0_21] : memref<49x128xf32, #tpu.memory_space<vmem>>, vector<1x128xf32>
    %86 = vector.shape_cast %85 : vector<1x128xf32> to vector<1x1x128xf32>
    %87 = vector.broadcast %86 : vector<1x1x128xf32> to vector<8x16x128xf32>
    %88 = arith.mulf %84, %87 : vector<8x16x128xf32>
    %89 = arith.addf %82, %88 : vector<8x16x128xf32>
    %c19_i32_22 = arith.constant 19 : i32
    %90 = tpu.dynamic_rotate %55 by %c19_i32_22 dim 1 : vector<8x24x128xf32>, i32 -> vector<8x24x128xf32>
    %91 = vector.extract_strided_slice %90 {offsets = [0, 0, 0], sizes = [8, 16, 128], strides = [1, 1, 1]} : vector<8x24x128xf32> to vector<8x16x128xf32>
    %c12 = arith.constant 12 : index
    %c0_23 = arith.constant 0 : index
    %92 = vector.load %arg3[%c12, %c0_23] : memref<49x128xf32, #tpu.memory_space<vmem>>, vector<1x128xf32>
    %93 = vector.shape_cast %92 : vector<1x128xf32> to vector<1x1x128xf32>
    %94 = vector.broadcast %93 : vector<1x1x128xf32> to vector<8x16x128xf32>
    %95 = arith.mulf %91, %94 : vector<8x16x128xf32>
    %96 = arith.addf %89, %95 : vector<8x16x128xf32>
    %c18_i32_24 = arith.constant 18 : i32
    %97 = tpu.dynamic_rotate %55 by %c18_i32_24 dim 1 : vector<8x24x128xf32>, i32 -> vector<8x24x128xf32>
    %98 = vector.extract_strided_slice %97 {offsets = [0, 0, 0], sizes = [8, 16, 128], strides = [1, 1, 1]} : vector<8x24x128xf32> to vector<8x16x128xf32>
    %c13 = arith.constant 13 : index
    %c0_25 = arith.constant 0 : index
    %99 = vector.load %arg3[%c13, %c0_25] : memref<49x128xf32, #tpu.memory_space<vmem>>, vector<1x128xf32>
    %100 = vector.shape_cast %99 : vector<1x128xf32> to vector<1x1x128xf32>
    %101 = vector.broadcast %100 : vector<1x1x128xf32> to vector<8x16x128xf32>
    %102 = arith.mulf %98, %101 : vector<8x16x128xf32>
    %103 = arith.addf %96, %102 : vector<8x16x128xf32>
    %c2_i32 = arith.constant 2 : i32
    %104 = arith.addi %0, %c2_i32 : i32
    %c0_26 = arith.constant 0 : index
    %105 = arith.index_cast %104 : i32 to index
    %c0_27 = arith.constant 0 : index
    %c0_28 = arith.constant 0 : index
    %106 = vector.load %arg2[%c0_26, %105, %c0_27, %c0_28] : memref<1x22x24x128xf32, #tpu.memory_space<vmem>>, vector<1x8x24x128xf32>
    %107 = vector.shape_cast %106 : vector<1x8x24x128xf32> to vector<8x24x128xf32>
    %108 = vector.extract_strided_slice %107 {offsets = [0, 0, 0], sizes = [8, 16, 128], strides = [1, 1, 1]} : vector<8x24x128xf32> to vector<8x16x128xf32>
    %c14 = arith.constant 14 : index
    %c0_29 = arith.constant 0 : index
    %109 = vector.load %arg3[%c14, %c0_29] : memref<49x128xf32, #tpu.memory_space<vmem>>, vector<1x128xf32>
    %110 = vector.shape_cast %109 : vector<1x128xf32> to vector<1x1x128xf32>
    %111 = vector.broadcast %110 : vector<1x1x128xf32> to vector<8x16x128xf32>
    %112 = arith.mulf %108, %111 : vector<8x16x128xf32>
    %113 = arith.addf %103, %112 : vector<8x16x128xf32>
    %c23_i32_30 = arith.constant 23 : i32
    %114 = tpu.dynamic_rotate %107 by %c23_i32_30 dim 1 : vector<8x24x128xf32>, i32 -> vector<8x24x128xf32>
    %115 = vector.extract_strided_slice %114 {offsets = [0, 0, 0], sizes = [8, 16, 128], strides = [1, 1, 1]} : vector<8x24x128xf32> to vector<8x16x128xf32>
    %c15 = arith.constant 15 : index
    %c0_31 = arith.constant 0 : index
    %116 = vector.load %arg3[%c15, %c0_31] : memref<49x128xf32, #tpu.memory_space<vmem>>, vector<1x128xf32>
    %117 = vector.shape_cast %116 : vector<1x128xf32> to vector<1x1x128xf32>
    %118 = vector.broadcast %117 : vector<1x1x128xf32> to vector<8x16x128xf32>
    %119 = arith.mulf %115, %118 : vector<8x16x128xf32>
    %120 = arith.addf %113, %119 : vector<8x16x128xf32>
    %c22_i32_32 = arith.constant 22 : i32
    %121 = tpu.dynamic_rotate %107 by %c22_i32_32 dim 1 : vector<8x24x128xf32>, i32 -> vector<8x24x128xf32>
    %122 = vector.extract_strided_slice %121 {offsets = [0, 0, 0], sizes = [8, 16, 128], strides = [1, 1, 1]} : vector<8x24x128xf32> to vector<8x16x128xf32>
    %c16 = arith.constant 16 : index
    %c0_33 = arith.constant 0 : index
    %123 = vector.load %arg3[%c16, %c0_33] : memref<49x128xf32, #tpu.memory_space<vmem>>, vector<1x128xf32>
    %124 = vector.shape_cast %123 : vector<1x128xf32> to vector<1x1x128xf32>
    %125 = vector.broadcast %124 : vector<1x1x128xf32> to vector<8x16x128xf32>
    %126 = arith.mulf %122, %125 : vector<8x16x128xf32>
    %127 = arith.addf %120, %126 : vector<8x16x128xf32>
    %c21_i32_34 = arith.constant 21 : i32
    %128 = tpu.dynamic_rotate %107 by %c21_i32_34 dim 1 : vector<8x24x128xf32>, i32 -> vector<8x24x128xf32>
    %129 = vector.extract_strided_slice %128 {offsets = [0, 0, 0], sizes = [8, 16, 128], strides = [1, 1, 1]} : vector<8x24x128xf32> to vector<8x16x128xf32>
    %c17 = arith.constant 17 : index
    %c0_35 = arith.constant 0 : index
    %130 = vector.load %arg3[%c17, %c0_35] : memref<49x128xf32, #tpu.memory_space<vmem>>, vector<1x128xf32>
    %131 = vector.shape_cast %130 : vector<1x128xf32> to vector<1x1x128xf32>
    %132 = vector.broadcast %131 : vector<1x1x128xf32> to vector<8x16x128xf32>
    %133 = arith.mulf %129, %132 : vector<8x16x128xf32>
    %134 = arith.addf %127, %133 : vector<8x16x128xf32>
    %c20_i32_36 = arith.constant 20 : i32
    %135 = tpu.dynamic_rotate %107 by %c20_i32_36 dim 1 : vector<8x24x128xf32>, i32 -> vector<8x24x128xf32>
    %136 = vector.extract_strided_slice %135 {offsets = [0, 0, 0], sizes = [8, 16, 128], strides = [1, 1, 1]} : vector<8x24x128xf32> to vector<8x16x128xf32>
    %c18 = arith.constant 18 : index
    %c0_37 = arith.constant 0 : index
    %137 = vector.load %arg3[%c18, %c0_37] : memref<49x128xf32, #tpu.memory_space<vmem>>, vector<1x128xf32>
    %138 = vector.shape_cast %137 : vector<1x128xf32> to vector<1x1x128xf32>
    %139 = vector.broadcast %138 : vector<1x1x128xf32> to vector<8x16x128xf32>
    %140 = arith.mulf %136, %139 : vector<8x16x128xf32>
    %141 = arith.addf %134, %140 : vector<8x16x128xf32>
    %c19_i32_38 = arith.constant 19 : i32
    %142 = tpu.dynamic_rotate %107 by %c19_i32_38 dim 1 : vector<8x24x128xf32>, i32 -> vector<8x24x128xf32>
    %143 = vector.extract_strided_slice %142 {offsets = [0, 0, 0], sizes = [8, 16, 128], strides = [1, 1, 1]} : vector<8x24x128xf32> to vector<8x16x128xf32>
    %c19 = arith.constant 19 : index
    %c0_39 = arith.constant 0 : index
    %144 = vector.load %arg3[%c19, %c0_39] : memref<49x128xf32, #tpu.memory_space<vmem>>, vector<1x128xf32>
    %145 = vector.shape_cast %144 : vector<1x128xf32> to vector<1x1x128xf32>
    %146 = vector.broadcast %145 : vector<1x1x128xf32> to vector<8x16x128xf32>
    %147 = arith.mulf %143, %146 : vector<8x16x128xf32>
    %148 = arith.addf %141, %147 : vector<8x16x128xf32>
    %c18_i32_40 = arith.constant 18 : i32
    %149 = tpu.dynamic_rotate %107 by %c18_i32_40 dim 1 : vector<8x24x128xf32>, i32 -> vector<8x24x128xf32>
    %150 = vector.extract_strided_slice %149 {offsets = [0, 0, 0], sizes = [8, 16, 128], strides = [1, 1, 1]} : vector<8x24x128xf32> to vector<8x16x128xf32>
    %c20 = arith.constant 20 : index
    %c0_41 = arith.constant 0 : index
    %151 = vector.load %arg3[%c20, %c0_41] : memref<49x128xf32, #tpu.memory_space<vmem>>, vector<1x128xf32>
    %152 = vector.shape_cast %151 : vector<1x128xf32> to vector<1x1x128xf32>
    %153 = vector.broadcast %152 : vector<1x1x128xf32> to vector<8x16x128xf32>
    %154 = arith.mulf %150, %153 : vector<8x16x128xf32>
    %155 = arith.addf %148, %154 : vector<8x16x128xf32>
    %c3_i32 = arith.constant 3 : i32
    %156 = arith.addi %0, %c3_i32 : i32
    %c0_42 = arith.constant 0 : index
    %157 = arith.index_cast %156 : i32 to index
    %c0_43 = arith.constant 0 : index
    %c0_44 = arith.constant 0 : index
    %158 = vector.load %arg2[%c0_42, %157, %c0_43, %c0_44] : memref<1x22x24x128xf32, #tpu.memory_space<vmem>>, vector<1x8x24x128xf32>
    %159 = vector.shape_cast %158 : vector<1x8x24x128xf32> to vector<8x24x128xf32>
    %160 = vector.extract_strided_slice %159 {offsets = [0, 0, 0], sizes = [8, 16, 128], strides = [1, 1, 1]} : vector<8x24x128xf32> to vector<8x16x128xf32>
    %c21 = arith.constant 21 : index
    %c0_45 = arith.constant 0 : index
    %161 = vector.load %arg3[%c21, %c0_45] : memref<49x128xf32, #tpu.memory_space<vmem>>, vector<1x128xf32>
    %162 = vector.shape_cast %161 : vector<1x128xf32> to vector<1x1x128xf32>
    %163 = vector.broadcast %162 : vector<1x1x128xf32> to vector<8x16x128xf32>
    %164 = arith.mulf %160, %163 : vector<8x16x128xf32>
    %165 = arith.addf %155, %164 : vector<8x16x128xf32>
    %c23_i32_46 = arith.constant 23 : i32
    %166 = tpu.dynamic_rotate %159 by %c23_i32_46 dim 1 : vector<8x24x128xf32>, i32 -> vector<8x24x128xf32>
    %167 = vector.extract_strided_slice %166 {offsets = [0, 0, 0], sizes = [8, 16, 128], strides = [1, 1, 1]} : vector<8x24x128xf32> to vector<8x16x128xf32>
    %c22 = arith.constant 22 : index
    %c0_47 = arith.constant 0 : index
    %168 = vector.load %arg3[%c22, %c0_47] : memref<49x128xf32, #tpu.memory_space<vmem>>, vector<1x128xf32>
    %169 = vector.shape_cast %168 : vector<1x128xf32> to vector<1x1x128xf32>
    %170 = vector.broadcast %169 : vector<1x1x128xf32> to vector<8x16x128xf32>
    %171 = arith.mulf %167, %170 : vector<8x16x128xf32>
    %172 = arith.addf %165, %171 : vector<8x16x128xf32>
    %c22_i32_48 = arith.constant 22 : i32
    %173 = tpu.dynamic_rotate %159 by %c22_i32_48 dim 1 : vector<8x24x128xf32>, i32 -> vector<8x24x128xf32>
    %174 = vector.extract_strided_slice %173 {offsets = [0, 0, 0], sizes = [8, 16, 128], strides = [1, 1, 1]} : vector<8x24x128xf32> to vector<8x16x128xf32>
    %c23 = arith.constant 23 : index
    %c0_49 = arith.constant 0 : index
    %175 = vector.load %arg3[%c23, %c0_49] : memref<49x128xf32, #tpu.memory_space<vmem>>, vector<1x128xf32>
    %176 = vector.shape_cast %175 : vector<1x128xf32> to vector<1x1x128xf32>
    %177 = vector.broadcast %176 : vector<1x1x128xf32> to vector<8x16x128xf32>
    %178 = arith.mulf %174, %177 : vector<8x16x128xf32>
    %179 = arith.addf %172, %178 : vector<8x16x128xf32>
    %c21_i32_50 = arith.constant 21 : i32
    %180 = tpu.dynamic_rotate %159 by %c21_i32_50 dim 1 : vector<8x24x128xf32>, i32 -> vector<8x24x128xf32>
    %181 = vector.extract_strided_slice %180 {offsets = [0, 0, 0], sizes = [8, 16, 128], strides = [1, 1, 1]} : vector<8x24x128xf32> to vector<8x16x128xf32>
    %182 = vector.shape_cast %181 : vector<8x16x128xf32> to vector<128x128xf32>
    %c0_51 = arith.constant 0 : index
    %c0_52 = arith.constant 0 : index
    %c0_53 = arith.constant 0 : index
    %183 = vector.load %arg9[%c0_51, %c0_52, %c0_53] : memref<1x128x128xf32, #tpu.memory_space<vmem>>, vector<1x128x128xf32>
    %184 = vector.shape_cast %183 : vector<1x128x128xf32> to vector<128x128xf32>
    %185 = vector.shape_cast %182 : vector<128x128xf32> to vector<1x128x128xf32>
    tpu.vector_store %arg9[%c0_51, %c0_52, %c0_53], %185 {strides = array<i32>} : memref<1x128x128xf32, #tpu.memory_space<vmem>>, vector<1x128x128xf32>,
    %c24 = arith.constant 24 : index
    %c0_54 = arith.constant 0 : index
    %186 = vector.load %arg3[%c24, %c0_54] : memref<49x128xf32, #tpu.memory_space<vmem>>, vector<1x128xf32>
    %187 = vector.shape_cast %186 : vector<1x128xf32> to vector<1x1x128xf32>
    %188 = vector.broadcast %187 : vector<1x1x128xf32> to vector<8x16x128xf32>
    %189 = arith.mulf %181, %188 : vector<8x16x128xf32>
    %190 = arith.addf %179, %189 : vector<8x16x128xf32>
    %c20_i32_55 = arith.constant 20 : i32
    %191 = tpu.dynamic_rotate %159 by %c20_i32_55 dim 1 : vector<8x24x128xf32>, i32 -> vector<8x24x128xf32>
    %192 = vector.extract_strided_slice %191 {offsets = [0, 0, 0], sizes = [8, 16, 128], strides = [1, 1, 1]} : vector<8x24x128xf32> to vector<8x16x128xf32>
    %c25 = arith.constant 25 : index
    %c0_56 = arith.constant 0 : index
    %193 = vector.load %arg3[%c25, %c0_56] : memref<49x128xf32, #tpu.memory_space<vmem>>, vector<1x128xf32>
    %194 = vector.shape_cast %193 : vector<1x128xf32> to vector<1x1x128xf32>
    %195 = vector.broadcast %194 : vector<1x1x128xf32> to vector<8x16x128xf32>
    %196 = arith.mulf %192, %195 : vector<8x16x128xf32>
    %197 = arith.addf %190, %196 : vector<8x16x128xf32>
    %c19_i32_57 = arith.constant 19 : i32
    %198 = tpu.dynamic_rotate %159 by %c19_i32_57 dim 1 : vector<8x24x128xf32>, i32 -> vector<8x24x128xf32>
    %199 = vector.extract_strided_slice %198 {offsets = [0, 0, 0], sizes = [8, 16, 128], strides = [1, 1, 1]} : vector<8x24x128xf32> to vector<8x16x128xf32>
    %c26 = arith.constant 26 : index
    %c0_58 = arith.constant 0 : index
    %200 = vector.load %arg3[%c26, %c0_58] : memref<49x128xf32, #tpu.memory_space<vmem>>, vector<1x128xf32>
    %201 = vector.shape_cast %200 : vector<1x128xf32> to vector<1x1x128xf32>
    %202 = vector.broadcast %201 : vector<1x1x128xf32> to vector<8x16x128xf32>
    %203 = arith.mulf %199, %202 : vector<8x16x128xf32>
    %204 = arith.addf %197, %203 : vector<8x16x128xf32>
    %c18_i32_59 = arith.constant 18 : i32
    %205 = tpu.dynamic_rotate %159 by %c18_i32_59 dim 1 : vector<8x24x128xf32>, i32 -> vector<8x24x128xf32>
    %206 = vector.extract_strided_slice %205 {offsets = [0, 0, 0], sizes = [8, 16, 128], strides = [1, 1, 1]} : vector<8x24x128xf32> to vector<8x16x128xf32>
    %c27 = arith.constant 27 : index
    %c0_60 = arith.constant 0 : index
    %207 = vector.load %arg3[%c27, %c0_60] : memref<49x128xf32, #tpu.memory_space<vmem>>, vector<1x128xf32>
    %208 = vector.shape_cast %207 : vector<1x128xf32> to vector<1x1x128xf32>
    %209 = vector.broadcast %208 : vector<1x1x128xf32> to vector<8x16x128xf32>
    %210 = arith.mulf %206, %209 : vector<8x16x128xf32>
    %211 = arith.addf %204, %210 : vector<8x16x128xf32>
    %c4_i32 = arith.constant 4 : i32
    %212 = arith.addi %0, %c4_i32 : i32
    %c0_61 = arith.constant 0 : index
    %213 = arith.index_cast %212 : i32 to index
    %c0_62 = arith.constant 0 : index
    %c0_63 = arith.constant 0 : index
    %214 = vector.load %arg2[%c0_61, %213, %c0_62, %c0_63] : memref<1x22x24x128xf32, #tpu.memory_space<vmem>>, vector<1x8x24x128xf32>
    %215 = vector.shape_cast %214 : vector<1x8x24x128xf32> to vector<8x24x128xf32>
    %216 = vector.extract_strided_slice %215 {offsets = [0, 0, 0], sizes = [8, 16, 128], strides = [1, 1, 1]} : vector<8x24x128xf32> to vector<8x16x128xf32>
    %c28 = arith.constant 28 : index
    %c0_64 = arith.constant 0 : index
    %217 = vector.load %arg3[%c28, %c0_64] : memref<49x128xf32, #tpu.memory_space<vmem>>, vector<1x128xf32>
    %218 = vector.shape_cast %217 : vector<1x128xf32> to vector<1x1x128xf32>
    %219 = vector.broadcast %218 : vector<1x1x128xf32> to vector<8x16x128xf32>
    %220 = arith.mulf %216, %219 : vector<8x16x128xf32>
    %221 = arith.addf %211, %220 : vector<8x16x128xf32>
    %c23_i32_65 = arith.constant 23 : i32
    %222 = tpu.dynamic_rotate %215 by %c23_i32_65 dim 1 : vector<8x24x128xf32>, i32 -> vector<8x24x128xf32>
    %223 = vector.extract_strided_slice %222 {offsets = [0, 0, 0], sizes = [8, 16, 128], strides = [1, 1, 1]} : vector<8x24x128xf32> to vector<8x16x128xf32>
    %c29 = arith.constant 29 : index
    %c0_66 = arith.constant 0 : index
    %224 = vector.load %arg3[%c29, %c0_66] : memref<49x128xf32, #tpu.memory_space<vmem>>, vector<1x128xf32>
    %225 = vector.shape_cast %224 : vector<1x128xf32> to vector<1x1x128xf32>
    %226 = vector.broadcast %225 : vector<1x1x128xf32> to vector<8x16x128xf32>
    %227 = arith.mulf %223, %226 : vector<8x16x128xf32>
    %228 = arith.addf %221, %227 : vector<8x16x128xf32>
    %c22_i32_67 = arith.constant 22 : i32
    %229 = tpu.dynamic_rotate %215 by %c22_i32_67 dim 1 : vector<8x24x128xf32>, i32 -> vector<8x24x128xf32>
    %230 = vector.extract_strided_slice %229 {offsets = [0, 0, 0], sizes = [8, 16, 128], strides = [1, 1, 1]} : vector<8x24x128xf32> to vector<8x16x128xf32>
    %c30 = arith.constant 30 : index
    %c0_68 = arith.constant 0 : index
    %231 = vector.load %arg3[%c30, %c0_68] : memref<49x128xf32, #tpu.memory_space<vmem>>, vector<1x128xf32>
    %232 = vector.shape_cast %231 : vector<1x128xf32> to vector<1x1x128xf32>
    %233 = vector.broadcast %232 : vector<1x1x128xf32> to vector<8x16x128xf32>
    %234 = arith.mulf %230, %233 : vector<8x16x128xf32>
    %235 = arith.addf %228, %234 : vector<8x16x128xf32>
    %c21_i32_69 = arith.constant 21 : i32
    %236 = tpu.dynamic_rotate %215 by %c21_i32_69 dim 1 : vector<8x24x128xf32>, i32 -> vector<8x24x128xf32>
    %237 = vector.extract_strided_slice %236 {offsets = [0, 0, 0], sizes = [8, 16, 128], strides = [1, 1, 1]} : vector<8x24x128xf32> to vector<8x16x128xf32>
    %c31 = arith.constant 31 : index
    %c0_70 = arith.constant 0 : index
    %238 = vector.load %arg3[%c31, %c0_70] : memref<49x128xf32, #tpu.memory_space<vmem>>, vector<1x128xf32>
    %239 = vector.shape_cast %238 : vector<1x128xf32> to vector<1x1x128xf32>
    %240 = vector.broadcast %239 : vector<1x1x128xf32> to vector<8x16x128xf32>
    %241 = arith.mulf %237, %240 : vector<8x16x128xf32>
    %242 = arith.addf %235, %241 : vector<8x16x128xf32>
    %c20_i32_71 = arith.constant 20 : i32
    %243 = tpu.dynamic_rotate %215 by %c20_i32_71 dim 1 : vector<8x24x128xf32>, i32 -> vector<8x24x128xf32>
    %244 = vector.extract_strided_slice %243 {offsets = [0, 0, 0], sizes = [8, 16, 128], strides = [1, 1, 1]} : vector<8x24x128xf32> to vector<8x16x128xf32>
    %c32 = arith.constant 32 : index
    %c0_72 = arith.constant 0 : index
    %245 = vector.load %arg3[%c32, %c0_72] : memref<49x128xf32, #tpu.memory_space<vmem>>, vector<1x128xf32>
    %246 = vector.shape_cast %245 : vector<1x128xf32> to vector<1x1x128xf32>
    %247 = vector.broadcast %246 : vector<1x1x128xf32> to vector<8x16x128xf32>
    %248 = arith.mulf %244, %247 : vector<8x16x128xf32>
    %249 = arith.addf %242, %248 : vector<8x16x128xf32>
    %c19_i32_73 = arith.constant 19 : i32
    %250 = tpu.dynamic_rotate %215 by %c19_i32_73 dim 1 : vector<8x24x128xf32>, i32 -> vector<8x24x128xf32>
    %251 = vector.extract_strided_slice %250 {offsets = [0, 0, 0], sizes = [8, 16, 128], strides = [1, 1, 1]} : vector<8x24x128xf32> to vector<8x16x128xf32>
    %c33 = arith.constant 33 : index
    %c0_74 = arith.constant 0 : index
    %252 = vector.load %arg3[%c33, %c0_74] : memref<49x128xf32, #tpu.memory_space<vmem>>, vector<1x128xf32>
    %253 = vector.shape_cast %252 : vector<1x128xf32> to vector<1x1x128xf32>
    %254 = vector.broadcast %253 : vector<1x1x128xf32> to vector<8x16x128xf32>
    %255 = arith.mulf %251, %254 : vector<8x16x128xf32>
    %256 = arith.addf %249, %255 : vector<8x16x128xf32>
    %c18_i32_75 = arith.constant 18 : i32
    %257 = tpu.dynamic_rotate %215 by %c18_i32_75 dim 1 : vector<8x24x128xf32>, i32 -> vector<8x24x128xf32>
    %258 = vector.extract_strided_slice %257 {offsets = [0, 0, 0], sizes = [8, 16, 128], strides = [1, 1, 1]} : vector<8x24x128xf32> to vector<8x16x128xf32>
    %c34 = arith.constant 34 : index
    %c0_76 = arith.constant 0 : index
    %259 = vector.load %arg3[%c34, %c0_76] : memref<49x128xf32, #tpu.memory_space<vmem>>, vector<1x128xf32>
    %260 = vector.shape_cast %259 : vector<1x128xf32> to vector<1x1x128xf32>
    %261 = vector.broadcast %260 : vector<1x1x128xf32> to vector<8x16x128xf32>
    %262 = arith.mulf %258, %261 : vector<8x16x128xf32>
    %263 = arith.addf %256, %262 : vector<8x16x128xf32>
    %c5_i32 = arith.constant 5 : i32
    %264 = arith.addi %0, %c5_i32 : i32
    %c0_77 = arith.constant 0 : index
    %265 = arith.index_cast %264 : i32 to index
    %c0_78 = arith.constant 0 : index
    %c0_79 = arith.constant 0 : index
    %266 = vector.load %arg2[%c0_77, %265, %c0_78, %c0_79] : memref<1x22x24x128xf32, #tpu.memory_space<vmem>>, vector<1x8x24x128xf32>
    %267 = vector.shape_cast %266 : vector<1x8x24x128xf32> to vector<8x24x128xf32>
    %268 = vector.extract_strided_slice %267 {offsets = [0, 0, 0], sizes = [8, 16, 128], strides = [1, 1, 1]} : vector<8x24x128xf32> to vector<8x16x128xf32>
    %c35 = arith.constant 35 : index
    %c0_80 = arith.constant 0 : index
    %269 = vector.load %arg3[%c35, %c0_80] : memref<49x128xf32, #tpu.memory_space<vmem>>, vector<1x128xf32>
    %270 = vector.shape_cast %269 : vector<1x128xf32> to vector<1x1x128xf32>
    %271 = vector.broadcast %270 : vector<1x1x128xf32> to vector<8x16x128xf32>
    %272 = arith.mulf %268, %271 : vector<8x16x128xf32>
    %273 = arith.addf %263, %272 : vector<8x16x128xf32>
    %c23_i32_81 = arith.constant 23 : i32
    %274 = tpu.dynamic_rotate %267 by %c23_i32_81 dim 1 : vector<8x24x128xf32>, i32 -> vector<8x24x128xf32>
    %275 = vector.extract_strided_slice %274 {offsets = [0, 0, 0], sizes = [8, 16, 128], strides = [1, 1, 1]} : vector<8x24x128xf32> to vector<8x16x128xf32>
    %c36 = arith.constant 36 : index
    %c0_82 = arith.constant 0 : index
    %276 = vector.load %arg3[%c36, %c0_82] : memref<49x128xf32, #tpu.memory_space<vmem>>, vector<1x128xf32>
    %277 = vector.shape_cast %276 : vector<1x128xf32> to vector<1x1x128xf32>
    %278 = vector.broadcast %277 : vector<1x1x128xf32> to vector<8x16x128xf32>
    %279 = arith.mulf %275, %278 : vector<8x16x128xf32>
    %280 = arith.addf %273, %279 : vector<8x16x128xf32>
    %c22_i32_83 = arith.constant 22 : i32
    %281 = tpu.dynamic_rotate %267 by %c22_i32_83 dim 1 : vector<8x24x128xf32>, i32 -> vector<8x24x128xf32>
    %282 = vector.extract_strided_slice %281 {offsets = [0, 0, 0], sizes = [8, 16, 128], strides = [1, 1, 1]} : vector<8x24x128xf32> to vector<8x16x128xf32>
    %c37 = arith.constant 37 : index
    %c0_84 = arith.constant 0 : index
    %283 = vector.load %arg3[%c37, %c0_84] : memref<49x128xf32, #tpu.memory_space<vmem>>, vector<1x128xf32>
    %284 = vector.shape_cast %283 : vector<1x128xf32> to vector<1x1x128xf32>
    %285 = vector.broadcast %284 : vector<1x1x128xf32> to vector<8x16x128xf32>
    %286 = arith.mulf %282, %285 : vector<8x16x128xf32>
    %287 = arith.addf %280, %286 : vector<8x16x128xf32>
    %c21_i32_85 = arith.constant 21 : i32
    %288 = tpu.dynamic_rotate %267 by %c21_i32_85 dim 1 : vector<8x24x128xf32>, i32 -> vector<8x24x128xf32>
    %289 = vector.extract_strided_slice %288 {offsets = [0, 0, 0], sizes = [8, 16, 128], strides = [1, 1, 1]} : vector<8x24x128xf32> to vector<8x16x128xf32>
    %c38 = arith.constant 38 : index
    %c0_86 = arith.constant 0 : index
    %290 = vector.load %arg3[%c38, %c0_86] : memref<49x128xf32, #tpu.memory_space<vmem>>, vector<1x128xf32>
    %291 = vector.shape_cast %290 : vector<1x128xf32> to vector<1x1x128xf32>
    %292 = vector.broadcast %291 : vector<1x1x128xf32> to vector<8x16x128xf32>
    %293 = arith.mulf %289, %292 : vector<8x16x128xf32>
    %294 = arith.addf %287, %293 : vector<8x16x128xf32>
    %c20_i32_87 = arith.constant 20 : i32
    %295 = tpu.dynamic_rotate %267 by %c20_i32_87 dim 1 : vector<8x24x128xf32>, i32 -> vector<8x24x128xf32>
    %296 = vector.extract_strided_slice %295 {offsets = [0, 0, 0], sizes = [8, 16, 128], strides = [1, 1, 1]} : vector<8x24x128xf32> to vector<8x16x128xf32>
    %c39 = arith.constant 39 : index
    %c0_88 = arith.constant 0 : index
    %297 = vector.load %arg3[%c39, %c0_88] : memref<49x128xf32, #tpu.memory_space<vmem>>, vector<1x128xf32>
    %298 = vector.shape_cast %297 : vector<1x128xf32> to vector<1x1x128xf32>
    %299 = vector.broadcast %298 : vector<1x1x128xf32> to vector<8x16x128xf32>
    %300 = arith.mulf %296, %299 : vector<8x16x128xf32>
    %301 = arith.addf %294, %300 : vector<8x16x128xf32>
    %c19_i32_89 = arith.constant 19 : i32
    %302 = tpu.dynamic_rotate %267 by %c19_i32_89 dim 1 : vector<8x24x128xf32>, i32 -> vector<8x24x128xf32>
    %303 = vector.extract_strided_slice %302 {offsets = [0, 0, 0], sizes = [8, 16, 128], strides = [1, 1, 1]} : vector<8x24x128xf32> to vector<8x16x128xf32>
    %c40 = arith.constant 40 : index
    %c0_90 = arith.constant 0 : index
    %304 = vector.load %arg3[%c40, %c0_90] : memref<49x128xf32, #tpu.memory_space<vmem>>, vector<1x128xf32>
    %305 = vector.shape_cast %304 : vector<1x128xf32> to vector<1x1x128xf32>
    %306 = vector.broadcast %305 : vector<1x1x128xf32> to vector<8x16x128xf32>
    %307 = arith.mulf %303, %306 : vector<8x16x128xf32>
    %308 = arith.addf %301, %307 : vector<8x16x128xf32>
    %c18_i32_91 = arith.constant 18 : i32
    %309 = tpu.dynamic_rotate %267 by %c18_i32_91 dim 1 : vector<8x24x128xf32>, i32 -> vector<8x24x128xf32>
    %310 = vector.extract_strided_slice %309 {offsets = [0, 0, 0], sizes = [8, 16, 128], strides = [1, 1, 1]} : vector<8x24x128xf32> to vector<8x16x128xf32>
    %c41 = arith.constant 41 : index
    %c0_92 = arith.constant 0 : index
    %311 = vector.load %arg3[%c41, %c0_92] : memref<49x128xf32, #tpu.memory_space<vmem>>, vector<1x128xf32>
    %312 = vector.shape_cast %311 : vector<1x128xf32> to vector<1x1x128xf32>
    %313 = vector.broadcast %312 : vector<1x1x128xf32> to vector<8x16x128xf32>
    %314 = arith.mulf %310, %313 : vector<8x16x128xf32>
    %315 = arith.addf %308, %314 : vector<8x16x128xf32>
    %c6_i32 = arith.constant 6 : i32
    %316 = arith.addi %0, %c6_i32 : i32
    %c0_93 = arith.constant 0 : index
    %317 = arith.index_cast %316 : i32 to index
    %c0_94 = arith.constant 0 : index
    %c0_95 = arith.constant 0 : index
    %318 = vector.load %arg2[%c0_93, %317, %c0_94, %c0_95] : memref<1x22x24x128xf32, #tpu.memory_space<vmem>>, vector<1x8x24x128xf32>
    %319 = vector.shape_cast %318 : vector<1x8x24x128xf32> to vector<8x24x128xf32>
    %320 = vector.extract_strided_slice %319 {offsets = [0, 0, 0], sizes = [8, 16, 128], strides = [1, 1, 1]} : vector<8x24x128xf32> to vector<8x16x128xf32>
    %c42 = arith.constant 42 : index
    %c0_96 = arith.constant 0 : index
    %321 = vector.load %arg3[%c42, %c0_96] : memref<49x128xf32, #tpu.memory_space<vmem>>, vector<1x128xf32>
    %322 = vector.shape_cast %321 : vector<1x128xf32> to vector<1x1x128xf32>
    %323 = vector.broadcast %322 : vector<1x1x128xf32> to vector<8x16x128xf32>
    %324 = arith.mulf %320, %323 : vector<8x16x128xf32>
    %325 = arith.addf %315, %324 : vector<8x16x128xf32>
    %c23_i32_97 = arith.constant 23 : i32
    %326 = tpu.dynamic_rotate %319 by %c23_i32_97 dim 1 : vector<8x24x128xf32>, i32 -> vector<8x24x128xf32>
    %327 = vector.extract_strided_slice %326 {offsets = [0, 0, 0], sizes = [8, 16, 128], strides = [1, 1, 1]} : vector<8x24x128xf32> to vector<8x16x128xf32>
    %c43 = arith.constant 43 : index
    %c0_98 = arith.constant 0 : index
    %328 = vector.load %arg3[%c43, %c0_98] : memref<49x128xf32, #tpu.memory_space<vmem>>, vector<1x128xf32>
    %329 = vector.shape_cast %328 : vector<1x128xf32> to vector<1x1x128xf32>
    %330 = vector.broadcast %329 : vector<1x1x128xf32> to vector<8x16x128xf32>
    %331 = arith.mulf %327, %330 : vector<8x16x128xf32>
    %332 = arith.addf %325, %331 : vector<8x16x128xf32>
    %c22_i32_99 = arith.constant 22 : i32
    %333 = tpu.dynamic_rotate %319 by %c22_i32_99 dim 1 : vector<8x24x128xf32>, i32 -> vector<8x24x128xf32>
    %334 = vector.extract_strided_slice %333 {offsets = [0, 0, 0], sizes = [8, 16, 128], strides = [1, 1, 1]} : vector<8x24x128xf32> to vector<8x16x128xf32>
    %c44 = arith.constant 44 : index
    %c0_100 = arith.constant 0 : index
    %335 = vector.load %arg3[%c44, %c0_100] : memref<49x128xf32, #tpu.memory_space<vmem>>, vector<1x128xf32>
    %336 = vector.shape_cast %335 : vector<1x128xf32> to vector<1x1x128xf32>
    %337 = vector.broadcast %336 : vector<1x1x128xf32> to vector<8x16x128xf32>
    %338 = arith.mulf %334, %337 : vector<8x16x128xf32>
    %339 = arith.addf %332, %338 : vector<8x16x128xf32>
    %c21_i32_101 = arith.constant 21 : i32
    %340 = tpu.dynamic_rotate %319 by %c21_i32_101 dim 1 : vector<8x24x128xf32>, i32 -> vector<8x24x128xf32>
    %341 = vector.extract_strided_slice %340 {offsets = [0, 0, 0], sizes = [8, 16, 128], strides = [1, 1, 1]} : vector<8x24x128xf32> to vector<8x16x128xf32>
    %c45 = arith.constant 45 : index
    %c0_102 = arith.constant 0 : index
    %342 = vector.load %arg3[%c45, %c0_102] : memref<49x128xf32, #tpu.memory_space<vmem>>, vector<1x128xf32>
    %343 = vector.shape_cast %342 : vector<1x128xf32> to vector<1x1x128xf32>
    %344 = vector.broadcast %343 : vector<1x1x128xf32> to vector<8x16x128xf32>
    %345 = arith.mulf %341, %344 : vector<8x16x128xf32>
    %346 = arith.addf %339, %345 : vector<8x16x128xf32>
    %c20_i32_103 = arith.constant 20 : i32
    %347 = tpu.dynamic_rotate %319 by %c20_i32_103 dim 1 : vector<8x24x128xf32>, i32 -> vector<8x24x128xf32>
    %348 = vector.extract_strided_slice %347 {offsets = [0, 0, 0], sizes = [8, 16, 128], strides = [1, 1, 1]} : vector<8x24x128xf32> to vector<8x16x128xf32>
    %c46 = arith.constant 46 : index
    %c0_104 = arith.constant 0 : index
    %349 = vector.load %arg3[%c46, %c0_104] : memref<49x128xf32, #tpu.memory_space<vmem>>, vector<1x128xf32>
    %350 = vector.shape_cast %349 : vector<1x128xf32> to vector<1x1x128xf32>
    %351 = vector.broadcast %350 : vector<1x1x128xf32> to vector<8x16x128xf32>
    %352 = arith.mulf %348, %351 : vector<8x16x128xf32>
    %353 = arith.addf %346, %352 : vector<8x16x128xf32>
    %c19_i32_105 = arith.constant 19 : i32
    %354 = tpu.dynamic_rotate %319 by %c19_i32_105 dim 1 : vector<8x24x128xf32>, i32 -> vector<8x24x128xf32>
    %355 = vector.extract_strided_slice %354 {offsets = [0, 0, 0], sizes = [8, 16, 128], strides = [1, 1, 1]} : vector<8x24x128xf32> to vector<8x16x128xf32>
    %c47 = arith.constant 47 : index
    %c0_106 = arith.constant 0 : index
    %356 = vector.load %arg3[%c47, %c0_106] : memref<49x128xf32, #tpu.memory_space<vmem>>, vector<1x128xf32>
    %357 = vector.shape_cast %356 : vector<1x128xf32> to vector<1x1x128xf32>
    %358 = vector.broadcast %357 : vector<1x1x128xf32> to vector<8x16x128xf32>
    %359 = arith.mulf %355, %358 : vector<8x16x128xf32>
    %360 = arith.addf %353, %359 : vector<8x16x128xf32>
    %c18_i32_107 = arith.constant 18 : i32
    %361 = tpu.dynamic_rotate %319 by %c18_i32_107 dim 1 : vector<8x24x128xf32>, i32 -> vector<8x24x128xf32>
    %362 = vector.extract_strided_slice %361 {offsets = [0, 0, 0], sizes = [8, 16, 128], strides = [1, 1, 1]} : vector<8x24x128xf32> to vector<8x16x128xf32>
    %c48 = arith.constant 48 : index
    %c0_108 = arith.constant 0 : index
    %363 = vector.load %arg3[%c48, %c0_108] : memref<49x128xf32, #tpu.memory_space<vmem>>, vector<1x128xf32>
    %364 = vector.shape_cast %363 : vector<1x128xf32> to vector<1x1x128xf32>
    %365 = vector.broadcast %364 : vector<1x1x128xf32> to vector<8x16x128xf32>
    %366 = arith.mulf %362, %365 : vector<8x16x128xf32>
    %367 = arith.addf %360, %366 : vector<8x16x128xf32>
    %368 = vector.shape_cast %367 : vector<8x16x128xf32> to vector<128x128xf32>
    %c0_109 = arith.constant 0 : index
    %c0_110 = arith.constant 0 : index
    %369 = vector.load %arg4[%c0_109, %c0_110] : memref<1x128xf32, #tpu.memory_space<vmem>>, vector<1x128xf32>
    %370 = vector.broadcast %369 : vector<1x128xf32> to vector<128x128xf32>
    %371 = arith.addf %368, %370 : vector<128x128xf32>
    %cst = arith.constant dense<0.000000e+00> : vector<128xf32>
    %372 = vector.multi_reduction <add>, %371, %cst [1] : vector<128x128xf32> to vector<128xf32>
    %373 = vector.shape_cast %372 : vector<128xf32> to vector<128x1xf32>
    %cst_111 = arith.constant 1.280000e+02 : f32
    %374 = vector.broadcast %cst_111 : f32 to vector<128x1xf32>
    %375 = arith.divf %373, %374 : vector<128x1xf32>
    %376 = vector.broadcast %375 : vector<128x1xf32> to vector<128x128xf32>
    %377 = arith.subf %371, %376 : vector<128x128xf32>
    %378 = arith.mulf %377, %377 : vector<128x128xf32>
    %cst_112 = arith.constant dense<0.000000e+00> : vector<128xf32>
    %379 = vector.multi_reduction <add>, %378, %cst_112 [1] : vector<128x128xf32> to vector<128xf32>
    %380 = vector.shape_cast %379 : vector<128xf32> to vector<128x1xf32>
    %cst_113 = arith.constant 1.280000e+02 : f32
    %381 = vector.broadcast %cst_113 : f32 to vector<128x1xf32>
    %382 = arith.divf %380, %381 : vector<128x1xf32>
    %cst_114 = arith.constant 9.99999997E-7 : f32
    %383 = vector.broadcast %cst_114 : f32 to vector<128x1xf32>
    %384 = arith.addf %382, %383 : vector<128x1xf32>
    %385 = math.rsqrt %384 : vector<128x1xf32>
    %386 = vector.broadcast %385 : vector<128x1xf32> to vector<128x128xf32>
    %387 = arith.mulf %377, %386 : vector<128x128xf32>
    %388 = arith.truncf %387 : vector<128x128xf32> to vector<128x128xbf16>
    %c0_115 = arith.constant 0 : index
    %c0_116 = arith.constant 0 : index
    %389 = vector.load %arg5[%c0_115, %c0_116] : memref<128x512xbf16, #tpu.memory_space<vmem>>, vector<128x512xbf16>
    %cst_117 = arith.constant dense<0.000000e+00> : vector<128x512xf32>
    %390 = tpu.matmul %388, %389, %cst_117 {dimension_numbers = #tpu.dot_dimension_numbers<[1], [0], [0], [1], [0, 0, 1, 1], [], []>} : vector<128x128xbf16>, vector<128x512xbf16>, vector<128x512xf32> -> vector<128x512xf32>
    %c0_118 = arith.constant 0 : index
    %c0_119 = arith.constant 0 : index
    %391 = vector.load %arg6[%c0_118, %c0_119] : memref<1x512xf32, #tpu.memory_space<vmem>>, vector<1x512xf32>
    %392 = vector.broadcast %391 : vector<1x512xf32> to vector<128x512xf32>
    %393 = arith.addf %390, %392 : vector<128x512xf32>
    %394 = arith.truncf %393 : vector<128x512xf32> to vector<128x512xbf16>
    %cst_120 = arith.constant 5.000000e-01 : bf16
    %395 = vector.broadcast %cst_120 : bf16 to vector<128x512xbf16>
    %396 = arith.mulf %395, %394 : vector<128x512xbf16>
    %397 = arith.mulf %394, %394 : vector<128x512xbf16>
    %398 = arith.mulf %397, %394 : vector<128x512xbf16>
    %cst_121 = arith.constant 4.467770e-02 : bf16
    %399 = vector.broadcast %cst_121 : bf16 to vector<128x512xbf16>
    %400 = arith.mulf %399, %398 : vector<128x512xbf16>
    %401 = arith.addf %394, %400 : vector<128x512xbf16>
    %cst_122 = arith.constant 7.968750e-01 : bf16
    %402 = vector.broadcast %cst_122 : bf16 to vector<128x512xbf16>
    %403 = arith.mulf %402, %401 : vector<128x512xbf16>
    %404 = math.tanh %403 : vector<128x512xbf16>
    %cst_123 = arith.constant 1.000000e+00 : bf16
    %405 = vector.broadcast %cst_123 : bf16 to vector<128x512xbf16>
    %406 = arith.addf %405, %404 : vector<128x512xbf16>
    %407 = arith.mulf %396, %406 : vector<128x512xbf16>
    %c0_124 = arith.constant 0 : index
    %c0_125 = arith.constant 0 : index
    %408 = vector.load %arg7[%c0_124, %c0_125] : memref<512x128xbf16, #tpu.memory_space<vmem>>, vector<512x128xbf16>
    %cst_126 = arith.constant dense<0.000000e+00> : vector<128x128xf32>
    %409 = tpu.matmul %407, %408, %cst_126 {dimension_numbers = #tpu.dot_dimension_numbers<[1], [0], [0], [1], [0, 0, 1, 1], [], []>} : vector<128x512xbf16>, vector<512x128xbf16>, vector<128x128xf32> -> vector<128x128xf32>
    %c0_127 = arith.constant 0 : index
    %c0_128 = arith.constant 0 : index
    %410 = vector.load %arg8[%c0_127, %c0_128] : memref<1x128xf32, #tpu.memory_space<vmem>>, vector<1x128xf32>
    %411 = vector.broadcast %410 : vector<1x128xf32> to vector<128x128xf32>
    %412 = arith.addf %409, %411 : vector<128x128xf32>
    %c0_129 = arith.constant 0 : index
    %c0_130 = arith.constant 0 : index
    %c0_131 = arith.constant 0 : index
    %413 = vector.load %arg9[%c0_129, %c0_130, %c0_131] : memref<1x128x128xf32, #tpu.memory_space<vmem>>, vector<1x128x128xf32>
    %414 = vector.shape_cast %413 : vector<1x128x128xf32> to vector<128x128xf32>
    %415 = arith.addf %414, %412 : vector<128x128xf32>
    %c0_132 = arith.constant 0 : index
    %c0_133 = arith.constant 0 : index
    %c0_134 = arith.constant 0 : index
    %416 = vector.load %arg9[%c0_132, %c0_133, %c0_134] : memref<1x128x128xf32, #tpu.memory_space<vmem>>, vector<1x128x128xf32>
    %417 = vector.shape_cast %416 : vector<1x128x128xf32> to vector<128x128xf32>
    %418 = vector.shape_cast %415 : vector<128x128xf32> to vector<1x128x128xf32>
    tpu.vector_store %arg9[%c0_132, %c0_133, %c0_134], %418 {strides = array<i32>} : memref<1x128x128xf32, #tpu.memory_space<vmem>>, vector<1x128x128xf32>,
    return
  }
  func.func @transform_0(%arg0: i32, %arg1: i32) -> (i32, i32, i32, i32) {
    %c0_i32 = arith.constant 0 : i32
    %c0_i32_0 = arith.constant 0 : i32
    %c0_i32_1 = arith.constant 0 : i32
    %c0_i32_2 = arith.constant 0 : i32
    return %arg0, %c0_i32, %c0_i32_0, %c0_i32_1 : i32, i32, i32, i32
  }
  func.func @transform_1(%arg0: i32, %arg1: i32) -> (i32, i32) {
    %c0_i32 = arith.constant 0 : i32
    %c0_i32_0 = arith.constant 0 : i32
    %c0_i32_1 = arith.constant 0 : i32
    return %c0_i32, %c0_i32_0 : i32, i32
  }
  func.func @transform_2(%arg0: i32, %arg1: i32) -> (i32, i32) {
    %c0_i32 = arith.constant 0 : i32
    %c0_i32_0 = arith.constant 0 : i32
    %c0_i32_1 = arith.constant 0 : i32
    return %c0_i32, %c0_i32_0 : i32, i32
  }
  func.func @transform_3(%arg0: i32, %arg1: i32) -> (i32, i32) {
    %c0_i32 = arith.constant 0 : i32
    %c0_i32_0 = arith.constant 0 : i32
    %c0_i32_1 = arith.constant 0 : i32
    return %c0_i32, %c0_i32_0 : i32, i32
  }
  func.func @transform_4(%arg0: i32, %arg1: i32) -> (i32, i32) {
    %c0_i32 = arith.constant 0 : i32
    %c0_i32_0 = arith.constant 0 : i32
    %c0_i32_1 = arith.constant 0 : i32
    return %c0_i32, %c0_i32_0 : i32, i32
  }
  func.func @transform_5(%arg0: i32, %arg1: i32) -> (i32, i32) {
    %c0_i32 = arith.constant 0 : i32
    %c0_i32_0 = arith.constant 0 : i32
    %c0_i32_1 = arith.constant 0 : i32
    return %c0_i32, %c0_i32_0 : i32, i32
  }
  func.func @transform_6(%arg0: i32, %arg1: i32) -> (i32, i32) {
    %c0_i32 = arith.constant 0 : i32
    %c0_i32_0 = arith.constant 0 : i32
    %c0_i32_1 = arith.constant 0 : i32
    return %c0_i32, %c0_i32_0 : i32, i32
  }
  func.func @transform_7(%arg0: i32, %arg1: i32) -> (i32, i32, i32) {
    %c0_i32 = arith.constant 0 : i32
    %c0_i32_0 = arith.constant 0 : i32
    return %arg0, %arg1, %c0_i32 : i32, i32, i32
  }
}

</mosaic_0001>

<bundles_post_ra>
// kernel: tpu_custom_call.1
= control target key start
LH: loop header
LB: loop body
LE: loop exit
PB: predicated region body
PF: predicated region fallthrough
CT: control target
= control target key end

     0   :  { %s15461_s0 = inlined_call_operand.hbm [shape: f32[2,22,24,128], index: 0, kind: input, shape index: {}]   ;;  %s15462_s1 = inlined_call_operand.hbm [shape: f32[49,128], index: 1, kind: input, shape index: {}]   ;;  %s15463_s2 = inlined_call_operand.vmem [shape: f32[1,128], index: 2, kind: input, shape index: {}]   ;;  %s15464_s3 = inlined_call_operand.hbm [shape: bf16[128,512], index: 3, kind: input, shape index: {}]   ;;  %s15465_s4 = inlined_call_operand.hbm [shape: f32[1,512], index: 4, kind: input, shape index: {}]   ;;  %s15466_s5 = inlined_call_operand.hbm [shape: bf16[512,128], index: 5, kind: input, shape index: {}]   ;;  %s15467_s6 = inlined_call_operand.vmem [shape: f32[1,128], index: 6, kind: input, shape index: {}]   ;;  %s15468_s7 = inlined_call_operand.hbm [shape: f32[2,256,128], index: 7, kind: output, shape index: {}]  }
   0x1   :  { %16234 = sst [smem:[#allocation134_spill]] %s15462_s1 }
   0x2   :  { %16235 = sst [smem:[#allocation135_spill]] %s15464_s3 }
   0x3   :  { %16236 = sst [smem:[#allocation136_spill]] %s15465_s4 }
   0x4   :  { %16237 = sst [smem:[#allocation137_spill]] %s15466_s5 }
   0x5   :  { %16238 = sst [smem:[#allocation138_spill]] %s15468_s7 }
   0x6   :  { %12 = vsyncpa [#allocation3], 0 }
   0x7   :  { %14 = vsyncpa [#allocation3 + $0x1], 0 }
   0x8   :  { %15 = vsyncpa [#allocation6], 0 }
   0x9   :  { %16 = vsyncpa [#allocation9], 0 }
   0xa   :  { %17 = vsyncpa [#allocation4], 0 }
   0xb   :  { %19 = vsyncpa [#allocation4 + $0x1], 0  ;;  %s8243_s24 = smov 0   ;;  %s8245_s25 = smov 0  }
   0xc   :  { %s8247_s26 = smov 0   ;;  %s8249_s27 = smov 0  }
   0xd   :  { %s8251_s28 = smov 0   ;;  %s8253_s29 = smov 0  }
   0xe   :  { %s8255_s30 = smov 0   ;;  %s8257_s8 = smov 0  }
   0xf   :  { %s8259_s9 = smov 0   ;;  %s8261_s10 = smov 0  }
  0x10   :  { %s8263_s11 = smov 0  }
  0x11 LB: > { %16239 = sst [smem:[#allocation16_spill]] %s8148_s24  ;;  %s6819_s12 = sadd.s32 4294967295, %s8188_s11   ;;  %s8188_s11 = sphi %s8263_s11, %s25_s11   ;;  %s8184_s10 = sphi %s8261_s10, %s17599_s10   ;;  %s8180_s9 = sphi %s8259_s9, %s17590_s9   ;;  %s8176_s8 = sphi %s8257_s8, %s17598_s8   ;;  %s8172_s30 = sphi %s8255_s30, %s17589_s30   ;;  %s8168_s29 = sphi %s8253_s29, %s17597_s29   ;;  %s8164_s28 = sphi %s8251_s28, %s17596_s28   ;;  %s8160_s27 = sphi %s8249_s27, %s17595_s27   ;;  %s8156_s26 = sphi %s8247_s26, %s17594_s26   ;;  %s8152_s25 = sphi %s8245_s25, %s17593_s25   ;;  %s8148_s24 = sphi %s8243_s24, %s17592_s24  }
  0x12   : > { %16240 = sst [smem:[#allocation17_spill]] %s8176_s8  ;;  %s6820_s13 = sadd.s32 4294967294, %s8188_s11  }
  0x13   : > { %16241 = sst [smem:[#allocation18_spill]] %s8180_s9  ;;  %p57_p0 = scmp.ne.s32.totalorder %s8164_s28, %s8160_s27 }
  0x14   : > { %p8299_p1 = scmp.eq.s32.totalorder %s6819_s12, 0  ;;  %p208_p2 = scmp.ne.s32.totalorder %s8156_s26, %s8152_s25 }
  0x15   : > { %p209_p3 = scmp.eq.s32.totalorder %s6819_s12, 3  ;;  %p214_p5 = scmp.ne.s32.totalorder %s8152_s25, %s8148_s24 }
  0x16   : > { %p8307_p4 = por %p8299_p1, %p57_p0  ;;  %p215_p7 = scmp.eq.s32.totalorder %s6820_s13, 3 }
  0x17   : > { %p8313_p6 = por %p209_p3, %p208_p2  ;;  %p6821_p8 = scmp.ge.s32.totalorder %s8188_s11, 1 }
  0x18   : > { %p222_p9 = scmp.lt.s32.totalorder %s8188_s11, 5  ;;  %p8319_p10 = por %p215_p7, %p214_p5 }
  0x19   : > { %s16244_s16 = scalar_select %p8313_p6, 1, 0 }
  0x1a   : > { %s16246_s17 = scalar_select %p8319_p10, 1, 0 }
  0x1b   : > { %16245 = sst [smem:[#allocation19_spill]] %s16244_s16  ;;  %p8323_p11 = pnand %p6821_p8, %p222_p9 }
  0x1c   : > { %16247 = sst [smem:[#allocation20_spill]] %s16246_s17  ;;  %s8190_s22 = smov [#allocation5]  }
  0x1d   : > { %s16249_s1 = sld [smem:[#allocation134_spill]]  ;;  %p7341_p12 = pneg %p8323_p11 }
  0x1e   : > { %s235_s23 = sshll.u32 %s8190_s22, 4  ;;  %s16251_s4 = sld [smem:[#allocation136_spill]]  ;;  %s236_s23 = int_to_ptr.vmem [resolvable:$true] %s235_s23 }
  0x1f   : > { %p8334_p13 = pnand %p7341_p12, %p8299_p1  ;;  %s15474_s19 = smov 128  }
  0x20   : > { %s15475_s20 = smov 8   ;;  %s16252_s3 = sld [smem:[#allocation135_spill]] }
  0x21   : > { %s8193_s16 = smov [#allocation8]   ;;  %s8194_s12 = smov [#allocation7]  }
  0x22   : > { %s267_s7 = sshll.u32 %s8193_s16, 4  ;;  %s252_s13 = sshll.u32 %s8194_s12, 4  ;;  %s268_s7 = int_to_ptr.vmem [resolvable:$true] %s267_s7  ;;  %s253_s13 = int_to_ptr.vmem [resolvable:$true] %s252_s13 }
  0x23   : > { %s233_s21 = sshll.u32 %s16249_s1, 4  ;;  %s16253_s5 = sld [smem:[#allocation137_spill]]  ;;  %s234_s21 = int_to_ptr.hbm [resolvable:$true] %s233_s21 }
  0x24   : > { %s265_s17 = sshll.u32 %s16251_s4, 4  ;;  %s8195_s4 = smov 256   ;;  %s266_s17 = int_to_ptr.hbm [resolvable:$true] %s265_s17 }
  0x25   : > { %7344 = dma.hbm_to_vmem [thread:$0]  (!%p8334_p13), %s234_s21, 896, %s236_s23, [#allocation6], %s15474_s19, %s15474_s19, %s15475_s20  }
  0x26   : > { %s250_s24 = sshll.u32 %s16252_s3, 4  ;;  %s8196_s21 = smov 16   ;;  %s251_s24 = int_to_ptr.hbm [resolvable:$true] %s250_s24 }
  0x27   : > { %7350 = dma.hbm_to_vmem [thread:$0]  (!%p8334_p13), %s266_s17, 64, %s268_s7, [#allocation9]  }
  0x28   : > { %7347 = dma.hbm_to_vmem [thread:$0]  (!%p8334_p13), %s251_s24, 4096, %s253_s13, [#allocation6], %s8195_s4, %s8195_s4, %s8196_s21  }
  0x29   : > { %s276_s23 = sshll.u32 %s16253_s5, 4  ;;  %s8197_s7 = smov [#allocation10]   ;;  %s277_s23 = int_to_ptr.hbm [resolvable:$true] %s276_s23 }
  0x2a   : > { %s278_s17 = sshll.u32 %s8197_s7, 4  ;;  %s8198_s22 = smov 64   ;;  %s279_s17 = int_to_ptr.vmem [resolvable:$true] %s278_s17 }
  0x2b   : > { %s8199_s12 = smov 4   ;;  %s34_s19 = sadd.s32 1, %s8180_s9 }
  0x2c   : > { %7353 = dma.hbm_to_vmem [thread:$0]  (!%p8334_p13), %s277_s23, 4096, %s279_s17, [#allocation9], %s8198_s22, %s8198_s22, %s8199_s12  }
  0x2d   : > { %p35_p0 = scmp.ge.s32.totalorder %s34_s19, 2  ;;  %s37_s4 = sadd.s32 1, %s8184_s10 }
  0x2e   : > { %p51_p2 = scmp.ne.s32.totalorder %s8168_s29, %s8164_s28  ;;  %s44_s24 = sadd.s32 1, %s8168_s29 }
  0x2f   : > { %s17601_s19 = smov (%p35_p0, %s34_s19), 0  ;;  %s17603_s4 = smov (!%p35_p0, %s37_s4), %s8184_s10 }
  0x30   : > { %16254 = sst [smem:[#allocation21_spill]] %s17601_s19  ;;  %p52_p3 = scmp.eq.s32.totalorder %s8188_s11, 0 }
  0x31   : > { %p39_p5 = scmp.ge.s32.totalorder %s17603_s4, 2  ;;  %s194_s13 = ssub.s32 %s8180_s9, %s17601_s19 }
  0x32   : > { %p8369_p7 = por %p52_p3, %p51_p2  ;;  %s198_s21 = sadd.s32 1, %s8156_s26 }
  0x33   : > { %s17605_s4 = smov (%p39_p5, %s17603_s4), 0  ;;  %p7366_p8 = scmp.lt.s32.totalorder %s8188_s11, 4 }
  0x34   : > { %16256 = sst [smem:[#allocation22_spill]] %s17605_s4  ;;  %s295_s1 = sand.u32 1, %s8168_s29  }
  0x35   : > { %s41_s16 = ssub.s32 %s8184_s10, %s17605_s4  ;;  %s7319_s23 = smul.u32 528, %s8184_s10 }
  0x36   : > { %p42_p9 = scmp.eq.s32.totalorder %s41_s16, 0  ;;  %s195_s7 = sor.u32 %s194_s13, %s41_s16 }
  0x37   : > { %p196_p12 = scmp.eq.s32.totalorder %s195_s7, 0  ;;  %s7318_s17 = smul.u32 528, %s295_s1 }
  0x38   : > { %s8382_s22 = scalar_select %p42_p9, %s8168_s29, %s44_s24  }
  0x39   : > { %s8385_s12 = scalar_select %p196_p12, %s8156_s26, %s198_s21  }
  0x3a   : > { %s304_s5 = scalar_lea.hbm %s15461_s0, %s7319_s23  ;;  %s299_s9 = scalar_lea.vmem [#allocation2], %s7318_s17 }
  0x3b   : > { %s305_s19 = sshll.u32 %s304_s5, 4  ;;  %s307_s8 = sshll.u32 %s299_s9, 4  ;;  %s306_s19 = int_to_ptr.hbm [resolvable:$true] %s305_s19  ;;  %s308_s8 = int_to_ptr.vmem [resolvable:$true] %s307_s8 }
  0x3c   : > { %p7355_p13 = pnand %p7366_p8, %p8369_p7  ;;  %s296_s4 = scalar_lea.sflag [#allocation3], %s295_s1 }
  0x3d   : > { %s16257_s13 = smov 8   ;;  %s16258_s16 = smov 128  }
  0x3e   : > { %7357 = dma.hbm_to_vmem [thread:$0]  (!%p7355_p13), %s306_s19, 8448, %s308_s8, %s296_s4, %s16258_s16, %s16258_s16, %s16257_s13  }
  0x3f   : > { %319 = sbr.rel (%p8323_p11) target bundleno = 1605 (0x645), region = 48 }
  0x44   : > { %s321_s3 = sand.u32 1, %s8164_s28  }
  0x45   : > { %s7320_s20 = smul.u32 528, %s321_s3  ;;  %s322_s5 = scalar_lea.sflag [#allocation3], %s321_s3 }
  0x47   : > { %s325_s24 = scalar_lea.vmem [#allocation2], %s7320_s20 }
  0x48   : > { %8131 = dma.done.wait (%p8307_p4), %s322_s5, 8448  }
  0x49   : > { %8133 = vsyncadd (%p8307_p4), %s322_s5, 4294958848 }
  0x4a   : > { %8135 = dma.done.wait (%p8299_p1), [#allocation6], 4992  }
  0x4b   : > { %8137 = vsyncadd (%p8299_p1), [#allocation6], 4294962304 }
  0x4c   : > { %8139 = dma.done.wait (%p8299_p1), [#allocation9], 4160  }
  0x4d   : > { %8141 = vsyncadd (%p8299_p1), [#allocation9], 4294963136  ;;  %s6835_s8 = smul.u32 192, %s8172_s30  ;;  %v447_v0 = vlaneseq  ;;  %v8429_v4 = vld [vmem:[#allocation5] ss:$0 sm:$0xff]  ;;  %s374_s16 = sand.u32 1, %s8152_s25  }
  0x4e   : > { %v8433_v7 = vld [vmem:[#allocation5 + $0x1] ss:$0 sm:$0xff]  ;;  %v8445_v12 = vld [vmem:[#allocation5 + $0x2] ss:$0 sm:$0xff]  ;;  %v8457_v17 = vld [vmem:[#allocation5 + $0x3] ss:$0 sm:$0xff] }
  0x4f   : > { %v8413_v1 = vshrl.u32 %v447_v0, 7  ;;  %s8415_s9 = scalar_lea.vmem %s325_s24, %s6835_s8 [#allocation2]  ;;  %v8469_v22 = vld [vmem:[#allocation5 + $0x4] ss:$0 sm:$0xff]  ;;  %v8481_v28 = vld [vmem:[#allocation5 + $0x5] ss:$0 sm:$0xff]  ;;  %s6833_s3 = sshll.u32 %s374_s16, 7 }
  0x50   : > { %v8422_v2 = vld [vmem:[%s8415_s9 + $0x18] sm:$0xff]  ;;  %v8425_v3 = vld [vmem:[%s8415_s9 + $0x20] sm:$0xff]  ;;  %v8485_v30 = vld [vmem:[%s8415_s9 + $0x30] sm:$0xff]  ;;  %s15347_s20 = scalar_lea.vmem [#allocation11], %s6833_s3  ;;  %s17580_s5 = sld [smem:[#allocation17_spill]] }
  0x51   : > { %vm449_vm0 = vcmp.lt.s32.totalorder %v8413_v1, 7  ;;  %vm524_vm1 = vcmp.lt.s32.totalorder %v8413_v1, 6  ;;  %vm599_vm2 = vcmp.lt.s32.totalorder %v8413_v1, 5  ;;  %vm674_vm3 = vcmp.lt.s32.totalorder %v8413_v1, 4  ;;  %16259 = vst [vmem:[#allocation23_spill] sm:$0xff] %v8485_v30  ;;  %v8495_v33 = vld [vmem:[%s8415_s9 + $0x38] sm:$0xff] }
  0x52   : > { %vm749_vm4 = vcmp.lt.s32.totalorder %v8413_v1, 3  ;;  %vm824_vm5 = vcmp.lt.s32.totalorder %v8413_v1, 2  ;;  %v424_v5 = vrot.slane %v8422_v2, 1  ;;  %v15495_v6 = vrot.slane %v8425_v3, 1  ;;  %16260 = vst [vmem:[#allocation24_spill] sm:$0xff] %v8495_v33  ;;  %v8536_v56 = vld [vmem:[%s8415_s9 + $0x48] sm:$0xff] }
  0x53   : > { %v501_v8 = vrot.slane %v8422_v2, 2  ;;  %v15491_v9 = vrot.slane %v8425_v3, 2  ;;  %v409_v10 = vmul.f32 %v8429_v4, %v8422_v2  ;;  %v576_v13 = vrot.slane %v8422_v2, 3  ;;  %v8499_v36 = vld [vmem:[#allocation5 + $0x6] ss:$0 sm:$0xff]  ;;  %16262 = vst [vmem:[#allocation26_spill] sm:$0xff] %v8536_v56 }
  0x54   : > { %v8443_v11 = vsel %vm449_vm0, %v424_v5, %v15495_v6  ;;  %v15490_v14 = vrot.slane %v8425_v3, 3  ;;  %v651_v18 = vrot.slane %v8422_v2, 4  ;;  %v15489_v19 = vrot.slane %v8425_v3, 4  ;;  %v8509_v40 = vld [vmem:[#allocation5 + $0x7] ss:$0 sm:$0xff]  ;;  %v8555_v62 = vld [vmem:[%s8415_s9 + $0x50] sm:$0xff] }
  0x55   : > { %v470_v15 = vmul.f32 %v8433_v7, %v8443_v11  ;;  %v8455_v16 = vsel %vm524_vm1, %v501_v8, %v15491_v9  ;;  %v726_v23 = vrot.slane %v8422_v2, 5  ;;  %v15488_v24 = vrot.slane %v8425_v3, 5  ;;  %v8513_v43 = vld [vmem:[#allocation5 + $0x8] ss:$0 sm:$0xff]  ;;  %v8527_v51 = vld [vmem:[#allocation5 + $0x9] ss:$0 sm:$0xff] }
  0x56   : > { %v545_v20 = vmul.f32 %v8445_v12, %v8455_v16  ;;  %v8467_v21 = vsel %vm599_vm2, %v576_v13, %v15490_v14  ;;  %v8479_v27 = vsel %vm674_vm3, %v651_v18, %v15489_v19  ;;  %v801_v29 = vrot.slane %v8422_v2, 6  ;;  %v8533_v55 = vld [vmem:[#allocation5 + $0xa] ss:$0 sm:$0xff]  ;;  %v8552_v61 = vld [vmem:[#allocation5 + $0xb] ss:$0 sm:$0xff]  ;;  %16266 = vst [vmem:[#allocation30_spill] sm:$0xff] %v8555_v62 }
  0x57   : > { %v486_v25 = vadd.f32 %v470_v15, %v409_v10  ;;  %v620_v26 = vmul.f32 %v8457_v17, %v8467_v21  ;;  %v8491_v31 = vsel %vm749_vm4, %v726_v23, %v15488_v24  ;;  %v15487_v32 = vrot.slane %v8425_v3, 6  ;;  %16265 = vst [vmem:[#allocation29_spill] sm:$0xff] %v8552_v61  ;;  %v8647_v24 = vld [vmem:[#allocation5 + $0x14] ss:$0 sm:$0xff]  ;;  %s7249_s24 = sshll.u32 %s8172_s30, 4  ;;  %s7250_s8 = sshll.u32 %s17580_s5, 5 }
  0x58   : > { %v695_v35 = vmul.f32 %v8469_v22, %v8479_v27  ;;  %v937_v37 = vrot.slane %v8485_v30, 1  ;;  %v15486_v38 = vrot.slane %v8495_v33, 1  ;;  %v770_v42 = vmul.f32 %v8481_v28, %v8491_v31  ;;  %16282 = vst [vmem:[#allocation46_spill] sm:$0xff] %v8647_v24  ;;  %s17584_s18 = sld [smem:[#allocation138_spill]]  ;;  %s6665_s27 = sshll.u32 %s15347_s20, 4  ;;  %s6666_s27 = int_to_ptr.vmem [resolvable:$true] %s6665_s27 }
  0x59   : > { %v561_v34 = vadd.f32 %v545_v20, %v486_v25  ;;  %v8507_v39 = vsel %vm824_vm5, %v801_v29, %v15487_v32  ;;  %v1011_v44 = vrot.slane %v8485_v30, 2  ;;  %v15485_v45 = vrot.slane %v8495_v33, 2  ;;  %s6651_s1 = scalar_lea.sflag [#allocation4], %s374_s16 }
  0x5a   : > { %v8521_v46 = vsel %vm449_vm0, %v937_v37, %v15486_v38  ;;  %v1085_v47 = vrot.slane %v8485_v30, 3  ;;  %v15484_v48 = vrot.slane %v8495_v33, 3  ;;  %v845_v50 = vmul.f32 %v8499_v36, %v8507_v39  ;;  %v8579_v37 = vld [vmem:[#allocation5 + $0xd] ss:$0 sm:$0xff] }
  0x5b   : > { %v636_v41 = vadd.f32 %v620_v26, %v561_v34  ;;  %16261 = vst [vmem:[#allocation25_spill] sm:$0xff] %v8521_v46  ;;  %v1159_v52 = vrot.slane %v8485_v30, 4  ;;  %v15483_v53 = vrot.slane %v8495_v33, 4  ;;  %v906_v54 = vmul.f32 %v8509_v40, %v8485_v30 }
  0x5c   : > { %v980_v58 = vmul.f32 %v8513_v43, %v8521_v46  ;;  %v8544_v59 = vsel %vm524_vm1, %v1011_v44, %v15485_v45  ;;  %v8550_v60 = vsel %vm599_vm2, %v1085_v47, %v15484_v48  ;;  %v1233_v0 = vrot.slane %v8485_v30, 5  ;;  %v8631_v48 = vld [vmem:[#allocation5 + $0x12] ss:$0 sm:$0xff] }
  0x5d   : > { %v711_v49 = vadd.f32 %v695_v35, %v636_v41  ;;  %16263 = vst [vmem:[#allocation27_spill] sm:$0xff] %v8544_v59  ;;  %v8561_v63 = vsel %vm674_vm3, %v1159_v52, %v15483_v53  ;;  %v15481_v5 = vrot.slane %v8495_v33, 5  ;;  %v1307_v8 = vrot.slane %v8485_v30, 6  ;;  %v8577_v35 = vld [vmem:[#allocation5 + $0xc] ss:$0 sm:$0xff] }
  0x5e   : > { %16264 = vst [vmem:[#allocation28_spill] sm:$0xff] %v8550_v60  ;;  %v15480_v13 = vrot.slane %v8495_v33, 6  ;;  %v1442_v15 = vrot.slane %v8536_v56, 1  ;;  %v15479_v18 = vrot.slane %v8555_v62, 1  ;;  %v1516_v20 = vrot.slane %v8536_v56, 2  ;;  %s8078_s3 = scalar_lea.hbm %s17584_s18, 512 }
  0x5f   : > { %v786_v57 = vadd.f32 %v770_v42, %v711_v49  ;;  %16267 = vst [vmem:[#allocation31_spill] sm:$0xff] %v8561_v63  ;;  %v15482_v23 = vrot.slane %v8555_v62, 2  ;;  %v1054_v26 = vmul.f32 %v8527_v51, %v8544_v59  ;;  %v1128_v29 = vmul.f32 %v8533_v55, %v8550_v60  ;;  %v8581_v41 = vld [vmem:[#allocation5 + $0xe] ss:$0 sm:$0xff]  ;;  %v8603_v52 = vld [vmem:[#allocation5 + $0x10] ss:$0 sm:$0xff] }
  0x60   : > { %v1202_v34 = vmul.f32 %v8552_v61, %v8561_v63  ;;  %16268 = vst [vmem:[#allocation32_spill] sm:$0xff] %v8577_v35  ;;  %v8587_v44 = vsel %vm749_vm4, %v1233_v0, %v15481_v5  ;;  %v8593_v47 = vsel %vm824_vm5, %v1307_v8, %v15480_v13  ;;  %v8599_v49 = vsel %vm449_vm0, %v1442_v15, %v15479_v18  ;;  %v8620_v5 = vld [vmem:[%s8415_s9 + $0x60] sm:$0xff]  ;;  %v8754_v63 = vld [vmem:[#allocation5 + $0x1b] ss:$0 sm:$0xff]  ;;  %v8759_v60 = vld [vmem:[#allocation5 + $0x1d] ss:$0 sm:$0xff] }
  0x61   : > { %v861_v10 = vadd.f32 %v845_v50, %v786_v57  ;;  %16269 = vst [vmem:[#allocation33_spill] sm:$0xff] %v8581_v41  ;;  %v8601_v50 = vld [vmem:[#allocation5 + $0xf] ss:$0 sm:$0xff]  ;;  %v1590_v57 = vrot.slane %v8536_v56, 3  ;;  %v1664_v0 = vrot.slane %v8536_v56, 4  ;;  %v1738_v15 = vrot.slane %v8536_v56, 5 }
  0x62   : > { %16270 = vst [vmem:[#allocation34_spill] sm:$0xff] %v8587_v44  ;;  %v1812_v18 = vrot.slane %v8536_v56, 6  ;;  %v15499_v13 = vrot.slane %v8555_v62, 6  ;;  %v1276_v53 = vmul.f32 %v8577_v35, %v8587_v44  ;;  %v1411_v45 = vmul.f32 %v8581_v41, %v8536_v56  ;;  %v8740_v44 = vld [vmem:[#allocation5 + $0x19] ss:$0 sm:$0xff] }
  0x63   : > { %v922_v25 = vadd.f32 %v906_v54, %v861_v10  ;;  %16271 = vst [vmem:[#allocation35_spill] sm:$0xff] %v8593_v47  ;;  %v8609_v54 = vsel %vm524_vm1, %v1516_v20, %v15482_v23  ;;  %v15493_v10 = vrot.slane %v8555_v62, 4  ;;  %v8623_v20 = vld [vmem:[%s8415_s9 + $0x68] sm:$0xff]  ;;  %v1485_v38 = vmul.f32 %v8601_v50, %v8599_v49 }
  0x64   : > { %16272 = vst [vmem:[#allocation36_spill] sm:$0xff] %v8599_v49  ;;  %v1559_v32 = vmul.f32 %v8603_v52, %v8609_v54  ;;  %v2095_v6 = vrot.slane %v8620_v5, 3  ;;  %v8710_v49 = vld [vmem:[#allocation5 + $0x16] ss:$0 sm:$0xff] }
  0x65   : > { %v996_v42 = vadd.f32 %v980_v58, %v922_v25  ;;  %16273 = vst [vmem:[#allocation37_spill] sm:$0xff] %v8601_v50  ;;  %v15492_v58 = vrot.slane %v8555_v62, 3  ;;  %v15494_v25 = vrot.slane %v8555_v62, 5  ;;  %v8653_v14 = vsel %vm674_vm3, %v1664_v0, %v15493_v10  ;;  %v8695_v10 = vld [vmem:[%s8415_s9 + $0x78] sm:$0xff] }
  0x66   : > { %16274 = vst [vmem:[#allocation38_spill] sm:$0xff] %v8603_v52  ;;  %v2021_v0 = vrot.slane %v8620_v5, 2  ;;  %v2690_v52 = vrot.slane %v8695_v10, 4  ;;  %v2838_v50 = vrot.slane %v8695_v10, 6 }
  0x67   : > { %16275 = vst [vmem:[#allocation39_spill] sm:$0xff] %v8609_v54  ;;  %v1070_v8 = vadd.f32 %v1054_v26, %v996_v42  ;;  %v1350_v26 = vmul.f32 %v8579_v37, %v8593_v47  ;;  %v8629_v42 = vld [vmem:[#allocation5 + $0x11] ss:$0 sm:$0xff]  ;;  %v8659_v9 = vsel %vm749_vm4, %v1738_v15, %v15494_v25  ;;  %v8678_v54 = vld [vmem:[%s8415_s9] sm:$0xff]  ;;  %v2333_v47 = vrot.slane %v8620_v5, 6 }
  0x68   : > { %16276 = vst [vmem:[#allocation40_spill] sm:$0xff] %v8620_v5 }
  0x69   : > { %16277 = vst [vmem:[#allocation41_spill] sm:$0xff] %v8623_v20  ;;  %v1144_v23 = vadd.f32 %v1128_v29, %v1070_v8  ;;  %v8643_v29 = vsel %vm599_vm2, %v1590_v57, %v15492_v58  ;;  %v8645_v8 = vld [vmem:[#allocation5 + $0x13] ss:$0 sm:$0xff]  ;;  %v8661_v57 = vld [vmem:[#allocation5 + $0x15] ss:$0 sm:$0xff]  ;;  %v1947_v58 = vrot.slane %v8620_v5, 1 }
  0x6a   : > { %16278 = vst [vmem:[#allocation42_spill] sm:$0xff] %v8629_v42  ;;  %v1633_v25 = vmul.f32 %v8629_v42, %v8643_v29  ;;  %v2616_v42 = vrot.slane %v8695_v10, 3 }
  0x6b   : > { %16279 = vst [vmem:[#allocation43_spill] sm:$0xff] %v8631_v48  ;;  %v1218_v19 = vadd.f32 %v1202_v34, %v1144_v23  ;;  %v8668_v23 = vsel %vm824_vm5, %v1812_v18, %v15499_v13  ;;  %v2185_v18 = vrot.slane %v8620_v5, 4  ;;  %v2259_v34 = vrot.slane %v8620_v5, 5 }
  0x6c   : > { %16280 = vst [vmem:[#allocation44_spill] sm:$0xff] %v8643_v29  ;;  %v8692_v62 = vmul.f32 %v8647_v24, %v8668_v23  ;;  %v8698_v29 = vld [vmem:[%s8415_s9 + $0x80] sm:$0xff]  ;;  %v8702_v13 = vmul.f32 %v8661_v57, %v8620_v5  ;;  %v16294_v24 = vrot.slane %v8623_v20, 3  ;;  %v8767_v5 = vld [vmem:[#allocation5 + $0x1f] ss:$0 sm:$0xff] }
  0x6d   : > { %16281 = vst [vmem:[#allocation45_spill] sm:$0xff] %v8645_v8  ;;  %v1292_v15 = vadd.f32 %v1276_v53, %v1218_v19  ;;  %v1707_v19 = vmul.f32 %v8631_v48, %v8653_v14  ;;  %v8688_v53 = vmul.f32 %v8645_v8, %v8659_v9  ;;  %v16308_v30 = vrot.slane %v8698_v29, 1 }
  0x6e   : > { %16283 = vst [vmem:[#allocation47_spill] sm:$0xff] %v8653_v14  ;;  %v8718_v14 = vld [vmem:[#allocation5 + $0x17] ss:$0 sm:$0xff] }
  0x6f   : > { %16284 = vst [vmem:[#allocation48_spill] sm:$0xff] %v8659_v9  ;;  %v1366_v33 = vadd.f32 %v1350_v26, %v1292_v15  ;;  %v16289_v26 = vrot.slane %v8623_v20, 1  ;;  %v16291_v9 = vrot.slane %v8623_v20, 2 }
  0x70   : > { %16285 = vst [vmem:[#allocation49_spill] sm:$0xff] %v8661_v57  ;;  %v8722_v57 = vmul.f32 %v8429_v4, %v8678_v54 }
  0x71   : > { %16286 = vst [vmem:[#allocation50_spill] sm:$0xff] %v8668_v23  ;;  %v8708_v15 = vsel %vm449_vm0, %v1947_v58, %v16289_v26  ;;  %v8716_v23 = vsel %vm524_vm1, %v2021_v0, %v16291_v9  ;;  %v1427_v56 = vadd.f32 %v1411_v45, %v1366_v33  ;;  %v8728_v58 = vsel %vm599_vm2, %v2095_v6, %v16294_v24  ;;  %v8730_v26 = vld [vmem:[#allocation5 + $0x18] ss:$0 sm:$0xff]  ;;  %v8748_v24 = vld [vmem:[#allocation5 + $0x1a] ss:$0 sm:$0xff] }
  0x72   : > { %16287 = vst [vmem:[#allocation51_spill] sm:$0xff] %v8695_v10  ;;  %v16297_v0 = vrot.slane %v8623_v20, 4  ;;  %v16299_v33 = vrot.slane %v8623_v20, 5  ;;  %v8750_v45 = vld [vmem:[#allocation5 + $0x1c] ss:$0 sm:$0xff]  ;;  %v2468_v9 = vrot.slane %v8695_v10, 1  ;;  %v1990_v41 = vmul.f32 %v8710_v49, %v8708_v15 }
  0x73   : > { %16288 = vst [vmem:[#allocation52_spill] sm:$0xff] %v8698_v29  ;;  %v1501_v48 = vadd.f32 %v1485_v38, %v1427_v56  ;;  %v2764_v38 = vrot.slane %v8695_v10, 5  ;;  %v8778_v59 = vmul.f32 %v8730_v26, %v8728_v58 }
  0x74   : > { %16290 = vst [vmem:[#allocation53_spill] sm:$0xff] %v8708_v15  ;;  %v8738_v8 = vsel %vm674_vm3, %v2185_v18, %v16297_v0  ;;  %v8746_v6 = vsel %vm749_vm4, %v2259_v34, %v16299_v33  ;;  %v2542_v18 = vrot.slane %v8695_v10, 2  ;;  %v8761_v34 = vld [vmem:[#allocation5 + $0x1e] ss:$0 sm:$0xff]  ;;  %v2064_v33 = vmul.f32 %v8718_v14, %v8716_v23  ;;  %v8786_v0 = vld [vmem:[#allocation5 + $0x20] ss:$0 sm:$0xff] }
  0x75   : > { %16292 = vst [vmem:[#allocation54_spill] sm:$0xff] %v8716_v23  ;;  %v1575_v56 = vadd.f32 %v1559_v32, %v1501_v48  ;;  %v16305_v32 = vrot.slane %v8623_v20, 6  ;;  %v8792_v15 = vsel %vm449_vm0, %v2468_v9, %v16308_v30  ;;  %v16310_v23 = vrot.slane %v8698_v29, 2  ;;  %v8800_v20 = vld [vmem:[#allocation5 + $0x21] ss:$0 sm:$0xff] }
  0x76   : > { %16293 = vst [vmem:[#allocation55_spill] sm:$0xff] %v8718_v14  ;;  %v8813_v30 = vmul.f32 %v8740_v44, %v8738_v8  ;;  %v8817_v9 = vmul.f32 %v8748_v24, %v8746_v6 }
  0x77   : > { %16295 = vst [vmem:[#allocation56_spill] sm:$0xff] %v8728_v58  ;;  %v8784_v48 = vsel %vm824_vm5, %v2333_v47, %v16305_v32  ;;  %v1649_v46 = vadd.f32 %v1633_v25, %v1575_v56  ;;  %v8798_v58 = vsel %vm524_vm1, %v2542_v18, %v16310_v23  ;;  %v8805_v47 = vld [vmem:[%s8415_s9 + $0x90] sm:$0xff]  ;;  %v8809_v25 = vmul.f32 %v8429_v4, %v8425_v3  ;;  %v8830_v32 = vld [vmem:[%s8415_s9 + $0x98] sm:$0xff] }
  0x78   : > { %16296 = vst [vmem:[#allocation57_spill] sm:$0xff] %v8730_v26  ;;  %v8802_v26 = vld [vmem:[#allocation5 + $0x22] ss:$0 sm:$0xff]  ;;  %v8821_v23 = vmul.f32 %v8750_v45, %v8695_v10  ;;  %v16315_v18 = vrot.slane %v8698_v29, 3  ;;  %v16320_v10 = vrot.slane %v8698_v29, 5 }
  0x79   : > { %16298 = vst [vmem:[#allocation58_spill] sm:$0xff] %v8738_v8  ;;  %v1723_v14 = vadd.f32 %v1707_v19, %v1649_v46  ;;  %v8834_v8 = vmul.f32 %v8754_v63, %v8784_v48  ;;  %v8852_v46 = vmul.f32 %v8759_v60, %v8792_v15  ;;  %v8856_v19 = vmul.f32 %v8761_v34, %v8798_v58 }
  0x7a   : > { %16300 = vst [vmem:[#allocation59_spill] sm:$0xff] %v8746_v6  ;;  %v8827_v56 = vsel %vm599_vm2, %v2616_v42, %v16315_v18  ;;  %v16318_v6 = vrot.slane %v8698_v29, 4  ;;  %v8848_v42 = vld [vmem:[#allocation5 + $0x23] ss:$0 sm:$0xff]  ;;  %v16323_v18 = vrot.slane %v8698_v29, 6 }
  0x7b   : > { %16301 = vst [vmem:[#allocation60_spill] sm:$0xff] %v8748_v24 }
  0x7c   : > { %16302 = vst [vmem:[#allocation61_spill] sm:$0xff] %v8750_v45  ;;  %v8840_v24 = vsel %vm674_vm3, %v2690_v52, %v16318_v6  ;;  %v8846_v45 = vsel %vm749_vm4, %v2764_v38, %v16320_v10  ;;  %v8862_v52 = vsel %vm824_vm5, %v2838_v50, %v16323_v18  ;;  %v8865_v6 = vld [vmem:[%s8415_s9 + $0x8] sm:$0xff]  ;;  %v423_v10 = vrot.slane %v8678_v54, 1 }
  0x7d   : > { %16303 = vst [vmem:[#allocation62_spill] sm:$0xff] %v8761_v34  ;;  %v1797_v38 = vadd.f32 %v8688_v53, %v1723_v14  ;;  %v8877_v29 = vmul.f32 %v8786_v0, %v8840_v24  ;;  %v8881_v50 = vmul.f32 %v8800_v20, %v8846_v45  ;;  %v8885_v18 = vmul.f32 %v8509_v40, %v8422_v2  ;;  %v8902_v2 = vld [vmem:[#allocation5 + $0x24] ss:$0 sm:$0xff] }
  0x7e   : > { %16304 = vst [vmem:[#allocation63_spill] sm:$0xff] %v8767_v5  ;;  %v8889_v14 = vmul.f32 %v8513_v43, %v8443_v11  ;;  %v8907_v11 = vmul.f32 %v8527_v51, %v8455_v16  ;;  %v575_v16 = vrot.slane %v8678_v54, 3 }
  0x7f   : > { %16306 = vst [vmem:[#allocation64_spill] sm:$0xff] %v8784_v48  ;;  %v2973_v48 = vrot.slane %v8805_v47, 1  ;;  %v1871_v53 = vadd.f32 %v8692_v62, %v1797_v38  ;;  %v8911_v62 = vmul.f32 %v8533_v55, %v8467_v21 }
  0x80   : > { %16307 = vst [vmem:[#allocation65_spill] sm:$0xff] %v8786_v0 }
  0x81   : > { %16309 = vst [vmem:[#allocation66_spill] sm:$0xff] %v8792_v15  ;;  %v8871_v15 = vmul.f32 %v8767_v5, %v8827_v56  ;;  %v1932_v38 = vadd.f32 %v8702_v13, %v1871_v53  ;;  %v8930_v13 = vmul.f32 %v8552_v61, %v8479_v27 }
  0x82   : > { %16311 = vst [vmem:[#allocation67_spill] sm:$0xff] %v8798_v58  ;;  %v8894_v58 = vmul.f32 %v8802_v26, %v8862_v52 }
  0x83   : > { %16312 = vst [vmem:[#allocation68_spill] sm:$0xff] %v8800_v20  ;;  %v2006_v53 = vadd.f32 %v1990_v41, %v1932_v38  ;;  %v8949_v41 = vmul.f32 %v8429_v4, %v8865_v6  ;;  %v15572_v4 = vrot.slane %v8865_v6, 4 }
  0x84   : > { %16313 = vst [vmem:[#allocation69_spill] sm:$0xff] %v8802_v26  ;;  %v3047_v26 = vrot.slane %v8805_v47, 2 }
  0x85   : > { %16314 = vst [vmem:[#allocation70_spill] sm:$0xff] %v8805_v47  ;;  %v2080_v38 = vadd.f32 %v2064_v33, %v2006_v53 }
  0x86   : > { %16316 = vst [vmem:[#allocation71_spill] sm:$0xff] %v8827_v56  ;;  %v500_v56 = vrot.slane %v8678_v54, 2 }
  0x87   : > { %16317 = vst [vmem:[#allocation72_spill] sm:$0xff] %v8830_v32  ;;  %v2170_v33 = vadd.f32 %v8778_v59, %v2080_v38  ;;  %v16332_v59 = vrot.slane %v8830_v32, 2  ;;  %v8979_v38 = vld [vmem:[%s8415_s9 + $0xa8] sm:$0xff] }
  0x88   : > { %16319 = vst [vmem:[#allocation73_spill] sm:$0xff] %v8840_v24  ;;  %v16327_v24 = vrot.slane %v8830_v32, 1  ;;  %v3700_v61 = vrot.slane %v8979_v38, 4 }
  0x89   : > { %16321 = vst [vmem:[#allocation74_spill] sm:$0xff] %v8846_v45  ;;  %v8900_v45 = vmul.f32 %v8848_v42, %v8805_v47 }
  0x8a   : > { %16322 = vst [vmem:[#allocation75_spill] sm:$0xff] %v8848_v42  ;;  %v16329_v42 = vrot.slane %v8865_v6, 1 }
  0x8b   : > { %16324 = vst [vmem:[#allocation76_spill] sm:$0xff] %v8862_v52  ;;  %v8918_v52 = vsel %vm449_vm0, %v2973_v48, %v16327_v24  ;;  %v16330_v24 = vrot.slane %v8865_v6, 2 }
  0x8c   : > { %16325 = vst [vmem:[#allocation77_spill] sm:$0xff] %v8865_v6  ;;  %v458_v20 = vsel %vm449_vm0, %v423_v10, %v16329_v42  ;;  %v15568_v42 = vrot.slane %v8865_v6, 3  ;;  %v8939_v10 = vmul.f32 %v8577_v35, %v8491_v31  ;;  %v8943_v21 = vmul.f32 %v8902_v2, %v8918_v52 }
  0x8d   : > { %16326 = vst [vmem:[#allocation78_spill] sm:$0xff] %v8902_v2  ;;  %v468_v0 = vmul.f32 %v8433_v7, %v458_v20  ;;  %v533_v48 = vsel %vm524_vm1, %v500_v56, %v16330_v24  ;;  %v3121_v20 = vrot.slane %v8805_v47, 3  ;;  %v725_v56 = vrot.slane %v8678_v54, 5 }
  0x8e   : > { %16328 = vst [vmem:[#allocation79_spill] sm:$0xff] %v8918_v52  ;;  %v543_v24 = vmul.f32 %v8445_v12, %v533_v48  ;;  %v608_v31 = vsel %vm599_vm2, %v575_v16, %v15568_v42  ;;  %v3195_v52 = vrot.slane %v8805_v47, 4  ;;  %v15573_v42 = vrot.slane %v8865_v6, 5 }
  0x8f   : > { %v484_v27 = vadd.f32 %v468_v0, %v8722_v57  ;;  %16331 = vst [vmem:[#allocation80_spill] sm:$0xff] %v8949_v41  ;;  %v618_v57 = vmul.f32 %v8457_v17, %v608_v31  ;;  %v650_v0 = vrot.slane %v8678_v54, 4  ;;  %v3269_v41 = vrot.slane %v8805_v47, 5 }
  0x90   : > { %v2244_v2 = vadd.f32 %v8813_v30, %v2170_v33  ;;  %v16335_v35 = vrot.slane %v8830_v32, 3  ;;  %v3343_v30 = vrot.slane %v8805_v47, 6  ;;  %v16340_v33 = vrot.slane %v8830_v32, 5  ;;  %v9024_v47 = vld [vmem:[#allocation5 + $0x28] ss:$0 sm:$0xff] }
  0x91   : > { %v559_v48 = vadd.f32 %v543_v24, %v484_v27  ;;  %v683_v31 = vsel %vm674_vm3, %v650_v0, %v15572_v4  ;;  %v8976_v27 = vsel %vm524_vm1, %v3047_v26, %v16332_v59  ;;  %v8982_v24 = vld [vmem:[%s8415_s9 + $0xb0] sm:$0xff]  ;;  %v758_v26 = vsel %vm749_vm4, %v725_v56, %v15573_v42  ;;  %v9007_v4 = vld [vmem:[#allocation5 + $0x26] ss:$0 sm:$0xff]  ;;  %16343 = vst [vmem:[#allocation88_spill] sm:$0xff] %v9024_v47 }
  0x92   : > { %16333 = vst [vmem:[#allocation81_spill] sm:$0xff] %v8976_v27  ;;  %v693_v53 = vmul.f32 %v8469_v22, %v683_v31  ;;  %v8989_v0 = vsel %vm599_vm2, %v3121_v20, %v16335_v35  ;;  %v2318_v59 = vadd.f32 %v8817_v9, %v2244_v2  ;;  %v768_v20 = vmul.f32 %v8481_v28, %v758_v26  ;;  %v9032_v2 = vld [vmem:[#allocation5 + $0x29] ss:$0 sm:$0xff]  ;;  %v9039_v26 = vld [vmem:[#allocation5 + $0x2b] ss:$0 sm:$0xff] }
  0x93   : > { %16334 = vst [vmem:[#allocation82_spill] sm:$0xff] %v8982_v24  ;;  %v634_v16 = vadd.f32 %v618_v57, %v559_v48  ;;  %v8998_v57 = vld [vmem:[#allocation5 + $0x25] ss:$0 sm:$0xff]  ;;  %v16337_v48 = vrot.slane %v8830_v32, 4  ;;  %v9013_v56 = vsel %vm749_vm4, %v3269_v41, %v16340_v33  ;;  %v3478_v9 = vrot.slane %v8979_v38, 1 }
  0x94   : > { %16336 = vst [vmem:[#allocation83_spill] sm:$0xff] %v8989_v0  ;;  %v800_v42 = vrot.slane %v8678_v54, 6  ;;  %v16344_v41 = vrot.slane %v8830_v32, 6  ;;  %v3626_v54 = vrot.slane %v8979_v38, 3  ;;  %v9049_v34 = vmul.f32 %v8998_v57, %v8976_v27 }
  0x95   : > { %v9004_v31 = vsel %vm674_vm3, %v3195_v52, %v16337_v48  ;;  %v709_v35 = vadd.f32 %v693_v53, %v634_v16  ;;  %16339 = vst [vmem:[#allocation85_spill] sm:$0xff] %v9007_v4  ;;  %v2392_v52 = vadd.f32 %v8834_v8, %v2318_v59  ;;  %v9019_v48 = vld [vmem:[#allocation5 + $0x27] ss:$0 sm:$0xff]  ;;  %v3552_v53 = vrot.slane %v8979_v38, 2  ;;  %v9037_v16 = vld [vmem:[#allocation5 + $0x2a] ss:$0 sm:$0xff] }
  0x96   : > { %16338 = vst [vmem:[#allocation84_spill] sm:$0xff] %v9004_v31  ;;  %v9030_v33 = vsel %vm824_vm5, %v3343_v30, %v16344_v41  ;;  %v16349_v30 = vrot.slane %v8865_v6, 6  ;;  %v9060_v32 = vmul.f32 %v8579_v37, %v8507_v39  ;;  %v9069_v8 = vmul.f32 %v9019_v48, %v9004_v31  ;;  %v9089_v31 = vld [vmem:[#allocation5 + $0x2e] ss:$0 sm:$0xff] }
  0x97   : > { %16341 = vst [vmem:[#allocation86_spill] sm:$0xff] %v9013_v56  ;;  %v784_v59 = vadd.f32 %v768_v20, %v709_v35  ;;  %v2453_v5 = vadd.f32 %v8821_v23, %v2392_v52  ;;  %v16350_v35 = vrot.slane %v8982_v24, 1  ;;  %v9055_v20 = vld [vmem:[#allocation5 + $0x2c] ss:$0 sm:$0xff]  ;;  %v9079_v39 = vmul.f32 %v9024_v47, %v9013_v56 }
  0x98   : > { %16342 = vst [vmem:[#allocation87_spill] sm:$0xff] %v9019_v48  ;;  %v833_v41 = vsel %vm824_vm5, %v800_v42, %v16349_v30  ;;  %v9065_v30 = vmul.f32 %v9007_v4, %v8989_v0  ;;  %v16359_v47 = vld [vmem:[#allocation25_spill] sm:$0xff]  ;;  %v16361_v48 = vld [vmem:[#allocation27_spill] sm:$0xff] }
  0x99   : > { %16345 = vst [vmem:[#allocation89_spill] sm:$0xff] %v9030_v33  ;;  %v3510_v23 = vsel %vm449_vm0, %v3478_v9, %v16350_v35  ;;  %v843_v52 = vmul.f32 %v8499_v36, %v833_v41  ;;  %v2527_v42 = vadd.f32 %v8852_v46, %v2453_v5  ;;  %v16352_v9 = vrot.slane %v8982_v24, 2  ;;  %v9075_v35 = vld [vmem:[#allocation5 + $0x2d] ss:$0 sm:$0xff] }
  0x9a   : > { %16346 = vst [vmem:[#allocation90_spill] sm:$0xff] %v9032_v2  ;;  %v9083_v5 = vmul.f32 %v9032_v2, %v9030_v33  ;;  %v16354_v46 = vrot.slane %v8982_v24, 3  ;;  %v9097_v56 = vmul.f32 %v9039_v26, %v3510_v23  ;;  %v16356_v33 = vrot.slane %v8982_v24, 4  ;;  %v386_v2 = vld [vmem:[%s8415_s9 + $0x28] sm:$0xff] }
  0x9b   : > { %16347 = vst [vmem:[#allocation91_spill] sm:$0xff] %v9037_v16  ;;  %v3584_v41 = vsel %vm524_vm1, %v3552_v53, %v16352_v9  ;;  %v859_v0 = vadd.f32 %v843_v52, %v784_v59  ;;  %v2601_v53 = vadd.f32 %v8856_v19, %v2527_v42  ;;  %v9094_v9 = vmul.f32 %v9037_v16, %v8979_v38  ;;  %v16362_v19 = vld [vmem:[#allocation38_spill] sm:$0xff] }
  0x9c   : > { %16348 = vst [vmem:[#allocation92_spill] sm:$0xff] %v9039_v26  ;;  %v3658_v6 = vsel %vm599_vm2, %v3626_v54, %v16354_v46  ;;  %v3732_v27 = vsel %vm674_vm3, %v3700_v61, %v16356_v33  ;;  %v9105_v54 = vmul.f32 %v9055_v20, %v3584_v41  ;;  %v3774_v59 = vrot.slane %v8979_v38, 5  ;;  %v16357_v46 = vld [vmem:[#allocation23_spill] sm:$0xff]  ;;  %v16358_v26 = vld [vmem:[#allocation33_spill] sm:$0xff] }
  0x9d   : > { %16351 = vst [vmem:[#allocation93_spill] sm:$0xff] %v9055_v20  ;;  %v920_v52 = vadd.f32 %v8885_v18, %v859_v0  ;;  %v2675_v42 = vadd.f32 %v8871_v15, %v2601_v53  ;;  %v9112_v23 = vmul.f32 %v9075_v35, %v3658_v6  ;;  %v1409_v16 = vmul.f32 %v16358_v26, %v16357_v46  ;;  %v16360_v61 = vld [vmem:[#allocation37_spill] sm:$0xff] }
  0x9e   : > { %16353 = vst [vmem:[#allocation94_spill] sm:$0xff] %v9075_v35  ;;  %v1483_v33 = vmul.f32 %v16360_v61, %v16359_v47  ;;  %v9119_v41 = vmul.f32 %v9089_v31, %v3732_v27  ;;  %v9124_v4 = vmul.f32 %v16362_v19, %v16361_v48  ;;  %v440_v18 = vrot.slane %v386_v2, 1  ;;  %v9131_v35 = vld [vmem:[#allocation5 + $0x2f] ss:$0 sm:$0xff] }
  0x9f   : > { %16355 = vst [vmem:[#allocation95_spill] sm:$0xff] %v9089_v31  ;;  %v994_v20 = vadd.f32 %v8889_v14, %v920_v52  ;;  %v2749_v15 = vadd.f32 %v8877_v29, %v2675_v42  ;;  %v517_v6 = vrot.slane %v386_v2, 2  ;;  %v592_v0 = vrot.slane %v386_v2, 3 }
  0xa0   : > { %v667_v53 = vrot.slane %v386_v2, 4  ;;  %v16363_v46 = vrot.slane %v8982_v24, 5  ;;  %v16364_v27 = vrot.slane %v8425_v3, 1  ;;  %v742_v29 = vrot.slane %v386_v2, 5 }
  0xa1   : > { %v1068_v14 = vadd.f32 %v8907_v11, %v994_v20  ;;  %v2823_v52 = vadd.f32 %v8881_v50, %v2749_v15  ;;  %v16366_v31 = vrot.slane %v8425_v3, 2  ;;  %v16368_v11 = vrot.slane %v8425_v3, 3 }
  0xa2   : > { %v3806_v47 = vsel %vm749_vm4, %v3774_v59, %v16363_v46  ;;  %v9138_v48 = vsel %vm449_vm0, %v16364_v27, %v440_v18  ;;  %v3848_v18 = vrot.slane %v8979_v38, 6  ;;  %v15608_v46 = vrot.slane %v8982_v24, 6  ;;  %v9171_v38 = vld [vmem:[%s8415_s9 + $0x40] sm:$0xff] }
  0xa3   : > { %16365 = vst [vmem:[#allocation23_spill] sm:$0xff] %v9138_v48  ;;  %v471_v42 = vmul.f32 %v8433_v7, %v9138_v48  ;;  %v9147_v59 = vsel %vm524_vm1, %v16366_v31, %v517_v6  ;;  %v9153_v20 = vsel %vm599_vm2, %v16368_v11, %v592_v0  ;;  %v1142_v50 = vadd.f32 %v8911_v62, %v1068_v14  ;;  %v16372_v14 = vld [vmem:[#allocation28_spill] sm:$0xff] }
  0xa4   : > { %16367 = vst [vmem:[#allocation33_spill] sm:$0xff] %v9147_v59  ;;  %v546_v7 = vmul.f32 %v8445_v12, %v9147_v59  ;;  %v2897_v15 = vadd.f32 %v8894_v58, %v2823_v52  ;;  %v621_v6 = vmul.f32 %v8457_v17, %v9153_v20  ;;  %v16370_v27 = vrot.slane %v8425_v3, 4  ;;  %v16373_v58 = vld [vmem:[#allocation42_spill] sm:$0xff] }
  0xa5   : > { %16369 = vst [vmem:[#allocation25_spill] sm:$0xff] %v9153_v20  ;;  %v487_v31 = vadd.f32 %v471_v42, %v8809_v25  ;;  %v9174_v62 = vmul.f32 %v9131_v35, %v3806_v47  ;;  %v1216_v12 = vadd.f32 %v8930_v13, %v1142_v50  ;;  %v1631_v52 = vmul.f32 %v16373_v58, %v16372_v14  ;;  %v9192_v47 = vld [vmem:[#allocation5 + $0x30] ss:$0 sm:$0xff]  ;;  %v16377_v14 = vld [vmem:[#allocation31_spill] sm:$0xff] }
  0xa6   : > { %v9168_v0 = vsel %vm674_vm3, %v16370_v27, %v667_v53  ;;  %v16374_v25 = vrot.slane %v8425_v3, 5  ;;  %v2958_v42 = vadd.f32 %v8900_v45, %v2897_v15  ;;  %v817_v27 = vrot.slane %v386_v2, 6  ;;  %16376 = vst [vmem:[#allocation38_spill] sm:$0xff] %v9192_v47  ;;  %v16378_v20 = vld [vmem:[#allocation43_spill] sm:$0xff] }
  0xa7   : > { %16371 = vst [vmem:[#allocation37_spill] sm:$0xff] %v9168_v0  ;;  %v562_v53 = vadd.f32 %v546_v7, %v487_v31  ;;  %v696_v11 = vmul.f32 %v8469_v22, %v9168_v0  ;;  %v3880_v13 = vsel %vm824_vm5, %v3848_v18, %v15608_v46  ;;  %v1290_v50 = vadd.f32 %v8939_v10, %v1216_v12  ;;  %v16381_v10 = vld [vmem:[#allocation34_spill] sm:$0xff]  ;;  %v16382_v31 = vld [vmem:[#allocation45_spill] sm:$0xff] }
  0xa8   : > { %v9183_v17 = vsel %vm749_vm4, %v16374_v25, %v742_v29  ;;  %v1705_v29 = vmul.f32 %v16378_v20, %v16377_v14  ;;  %v953_v25 = vrot.slane %v9171_v38, 1  ;;  %v3032_v45 = vadd.f32 %v8943_v21, %v2958_v42  ;;  %v16383_v14 = vld [vmem:[#allocation35_spill] sm:$0xff]  ;;  %v16384_v46 = vld [vmem:[#allocation46_spill] sm:$0xff] }
  0xa9   : > { %16375 = vst [vmem:[#allocation27_spill] sm:$0xff] %v9183_v17  ;;  %v637_v7 = vadd.f32 %v621_v6, %v562_v53  ;;  %v771_v22 = vmul.f32 %v8481_v28, %v9183_v17  ;;  %v16379_v2 = vrot.slane %v8425_v3, 6  ;;  %v1364_v15 = vadd.f32 %v9060_v32, %v1290_v50  ;;  %v16385_v42 = vld [vmem:[#allocation26_spill] sm:$0xff]  ;;  %v16386_v28 = vld [vmem:[#allocation49_spill] sm:$0xff]  ;;  %v16387_v50 = vld [vmem:[#allocation24_spill] sm:$0xff] }
  0xaa   : > { %v1779_v12 = vmul.f32 %v16382_v31, %v16381_v10  ;;  %v1853_v0 = vmul.f32 %v16384_v46, %v16383_v14  ;;  %v1027_v21 = vrot.slane %v9171_v38, 2  ;;  %v3106_v6 = vadd.f32 %v9049_v34, %v3032_v45  ;;  %v16390_v45 = vld [vmem:[#allocation36_spill] sm:$0xff] }
  0xab   : > { %v9205_v18 = vsel %vm824_vm5, %v16379_v2, %v817_v27  ;;  %v1914_v53 = vmul.f32 %v16386_v28, %v16385_v42  ;;  %v712_v3 = vadd.f32 %v696_v11, %v637_v7  ;;  %v9219_v2 = vmul.f32 %v9192_v47, %v3880_v13  ;;  %v16391_v42 = vld [vmem:[#allocation39_spill] sm:$0xff] }
  0xac   : > { %16380 = vst [vmem:[#allocation28_spill] sm:$0xff] %v9205_v18  ;;  %v846_v27 = vmul.f32 %v8499_v36, %v9205_v18  ;;  %v1425_v32 = vadd.f32 %v1409_v16, %v1364_v15  ;;  %v16388_v10 = vrot.slane %v16387_v50, 1  ;;  %v1101_v17 = vrot.slane %v9171_v38, 3  ;;  %v16392_v16 = vld [vmem:[#allocation55_spill] sm:$0xff] }
  0xad   : > { %v3180_v34 = vadd.f32 %v9065_v30, %v3106_v6  ;;  %v1988_v11 = vmul.f32 %v8710_v49, %v16390_v45  ;;  %v787_v7 = vadd.f32 %v771_v22, %v712_v3  ;;  %v907_v36 = vmul.f32 %v8509_v40, %v16387_v50  ;;  %v16396_v22 = vld [vmem:[#allocation57_spill] sm:$0xff]  ;;  %v16397_v45 = vld [vmem:[#allocation47_spill] sm:$0xff] }
  0xae   : > { %v9225_v14 = vsel %vm449_vm0, %v16388_v10, %v953_v25  ;;  %v1499_v13 = vadd.f32 %v1483_v33, %v1425_v32  ;;  %v9235_v15 = vmul.f32 %v16392_v16, %v16391_v42  ;;  %v16393_v18 = vrot.slane %v16387_v50, 2  ;;  %v16395_v10 = vld [vmem:[#allocation44_spill] sm:$0xff] }
  0xaf   : > { %16389 = vst [vmem:[#allocation42_spill] sm:$0xff] %v9225_v14  ;;  %v1175_v30 = vrot.slane %v9171_v38, 4  ;;  %v3254_v6 = vadd.f32 %v9069_v8, %v3180_v34  ;;  %v9247_v3 = vmul.f32 %v16396_v22, %v16395_v10  ;;  %v862_v40 = vadd.f32 %v846_v27, %v787_v7  ;;  %v16400_v27 = vld [vmem:[#allocation48_spill] sm:$0xff] }
  0xb0   : > { %v9241_v25 = vsel %vm524_vm1, %v16393_v18, %v1027_v21  ;;  %v981_v33 = vmul.f32 %v8513_v43, %v9225_v14  ;;  %v1573_v32 = vadd.f32 %v9124_v4, %v1499_v13  ;;  %v9254_v42 = vmul.f32 %v8740_v44, %v16397_v45  ;;  %v16401_v7 = vld [vmem:[#allocation60_spill] sm:$0xff]  ;;  %v16402_v45 = vld [vmem:[#allocation50_spill] sm:$0xff] }
  0xb1   : > { %16394 = vst [vmem:[#allocation31_spill] sm:$0xff] %v9241_v25  ;;  %v16398_v18 = vrot.slane %v16387_v50, 3  ;;  %v1249_v21 = vrot.slane %v9171_v38, 5  ;;  %v3328_v34 = vadd.f32 %v9079_v39, %v3254_v6  ;;  %v9266_v10 = vmul.f32 %v16401_v7, %v16400_v27  ;;  %v9282_v6 = vld [vmem:[%s8415_s9 + $0x58] sm:$0xff]  ;;  %v16406_v27 = vld [vmem:[#allocation61_spill] sm:$0xff] }
  0xb2   : > { %v923_v43 = vadd.f32 %v907_v36, %v862_v40  ;;  %v1055_v4 = vmul.f32 %v8527_v51, %v9241_v25  ;;  %v1647_v13 = vadd.f32 %v1631_v52, %v1573_v32  ;;  %v9272_v14 = vmul.f32 %v8754_v63, %v16402_v45  ;;  %v16405_v40 = vld [vmem:[#allocation40_spill] sm:$0xff]  ;;  %v16407_v25 = vld [vmem:[#allocation53_spill] sm:$0xff] }
  0xb3   : > { %v9260_v8 = vsel %vm599_vm2, %v16398_v18, %v1101_v17  ;;  %v16403_v17 = vrot.slane %v16387_v50, 4  ;;  %v1323_v39 = vrot.slane %v9171_v38, 6  ;;  %v3402_v36 = vadd.f32 %v9083_v5, %v3328_v34 }
  0xb4   : > { %16399 = vst [vmem:[#allocation43_spill] sm:$0xff] %v9260_v8  ;;  %v9287_v51 = vmul.f32 %v16406_v27, %v16405_v40  ;;  %v997_v52 = vadd.f32 %v981_v33, %v923_v43  ;;  %v1129_v32 = vmul.f32 %v8533_v55, %v9260_v8  ;;  %v1721_v45 = vadd.f32 %v1705_v29, %v1647_v13  ;;  %v16412_v55 = vld [vmem:[#allocation29_spill] sm:$0xff]  ;;  %v16413_v13 = vld [vmem:[#allocation56_spill] sm:$0xff]  ;;  %v16414_v40 = vld [vmem:[#allocation63_spill] sm:$0xff] }
  0xb5   : > { %v9278_v18 = vsel %vm674_vm3, %v16403_v17, %v1175_v30  ;;  %v9293_v59 = vmul.f32 %v8759_v60, %v16407_v25  ;;  %v16408_v30 = vld [vmem:[#allocation54_spill] sm:$0xff]  ;;  %v16410_v48 = vrot.slane %v16387_v50, 5  ;;  %v3463_v33 = vadd.f32 %v9094_v9, %v3402_v36 }
  0xb6   : > { %16404 = vst [vmem:[#allocation34_spill] sm:$0xff] %v9278_v18  ;;  %v16409_v17 = vld [vmem:[#allocation62_spill] sm:$0xff]  ;;  %v1071_v34 = vadd.f32 %v1055_v4, %v997_v52  ;;  %v1203_v29 = vmul.f32 %v16412_v55, %v9278_v18  ;;  %v1458_v43 = vrot.slane %v9282_v6, 1  ;;  %v1795_v25 = vadd.f32 %v1779_v12, %v1721_v45  ;;  %v16417_v4 = vld [vmem:[#allocation32_spill] sm:$0xff]  ;;  %v16419_v55 = vld [vmem:[#allocation65_spill] sm:$0xff] }
  0xb7   : > { %v9297_v38 = vmul.f32 %v16409_v17, %v16408_v30  ;;  %v9303_v5 = vsel %vm749_vm4, %v16410_v48, %v1249_v21  ;;  %v9311_v8 = vmul.f32 %v16414_v40, %v16413_v13  ;;  %v16415_v30 = vrot.slane %v16387_v50, 6  ;;  %v16418_v45 = vld [vmem:[#allocation58_spill] sm:$0xff] }
  0xb8   : > { %16411 = vst [vmem:[#allocation45_spill] sm:$0xff] %v9303_v5  ;;  %v1532_v48 = vrot.slane %v9282_v6, 2  ;;  %v3537_v9 = vadd.f32 %v9097_v56, %v3463_v33  ;;  %v1145_v21 = vadd.f32 %v1129_v32, %v1071_v34  ;;  %v1277_v36 = vmul.f32 %v16417_v4, %v9303_v5  ;;  %v16420_v50 = vld [vmem:[#allocation30_spill] sm:$0xff]  ;;  %v16424_v4 = vld [vmem:[#allocation68_spill] sm:$0xff]  ;;  %v16426_v5 = vld [vmem:[#allocation69_spill] sm:$0xff] }
  0xb9   : > { %v9317_v24 = vsel %vm824_vm5, %v16415_v30, %v1323_v39  ;;  %v1606_v12 = vrot.slane %v9282_v6, 3  ;;  %v1869_v52 = vadd.f32 %v1853_v0, %v1795_v25  ;;  %v9326_v13 = vmul.f32 %v16419_v55, %v16418_v45  ;;  %v16423_v25 = vld [vmem:[#allocation59_spill] sm:$0xff] }
  0xba   : > { %16416 = vst [vmem:[#allocation35_spill] sm:$0xff] %v9317_v24  ;;  %v1412_v39 = vmul.f32 %v16358_v26, %v16420_v50  ;;  %v1680_v30 = vrot.slane %v9282_v6, 4  ;;  %v3611_v18 = vadd.f32 %v9105_v54, %v3537_v9  ;;  %v1219_v56 = vadd.f32 %v1203_v29, %v1145_v21  ;;  %v16425_v26 = vld [vmem:[#allocation64_spill] sm:$0xff]  ;;  %v16429_v9 = vld [vmem:[#allocation51_spill] sm:$0xff] }
  0xbb   : > { %v1351_v32 = vmul.f32 %v8579_v37, %v9317_v24  ;;  %v16421_v33 = vrot.slane %v16420_v50, 1  ;;  %v1930_v34 = vadd.f32 %v1914_v53, %v1869_v52  ;;  %v9342_v45 = vmul.f32 %v16424_v4, %v16423_v25  ;;  %v6895_v25 = vld [vmem:[%s8415_s9 + $0x70] sm:$0xff] }
  0xbc   : > { %v9346_v47 = vmul.f32 %v16426_v5, %v16425_v26  ;;  %v16427_v54 = vrot.slane %v16420_v50, 2  ;;  %v3685_v29 = vadd.f32 %v9112_v23, %v3611_v18  ;;  %v1293_v53 = vadd.f32 %v1277_v36, %v1219_v56  ;;  %v16435_v56 = vld [vmem:[#allocation66_spill] sm:$0xff] }
  0xbd   : > { %v9338_v0 = vsel %vm449_vm0, %v16421_v33, %v1458_v43  ;;  %v16430_v43 = vld [vmem:[#allocation75_spill] sm:$0xff]  ;;  %v16431_v52 = vrot.slane %v16420_v50, 3  ;;  %v2004_v26 = vadd.f32 %v1988_v11, %v1930_v34  ;;  %v1754_v18 = vrot.slane %v9282_v6, 5 }
  0xbe   : > { %16422 = vst [vmem:[#allocation46_spill] sm:$0xff] %v9338_v0  ;;  %v9352_v37 = vsel %vm524_vm1, %v16427_v54, %v1532_v48  ;;  %v9357_v21 = vmul.f32 %v16430_v43, %v16429_v9  ;;  %v1486_v24 = vmul.f32 %v16360_v61, %v9338_v0  ;;  %v16433_v48 = vrot.slane %v16420_v50, 4  ;;  %v16436_v54 = vld [vmem:[#allocation78_spill] sm:$0xff] }
  0xbf   : > { %16428 = vst [vmem:[#allocation26_spill] sm:$0xff] %v9352_v37  ;;  %v9363_v33 = vsel %vm599_vm2, %v16431_v52, %v1606_v12  ;;  %v3759_v36 = vadd.f32 %v9119_v41, %v3685_v29  ;;  %v9378_v9 = vmul.f32 %v16436_v54, %v16435_v56  ;;  %v1367_v12 = vadd.f32 %v1351_v32, %v1293_v53  ;;  %v9390_v41 = vld [vmem:[%s15463_s2] ss:$0 sm:$0xff] }
  0xc0   : > { %16432 = vst [vmem:[#allocation49_spill] sm:$0xff] %v9363_v33  ;;  %v9372_v23 = vsel %vm674_vm3, %v16433_v48, %v1680_v30  ;;  %v1560_v11 = vmul.f32 %v16362_v19, %v9352_v37  ;;  %v2078_v61 = vadd.f32 %v9235_v15, %v2004_v26  ;;  %v1634_v34 = vmul.f32 %v16373_v58, %v9363_v33  ;;  %v16438_v29 = vld [vmem:[#allocation67_spill] sm:$0xff] }
  0xc1   : > { %16434 = vst [vmem:[#allocation24_spill] sm:$0xff] %v9372_v23  ;;  %v1828_v30 = vrot.slane %v9282_v6, 6  ;;  %v1963_v52 = vrot.slane %v6895_v25, 1  ;;  %v3833_v48 = vadd.f32 %v9174_v62, %v3759_v36  ;;  %v9394_v32 = vmul.f32 %v8998_v57, %v16438_v29  ;;  %v16441_v56 = vld [vmem:[#allocation71_spill] sm:$0xff]  ;;  %v16442_v29 = vld [vmem:[#allocation85_spill] sm:$0xff] }
  0xc2   : > { %16437 = vst [vmem:[#allocation36_spill] sm:$0xff] %v9390_v41  ;;  %v1428_v19 = vadd.f32 %v1412_v39, %v1367_v12  ;;  %v1708_v15 = vmul.f32 %v16378_v20, %v9372_v23  ;;  %v2168_v58 = vadd.f32 %v9247_v3, %v2078_v61  ;;  %v16439_v6 = vrot.slane %v16420_v50, 5  ;;  %v16443_v12 = vld [vmem:[#allocation41_spill] sm:$0xff] }
  0xc3   : > { %v2037_v53 = vrot.slane %v6895_v25, 2  ;;  %v2111_v26 = vrot.slane %v6895_v25, 3  ;;  %v3907_v36 = vadd.f32 %v9219_v2, %v3833_v48  ;;  %v9408_v33 = vmul.f32 %v16442_v29, %v16441_v56  ;;  %v16473_v23 = vld [vmem:[#allocation93_spill] sm:$0xff] }
  0xc4   : > { %v9403_v62 = vsel %vm749_vm4, %v16439_v6, %v1754_v18  ;;  %v1502_v39 = vadd.f32 %v1486_v24, %v1428_v19  ;;  %v1917_v20 = vmul.f32 %v16386_v28, %v16443_v12  ;;  %v2242_v3 = vadd.f32 %v9254_v42, %v2168_v58  ;;  %v16449_v19 = vld [vmem:[#allocation73_spill] sm:$0xff]  ;;  %v16450_v28 = vld [vmem:[#allocation87_spill] sm:$0xff] }
  0xc5   : > { %16440 = vst [vmem:[#allocation39_spill] sm:$0xff] %v9403_v62  ;;  %v16444_v61 = vrot.slane %v16420_v50, 6  ;;  %v16446_v6 = vrot.slane %v16443_v12, 1  ;;  %v2201_v48 = vrot.slane %v6895_v25, 4  ;;  %v9426_v24 = vadd.f32 %v9390_v41, %v3907_v36 }
  0xc6   : > { %v9430_v56 = vmul.f32 %v16450_v28, %v16449_v19  ;;  %v1576_v42 = vadd.f32 %v1560_v11, %v1502_v39  ;;  %v1782_v50 = vmul.f32 %v16382_v31, %v9403_v62  ;;  %v2316_v58 = vadd.f32 %v9266_v10, %v2242_v3  ;;  %v16455_v3 = vld [vmem:[#allocation74_spill] sm:$0xff] }
  0xc7   : > { %v9417_v18 = vsel %vm824_vm5, %v16444_v61, %v1828_v30  ;;  %v9423_v2 = vsel %vm449_vm0, %v16446_v6, %v1963_v52  ;;  %16448 = vst [vmem:[#allocation47_spill] sm:$0xff] %v9426_v24  ;;  %v6921_v30 = vld [vmem:[%s8415_s9 + $0x88] sm:$0xff]  ;;  %v16451_v61 = vrot.slane %v16443_v12, 2  ;;  %v16453_v36 = vrot.slane %v16443_v12, 3  ;;  %3945 = vadd.xlane.f32.xlu1 %v9426_v24  ;;  %v16460_v24 = vld [vmem:[#allocation90_spill] sm:$0xff] }
  0xc8   : > { %16445 = vst [vmem:[#allocation55_spill] sm:$0xff] %v9417_v18  ;;  %v2275_v19 = vrot.slane %v6895_v25, 5  ;;  %v1650_v11 = vadd.f32 %v1634_v34, %v1576_v42  ;;  %v1856_v31 = vmul.f32 %v16384_v46, %v9417_v18  ;;  %v1991_v10 = vmul.f32 %v8710_v49, %v9423_v2  ;;  %v16459_v42 = vld [vmem:[#allocation76_spill] sm:$0xff] }
  0xc9   : > { %16447 = vst [vmem:[#allocation57_spill] sm:$0xff] %v9423_v2  ;;  %v9440_v52 = vsel %vm524_vm1, %v16451_v61, %v2037_v53  ;;  %v9446_v6 = vsel %vm599_vm2, %v16453_v36, %v2111_v26  ;;  %v2349_v39 = vrot.slane %v6895_v25, 6  ;;  %v2390_v53 = vadd.f32 %v9272_v14, %v2316_v58  ;;  %v16456_v61 = vld [vmem:[#allocation88_spill] sm:$0xff]  ;;  %v16461_v58 = vld [vmem:[#allocation70_spill] sm:$0xff] }
  0xca   : > { %16452 = vst [vmem:[#allocation48_spill] sm:$0xff] %v9440_v52  ;;  %v9456_v62 = vmul.f32 %v16456_v61, %v16455_v3  ;;  %v16457_v26 = vrot.slane %v16443_v12, 4  ;;  %v2484_v34 = vrot.slane %v6921_v30, 1  ;;  %v9466_v46 = vmul.f32 %v16460_v24, %v16459_v42  ;;  %v16462_v3 = vld [vmem:[#allocation91_spill] sm:$0xff] }
  0xcb   : > { %16454 = vst [vmem:[#allocation60_spill] sm:$0xff] %v9446_v6  ;;  %v1724_v18 = vadd.f32 %v1708_v15, %v1650_v11  ;;  %v2065_v49 = vmul.f32 %v16392_v16, %v9440_v52  ;;  %v2155_v14 = vmul.f32 %v16396_v22, %v9446_v6  ;;  %v2451_v25 = vadd.f32 %v9287_v51, %v2390_v53  ;;  %v16471_v52 = vld [vmem:[#allocation92_spill] sm:$0xff] }
  0xcc   : > { %v9462_v36 = vsel %vm674_vm3, %v16457_v26, %v2201_v48  ;;  %v9475_v2 = vmul.f32 %v16462_v3, %v16461_v58  ;;  %v16463_v48 = vrot.slane %v16443_v12, 5  ;;  %v2558_v15 = vrot.slane %v6921_v30, 2  ;;  %v16467_v58 = vld [vmem:[#allocation52_spill] sm:$0xff] }
  0xcd   : > { %16458 = vst [vmem:[#allocation50_spill] sm:$0xff] %v9462_v36  ;;  %v1798_v11 = vadd.f32 %v1782_v50, %v1724_v18  ;;  %v2229_v16 = vmul.f32 %v8740_v44, %v9462_v36  ;;  %v16465_v22 = vrot.slane %v16443_v12, 6  ;;  %v2632_v53 = vrot.slane %v6921_v30, 3  ;;  %v16470_v50 = vld [vmem:[#allocation79_spill] sm:$0xff] }
  0xce   : > { %v9481_v26 = vsel %vm749_vm4, %v16463_v48, %v2275_v19  ;;  %v2525_v42 = vadd.f32 %v9293_v59, %v2451_v25  ;;  %v16468_v6 = vrot.slane %v16467_v58, 1  ;;  %v2706_v48 = vrot.slane %v6921_v30, 4  ;;  %v9505_v36 = vld [vmem:[%s8415_s9 + $0xa0] sm:$0xff]  ;;  %v16472_v25 = vld [vmem:[#allocation81_spill] sm:$0xff] }
  0xcf   : > { %16464 = vst [vmem:[#allocation40_spill] sm:$0xff] %v9481_v26  ;;  %v9489_v51 = vsel %vm824_vm5, %v16465_v22, %v2349_v39  ;;  %v2780_v18 = vrot.slane %v6921_v30, 5  ;;  %v9500_v44 = vmul.f32 %v16471_v52, %v16470_v50  ;;  %v1872_v12 = vadd.f32 %v1856_v31, %v1798_v11 }
  0xd0   : > { %16466 = vst [vmem:[#allocation61_spill] sm:$0xff] %v9489_v51  ;;  %v9496_v19 = vsel %vm449_vm0, %v16468_v6, %v2484_v34  ;;  %v2303_v39 = vmul.f32 %v16401_v7, %v9481_v26  ;;  %v2854_v22 = vrot.slane %v6921_v30, 6  ;;  %v2599_v59 = vadd.f32 %v9297_v38, %v2525_v42 }
  0xd1   : > { %16469 = vst [vmem:[#allocation53_spill] sm:$0xff] %v9496_v19  ;;  %v9510_v37 = vmul.f32 %v16473_v23, %v16472_v25  ;;  %v2438_v6 = vmul.f32 %v16406_v27, %v16467_v58  ;;  %v16474_v34 = vrot.slane %v16467_v58, 2  ;;  %v1933_v11 = vadd.f32 %v1917_v20, %v1872_v12  ;;  %v16482_v12 = vld [vmem:[#allocation83_spill] sm:$0xff]  ;;  %v16483_v25 = vld [vmem:[#allocation94_spill] sm:$0xff] }
  0xd2   : > { %v2377_v7 = vmul.f32 %v8754_v63, %v9489_v51  ;;  %v9524_v38 = vmul.f32 %v8759_v60, %v9496_v19  ;;  %v16476_v30 = vrot.slane %v16467_v58, 3  ;;  %v2673_v42 = vadd.f32 %v9311_v8, %v2599_v59  ;;  %v16495_v19 = vld [vmem:[#allocation38_spill] sm:$0xff] }
  0xd3   : > { %v9518_v31 = vsel %vm524_vm1, %v16474_v34, %v2558_v15  ;;  %v16478_v15 = vrot.slane %v16467_v58, 4  ;;  %v16480_v63 = vrot.slane %v16467_v58, 5  ;;  %v2989_v50 = vrot.slane %v9505_v36, 1 }
  0xd4   : > { %16475 = vst [vmem:[#allocation54_spill] sm:$0xff] %v9518_v31  ;;  %v9530_v27 = vsel %vm599_vm2, %v16476_v30, %v2632_v53  ;;  %v9548_v53 = vmul.f32 %v16483_v25, %v16482_v12  ;;  %v2007_v34 = vadd.f32 %v1991_v10, %v1933_v11  ;;  %v9552_v8 = vmul.f32 %v16409_v17, %v9518_v31  ;;  %v16486_v30 = vld [vmem:[#allocation84_spill] sm:$0xff]  ;;  %v9574_v11 = vld [vmem:[%s8415_s9 + $0x10] sm:$0xff] }
  0xd5   : > { %16477 = vst [vmem:[#allocation62_spill] sm:$0xff] %v9530_v27  ;;  %v9537_v20 = vsel %vm674_vm3, %v16478_v15, %v2706_v48  ;;  %v9543_v60 = vsel %vm749_vm4, %v16480_v63, %v2780_v18  ;;  %v16484_v48 = vrot.slane %v16467_v58, 6  ;;  %v2747_v18 = vadd.f32 %v9326_v13, %v2673_v42  ;;  %v16487_v15 = vld [vmem:[#allocation95_spill] sm:$0xff]  ;;  %v16488_v10 = vld [vmem:[#allocation72_spill] sm:$0xff]  ;;  %v16489_v58 = vld [vmem:[#allocation86_spill] sm:$0xff] }
  0xd6   : > { %16479 = vst [vmem:[#allocation29_spill] sm:$0xff] %v9537_v20  ;;  %v9563_v63 = vmul.f32 %v16487_v15, %v16486_v30  ;;  %v9567_v12 = vmul.f32 %v16414_v40, %v9530_v27  ;;  %v9571_v17 = vmul.f32 %v16430_v43, %v16488_v10  ;;  %v9582_v13 = vmul.f32 %v16419_v55, %v9537_v20 }
  0xd7   : > { %16481 = vst [vmem:[#allocation63_spill] sm:$0xff] %v9543_v60  ;;  %v9558_v59 = vsel %vm824_vm5, %v16484_v48, %v2854_v22  ;;  %v9578_v22 = vmul.f32 %v9131_v35, %v16489_v58  ;;  %v2081_v48 = vadd.f32 %v2065_v49, %v2007_v34  ;;  %v9586_v42 = vmul.f32 %v16424_v4, %v9543_v60 }
  0xd8   : > { %16485 = vst [vmem:[#allocation32_spill] sm:$0xff] %v9558_v59  ;;  %v2821_v40 = vadd.f32 %v9342_v45, %v2747_v18  ;;  %v9591_v43 = vmul.f32 %v16426_v5, %v9558_v59  ;;  %v16490_v30 = vrot.slane %v16488_v10, 1  ;;  %v3063_v49 = vrot.slane %v9505_v36, 2 }
  0xd9   : > { %v2171_v55 = vadd.f32 %v2155_v14, %v2081_v48  ;;  %v3137_v34 = vrot.slane %v9505_v36, 3  ;;  %v439_v4 = vrot.slane %v9574_v11, 1  ;;  %v516_v60 = vrot.slane %v9574_v11, 2 }
  0xda   : > { %v9597_v58 = vsel %vm449_vm0, %v16490_v30, %v2989_v50  ;;  %v2895_v45 = vadd.f32 %v9346_v47, %v2821_v40  ;;  %v3211_v5 = vrot.slane %v9505_v36, 4  ;;  %v3285_v18 = vrot.slane %v9505_v36, 5  ;;  %v16491_v50 = vld [vmem:[#allocation77_spill] sm:$0xff] }
  0xdb   : > { %v591_v59 = vrot.slane %v9574_v11, 3  ;;  %v2245_v20 = vadd.f32 %v2229_v16, %v2171_v55  ;;  %v16492_v30 = vrot.slane %v16491_v50, 1  ;;  %v16493_v48 = vrot.slane %v16491_v50, 2  ;;  %v16494_v40 = vld [vmem:[#allocation89_spill] sm:$0xff] }
  0xdc   : > { %v666_v31 = vrot.slane %v9574_v11, 4  ;;  %v2956_v47 = vadd.f32 %v9357_v21, %v2895_v45  ;;  %v9619_v51 = vmul.f32 %v16495_v19, %v16494_v40  ;;  %v16496_v16 = vrot.slane %v16488_v10, 2  ;;  %v9636_v45 = vld [vmem:[#allocation5 + $0x2] ss:$0 sm:$0xff] }
  0xdd   : > { %v450_v14 = vsel %vm449_vm0, %v16492_v30, %v439_v4  ;;  %v525_v27 = vsel %vm524_vm1, %v16493_v48, %v516_v60  ;;  %v9627_v4 = vld [vmem:[#allocation5 + $0x1] ss:$0 sm:$0xff]  ;;  %v2319_v26 = vadd.f32 %v2303_v39, %v2245_v20  ;;  %v16497_v60 = vrot.slane %v16488_v10, 3 }
  0xde   : > { %v9625_v55 = vsel %vm524_vm1, %v16496_v16, %v3063_v49  ;;  %v469_v30 = vmul.f32 %v9627_v4, %v450_v14  ;;  %v544_v48 = vmul.f32 %v9636_v45, %v525_v27  ;;  %v16498_v40 = vrot.slane %v16491_v50, 3  ;;  %v16500_v14 = vld [vmem:[#allocation80_spill] sm:$0xff] }
  0xdf   : > { %v9634_v21 = vsel %vm599_vm2, %v16497_v60, %v3137_v34  ;;  %v3030_v16 = vadd.f32 %v9378_v9, %v2956_v47  ;;  %v16499_v39 = vrot.slane %v16488_v10, 4  ;;  %v3359_v34 = vrot.slane %v9505_v36, 6 }
  0xe0   : > { %v600_v49 = vsel %vm599_vm2, %v16498_v40, %v591_v59  ;;  %v485_v60 = vadd.f32 %v469_v30, %v16500_v14  ;;  %v2393_v0 = vadd.f32 %v2377_v7, %v2319_v26  ;;  %v16501_v27 = vrot.slane %v16488_v10, 5  ;;  %v9658_v59 = vld [vmem:[#allocation5 + $0x3] ss:$0 sm:$0xff] }
  0xe1   : > { %v9648_v20 = vsel %vm674_vm3, %v16499_v39, %v3211_v5  ;;  %v619_v9 = vmul.f32 %v9658_v59, %v600_v49  ;;  %v16502_v47 = vrot.slane %v16491_v50, 4  ;;  %v3104_v36 = vadd.f32 %v9394_v32, %v3030_v16  ;;  %v6973_v49 = vld [vmem:[%s8415_s9 + $0xb8] sm:$0xff]  ;;  %v9679_v39 = vld [vmem:[#allocation5 + $0x4] ss:$0 sm:$0xff] }
  0xe2   : > { %v9656_v41 = vsel %vm749_vm4, %v16501_v27, %v3285_v18  ;;  %v9668_v26 = vmul.f32 %v16436_v54, %v9597_v58  ;;  %v9672_v7 = vmul.f32 %v8998_v57, %v9625_v55  ;;  %v560_v18 = vadd.f32 %v544_v48, %v485_v60 }
  0xe3   : > { %v675_v5 = vsel %vm674_vm3, %v16502_v47, %v666_v31  ;;  %v2454_v30 = vadd.f32 %v2438_v6, %v2393_v0  ;;  %v9676_v40 = vmul.f32 %v16442_v29, %v9634_v21  ;;  %v741_v32 = vrot.slane %v9574_v11, 5  ;;  %v9706_v47 = vld [vmem:[#allocation5 + $0x5] ss:$0 sm:$0xff] }
  0xe4   : > { %v694_v31 = vmul.f32 %v9679_v39, %v675_v5  ;;  %v3178_v54 = vadd.f32 %v9408_v33, %v3104_v36  ;;  %v9686_v16 = vmul.f32 %v16450_v28, %v9648_v20  ;;  %v9690_v57 = vmul.f32 %v16456_v61, %v9656_v41 }
  0xe5   : > { %v635_v0 = vadd.f32 %v619_v9, %v560_v18  ;;  %v2528_v29 = vadd.f32 %v9524_v38, %v2454_v30  ;;  %v16503_v6 = vrot.slane %v16488_v10, 6  ;;  %v16504_v14 = vrot.slane %v16491_v50, 5  ;;  %v9714_v30 = vld [vmem:[#allocation5 + $0x6] ss:$0 sm:$0xff] }
  0xe6   : > { %v816_v28 = vrot.slane %v9574_v11, 6  ;;  %v3252_v60 = vadd.f32 %v9430_v56, %v3178_v54  ;;  %v3494_v61 = vrot.slane %v6973_v49, 1  ;;  %v3568_v27 = vrot.slane %v6973_v49, 2 }
  0xe7   : > { %v9697_v48 = vsel %vm824_vm5, %v16503_v6, %v3359_v34  ;;  %v750_v33 = vsel %vm749_vm4, %v16504_v14, %v741_v32  ;;  %v710_v9 = vadd.f32 %v694_v31, %v635_v0  ;;  %v2602_v38 = vadd.f32 %v9552_v8, %v2528_v29  ;;  %v7692_v0 = vld [vmem:[%s8415_s9 + $0x20] sm:$0xff]  ;;  %v16506_v14 = vld [vmem:[#allocation82_spill] sm:$0xff] }
  0xe8   : > { %v3642_v10 = vrot.slane %v6973_v49, 3  ;;  %v769_v34 = vmul.f32 %v9706_v47, %v750_v33  ;;  %v16505_v5 = vrot.slane %v16491_v50, 6  ;;  %v3326_v11 = vadd.f32 %v9456_v62, %v3252_v60  ;;  %v9719_v29 = vld [vmem:[#allocation5 + $0x7] ss:$0 sm:$0xff] }
  0xe9   : > { %v3716_v18 = vrot.slane %v6973_v49, 4  ;;  %v3790_v56 = vrot.slane %v6973_v49, 5  ;;  %v2676_v8 = vadd.f32 %v9567_v12, %v2602_v38  ;;  %v3864_v32 = vrot.slane %v6973_v49, 6 }
  0xea   : > { %v825_v36 = vsel %vm824_vm5, %v16505_v5, %v816_v28  ;;  %v785_v54 = vadd.f32 %v769_v34, %v710_v9  ;;  %v905_v50 = vmul.f32 %v9719_v29, %v7692_v0  ;;  %v3400_v6 = vadd.f32 %v9466_v46, %v3326_v11  ;;  %v16510_v34 = vld [vmem:[#allocation23_spill] sm:$0xff]  ;;  %v16514_v0 = vld [vmem:[#allocation33_spill] sm:$0xff] }
  0xeb   : > { %v844_v31 = vmul.f32 %v9714_v30, %v825_v36  ;;  %v9725_v62 = vmul.f32 %v16460_v24, %v9697_v48  ;;  %v16507_v33 = vrot.slane %v16506_v14, 1  ;;  %v16508_v12 = vrot.slane %v16506_v14, 2  ;;  %v9740_v24 = vld [vmem:[#allocation5 + $0x8] ss:$0 sm:$0xff] }
  0xec   : > { %v2750_v60 = vadd.f32 %v9582_v13, %v2676_v8  ;;  %v16509_v9 = vrot.slane %v16506_v14, 3  ;;  %v979_v5 = vmul.f32 %v9740_v24, %v16510_v34  ;;  %v9747_v36 = vmul.f32 %v16462_v3, %v16506_v14  ;;  %v9802_v34 = vld [vmem:[#allocation5 + $0xc] ss:$0 sm:$0xff] }
  0xed   : > { %v3502_v28 = vsel %vm449_vm0, %v16507_v33, %v3494_v61  ;;  %v3576_v49 = vsel %vm524_vm1, %v16508_v12, %v3568_v27  ;;  %v860_v38 = vadd.f32 %v844_v31, %v785_v54  ;;  %v3461_v61 = vadd.f32 %v9475_v2, %v3400_v6  ;;  %v9762_v54 = vld [vmem:[#allocation5 + $0x9] ss:$0 sm:$0xff]  ;;  %16518 = vst [vmem:[#allocation65_spill] sm:$0xff] %v9802_v34 }
  0xee   : > { %v3650_v46 = vsel %vm599_vm2, %v16509_v9, %v3642_v10  ;;  %v16511_v13 = vrot.slane %v16506_v14, 4  ;;  %v16512_v10 = vrot.slane %v16506_v14, 5  ;;  %v2824_v31 = vadd.f32 %v9586_v42, %v2750_v60  ;;  %v9783_v60 = vld [vmem:[#allocation5 + $0xa] ss:$0 sm:$0xff] }
  0xef   : > { %v16513_v8 = vrot.slane %v16506_v14, 6  ;;  %v921_v3 = vadd.f32 %v905_v50, %v860_v38  ;;  %v1053_v6 = vmul.f32 %v9762_v54, %v16514_v0  ;;  %v9768_v33 = vmul.f32 %v16471_v52, %v3502_v28  ;;  %v9777_v14 = vld [vmem:[%s8415_s9 + $0x30] sm:$0xff]  ;;  %v9788_v28 = vld [vmem:[%s8415_s9 + $0x38] sm:$0xff] }
  0xf0   : > { %v3724_v27 = vsel %vm674_vm3, %v16511_v13, %v3716_v18  ;;  %v3798_v11 = vsel %vm749_vm4, %v16512_v10, %v3790_v56  ;;  %v3535_v18 = vadd.f32 %v9500_v44, %v3461_v61  ;;  %v9771_v56 = vmul.f32 %v16473_v23, %v3576_v49  ;;  %v16515_v44 = vld [vmem:[#allocation25_spill] sm:$0xff] }
  0xf1   : > { %v3872_v2 = vsel %vm824_vm5, %v16513_v8, %v3864_v32  ;;  %v9774_v42 = vmul.f32 %v16483_v25, %v3650_v46  ;;  %v2898_v32 = vadd.f32 %v9591_v43, %v2824_v31  ;;  %v9781_v50 = vmul.f32 %v16487_v15, %v3724_v27  ;;  %v9797_v43 = vld [vmem:[#allocation5 + $0xb] ss:$0 sm:$0xff]  ;;  %v16517_v15 = vld [vmem:[#allocation37_spill] sm:$0xff] }
  0xf2   : > { %v995_v12 = vadd.f32 %v979_v5, %v921_v3  ;;  %v1127_v52 = vmul.f32 %v9783_v60, %v16515_v44  ;;  %v3609_v23 = vadd.f32 %v9510_v37, %v3535_v18  ;;  %v9792_v25 = vmul.f32 %v9131_v35, %v3798_v11  ;;  %16516 = vst [vmem:[#allocation58_spill] sm:$0xff] %v9797_v43  ;;  %v16519_v5 = vld [vmem:[#allocation27_spill] sm:$0xff]  ;;  %v9828_v18 = vld [vmem:[#allocation5 + $0xd] ss:$0 sm:$0xff] }
  0xf3   : > { %v9795_v49 = vmul.f32 %v16495_v19, %v3872_v2  ;;  %v1201_v9 = vmul.f32 %v9797_v43, %v16517_v15  ;;  %v2959_v46 = vadd.f32 %v9571_v17, %v2898_v32  ;;  %v1275_v61 = vmul.f32 %v9802_v34, %v16519_v5  ;;  %v9812_v17 = vld [vmem:[#allocation5] ss:$0 sm:$0xff]  ;;  %16520 = vst [vmem:[#allocation30_spill] sm:$0xff] %v9828_v18  ;;  %v16521_v32 = vld [vmem:[#allocation28_spill] sm:$0xff] }
  0xf4   : > { %v1069_v38 = vadd.f32 %v1053_v6, %v995_v12  ;;  %v425_v37 = vrot.slane %v9777_v14, 1  ;;  %v3683_v35 = vadd.f32 %v9548_v53, %v3609_v23  ;;  %v15657_v19 = vrot.slane %v9788_v28, 1 }
  0xf5   : > { %v502_v13 = vrot.slane %v9777_v14, 2  ;;  %v15656_v27 = vrot.slane %v9788_v28, 2  ;;  %v3033_v10 = vadd.f32 %v9668_v26, %v2959_v46  ;;  %v411_v31 = vmul.f32 %v9812_v17, %v9777_v14  ;;  %v7701_v46 = vld [vmem:[%s8415_s9 + $0x38] sm:$0xff] }
  0xf6   : > { %v1143_v11 = vadd.f32 %v1127_v52, %v1069_v38  ;;  %v577_v8 = vrot.slane %v9777_v14, 3  ;;  %v3757_v2 = vadd.f32 %v9563_v63, %v3683_v35  ;;  %v460_v53 = vsel %vm449_vm0, %v425_v37, %v15657_v19  ;;  %v9842_v38 = vld [vmem:[#allocation5 + $0xe] ss:$0 sm:$0xff] }
  0xf7   : > { %v535_v26 = vsel %vm524_vm1, %v502_v13, %v15656_v27  ;;  %v15654_v3 = vrot.slane %v9788_v28, 3  ;;  %v3107_v0 = vadd.f32 %v9672_v7, %v3033_v10  ;;  %v1349_v63 = vmul.f32 %v9828_v18, %v16521_v32  ;;  %16522 = vst [vmem:[#allocation59_spill] sm:$0xff] %v9842_v38 }
  0xf8   : > { %v1217_v6 = vadd.f32 %v1201_v9, %v1143_v11  ;;  %v472_v12 = vmul.f32 %v9627_v4, %v460_v53  ;;  %v3831_v44 = vadd.f32 %v9578_v22, %v3757_v2  ;;  %v547_v52 = vmul.f32 %v9636_v45, %v535_v26 }
  0xf9   : > { %v610_v23 = vsel %vm599_vm2, %v577_v8, %v15654_v3  ;;  %v652_v15 = vrot.slane %v9777_v14, 4  ;;  %v3181_v7 = vadd.f32 %v9676_v40, %v3107_v0  ;;  %v1410_v5 = vmul.f32 %v9842_v38, %v7701_v46  ;;  %v16524_v8 = vld [vmem:[#allocation42_spill] sm:$0xff]  ;;  %v9978_v3 = vld [vmem:[%s8415_s9 + $0x68] sm:$0xff] }
  0xfa   : > { %v1291_v9 = vadd.f32 %v1275_v61, %v1217_v6  ;;  %v488_v37 = vadd.f32 %v472_v12, %v411_v31  ;;  %v3905_v22 = vadd.f32 %v9619_v51, %v3831_v44  ;;  %v622_v35 = vmul.f32 %v9658_v59, %v610_v23  ;;  %v9850_v61 = vld [vmem:[#allocation5 + $0xf] ss:$0 sm:$0xff]  ;;  %v16525_v31 = vld [vmem:[#allocation36_spill] sm:$0xff]  ;;  %v16528_v12 = vld [vmem:[#allocation31_spill] sm:$0xff]  ;;  %16549 = vst [vmem:[#allocation70_spill] sm:$0xff] %v9978_v3 }
  0xfb   : > { %v15653_v13 = vrot.slane %v9788_v28, 4  ;;  %v727_v10 = vrot.slane %v9777_v14, 5  ;;  %v3255_v11 = vadd.f32 %v9686_v16, %v3181_v7  ;;  %16523 = vst [vmem:[#allocation68_spill] sm:$0xff] %v9850_v61  ;;  %v1484_v2 = vmul.f32 %v9850_v61, %v16524_v8  ;;  %v9869_v23 = vld [vmem:[%s8415_s9 + $0x48] sm:$0xff]  ;;  %v9872_v7 = vld [vmem:[%s8415_s9 + $0x50] sm:$0xff] }
  0xfc   : > { %v1365_v40 = vadd.f32 %v1349_v63, %v1291_v9  ;;  %v563_v53 = vadd.f32 %v547_v52, %v488_v37  ;;  %v9855_v26 = vadd.f32 %v16525_v31, %v3905_v22  ;;  %v15652_v0 = vrot.slane %v9788_v28, 5  ;;  %v9864_v63 = vld [vmem:[#allocation5 + $0x10] ss:$0 sm:$0xff]  ;;  %16529 = vst [vmem:[#allocation51_spill] sm:$0xff] %v9869_v23  ;;  %v16531_v9 = vld [vmem:[#allocation43_spill] sm:$0xff] }
  0xfd   : > { %v685_v51 = vsel %vm674_vm3, %v652_v15, %v15653_v13  ;;  %v802_v6 = vrot.slane %v9777_v14, 6  ;;  %v3329_v16 = vadd.f32 %v9690_v57, %v3255_v11  ;;  %16527 = vst [vmem:[#allocation69_spill] sm:$0xff] %v9864_v63  ;;  %v1558_v44 = vmul.f32 %v9864_v63, %v16528_v12  ;;  %v9875_v15 = vld [vmem:[#allocation5 + $0x11] ss:$0 sm:$0xff]  ;;  %v16533_v11 = vld [vmem:[#allocation34_spill] sm:$0xff] }
  0xfe   : > { %16526 = vst [vmem:[#allocation64_spill] sm:$0xff] %v9855_v26  ;;  %v1426_v32 = vadd.f32 %v1410_v5, %v1365_v40  ;;  %v638_v52 = vadd.f32 %v622_v35, %v563_v53  ;;  %3941 = vadd.xlane.f32.xlu0 %v9855_v26  ;;  %v1632_v14 = vmul.f32 %v9875_v15, %v16531_v9  ;;  %v15650_v5 = vrot.slane %v9788_v28, 6  ;;  %v9886_v35 = vld [vmem:[#allocation5 + $0x12] ss:$0 sm:$0xff] }
  0xff   : > { %16530 = vst [vmem:[#allocation75_spill] sm:$0xff] %v9875_v15  ;;  %v697_v57 = vmul.f32 %v9679_v39, %v685_v51  ;;  %v760_v46 = vsel %vm749_vm4, %v727_v10, %v15652_v0  ;;  %v3403_v37 = vadd.f32 %v9725_v62, %v3329_v16  ;;  %v1706_v40 = vmul.f32 %v9886_v35, %v16533_v11  ;;  %v16548_v0 = vld [vmem:[#allocation26_spill] sm:$0xff] }
 0x100   : > { %v1500_v22 = vadd.f32 %v1484_v2, %v1426_v32  ;;  %16532 = vst [vmem:[#allocation66_spill] sm:$0xff] %v9886_v35  ;;  %v772_v8 = vmul.f32 %v9706_v47, %v760_v46  ;;  %v835_v51 = vsel %vm824_vm5, %v802_v6, %v15650_v5  ;;  %v938_v10 = vrot.slane %v9869_v23, 1 }
 0x101   : > { %v713_v53 = vadd.f32 %v697_v57, %v638_v52  ;;  %v15648_v12 = vrot.slane %v9872_v7, 1  ;;  %v3464_v62 = vadd.f32 %v9747_v36, %v3403_v37  ;;  %v847_v16 = vmul.f32 %v9714_v30, %v835_v51  ;;  %v16536_v37 = vld [vmem:[#allocation45_spill] sm:$0xff] }
 0x102   : > { %v1574_v2 = vadd.f32 %v1558_v44, %v1500_v22  ;;  %v908_v32 = vmul.f32 %v9719_v29, %v9869_v23  ;;  %v1012_v6 = vrot.slane %v9869_v23, 2  ;;  %v15647_v57 = vrot.slane %v9872_v7, 2  ;;  %v9910_v44 = vld [vmem:[#allocation5 + $0x13] ss:$0 sm:$0xff] }
 0x103   : > { %v788_v9 = vadd.f32 %v772_v8, %v713_v53  ;;  %v9905_v52 = vsel %vm449_vm0, %v938_v10, %v15648_v12  ;;  %v3538_v46 = vadd.f32 %v9768_v33, %v3464_v62  ;;  %16535 = vst [vmem:[#allocation67_spill] sm:$0xff] %v9910_v44  ;;  %v1780_v22 = vmul.f32 %v9910_v44, %v16536_v37  ;;  %v9925_v62 = vld [vmem:[#allocation5 + $0x14] ss:$0 sm:$0xff] }
 0x104   : > { %16534 = vst [vmem:[#allocation78_spill] sm:$0xff] %v9905_v52  ;;  %v1648_v36 = vadd.f32 %v1632_v14, %v1574_v2  ;;  %v982_v11 = vmul.f32 %v9740_v24, %v9905_v52  ;;  %v9920_v53 = vsel %vm524_vm1, %v1012_v6, %v15647_v57  ;;  %v1086_v51 = vrot.slane %v9869_v23, 3  ;;  %v16539_v2 = vld [vmem:[#allocation35_spill] sm:$0xff] }
 0x105   : > { %v863_v8 = vadd.f32 %v847_v16, %v788_v9  ;;  %16537 = vst [vmem:[#allocation71_spill] sm:$0xff] %v9920_v53  ;;  %v15649_v33 = vrot.slane %v9872_v7, 3  ;;  %v3612_v14 = vadd.f32 %v9771_v56, %v3538_v46  ;;  %v1854_v37 = vmul.f32 %v9925_v62, %v16539_v2  ;;  %v9941_v2 = vld [vmem:[#allocation5 + $0x15] ss:$0 sm:$0xff] }
 0x106   : > { %v1722_v10 = vadd.f32 %v1706_v40, %v1648_v36  ;;  %16538 = vst [vmem:[#allocation85_spill] sm:$0xff] %v9925_v62  ;;  %v1056_v16 = vmul.f32 %v9762_v54, %v9920_v53  ;;  %v1160_v57 = vrot.slane %v9869_v23, 4  ;;  %v15651_v56 = vrot.slane %v9872_v7, 4  ;;  %v7709_v36 = vld [vmem:[%s8415_s9 + $0x50] sm:$0xff] }
 0x107   : > { %v924_v9 = vadd.f32 %v908_v32, %v863_v8  ;;  %v9935_v6 = vsel %vm599_vm2, %v1086_v51, %v15649_v33  ;;  %v3686_v40 = vadd.f32 %v9774_v42, %v3612_v14  ;;  %16541 = vst [vmem:[#allocation73_spill] sm:$0xff] %v9941_v2  ;;  %v1915_v12 = vmul.f32 %v9941_v2, %v7709_v36  ;;  %v16544_v36 = vld [vmem:[#allocation46_spill] sm:$0xff] }
 0x108   : > { %16540 = vst [vmem:[#allocation41_spill] sm:$0xff] %v9935_v6  ;;  %v1796_v46 = vadd.f32 %v1780_v22, %v1722_v10  ;;  %v1130_v32 = vmul.f32 %v9783_v60, %v9935_v6  ;;  %v9950_v51 = vsel %vm674_vm3, %v1160_v57, %v15651_v56  ;;  %v1234_v33 = vrot.slane %v9869_v23, 5  ;;  %v9955_v10 = vld [vmem:[#allocation5 + $0x16] ss:$0 sm:$0xff] }
 0x109   : > { %v998_v8 = vadd.f32 %v982_v11, %v924_v9  ;;  %16542 = vst [vmem:[#allocation87_spill] sm:$0xff] %v9950_v51  ;;  %v15655_v42 = vrot.slane %v9872_v7, 5  ;;  %v3760_v22 = vadd.f32 %v9781_v50, %v3686_v40  ;;  %v1989_v5 = vmul.f32 %v9955_v10, %v16544_v36  ;;  %v9962_v9 = vld [vmem:[%s8415_s9 + $0x60] sm:$0xff]  ;;  %v9973_v36 = vld [vmem:[#allocation5 + $0x17] ss:$0 sm:$0xff] }
 0x10a   : > { %v1870_v14 = vadd.f32 %v1854_v37, %v1796_v46  ;;  %16543 = vst [vmem:[#allocation74_spill] sm:$0xff] %v9955_v10  ;;  %v1204_v11 = vmul.f32 %v9797_v43, %v9950_v51  ;;  %v1308_v50 = vrot.slane %v9869_v23, 6  ;;  %v15658_v37 = vrot.slane %v9872_v7, 6 }
 0x10b   : > { %16545 = vst [vmem:[#allocation88_spill] sm:$0xff] %v9962_v9  ;;  %v1072_v57 = vadd.f32 %v1056_v16, %v998_v8  ;;  %v9968_v56 = vsel %vm749_vm4, %v1234_v33, %v15655_v42  ;;  %v3834_v40 = vadd.f32 %v9792_v25, %v3760_v22  ;;  %v2063_v13 = vmul.f32 %v9973_v36, %v16548_v0  ;;  %v16552_v0 = vld [vmem:[#allocation49_spill] sm:$0xff] }
 0x10c   : > { %16546 = vst [vmem:[#allocation76_spill] sm:$0xff] %v9968_v56  ;;  %v1931_v46 = vadd.f32 %v1915_v12, %v1870_v14  ;;  %v1278_v8 = vmul.f32 %v9802_v34, %v9968_v56  ;;  %v9986_v33 = vsel %vm824_vm5, %v1308_v50, %v15658_v37  ;;  %v1443_v25 = vrot.slane %v9962_v9, 1  ;;  %v9990_v14 = vld [vmem:[#allocation5 + $0x18] ss:$0 sm:$0xff] }
 0x10d   : > { %16547 = vst [vmem:[#allocation90_spill] sm:$0xff] %v9973_v36  ;;  %v1146_v16 = vadd.f32 %v1130_v32, %v1072_v57  ;;  %v3908_v12 = vadd.f32 %v9795_v49, %v3834_v40  ;;  %v2153_v42 = vmul.f32 %v9990_v14, %v16552_v0  ;;  %v1352_v32 = vmul.f32 %v9828_v18, %v9986_v33  ;;  %v16555_v40 = vld [vmem:[#allocation24_spill] sm:$0xff] }
 0x10e   : > { %16550 = vst [vmem:[#allocation91_spill] sm:$0xff] %v9986_v33  ;;  %v2005_v22 = vadd.f32 %v1989_v5, %v1931_v46  ;;  %v15661_v27 = vrot.slane %v9978_v3, 1  ;;  %v1517_v19 = vrot.slane %v9962_v9, 2  ;;  %v15664_v50 = vrot.slane %v9978_v3, 2  ;;  %v10002_v5 = vld [vmem:[#allocation5 + $0x19] ss:$0 sm:$0xff] }
 0x10f   : > { %16551 = vst [vmem:[#allocation52_spill] sm:$0xff] %v9990_v14  ;;  %v1220_v57 = vadd.f32 %v1204_v11, %v1146_v16  ;;  %v10000_v37 = vadd.f32 %v16525_v31, %v3908_v12  ;;  %v2227_v46 = vmul.f32 %v10002_v5, %v16555_v40  ;;  %v1591_v0 = vrot.slane %v9962_v9, 3  ;;  %v16558_v40 = vld [vmem:[#allocation39_spill] sm:$0xff]  ;;  %v10227_v18 = vld [vmem:[#allocation5 + $0x2b] ss:$0 sm:$0xff] }
 0x110   : > { %v2079_v49 = vadd.f32 %v2063_v13, %v2005_v22  ;;  %16554 = vst [vmem:[#allocation92_spill] sm:$0xff] %v10002_v5  ;;  %v1413_v11 = vmul.f32 %v9842_v38, %v9962_v9  ;;  %v10013_v16 = vsel %vm449_vm0, %v1443_v25, %v15661_v27  ;;  %v10017_v22 = vld [vmem:[#allocation5 + $0x1a] ss:$0 sm:$0xff]  ;;  %v1665_v27 = vrot.slane %v9962_v9, 4 }
 0x111   : > { %16553 = vst [vmem:[#allocation79_spill] sm:$0xff] %v10000_v37  ;;  %v1294_v26 = vadd.f32 %v1278_v8, %v1220_v57  ;;  %3947 = vadd.xlane.f32.xlu1 %v10000_v37  ;;  %v2301_v8 = vmul.f32 %v10017_v22, %v16558_v40  ;;  %v10025_v57 = vsel %vm524_vm1, %v1517_v19, %v15664_v50  ;;  %v16561_v37 = vld [vmem:[#allocation55_spill] sm:$0xff]  ;;  %v16562_v56 = vrot.slane %v9978_v3, 3 }
 0x112   : > { %16556 = vst [vmem:[#allocation81_spill] sm:$0xff] %v10013_v16  ;;  %v2169_v12 = vadd.f32 %v2153_v42, %v2079_v49  ;;  %v1487_v25 = vmul.f32 %v9850_v61, %v10013_v16  ;;  %v10031_v49 = vld [vmem:[#allocation5 + $0x1b] ss:$0 sm:$0xff]  ;;  %v10043_v50 = vld [vmem:[#allocation5 + $0x1c] ss:$0 sm:$0xff]  ;;  %v1561_v13 = vmul.f32 %v9864_v63, %v10025_v57  ;;  %v16565_v51 = vrot.slane %v9978_v3, 4 }
 0x113   : > { %16557 = vst [vmem:[#allocation93_spill] sm:$0xff] %v10017_v22  ;;  %v1368_v33 = vadd.f32 %v1352_v32, %v1294_v26  ;;  %v2375_v40 = vmul.f32 %v10031_v49, %v16561_v37  ;;  %v10039_v19 = vsel %vm599_vm2, %v1591_v0, %v16562_v56  ;;  %v1739_v26 = vrot.slane %v9962_v9, 5  ;;  %v7717_v32 = vld [vmem:[%s8415_s9 + $0x68] sm:$0xff] }
 0x114   : > { %16559 = vst [vmem:[#allocation83_spill] sm:$0xff] %v10025_v57  ;;  %v2243_v42 = vadd.f32 %v2227_v46, %v2169_v12  ;;  %v2436_v46 = vmul.f32 %v10043_v50, %v7717_v32  ;;  %v10053_v56 = vsel %vm674_vm3, %v1665_v27, %v16565_v51  ;;  %v1813_v0 = vrot.slane %v9962_v9, 6  ;;  %v10063_v32 = vld [vmem:[%s8415_s9 + $0x80] sm:$0xff] }
 0x115   : > { %16560 = vst [vmem:[#allocation94_spill] sm:$0xff] %v10031_v49  ;;  %v1429_v12 = vadd.f32 %v1413_v11, %v1368_v33  ;;  %v1635_v33 = vmul.f32 %v9875_v15, %v10039_v19  ;;  %v10060_v11 = vld [vmem:[%s8415_s9 + $0x78] sm:$0xff]  ;;  %v16571_v27 = vrot.slane %v9978_v3, 5  ;;  %v16575_v9 = vrot.slane %v9978_v3, 6 }
 0x116   : > { %16563 = vst [vmem:[#allocation84_spill] sm:$0xff] %v10039_v19  ;;  %v2317_v16 = vadd.f32 %v2301_v8, %v2243_v42  ;;  %v10065_v8 = vld [vmem:[#allocation5 + $0x1d] ss:$0 sm:$0xff]  ;;  %v16570_v42 = vld [vmem:[#allocation57_spill] sm:$0xff]  ;;  %v1948_v15 = vrot.slane %v10060_v11, 1  ;;  %v16596_v61 = vrot.slane %v10063_v32, 6 }
 0x117   : > { %16564 = vst [vmem:[#allocation95_spill] sm:$0xff] %v10043_v50  ;;  %v1503_v53 = vadd.f32 %v1487_v25, %v1429_v12  ;;  %v2510_v57 = vmul.f32 %v10065_v8, %v16570_v42  ;;  %v10073_v51 = vsel %vm749_vm4, %v1739_v26, %v16571_v27  ;;  %v10075_v25 = vld [vmem:[#allocation5 + $0x1e] ss:$0 sm:$0xff]  ;;  %v16574_v12 = vld [vmem:[#allocation48_spill] sm:$0xff]  ;;  %v10085_v42 = vsel %vm824_vm5, %v1813_v0, %v16575_v9  ;;  %v10097_v9 = vld [vmem:[#allocation5 + $0x20] ss:$0 sm:$0xff] }
 0x118   : > { %16566 = vst [vmem:[#allocation72_spill] sm:$0xff] %v10053_v56  ;;  %v2391_v37 = vadd.f32 %v2375_v40, %v2317_v16  ;;  %v2584_v6 = vmul.f32 %v10075_v25, %v16574_v12  ;;  %v1709_v16 = vmul.f32 %v9886_v35, %v10053_v56  ;;  %v1783_v63 = vmul.f32 %v9910_v44, %v10073_v51  ;;  %v16578_v0 = vld [vmem:[#allocation50_spill] sm:$0xff]  ;;  %v16581_v44 = vld [vmem:[#allocation40_spill] sm:$0xff] }
 0x119   : > { %16567 = vst [vmem:[#allocation86_spill] sm:$0xff] %v10060_v11  ;;  %v1577_v19 = vadd.f32 %v1561_v13, %v1503_v53  ;;  %v10091_v53 = vld [vmem:[#allocation5 + $0x1f] ss:$0 sm:$0xff]  ;;  %v16577_v13 = vld [vmem:[#allocation60_spill] sm:$0xff]  ;;  %v2732_v35 = vmul.f32 %v10097_v9, %v16578_v0 }
 0x11a   : > { %16568 = vst [vmem:[#allocation77_spill] sm:$0xff] %v10063_v32  ;;  %v2452_v40 = vadd.f32 %v2436_v46, %v2391_v37  ;;  %v2658_v46 = vmul.f32 %v10091_v53, %v16577_v13  ;;  %v2022_v37 = vrot.slane %v10060_v11, 2  ;;  %v2096_v13 = vrot.slane %v10060_v11, 3 }
 0x11b   : > { %16569 = vst [vmem:[#allocation89_spill] sm:$0xff] %v10065_v8  ;;  %v1651_v27 = vadd.f32 %v1635_v33, %v1577_v19  ;;  %v1857_v19 = vmul.f32 %v9925_v62, %v10085_v42 }
 0x11c   : > { %16572 = vst [vmem:[#allocation38_spill] sm:$0xff] %v10073_v51  ;;  %v2526_v12 = vadd.f32 %v2510_v57, %v2452_v40  ;;  %v16579_v57 = vrot.slane %v10063_v32, 1  ;;  %v10111_v51 = vld [vmem:[#allocation5 + $0x21] ss:$0 sm:$0xff] }
 0x11d   : > { %16573 = vst [vmem:[#allocation80_spill] sm:$0xff] %v10075_v25  ;;  %v1725_v26 = vadd.f32 %v1709_v16, %v1651_v27  ;;  %v2806_v0 = vmul.f32 %v10111_v51, %v16581_v44  ;;  %v10115_v16 = vld [vmem:[#allocation5 + $0x22] ss:$0 sm:$0xff]  ;;  %v16582_v27 = vld [vmem:[#allocation61_spill] sm:$0xff]  ;;  %v2186_v44 = vrot.slane %v10060_v11, 4 }
 0x11e   : > { %16576 = vst [vmem:[#allocation82_spill] sm:$0xff] %v10085_v42  ;;  %v2600_v33 = vadd.f32 %v2584_v6, %v2526_v12  ;;  %v10107_v40 = vsel %vm449_vm0, %v1948_v15, %v16579_v57  ;;  %v2880_v6 = vmul.f32 %v10115_v16, %v16582_v27  ;;  %v1918_v15 = vmul.f32 %v9941_v2, %v10060_v11  ;;  %v10163_v2 = vld [vmem:[#allocation5 + $0x25] ss:$0 sm:$0xff] }
 0x11f   : > { %16580 = vst [vmem:[#allocation23_spill] sm:$0xff] %v10107_v40  ;;  %v1799_v12 = vadd.f32 %v1783_v63, %v1725_v26  ;;  %v16583_v42 = vrot.slane %v10063_v32, 2  ;;  %v1992_v63 = vmul.f32 %v9955_v10, %v10107_v40  ;;  %v2260_v26 = vrot.slane %v10060_v11, 5  ;;  %v10147_v40 = vld [vmem:[%s8415_s9 + $0x98] sm:$0xff] }
 0x120   : > { %v2674_v57 = vadd.f32 %v2658_v46, %v2600_v33  ;;  %v16585_v33 = vrot.slane %v10063_v32, 3  ;;  %16592 = vst [vmem:[#allocation42_spill] sm:$0xff] %v10163_v2 }
 0x121   : > { %v10125_v56 = vsel %vm524_vm1, %v2022_v37, %v16583_v42  ;;  %v1873_v52 = vadd.f32 %v1857_v19, %v1799_v12  ;;  %v2334_v37 = vrot.slane %v10060_v11, 6  ;;  %v10144_v12 = vld [vmem:[%s8415_s9 + $0x90] sm:$0xff] }
 0x122   : > { %16584 = vst [vmem:[#allocation33_spill] sm:$0xff] %v10125_v56  ;;  %v2748_v46 = vadd.f32 %v2732_v35, %v2674_v57  ;;  %v10137_v42 = vsel %vm599_vm2, %v2096_v13, %v16585_v33  ;;  %v2066_v19 = vmul.f32 %v9973_v36, %v10125_v56  ;;  %v7725_v35 = vld [vmem:[%s8415_s9 + $0x80] sm:$0xff]  ;;  %v16589_v33 = vld [vmem:[#allocation53_spill] sm:$0xff]  ;;  %v16593_v56 = vld [vmem:[#allocation54_spill] sm:$0xff]  ;;  %v16594_v36 = vrot.slane %v10063_v32, 5 }
 0x123   : > { %16586 = vst [vmem:[#allocation25_spill] sm:$0xff] %v10137_v42  ;;  %v1934_v62 = vadd.f32 %v1918_v15, %v1873_v52  ;;  %v10150_v57 = vld [vmem:[#allocation5 + $0x23] ss:$0 sm:$0xff]  ;;  %v10153_v13 = vld [vmem:[#allocation5 + $0x24] ss:$0 sm:$0xff]  ;;  %v16590_v52 = vrot.slane %v10063_v32, 4 }
 0x124   : > { %16587 = vst [vmem:[#allocation37_spill] sm:$0xff] %v10144_v12  ;;  %v2822_v27 = vadd.f32 %v2806_v0, %v2748_v46  ;;  %v2941_v10 = vmul.f32 %v10150_v57, %v7725_v35  ;;  %v3015_v11 = vmul.f32 %v10153_v13, %v16589_v33  ;;  %v3089_v0 = vmul.f32 %v10163_v2, %v16593_v56 }
 0x125   : > { %16588 = vst [vmem:[#allocation27_spill] sm:$0xff] %v10153_v13  ;;  %v10161_v15 = vsel %vm674_vm3, %v2186_v44, %v16590_v52  ;;  %v2008_v46 = vadd.f32 %v1992_v63, %v1934_v62  ;;  %v2156_v35 = vmul.f32 %v9990_v14, %v10137_v42  ;;  %v10173_v33 = vsel %vm749_vm4, %v2260_v26, %v16594_v36  ;;  %v10195_v62 = vld [vmem:[#allocation5 + $0x28] ss:$0 sm:$0xff] }
 0x126   : > { %16591 = vst [vmem:[#allocation28_spill] sm:$0xff] %v10161_v15  ;;  %v2896_v23 = vadd.f32 %v2880_v6, %v2822_v27  ;;  %v10179_v44 = vsel %vm824_vm5, %v2334_v37, %v16596_v61  ;;  %v2469_v52 = vrot.slane %v10144_v12, 1  ;;  %v2230_v63 = vmul.f32 %v10002_v5, %v10161_v15  ;;  %v10187_v6 = vld [vmem:[#allocation5 + $0x26] ss:$0 sm:$0xff]  ;;  %v16599_v27 = vld [vmem:[#allocation62_spill] sm:$0xff]  ;;  %v16601_v37 = vld [vmem:[#allocation29_spill] sm:$0xff] }
 0x127   : > { %16595 = vst [vmem:[#allocation36_spill] sm:$0xff] %v10173_v33  ;;  %v2082_v56 = vadd.f32 %v2066_v19, %v2008_v46  ;;  %v2543_v42 = vrot.slane %v10144_v12, 2  ;;  %v3163_v14 = vmul.f32 %v10187_v6, %v16599_v27  ;;  %v10191_v61 = vld [vmem:[#allocation5 + $0x27] ss:$0 sm:$0xff]  ;;  %v16602_v19 = vld [vmem:[#allocation63_spill] sm:$0xff]  ;;  %v2304_v27 = vmul.f32 %v10017_v22, %v10173_v33  ;;  %v10246_v33 = vld [vmem:[%s8415_s9 + $0xa8] sm:$0xff] }
 0x128   : > { %16597 = vst [vmem:[#allocation31_spill] sm:$0xff] %v10179_v44  ;;  %v2957_v26 = vadd.f32 %v2941_v10, %v2896_v23  ;;  %v3237_v32 = vmul.f32 %v10191_v61, %v16601_v37  ;;  %v3311_v46 = vmul.f32 %v10195_v62, %v16602_v19  ;;  %v10199_v15 = vld [vmem:[#allocation5 + $0x29] ss:$0 sm:$0xff]  ;;  %v2378_v5 = vmul.f32 %v10031_v49, %v10179_v44 }
 0x129   : > { %16598 = vst [vmem:[#allocation43_spill] sm:$0xff] %v10187_v6  ;;  %v16603_v36 = vld [vmem:[#allocation32_spill] sm:$0xff]  ;;  %v2172_v10 = vadd.f32 %v2156_v35, %v2082_v56  ;;  %v16604_v37 = vrot.slane %v10147_v40, 1  ;;  %v2617_v19 = vrot.slane %v10144_v12, 3  ;;  %v16606_v35 = vrot.slane %v10147_v40, 2 }
 0x12a   : > { %16600 = vst [vmem:[#allocation34_spill] sm:$0xff] %v10191_v61  ;;  %v3385_v23 = vmul.f32 %v10199_v15, %v16603_v36  ;;  %v3031_v38 = vadd.f32 %v3015_v11, %v2957_v26  ;;  %v2691_v11 = vrot.slane %v10144_v12, 4  ;;  %v16610_v22 = vrot.slane %v10147_v40, 3 }
 0x12b   : > { %v10211_v3 = vsel %vm449_vm0, %v2469_v52, %v16604_v37  ;;  %v2246_v34 = vadd.f32 %v2230_v63, %v2172_v10  ;;  %v10219_v56 = vsel %vm524_vm1, %v2543_v42, %v16606_v35  ;;  %v7733_v52 = vld [vmem:[%s8415_s9 + $0x98] sm:$0xff]  ;;  %v10224_v37 = vld [vmem:[#allocation5 + $0x2a] ss:$0 sm:$0xff]  ;;  %v3520_v63 = vmul.f32 %v10227_v18, %v9597_v58  ;;  %v10231_v10 = vld [vmem:[#allocation5 + $0x2c] ss:$0 sm:$0xff]  ;;  %16609 = vst [vmem:[#allocation26_spill] sm:$0xff] %v10246_v33 }
 0x12c   : > { %16605 = vst [vmem:[#allocation45_spill] sm:$0xff] %v10211_v3  ;;  %v3105_v26 = vadd.f32 %v3089_v0, %v3031_v38  ;;  %v3446_v44 = vmul.f32 %v10224_v37, %v7733_v52  ;;  %v3594_v42 = vmul.f32 %v10231_v10, %v9625_v55  ;;  %v10235_v35 = vld [vmem:[#allocation5 + $0x2d] ss:$0 sm:$0xff]  ;;  %v2439_v52 = vmul.f32 %v10043_v50, %v10144_v12  ;;  %v10249_v58 = vld [vmem:[%s8415_s9 + $0xb0] sm:$0xff] }
 0x12d   : > { %16607 = vst [vmem:[#allocation35_spill] sm:$0xff] %v10219_v56  ;;  %v10239_v38 = vmul.f32 %v10235_v35, %v9634_v21  ;;  %v2320_v0 = vadd.f32 %v2304_v27, %v2246_v34  ;;  %v2513_v36 = vmul.f32 %v10065_v8, %v10211_v3  ;;  %v2587_v55 = vmul.f32 %v10075_v25, %v10219_v56 }
 0x12e   : > { %16608 = vst [vmem:[#allocation46_spill] sm:$0xff] %v10224_v37  ;;  %v3179_v49 = vadd.f32 %v3163_v14, %v3105_v26  ;;  %v10257_v21 = vsel %vm599_vm2, %v2617_v19, %v16610_v22  ;;  %v2765_v34 = vrot.slane %v10144_v12, 5  ;;  %v16612_v50 = vrot.slane %v10147_v40, 4  ;;  %v10281_v22 = vld [vmem:[#allocation5 + $0x2f] ss:$0 sm:$0xff] }
 0x12f   : > { %16611 = vst [vmem:[#allocation24_spill] sm:$0xff] %v10257_v21  ;;  %v2394_v27 = vadd.f32 %v2378_v5, %v2320_v0  ;;  %v2839_v26 = vrot.slane %v10144_v12, 6  ;;  %v2974_v8 = vrot.slane %v10246_v33, 1  ;;  %v3048_v5 = vrot.slane %v10246_v33, 2 }
 0x130   : > { %v10264_v3 = vsel %vm674_vm3, %v2691_v11, %v16612_v50  ;;  %v3253_v56 = vadd.f32 %v3237_v32, %v3179_v49  ;;  %v3122_v43 = vrot.slane %v10246_v33, 3  ;;  %v3196_v14 = vrot.slane %v10246_v33, 4  ;;  %v10277_v32 = vld [vmem:[#allocation5 + $0x2e] ss:$0 sm:$0xff]  ;;  %v10287_v11 = vld [vmem:[#allocation5 + $0x30] ss:$0 sm:$0xff] }
 0x131   : > { %16613 = vst [vmem:[#allocation39_spill] sm:$0xff] %v10264_v3  ;;  %v2455_v19 = vadd.f32 %v2439_v52, %v2394_v27  ;;  %v3742_v25 = vmul.f32 %v10277_v32, %v9648_v20  ;;  %v3816_v52 = vmul.f32 %v10281_v22, %v9656_v41  ;;  %v3890_v49 = vmul.f32 %v10287_v11, %v9697_v48 }
 0x132   : > { %v3327_v50 = vadd.f32 %v3311_v46, %v3253_v56  ;;  %v2661_v46 = vmul.f32 %v10091_v53, %v10257_v21  ;;  %v2735_v20 = vmul.f32 %v10097_v9, %v10264_v3  ;;  %v16614_v0 = vrot.slane %v10147_v40, 5 }
 0x133   : > { %v2529_v27 = vadd.f32 %v2513_v36, %v2455_v19  ;;  %v16616_v19 = vrot.slane %v10147_v40, 6  ;;  %v16620_v3 = vrot.slane %v10249_v58, 2 }
 0x134   : > { %v3401_v56 = vadd.f32 %v3385_v23, %v3327_v50  ;;  %v10297_v41 = vsel %vm749_vm4, %v2765_v34, %v16614_v0  ;;  %v16618_v50 = vrot.slane %v10249_v58, 1  ;;  %v16622_v0 = vrot.slane %v10249_v58, 3 }
 0x135   : > { %16615 = vst [vmem:[#allocation55_spill] sm:$0xff] %v10297_v41  ;;  %v2603_v36 = vadd.f32 %v2587_v55, %v2529_v27  ;;  %v10303_v23 = vsel %vm824_vm5, %v2839_v26, %v16616_v19  ;;  %v10315_v21 = vsel %vm524_vm1, %v3048_v5, %v16620_v3  ;;  %v2944_v55 = vmul.f32 %v10150_v57, %v10246_v33 }
 0x136   : > { %16617 = vst [vmem:[#allocation57_spill] sm:$0xff] %v10303_v23  ;;  %v10309_v48 = vsel %vm449_vm0, %v2974_v8, %v16618_v50  ;;  %v3462_v34 = vadd.f32 %v3446_v44, %v3401_v56  ;;  %v10323_v26 = vsel %vm599_vm2, %v3122_v43, %v16622_v0  ;;  %v16624_v27 = vrot.slane %v10249_v58, 4  ;;  %v10336_v56 = vld [vmem:[%s8415_s9 + $0xc0] sm:$0xff] }
 0x137   : > { %16619 = vst [vmem:[#allocation48_spill] sm:$0xff] %v10309_v48  ;;  %v2677_v19 = vadd.f32 %v2661_v46, %v2603_v36  ;;  %v2809_v3 = vmul.f32 %v10111_v51, %v10297_v41  ;;  %v3270_v44 = vrot.slane %v10246_v33, 5  ;;  %v389_v50 = vld [vmem:[%s8415_s9 + $0x40] sm:$0xff]  ;;  %v2883_v43 = vmul.f32 %v10115_v16, %v10303_v23 }
 0x138   : > { %16621 = vst [vmem:[#allocation50_spill] sm:$0xff] %v10315_v21  ;;  %v10329_v8 = vsel %vm674_vm3, %v3196_v14, %v16624_v27  ;;  %v3536_v12 = vadd.f32 %v3520_v63, %v3462_v34  ;;  %v3018_v0 = vmul.f32 %v10153_v13, %v10309_v48  ;;  %v3092_v14 = vmul.f32 %v10163_v2, %v10315_v21 }
 0x139   : > { %16623 = vst [vmem:[#allocation40_spill] sm:$0xff] %v10323_v26  ;;  %v2751_v46 = vadd.f32 %v2735_v20, %v2677_v19  ;;  %v3166_v36 = vmul.f32 %v10187_v6, %v10323_v26  ;;  %v3240_v27 = vmul.f32 %v10191_v61, %v10329_v8  ;;  %v3344_v5 = vrot.slane %v10246_v33, 6  ;;  %v10370_v33 = vld [vmem:[%s8415_s9 + $0xc8] sm:$0xff] }
 0x13a   : > { %16625 = vst [vmem:[#allocation61_spill] sm:$0xff] %v10329_v8  ;;  %v3610_v63 = vadd.f32 %v3594_v42, %v3536_v12  ;;  %v10353_v23 = vmul.f32 %v10224_v37, %v10336_v56  ;;  %v441_v48 = vrot.slane %v389_v50, 1  ;;  %v16626_v20 = vrot.slane %v10249_v58, 5 }
 0x13b   : > { %v2825_v41 = vadd.f32 %v2809_v3, %v2751_v46  ;;  %v412_v8 = vmul.f32 %v9812_v17, %v9788_v28  ;;  %v518_v26 = vrot.slane %v389_v50, 2  ;;  %v3479_v42 = vrot.slane %v10336_v56, 1 }
 0x13c   : > { %v10359_v19 = vsel %vm749_vm4, %v3270_v44, %v16626_v20  ;;  %v3684_v12 = vadd.f32 %v10239_v38, %v3610_v63  ;;  %v16627_v34 = vrot.slane %v9788_v28, 1  ;;  %v593_v46 = vrot.slane %v389_v50, 3 }
 0x13d   : > { %v2899_v21 = vadd.f32 %v2883_v43, %v2825_v41  ;;  %v16628_v20 = vrot.slane %v9788_v28, 2  ;;  %v668_v38 = vrot.slane %v389_v50, 4  ;;  %v16629_v6 = vrot.slane %v9788_v28, 3 }
 0x13e   : > { %v452_v3 = vsel %vm449_vm0, %v16627_v34, %v441_v48  ;;  %v3758_v63 = vadd.f32 %v3742_v25, %v3684_v12  ;;  %v743_v34 = vrot.slane %v389_v50, 5  ;;  %v16631_v12 = vrot.slane %v9788_v28, 5 }
 0x13f   : > { %v473_v44 = vmul.f32 %v9627_v4, %v452_v3  ;;  %v527_v37 = vsel %vm524_vm1, %v16628_v20, %v518_v26  ;;  %v602_v48 = vsel %vm599_vm2, %v16629_v6, %v593_v46  ;;  %v2960_v41 = vadd.f32 %v2944_v55, %v2899_v21  ;;  %v10388_v26 = vld [vmem:[%s8415_s9 + $0x58] sm:$0xff] }
 0x140   : > { %v548_v61 = vmul.f32 %v9636_v45, %v527_v37  ;;  %v623_v2 = vmul.f32 %v9658_v59, %v602_v48  ;;  %v16630_v3 = vrot.slane %v9788_v28, 4  ;;  %v3832_v25 = vadd.f32 %v3816_v52, %v3758_v63 }
 0x141   : > { %v489_v43 = vadd.f32 %v473_v44, %v412_v8  ;;  %v15755_v37 = vrot.slane %v10370_v33, 1  ;;  %v752_v6 = vsel %vm749_vm4, %v16631_v12, %v743_v34  ;;  %v818_v46 = vrot.slane %v389_v50, 6 }
 0x142   : > { %v677_v13 = vsel %vm674_vm3, %v16630_v3, %v668_v38  ;;  %v3034_v21 = vadd.f32 %v3018_v0, %v2960_v41  ;;  %v16632_v55 = vrot.slane %v10249_v58, 6  ;;  %v3906_v38 = vadd.f32 %v3890_v49, %v3832_v25 }
 0x143   : > { %v564_v44 = vadd.f32 %v548_v61, %v489_v43  ;;  %v698_v20 = vmul.f32 %v9679_v39, %v677_v13  ;;  %v3553_v52 = vrot.slane %v10336_v56, 2  ;;  %v16633_v63 = vrot.slane %v9788_v28, 6 }
 0x144   : > { %v10399_v8 = vsel %vm824_vm5, %v3344_v5, %v16632_v55  ;;  %v954_v50 = vrot.slane %v10388_v26, 1  ;;  %v3108_v0 = vadd.f32 %v3092_v14, %v3034_v21  ;;  %v15754_v34 = vrot.slane %v10370_v33, 2 }
 0x145   : > { %v827_v48 = vsel %vm824_vm5, %v16633_v63, %v818_v46  ;;  %v639_v41 = vadd.f32 %v623_v2, %v564_v44  ;;  %v773_v5 = vmul.f32 %v9706_v47, %v752_v6  ;;  %v10411_v61 = vadd.f32 %v16525_v31, %v3906_v38 }
 0x146   : > { %v3314_v13 = vmul.f32 %v10195_v62, %v10359_v19  ;;  %v3627_v49 = vrot.slane %v10336_v56, 3  ;;  %v1028_v28 = vrot.slane %v10388_v26, 2  ;;  %v3182_v43 = vadd.f32 %v3166_v36, %v3108_v0 }
 0x147   : > { %16634 = vst [vmem:[#allocation53_spill] sm:$0xff] %v10411_v61  ;;  %v15752_v3 = vrot.slane %v10370_v33, 3  ;;  %v714_v25 = vadd.f32 %v698_v20, %v639_v41  ;;  %v848_v14 = vmul.f32 %v9714_v30, %v827_v48  ;;  %3943 = vadd.xlane.f32.xlu0 %v10411_v61  ;;  %v3388_v2 = vmul.f32 %v10199_v15, %v10399_v8 }
 0x148   : > { %v10426_v31 = vsel %vm449_vm0, %v3479_v42, %v15755_v37  ;;  %v16635_v12 = vrot.slane %v9872_v7, 1  ;;  %v1102_v6 = vrot.slane %v10388_v26, 3  ;;  %v3256_v46 = vadd.f32 %v3240_v27, %v3182_v43 }
 0x149   : > { %v10439_v21 = vsel %vm524_vm1, %v3553_v52, %v15754_v34  ;;  %v789_v55 = vadd.f32 %v773_v5, %v714_v25  ;;  %v909_v42 = vmul.f32 %v9719_v29, %v9872_v7  ;;  %v3701_v44 = vrot.slane %v10336_v56, 4 }
 0x14a   : > { %v10432_v36 = vsel %vm449_vm0, %v16635_v12, %v954_v50  ;;  %v15753_v20 = vrot.slane %v10370_v33, 4  ;;  %v16636_v38 = vrot.slane %v9872_v7, 2  ;;  %v1176_v27 = vrot.slane %v10388_v26, 4 }
 0x14b   : > { %v3330_v48 = vadd.f32 %v3314_v13, %v3256_v46  ;;  %v10456_v52 = vsel %vm599_vm2, %v3627_v49, %v15752_v3  ;;  %v864_v50 = vadd.f32 %v848_v14, %v789_v55  ;;  %v983_v0 = vmul.f32 %v9740_v24, %v10432_v36 }
 0x14c   : > { %v10449_v63 = vsel %vm524_vm1, %v16636_v38, %v1028_v28  ;;  %v3775_v41 = vrot.slane %v10336_v56, 5  ;;  %v15756_v5 = vrot.slane %v10370_v33, 5  ;;  %v16638_v28 = vrot.slane %v9872_v7, 3 }
 0x14d   : > { %16637 = vst [vmem:[#allocation54_spill] sm:$0xff] %v10449_v63  ;;  %v1250_v43 = vrot.slane %v10388_v26, 5  ;;  %v3404_v25 = vadd.f32 %v3388_v2, %v3330_v48  ;;  %v3523_v49 = vmul.f32 %v10227_v18, %v10426_v31  ;;  %v925_v14 = vadd.f32 %v909_v42, %v864_v50  ;;  %v6872_v48 = vld [vmem:[%s8415_s9 + $0x70] sm:$0xff] }
 0x14e   : > { %v10466_v13 = vsel %vm599_vm2, %v16638_v28, %v1102_v6  ;;  %v1057_v12 = vmul.f32 %v9762_v54, %v10449_v63  ;;  %v3597_v46 = vmul.f32 %v10231_v10, %v10439_v21  ;;  %v3671_v55 = vmul.f32 %v10235_v35, %v10456_v52 }
 0x14f   : > { %16639 = vst [vmem:[#allocation62_spill] sm:$0xff] %v10466_v13  ;;  %v16640_v38 = vrot.slane %v9872_v7, 4  ;;  %v1324_v2 = vrot.slane %v10388_v26, 6  ;;  %v3465_v42 = vadd.f32 %v10353_v23, %v3404_v25  ;;  %v10490_v50 = vsel %vm674_vm3, %v3701_v44, %v15753_v20 }
 0x150   : > { %16642 = vst [vmem:[#allocation63_spill] sm:$0xff] %v10490_v50  ;;  %v999_v28 = vadd.f32 %v983_v0, %v925_v14  ;;  %v1131_v3 = vmul.f32 %v9783_v60, %v10466_v13  ;;  %v3849_v26 = vrot.slane %v10336_v56, 6  ;;  %v16644_v25 = vrot.slane %v9872_v7, 5 }
 0x151   : > { %v10481_v6 = vsel %vm674_vm3, %v16640_v38, %v1176_v27  ;;  %v10498_v27 = vsel %vm749_vm4, %v3775_v41, %v15756_v5  ;;  %v3539_v0 = vadd.f32 %v3523_v49, %v3465_v42  ;;  %v16646_v38 = vld [vmem:[#allocation58_spill] sm:$0xff]  ;;  %v1459_v34 = vrot.slane %v6872_v48, 1 }
 0x152   : > { %16641 = vst [vmem:[#allocation29_spill] sm:$0xff] %v10481_v6  ;;  %v10506_v44 = vsel %vm749_vm4, %v16644_v25, %v1250_v43  ;;  %v1073_v14 = vadd.f32 %v1057_v12, %v999_v28  ;;  %v1205_v20 = vmul.f32 %v16646_v38, %v10481_v6  ;;  %v16647_v37 = vrot.slane %v9872_v7, 6  ;;  %v16649_v43 = vld [vmem:[#allocation65_spill] sm:$0xff] }
 0x153   : > { %16643 = vst [vmem:[#allocation32_spill] sm:$0xff] %v10498_v27  ;;  %v3613_v5 = vadd.f32 %v3597_v46, %v3539_v0  ;;  %v3745_v23 = vmul.f32 %v10277_v32, %v10490_v50  ;;  %v1279_v25 = vmul.f32 %v16649_v43, %v10506_v44  ;;  %v3819_v49 = vmul.f32 %v10281_v22, %v10498_v27  ;;  %v16652_v46 = vld [vmem:[#allocation30_spill] sm:$0xff] }
 0x154   : > { %16645 = vst [vmem:[#allocation96_spill] sm:$0xff] %v10506_v44  ;;  %v10514_v41 = vsel %vm824_vm5, %v16647_v37, %v1324_v2  ;;  %v1147_v61 = vadd.f32 %v1131_v3, %v1073_v14  ;;  %v16650_v12 = vrot.slane %v10370_v33, 6  ;;  %v1533_v42 = vrot.slane %v6872_v48, 2  ;;  %v16653_v0 = vld [vmem:[#allocation70_spill] sm:$0xff] }
 0x155   : > { %16648 = vst [vmem:[#allocation58_spill] sm:$0xff] %v10514_v41  ;;  %v3687_v37 = vadd.f32 %v3671_v55, %v3613_v5  ;;  %v1353_v28 = vmul.f32 %v16652_v46, %v10514_v41  ;;  %v16654_v3 = vrot.slane %v16653_v0, 1  ;;  %v1607_v44 = vrot.slane %v6872_v48, 3 }
 0x156   : > { %v10526_v7 = vsel %vm824_vm5, %v3849_v26, %v16650_v12  ;;  %v1221_v2 = vadd.f32 %v1205_v20, %v1147_v61  ;;  %v16656_v26 = vld [vmem:[#allocation59_spill] sm:$0xff]  ;;  %v16657_v61 = vld [vmem:[#allocation68_spill] sm:$0xff]  ;;  %v16658_v5 = vrot.slane %v16653_v0, 2  ;;  %v1755_v63 = vrot.slane %v6872_v48, 5 }
 0x157   : > { %16651 = vst [vmem:[#allocation65_spill] sm:$0xff] %v10526_v7  ;;  %v10534_v14 = vsel %vm449_vm0, %v16654_v3, %v1459_v34  ;;  %v3761_v6 = vadd.f32 %v3745_v23, %v3687_v37  ;;  %v3893_v13 = vmul.f32 %v10287_v11, %v10526_v7  ;;  %v1414_v12 = vmul.f32 %v16656_v26, %v16653_v0  ;;  %v16660_v37 = vld [vmem:[#allocation51_spill] sm:$0xff] }
 0x158   : > { %16655 = vst [vmem:[#allocation30_spill] sm:$0xff] %v10534_v14  ;;  %v1295_v27 = vadd.f32 %v1279_v25, %v1221_v2  ;;  %v1488_v20 = vmul.f32 %v16657_v61, %v10534_v14  ;;  %v10546_v55 = vsel %vm524_vm1, %v16658_v5, %v1533_v42  ;;  %v1681_v34 = vrot.slane %v6872_v48, 4  ;;  %v16661_v25 = vld [vmem:[#allocation78_spill] sm:$0xff]  ;;  %v16664_v5 = vld [vmem:[#allocation69_spill] sm:$0xff] }
 0x159   : > { %16659 = vst [vmem:[#allocation70_spill] sm:$0xff] %v10546_v55  ;;  %v3835_v3 = vadd.f32 %v3819_v49, %v3761_v6  ;;  %v413_v41 = vmul.f32 %v9812_v17, %v16660_v37  ;;  %v474_v2 = vmul.f32 %v9627_v4, %v16661_v25  ;;  %v16662_v7 = vrot.slane %v16653_v0, 3 }
 0x15a   : > { %v1369_v23 = vadd.f32 %v1353_v28, %v1295_v27  ;;  %v1562_v6 = vmul.f32 %v16664_v5, %v10546_v55  ;;  %v16665_v27 = vrot.slane %v16653_v0, 4  ;;  %v1829_v49 = vrot.slane %v6872_v48, 6  ;;  %v10569_v28 = vld [vmem:[%s15463_s2] ss:$0 sm:$0xff] }
 0x15b   : > { %v10556_v14 = vsel %vm599_vm2, %v16662_v7, %v1607_v44  ;;  %v3909_v50 = vadd.f32 %v3893_v13, %v3835_v3  ;;  %v490_v4 = vadd.f32 %v474_v2, %v413_v41  ;;  %16667 = vst [vmem:[#allocation51_spill] sm:$0xff] %v10569_v28  ;;  %v16669_v7 = vld [vmem:[#allocation75_spill] sm:$0xff]  ;;  %v6898_v3 = vld [vmem:[%s8415_s9 + $0x88] sm:$0xff] }
 0x15c   : > { %16663 = vst [vmem:[#allocation59_spill] sm:$0xff] %v10556_v14  ;;  %v1430_v42 = vadd.f32 %v1414_v12, %v1369_v23  ;;  %v10564_v17 = vsel %vm674_vm3, %v16665_v27, %v1681_v34  ;;  %v1636_v12 = vmul.f32 %v16669_v7, %v10556_v14  ;;  %v16670_v23 = vld [vmem:[#allocation71_spill] sm:$0xff]  ;;  %v16671_v34 = vrot.slane %v16653_v0, 5  ;;  %v16673_v41 = vld [vmem:[#allocation41_spill] sm:$0xff] }
 0x15d   : > { %16666 = vst [vmem:[#allocation68_spill] sm:$0xff] %v10564_v17  ;;  %v10572_v44 = vadd.f32 %v10569_v28, %v3909_v50  ;;  %v549_v37 = vmul.f32 %v9636_v45, %v16670_v23  ;;  %v624_v25 = vmul.f32 %v9658_v59, %v16673_v41  ;;  %v16675_v27 = vld [vmem:[#allocation87_spill] sm:$0xff]  ;;  %v16676_v45 = vrot.slane %v16653_v0, 6  ;;  %v16715_v28 = vld [vmem:[#allocation80_spill] sm:$0xff] }
 0x15e   : > { %v1504_v13 = vadd.f32 %v1488_v20, %v1430_v42  ;;  %v10583_v48 = vsel %vm749_vm4, %v16671_v34, %v1755_v63  ;;  %v16674_v20 = vld [vmem:[#allocation66_spill] sm:$0xff]  ;;  %v699_v14 = vmul.f32 %v9679_v39, %v16675_v27  ;;  %v1964_v63 = vrot.slane %v6898_v3, 1  ;;  %v16678_v59 = vld [vmem:[#allocation67_spill] sm:$0xff] }
 0x15f   : > { %16668 = vst [vmem:[#allocation78_spill] sm:$0xff] %v10572_v44  ;;  %3949 = vadd.xlane.f32.xlu2 %v10572_v44  ;;  %v1710_v2 = vmul.f32 %v16674_v20, %v10564_v17  ;;  %v565_v42 = vadd.f32 %v549_v37, %v490_v4  ;;  %v10596_v23 = vsel %vm824_vm5, %v16676_v45, %v1829_v49  ;;  %v2038_v17 = vrot.slane %v6898_v3, 2  ;;  %v16680_v37 = vld [vmem:[#allocation85_spill] sm:$0xff]  ;;  %v16681_v0 = vld [vmem:[#allocation91_spill] sm:$0xff] }
 0x160   : > { %16672 = vst [vmem:[#allocation69_spill] sm:$0xff] %v10583_v48  ;;  %v1578_v50 = vadd.f32 %v1562_v6, %v1504_v13  ;;  %v1784_v41 = vmul.f32 %v16678_v59, %v10583_v48  ;;  %v16679_v6 = vld [vmem:[#allocation76_spill] sm:$0xff]  ;;  %v1858_v39 = vmul.f32 %v16680_v37, %v10596_v23  ;;  %v849_v55 = vmul.f32 %v9714_v30, %v16681_v0  ;;  %v16682_v49 = vld [vmem:[#allocation77_spill] sm:$0xff] }
 0x161   : > { %16677 = vst [vmem:[#allocation75_spill] sm:$0xff] %v10596_v23  ;;  %v640_v44 = vadd.f32 %v624_v25, %v565_v42  ;;  %v774_v13 = vmul.f32 %v9706_v47, %v16679_v6  ;;  %v16683_v45 = vrot.slane %v16682_v49, 1  ;;  %v16685_v42 = vld [vmem:[#allocation73_spill] sm:$0xff] }
 0x162   : > { %v1652_v34 = vadd.f32 %v1636_v12, %v1578_v50  ;;  %v2112_v50 = vrot.slane %v6898_v3, 3  ;;  %v1919_v47 = vmul.f32 %v16685_v42, %v16682_v49 }
 0x163   : > { %v715_v27 = vadd.f32 %v699_v14, %v640_v44  ;;  %v10610_v12 = vsel %vm449_vm0, %v16683_v45, %v1964_v63  ;;  %v16687_v14 = vrot.slane %v16682_v49, 2  ;;  %v2202_v44 = vrot.slane %v6898_v3, 4  ;;  %v16689_v63 = vld [vmem:[#allocation74_spill] sm:$0xff] }
 0x164   : > { %v1726_v4 = vadd.f32 %v1710_v2, %v1652_v34  ;;  %16684 = vst [vmem:[#allocation71_spill] sm:$0xff] %v10610_v12  ;;  %v16686_v2 = vld [vmem:[#allocation88_spill] sm:$0xff]  ;;  %v1993_v45 = vmul.f32 %v16689_v63, %v10610_v12 }
 0x165   : > { %v790_v6 = vadd.f32 %v774_v13, %v715_v27  ;;  %v910_v34 = vmul.f32 %v9719_v29, %v16686_v2  ;;  %v10620_v30 = vsel %vm524_vm1, %v16687_v14, %v2038_v17  ;;  %v16691_v13 = vrot.slane %v16682_v49, 3  ;;  %v16693_v17 = vld [vmem:[#allocation90_spill] sm:$0xff]  ;;  %v6924_v12 = vld [vmem:[%s8415_s9 + $0xa0] sm:$0xff] }
 0x166   : > { %v1800_v25 = vadd.f32 %v1784_v41, %v1726_v4  ;;  %16688 = vst [vmem:[#allocation41_spill] sm:$0xff] %v10620_v30  ;;  %v16690_v4 = vld [vmem:[#allocation81_spill] sm:$0xff]  ;;  %v2276_v27 = vrot.slane %v6898_v3, 5  ;;  %v2067_v14 = vmul.f32 %v16693_v17, %v10620_v30 }
 0x167   : > { %v865_v41 = vadd.f32 %v849_v55, %v790_v6  ;;  %v984_v23 = vmul.f32 %v9740_v24, %v16690_v4  ;;  %v10630_v29 = vsel %vm599_vm2, %v16691_v13, %v2112_v50  ;;  %v16695_v55 = vrot.slane %v16682_v49, 4  ;;  %v16697_v50 = vld [vmem:[#allocation52_spill] sm:$0xff] }
 0x168   : > { %v1874_v0 = vadd.f32 %v1858_v39, %v1800_v25  ;;  %16692 = vst [vmem:[#allocation66_spill] sm:$0xff] %v10630_v29  ;;  %v16694_v39 = vld [vmem:[#allocation83_spill] sm:$0xff]  ;;  %v2350_v6 = vrot.slane %v6898_v3, 6  ;;  %v2157_v13 = vmul.f32 %v16697_v50, %v10630_v29 }
 0x169   : > { %v926_v48 = vadd.f32 %v910_v34, %v865_v41  ;;  %v1058_v25 = vmul.f32 %v9762_v54, %v16694_v39  ;;  %v10640_v24 = vsel %vm674_vm3, %v16695_v55, %v2202_v44  ;;  %v16699_v34 = vrot.slane %v16682_v49, 5  ;;  %v16701_v44 = vld [vmem:[#allocation92_spill] sm:$0xff] }
 0x16a   : > { %v1935_v2 = vadd.f32 %v1919_v47, %v1874_v0  ;;  %16696 = vst [vmem:[#allocation87_spill] sm:$0xff] %v10640_v24  ;;  %v16698_v0 = vld [vmem:[#allocation84_spill] sm:$0xff]  ;;  %v2231_v39 = vmul.f32 %v16701_v44, %v10640_v24  ;;  %v16703_v55 = vrot.slane %v16682_v49, 6  ;;  %v16708_v49 = vld [vmem:[#allocation82_spill] sm:$0xff] }
 0x16b   : > { %v1000_v47 = vadd.f32 %v984_v23, %v926_v48  ;;  %v1132_v30 = vmul.f32 %v9783_v60, %v16698_v0  ;;  %v10651_v54 = vsel %vm749_vm4, %v16699_v34, %v2276_v27  ;;  %v2485_v60 = vrot.slane %v6924_v12, 1  ;;  %v16705_v27 = vld [vmem:[#allocation93_spill] sm:$0xff] }
 0x16c   : > { %v2009_v4 = vadd.f32 %v1993_v45, %v1935_v2  ;;  %16700 = vst [vmem:[#allocation67_spill] sm:$0xff] %v10651_v54  ;;  %v16702_v45 = vld [vmem:[#allocation72_spill] sm:$0xff]  ;;  %v10661_v48 = vsel %vm824_vm5, %v16703_v55, %v2350_v6  ;;  %v2559_v23 = vrot.slane %v6924_v12, 2  ;;  %v2305_v34 = vmul.f32 %v16705_v27, %v10651_v54  ;;  %v16709_v6 = vld [vmem:[#allocation95_spill] sm:$0xff] }
 0x16d   : > { %v1074_v3 = vadd.f32 %v1058_v25, %v1000_v47  ;;  %v1206_v2 = vmul.f32 %v16646_v38, %v16702_v45  ;;  %16704 = vst [vmem:[#allocation76_spill] sm:$0xff] %v10661_v48  ;;  %v16707_v47 = vld [vmem:[#allocation94_spill] sm:$0xff]  ;;  %v1354_v29 = vmul.f32 %v16652_v46, %v16708_v49  ;;  %v2440_v55 = vmul.f32 %v16709_v6, %v10147_v40  ;;  %v16713_v49 = vld [vmem:[#allocation89_spill] sm:$0xff] }
 0x16e   : > { %v2083_v41 = vadd.f32 %v2067_v14, %v2009_v4  ;;  %v16706_v4 = vld [vmem:[#allocation38_spill] sm:$0xff]  ;;  %v2379_v38 = vmul.f32 %v16707_v47, %v10661_v48 }
 0x16f   : > { %v1148_v14 = vadd.f32 %v1132_v30, %v1074_v3  ;;  %v1280_v24 = vmul.f32 %v16649_v43, %v16706_v4  ;;  %v16711_v30 = vrot.slane %v10147_v40, 2 }
 0x170   : > { %v2173_v0 = vadd.f32 %v2157_v13, %v2083_v41  ;;  %v16710_v13 = vrot.slane %v10147_v40, 1 }
 0x171   : > { %v1222_v45 = vadd.f32 %v1206_v2, %v1148_v14  ;;  %v10683_v43 = vsel %vm524_vm1, %v16711_v30, %v2559_v23  ;;  %v2707_v2 = vrot.slane %v6924_v12, 4  ;;  %v16716_v30 = vrot.slane %v10147_v40, 3 }
 0x172   : > { %v2247_v25 = vadd.f32 %v2231_v39, %v2173_v0  ;;  %v10677_v41 = vsel %vm449_vm0, %v16710_v13, %v2485_v60  ;;  %v2633_v39 = vrot.slane %v6924_v12, 3  ;;  %v16712_v0 = vld [vmem:[#allocation86_spill] sm:$0xff]  ;;  %v16714_v13 = vld [vmem:[#allocation23_spill] sm:$0xff]  ;;  %v2588_v23 = vmul.f32 %v16715_v28, %v10683_v43 }
 0x173   : > { %v1296_v46 = vadd.f32 %v1280_v24, %v1222_v45  ;;  %v1415_v14 = vmul.f32 %v16656_v26, %v16712_v0  ;;  %v2514_v48 = vmul.f32 %v16713_v49, %v10677_v41  ;;  %v1489_v54 = vmul.f32 %v16657_v61, %v16714_v13  ;;  %v16719_v61 = vld [vmem:[#allocation33_spill] sm:$0xff] }
 0x174   : > { %v2321_v3 = vadd.f32 %v2305_v34, %v2247_v25  ;;  %v10697_v34 = vsel %vm599_vm2, %v16716_v30, %v2633_v39  ;;  %v2781_v24 = vrot.slane %v6924_v12, 5  ;;  %v2855_v25 = vrot.slane %v6924_v12, 6  ;;  %v16720_v30 = vld [vmem:[#allocation25_spill] sm:$0xff] }
 0x175   : > { %v1370_v60 = vadd.f32 %v1354_v29, %v1296_v46  ;;  %16717 = vst [vmem:[#allocation85_spill] sm:$0xff] %v10697_v34  ;;  %v6950_v46 = vld [vmem:[%s8415_s9 + $0xb8] sm:$0xff]  ;;  %v2662_v13 = vmul.f32 %v10091_v53, %v10697_v34  ;;  %v1637_v12 = vmul.f32 %v16669_v7, %v16720_v30  ;;  %v16725_v30 = vld [vmem:[#allocation36_spill] sm:$0xff] }
 0x176   : > { %v2395_v4 = vadd.f32 %v2379_v38, %v2321_v3  ;;  %v16718_v38 = vrot.slane %v10147_v40, 4  ;;  %v1563_v3 = vmul.f32 %v16664_v5, %v16719_v61  ;;  %v16722_v5 = vrot.slane %v10147_v40, 6 }
 0x177   : > { %v1431_v45 = vadd.f32 %v1415_v14, %v1370_v60 }
 0x178   : > { %v2456_v26 = vadd.f32 %v2440_v55, %v2395_v4  ;;  %v10703_v29 = vsel %vm674_vm3, %v16718_v38, %v2707_v2  ;;  %v16721_v4 = vrot.slane %v10147_v40, 5 }
 0x179   : > { %v1505_v39 = vadd.f32 %v1489_v54, %v1431_v45  ;;  %v2736_v55 = vmul.f32 %v10097_v9, %v10703_v29  ;;  %v2990_v54 = vrot.slane %v6950_v46, 1 }
 0x17a   : > { %v2530_v0 = vadd.f32 %v2514_v48, %v2456_v26  ;;  %v10718_v2 = vsel %vm749_vm4, %v16721_v4, %v2781_v24  ;;  %v10724_v48 = vsel %vm824_vm5, %v16722_v5, %v2855_v25  ;;  %v16724_v26 = vld [vmem:[#allocation28_spill] sm:$0xff]  ;;  %v1785_v24 = vmul.f32 %v16678_v59, %v16725_v30 }
 0x17b   : > { %16723 = vst [vmem:[#allocation91_spill] sm:$0xff] %v10724_v48  ;;  %v1579_v60 = vadd.f32 %v1563_v3, %v1505_v39  ;;  %v1711_v7 = vmul.f32 %v16674_v20, %v16724_v26  ;;  %v2810_v45 = vmul.f32 %v10111_v51, %v10718_v2  ;;  %v2884_v40 = vmul.f32 %v10115_v16, %v10724_v48 }
 0x17c   : > { %v2604_v14 = vadd.f32 %v2588_v23, %v2530_v0  ;;  %v3064_v4 = vrot.slane %v6950_v46, 2  ;;  %v3138_v25 = vrot.slane %v6950_v46, 3  ;;  %v16726_v23 = vrot.slane %v10249_v58, 1  ;;  %v16728_v0 = vld [vmem:[#allocation31_spill] sm:$0xff] }
 0x17d   : > { %v1653_v61 = vadd.f32 %v1637_v12, %v1579_v60  ;;  %v2945_v59 = vmul.f32 %v10150_v57, %v10249_v58  ;;  %v16729_v12 = vld [vmem:[#allocation37_spill] sm:$0xff]  ;;  %v16731_v26 = vrot.slane %v10249_v58, 2 }
 0x17e   : > { %v2678_v38 = vadd.f32 %v2662_v13, %v2604_v14  ;;  %v10738_v3 = vsel %vm449_vm0, %v16726_v23, %v2990_v54  ;;  %v1859_v13 = vmul.f32 %v16680_v37, %v16728_v0  ;;  %v1920_v14 = vmul.f32 %v16685_v42, %v16729_v12  ;;  %v16735_v12 = vld [vmem:[#allocation35_spill] sm:$0xff] }
 0x17f   : > { %16727 = vst [vmem:[#allocation77_spill] sm:$0xff] %v10738_v3  ;;  %v1727_v20 = vadd.f32 %v1711_v7, %v1653_v61  ;;  %v10752_v54 = vsel %vm524_vm1, %v16731_v26, %v3064_v4  ;;  %v16732_v7 = vrot.slane %v10249_v58, 3  ;;  %v3286_v61 = vrot.slane %v6950_v46, 5 }
 0x180   : > { %v2752_v5 = vadd.f32 %v2736_v55, %v2678_v38  ;;  %v16730_v55 = vld [vmem:[#allocation27_spill] sm:$0xff]  ;;  %v3212_v38 = vrot.slane %v6950_v46, 4  ;;  %v2068_v26 = vmul.f32 %v16693_v17, %v16735_v12  ;;  %v16739_v17 = vld [vmem:[#allocation24_spill] sm:$0xff] }
 0x181   : > { %v1801_v30 = vadd.f32 %v1785_v24, %v1727_v20  ;;  %v3019_v60 = vmul.f32 %v16730_v55, %v10738_v3  ;;  %v10758_v37 = vsel %vm599_vm2, %v16732_v7, %v3138_v25  ;;  %v16733_v24 = vld [vmem:[#allocation45_spill] sm:$0xff]  ;;  %v16734_v20 = vld [vmem:[#allocation42_spill] sm:$0xff]  ;;  %v16736_v3 = vld [vmem:[#allocation43_spill] sm:$0xff]  ;;  %v16737_v25 = vrot.slane %v10249_v58, 4 }
 0x182   : > { %v2826_v39 = vadd.f32 %v2810_v45, %v2752_v5  ;;  %v1994_v5 = vmul.f32 %v16689_v63, %v16733_v24  ;;  %v3093_v0 = vmul.f32 %v16734_v20, %v10752_v54  ;;  %v3167_v48 = vmul.f32 %v16736_v3, %v10758_v37 }
 0x183   : > { %v1875_v42 = vadd.f32 %v1859_v13, %v1801_v30  ;;  %v3360_v13 = vrot.slane %v6950_v46, 6  ;;  %v16738_v63 = vrot.slane %v10249_v58, 5  ;;  %v6976_v30 = vld [vmem:[%s8415_s9 + $0xd0] sm:$0xff]  ;;  %v2158_v7 = vmul.f32 %v16697_v50, %v16739_v17 }
 0x184   : > { %v2900_v45 = vadd.f32 %v2884_v40, %v2826_v39  ;;  %v10772_v40 = vsel %vm674_vm3, %v16737_v25, %v3212_v38  ;;  %v16741_v38 = vld [vmem:[#allocation39_spill] sm:$0xff]  ;;  %v3569_v50 = vrot.slane %v6976_v30, 2 }
 0x185   : > { %v1936_v4 = vadd.f32 %v1920_v14, %v1875_v42  ;;  %v16740_v42 = vld [vmem:[#allocation34_spill] sm:$0xff]  ;;  %v2232_v46 = vmul.f32 %v16701_v44, %v16741_v38  ;;  %v16743_v25 = vld [vmem:[#allocation55_spill] sm:$0xff] }
 0x186   : > { %v2961_v23 = vadd.f32 %v2945_v59, %v2900_v45  ;;  %v10778_v59 = vsel %vm749_vm4, %v16738_v63, %v3286_v61  ;;  %v3241_v24 = vmul.f32 %v16740_v42, %v10772_v40 }
 0x187   : > { %v2010_v14 = vadd.f32 %v1994_v5, %v1936_v4  ;;  %v3495_v5 = vrot.slane %v6976_v30, 1 }
 0x188   : > { %v3035_v39 = vadd.f32 %v3019_v60, %v2961_v23  ;;  %v3315_v60 = vmul.f32 %v10195_v62, %v10778_v59  ;;  %v16742_v23 = vrot.slane %v10249_v58, 6  ;;  %v16745_v58 = vld [vmem:[#allocation46_spill] sm:$0xff] }
 0x189   : > { %v2084_v12 = vadd.f32 %v2068_v26, %v2010_v14  ;;  %v16744_v14 = vld [vmem:[#allocation57_spill] sm:$0xff]  ;;  %v3450_v17 = vmul.f32 %v16745_v58, %v10370_v33 }
 0x18a   : > { %v3109_v45 = vadd.f32 %v3093_v0, %v3035_v39  ;;  %v10793_v61 = vsel %vm824_vm5, %v16742_v23, %v3360_v13  ;;  %v2306_v39 = vmul.f32 %v16705_v27, %v16743_v25  ;;  %v2380_v38 = vmul.f32 %v16707_v47, %v16744_v14 }
 0x18b   : > { %v2174_v0 = vadd.f32 %v2158_v7, %v2084_v12  ;;  %v3389_v44 = vmul.f32 %v10199_v15, %v10793_v61  ;;  %v16746_v13 = vrot.slane %v10370_v33, 1  ;;  %v3643_v7 = vrot.slane %v6976_v30, 3 }
 0x18c   : > { %v3183_v4 = vadd.f32 %v3167_v48, %v3109_v45  ;;  %v16747_v45 = vld [vmem:[#allocation26_spill] sm:$0xff]  ;;  %v16748_v12 = vrot.slane %v10370_v33, 2  ;;  %v3717_v47 = vrot.slane %v6976_v30, 4 }
 0x18d   : > { %v2248_v63 = vadd.f32 %v2232_v46, %v2174_v0  ;;  %v10807_v48 = vsel %vm449_vm0, %v16746_v13, %v3495_v5  ;;  %v2441_v27 = vmul.f32 %v16709_v6, %v16747_v45  ;;  %v16749_v5 = vld [vmem:[#allocation48_spill] sm:$0xff]  ;;  %v16751_v13 = vld [vmem:[#allocation50_spill] sm:$0xff] }
 0x18e   : > { %v3257_v26 = vadd.f32 %v3241_v24, %v3183_v4  ;;  %v10815_v46 = vsel %vm524_vm1, %v16748_v12, %v3569_v50  ;;  %v3524_v0 = vmul.f32 %v10227_v18, %v10807_v48  ;;  %v2515_v14 = vmul.f32 %v16713_v49, %v16749_v5 }
 0x18f   : > { %v2322_v23 = vadd.f32 %v2306_v39, %v2248_v63  ;;  %v3598_v6 = vmul.f32 %v10231_v10, %v10815_v46  ;;  %v3791_v50 = vrot.slane %v6976_v30, 5  ;;  %v2589_v39 = vmul.f32 %v16715_v28, %v16751_v13 }
 0x190   : > { %v3331_v24 = vadd.f32 %v3315_v60, %v3257_v26  ;;  %v16750_v60 = vrot.slane %v10370_v33, 3  ;;  %v16752_v63 = vrot.slane %v10370_v33, 4  ;;  %v3865_v49 = vrot.slane %v6976_v30, 6 }
 0x191   : > { %v2396_v25 = vadd.f32 %v2380_v38, %v2322_v23  ;;  %v16753_v23 = vld [vmem:[#allocation40_spill] sm:$0xff] }
 0x192   : > { %v3405_v4 = vadd.f32 %v3389_v44, %v3331_v24  ;;  %v10827_v26 = vsel %vm599_vm2, %v16750_v60, %v3643_v7  ;;  %v10835_v38 = vsel %vm674_vm3, %v16752_v63, %v3717_v47  ;;  %v2663_v5 = vmul.f32 %v10091_v53, %v16753_v23  ;;  %v10881_v23 = vld [vmem:[#allocation5] ss:$0 sm:$0xff] }
 0x193   : > { %v2457_v45 = vadd.f32 %v2441_v27, %v2396_v25  ;;  %v3672_v7 = vmul.f32 %v10235_v35, %v10827_v26  ;;  %v3746_v28 = vmul.f32 %v10277_v32, %v10835_v38  ;;  %v16755_v27 = vrot.slane %v10370_v33, 6  ;;  %v16756_v25 = vld [vmem:[#allocation61_spill] sm:$0xff]  ;;  %16759 = vst [vmem:[#allocation74_spill] sm:$0xff] %v10881_v23 }
 0x194   : > { %v3466_v44 = vadd.f32 %v3450_v17, %v3405_v4  ;;  %v16754_v17 = vrot.slane %v10370_v33, 5  ;;  %v2737_v53 = vmul.f32 %v10097_v9, %v16756_v25  ;;  %v10865_v33 = vld [vmem:[%s8415_s9 + $0xe0] sm:$0xff]  ;;  %v2885_v9 = vmul.f32 %v10115_v16, %v10399_v8 }
 0x195   : > { %v2531_v12 = vadd.f32 %v2515_v14, %v2457_v45  ;;  %v10853_v4 = vsel %vm824_vm5, %v16755_v27, %v3865_v49  ;;  %v2946_v49 = vmul.f32 %v10150_v57, %v10336_v56  ;;  %v3020_v45 = vmul.f32 %v16730_v55, %v10426_v31  ;;  %v10885_v8 = vld [vmem:[#allocation5 + $0x1] ss:$0 sm:$0xff]  ;;  %v10901_v25 = vld [vmem:[#allocation5 + $0x2] ss:$0 sm:$0xff] }
 0x196   : > { %v3540_v24 = vadd.f32 %v3524_v0, %v3466_v44  ;;  %v10847_v47 = vsel %vm749_vm4, %v16754_v17, %v3791_v50  ;;  %v2811_v50 = vmul.f32 %v10111_v51, %v10359_v19  ;;  %v3894_v44 = vmul.f32 %v10287_v11, %v10853_v4  ;;  %16760 = vst [vmem:[#allocation81_spill] sm:$0xff] %v10885_v8  ;;  %v16763_v27 = vld [vmem:[#allocation63_spill] sm:$0xff] }
 0x197   : > { %v2605_v0 = vadd.f32 %v2589_v39, %v2531_v12  ;;  %v3820_v60 = vmul.f32 %v10281_v22, %v10847_v47  ;;  %v3094_v51 = vmul.f32 %v16734_v20, %v10439_v21  ;;  %v475_v57 = vmul.f32 %v10885_v8, %v10432_v36  ;;  %16764 = vst [vmem:[#allocation52_spill] sm:$0xff] %v10901_v25 }
 0x198   : > { %v3614_v30 = vadd.f32 %v3598_v6, %v3540_v24  ;;  %v10862_v6 = vld [vmem:[%s8415_s9 + $0xd8] sm:$0xff]  ;;  %v10879_v24 = vrot.slane %v10865_v33, 1  ;;  %v10891_v31 = vrot.slane %v10865_v33, 2  ;;  %v10895_v55 = vrot.slane %v10865_v33, 3 }
 0x199   : > { %v2679_v13 = vadd.f32 %v2663_v5, %v2605_v0  ;;  %16757 = vst [vmem:[#allocation73_spill] sm:$0xff] %v10862_v6  ;;  %v3480_v19 = vrot.slane %v10862_v6, 1  ;;  %v7743_v5 = vld [vmem:[%s8415_s9 + $0x50] sm:$0xff]  ;;  %v3554_v56 = vrot.slane %v10862_v6, 2  ;;  %v3628_v21 = vrot.slane %v10862_v6, 3 }
 0x19a   : > { %v3688_v14 = vadd.f32 %v3672_v7, %v3614_v30  ;;  %16758 = vst [vmem:[#allocation88_spill] sm:$0xff] %v10879_v24  ;;  %v414_v16 = vmul.f32 %v7743_v5, %v10881_v23  ;;  %v3168_v30 = vmul.f32 %v16736_v3, %v10456_v52  ;;  %v3242_v36 = vmul.f32 %v16740_v42, %v16763_v27  ;;  %v16770_v52 = vld [vmem:[#allocation62_spill] sm:$0xff]  ;;  %v10915_v42 = vld [vmem:[%s8415_s9 + $0x60] sm:$0xff]  ;;  %v16778_v27 = vld [vmem:[#allocation65_spill] sm:$0xff] }
 0x19b   : > { %v2753_v63 = vadd.f32 %v2737_v53, %v2679_v13  ;;  %16761 = vst [vmem:[#allocation90_spill] sm:$0xff] %v10891_v31  ;;  %v8200_v0 = vmov 128.0   ;;  %v16765_v53 = vld [vmem:[#allocation54_spill] sm:$0xff] }
 0x19c   : > { %v3762_v39 = vadd.f32 %v3746_v28, %v3688_v14  ;;  %16762 = vst [vmem:[#allocation83_spill] sm:$0xff] %v10895_v55  ;;  %v491_v17 = vadd.f32 %v475_v57, %v414_v16  ;;  %7524 = vrcp.f32 %v8200_v0  ;;  %v550_v14 = vmul.f32 %v10901_v25, %v16765_v53 }
 0x19d   : > { %v2827_v12 = vadd.f32 %v2811_v50, %v2753_v63  ;;  %v10910_v63 = vld [vmem:[#allocation5 + $0x3] ss:$0 sm:$0xff]  ;;  %v10933_v16 = vsel %vm524_vm1, %v3554_v56, %v10891_v31  ;;  %v10938_v57 = vsel %vm599_vm2, %v3628_v21, %v10895_v55  ;;  %v10975_v53 = vrot.slane %v10865_v33, 5 }
 0x19e   : > { %v3836_v7 = vadd.f32 %v3820_v60, %v3762_v39  ;;  %v16766_v60 = vld [vmem:[#allocation51_spill] sm:$0xff]  ;;  %16769 = vst [vmem:[#allocation92_spill] sm:$0xff] %v10910_v63  ;;  %v625_v3 = vmul.f32 %v10910_v63, %v16770_v52  ;;  %v579_v55 = vrot.slane %v10915_v42, 3 }
 0x19f   : > { %v2901_v28 = vadd.f32 %v2885_v9, %v2827_v12  ;;  %v10918_v9 = vld [vmem:[%s8415_s9 + $0x68] sm:$0xff]  ;;  %v3702_v12 = vrot.slane %v10862_v6, 4  ;;  %16774 = vst [vmem:[#allocation94_spill] sm:$0xff] %v10933_v16 }
 0x1a0   : > { %v3910_v20 = vadd.f32 %v3894_v44, %v3836_v7  ;;  %v16768_v44 = vld [vmem:[#allocation32_spill] sm:$0xff]  ;;  %16771 = vst [vmem:[#allocation72_spill] sm:$0xff] %v10918_v9  ;;  %v10923_v7 = vsel %vm449_vm0, %v3480_v19, %v10879_v24 }
 0x1a1   : > { %v2962_v50 = vadd.f32 %v2946_v49, %v2901_v28  ;;  %v3316_v39 = vmul.f32 %v10195_v62, %v16768_v44  ;;  %16772 = vst [vmem:[#allocation93_spill] sm:$0xff] %v10923_v7  ;;  %v10927_v49 = vrot.slane %v10865_v33, 4  ;;  %v566_v62 = vadd.f32 %v550_v14, %v491_v17  ;;  %v10940_v19 = vld [vmem:[#allocation5 + $0x4] ss:$0 sm:$0xff] }
 0x1a2   : > { %v10906_v13 = vadd.f32 %v16766_v60, %v3910_v20  ;;  %16775 = vst [vmem:[#allocation82_spill] sm:$0xff] %v10938_v57  ;;  %v16777_v20 = vld [vmem:[#allocation29_spill] sm:$0xff]  ;;  %v3390_v17 = vmul.f32 %v10199_v15, %v16778_v27  ;;  %v3451_v14 = vmul.f32 %v16745_v58, %v10862_v6  ;;  %v3525_v21 = vmul.f32 %v10227_v18, %v10923_v7  ;;  %v16780_v44 = vld [vmem:[#allocation96_spill] sm:$0xff] }
 0x1a3   : > { %16773 = vst [vmem:[#allocation38_spill] sm:$0xff] %v10927_v49  ;;  %v3036_v5 = vadd.f32 %v3020_v45, %v2962_v50  ;;  %v700_v28 = vmul.f32 %v10940_v19, %v16777_v20  ;;  %v641_v0 = vadd.f32 %v625_v3, %v566_v62  ;;  %v427_v45 = vrot.slane %v10915_v42, 1  ;;  %v10952_v50 = vld [vmem:[#allocation5 + $0x5] ss:$0 sm:$0xff]  ;;  %v7525_v20 = vpop.eup %7524  ;;  %v10970_v27 = vld [vmem:[#allocation5 + $0x6] ss:$0 sm:$0xff] }
 0x1a4   : > { %16767 = vst [vmem:[#allocation84_spill] sm:$0xff] %v10906_v13  ;;  %3951 = vadd.xlane.f32.xlu2 %v10906_v13  ;;  %v775_v52 = vmul.f32 %v10952_v50, %v16780_v44  ;;  %v10958_v15 = vmul.f32 %v10231_v10, %v10933_v16  ;;  %v10967_v58 = vsel %vm674_vm3, %v3702_v12, %v10927_v49  ;;  %v3776_v62 = vrot.slane %v10862_v6, 5  ;;  %v16783_v44 = vld [vmem:[#allocation58_spill] sm:$0xff]  ;;  %v10977_v13 = vld [vmem:[#allocation5 + $0x7] ss:$0 sm:$0xff] }
 0x1a5   : > { %16776 = vst [vmem:[#allocation95_spill] sm:$0xff] %v10940_v19  ;;  %v3110_v56 = vadd.f32 %v3094_v51, %v3036_v5  ;;  %v10962_v51 = vmul.f32 %v10235_v35, %v10938_v57  ;;  %v716_v18 = vadd.f32 %v700_v28, %v641_v0  ;;  %v3974_v5 = vmul.f32 128.0, %v7525_v20  ;;  %v7751_v57 = vld [vmem:[%s8415_s9 + $0x68] sm:$0xff] }
 0x1a6   : > { %16779 = vst [vmem:[#allocation86_spill] sm:$0xff] %v10952_v50  ;;  %v850_v10 = vmul.f32 %v10970_v27, %v16783_v44  ;;  %v911_v12 = vmul.f32 %v7751_v57, %v10977_v13  ;;  %v16786_v28 = vrot.slane %v10918_v9, 1  ;;  %v10987_v16 = vrot.slane %v10865_v33, 6  ;;  %v10989_v49 = vld [vmem:[#allocation5 + $0x8] ss:$0 sm:$0xff] }
 0x1a7   : > { %16781 = vst [vmem:[#allocation89_spill] sm:$0xff] %v10967_v58  ;;  %v3184_v3 = vadd.f32 %v3168_v30, %v3110_v56  ;;  %v791_v35 = vadd.f32 %v775_v52, %v716_v18  ;;  %v3850_v56 = vrot.slane %v10862_v6, 6  ;;  %v3975_v44 = vsub.f32 1.0, %v3974_v5  ;;  %v16789_v52 = vld [vmem:[#allocation30_spill] sm:$0xff]  ;;  %v11032_v6 = vld [vmem:[#allocation5 + $0xb] ss:$0 sm:$0xff] }
 0x1a8   : > { %16782 = vst [vmem:[#allocation23_spill] sm:$0xff] %v10970_v27  ;;  %v462_v30 = vsel %vm449_vm0, %v427_v45, %v16786_v28  ;;  %v985_v18 = vmul.f32 %v10989_v49, %v16789_v52  ;;  %v504_v57 = vrot.slane %v10915_v42, 2  ;;  %vm3978_vm6 = vweird.f32 %v7525_v20 }
 0x1a9   : > { %16784 = vst [vmem:[#allocation80_spill] sm:$0xff] %v10975_v53  ;;  %v3258_v0 = vadd.f32 %v3242_v36, %v3184_v3  ;;  %v866_v7 = vadd.f32 %v850_v10, %v791_v35  ;;  %v3976_v24 = vmul.f32 %v7525_v20, %v3975_v44  ;;  %v415_v36 = vmul.f32 %v10881_v23, %v10915_v42  ;;  %v11003_v10 = vld [vmem:[#allocation5 + $0x9] ss:$0 sm:$0xff]  ;;  %v16792_v35 = vld [vmem:[#allocation70_spill] sm:$0xff]  ;;  %v3942_v44 = vpop.xlane.xlu0 %3941 }
 0x1aa   : > { %16785 = vst [vmem:[#allocation33_spill] sm:$0xff] %v10977_v13  ;;  %v476_v45 = vmul.f32 %v10885_v8, %v462_v30  ;;  %v11001_v3 = vsel %vm749_vm4, %v3776_v62, %v10975_v53  ;;  %v1059_v28 = vmul.f32 %v11003_v10, %v16792_v35  ;;  %v11014_v62 = vsel %vm824_vm5, %v3850_v56, %v10987_v16  ;;  %v16795_v8 = vld [vmem:[#allocation59_spill] sm:$0xff] }
 0x1ab   : > { %16787 = vst [vmem:[#allocation28_spill] sm:$0xff] %v10987_v16  ;;  %v3332_v31 = vadd.f32 %v3316_v39, %v3258_v0  ;;  %v927_v5 = vadd.f32 %v911_v12, %v866_v7  ;;  %v3977_v39 = vadd.f32 %v7525_v20, %v3976_v24  ;;  %v11007_v0 = vpop.xlane.xlu1 %3945  ;;  %v11016_v12 = vld [vmem:[#allocation5 + $0xa] ss:$0 sm:$0xff]  ;;  %v16796_v24 = vrot.slane %v10918_v9, 2 }
 0x1ac   : > { %16788 = vst [vmem:[#allocation36_spill] sm:$0xff] %v10989_v49  ;;  %v1133_v35 = vmul.f32 %v11016_v12, %v16795_v8  ;;  %v3747_v30 = vmul.f32 %v10277_v32, %v10967_v58  ;;  %v492_v56 = vadd.f32 %v476_v45, %v415_v36  ;;  %v16799_v16 = vld [vmem:[#allocation68_spill] sm:$0xff]  ;;  %v3895_v32 = vmul.f32 %v10287_v11, %v11014_v62 }
 0x1ad   : > { %16790 = vst [vmem:[#allocation31_spill] sm:$0xff] %v11001_v3  ;;  %v3406_v52 = vadd.f32 %v3390_v17, %v3332_v31  ;;  %v1001_v7 = vadd.f32 %v985_v18, %v927_v5  ;;  %v537_v31 = vsel %vm524_vm1, %v504_v57, %v16796_v24  ;;  %v11027_v23 = vsel %vm3978_vm6, %v7525_v20, %v3977_v39  ;;  %v16801_v45 = vld [vmem:[#allocation64_spill] sm:$0xff]  ;;  %v11046_v39 = vld [vmem:[#allocation5 + $0xc] ss:$0 sm:$0xff] }
 0x1ae   : > { %16791 = vst [vmem:[#allocation37_spill] sm:$0xff] %v11003_v10  ;;  %v3821_v18 = vmul.f32 %v10281_v22, %v11001_v3  ;;  %v3980_v5 = vmul.f32 %v11027_v23, %v3942_v44  ;;  %v1207_v57 = vmul.f32 %v11032_v6, %v16799_v16  ;;  %v551_v20 = vmul.f32 %v10901_v25, %v537_v31  ;;  %v16804_v44 = vld [vmem:[#allocation69_spill] sm:$0xff] }
 0x1af   : > { %16793 = vst [vmem:[#allocation27_spill] sm:$0xff] %v11014_v62  ;;  %v3467_v17 = vadd.f32 %v3451_v14, %v3406_v52  ;;  %v1075_v8 = vadd.f32 %v1059_v28, %v1001_v7  ;;  %v16800_v36 = vrot.slane %v10918_v9, 3  ;;  %v1281_v16 = vmul.f32 %v11046_v39, %v16804_v44  ;;  %v16806_v7 = vld [vmem:[#allocation75_spill] sm:$0xff]  ;;  %v11055_v31 = vld [vmem:[#allocation5 + $0xe] ss:$0 sm:$0xff] }
 0x1b0   : > { %16794 = vst [vmem:[#allocation45_spill] sm:$0xff] %v11016_v12  ;;  %v11044_v52 = vsub.f32 %v16801_v45, %v3980_v5  ;;  %v567_v5 = vadd.f32 %v551_v20, %v492_v56  ;;  %v11062_v45 = vld [vmem:[#allocation5 + $0xf] ss:$0 sm:$0xff]  ;;  %v16809_v44 = vld [vmem:[#allocation71_spill] sm:$0xff]  ;;  %v16813_v56 = vld [vmem:[#allocation66_spill] sm:$0xff]  ;;  %v15820_v3 = vrot.slane %v10918_v9, 6 }
 0x1b1   : > { %16797 = vst [vmem:[#allocation42_spill] sm:$0xff] %v11027_v23  ;;  %v3541_v14 = vadd.f32 %v3525_v21, %v3467_v17  ;;  %v612_v22 = vsel %vm599_vm2, %v579_v55, %v16800_v36  ;;  %v1149_v28 = vadd.f32 %v1133_v35, %v1075_v8  ;;  %v11050_v21 = vld [vmem:[#allocation5 + $0xd] ss:$0 sm:$0xff]  ;;  %v7759_v17 = vld [vmem:[%s8415_s9 + $0x80] sm:$0xff]  ;;  %v1490_v25 = vmul.f32 %v11062_v45, %v16809_v44 }
 0x1b2   : > { %16798 = vst [vmem:[#allocation35_spill] sm:$0xff] %v11032_v6  ;;  %v1355_v11 = vmul.f32 %v11050_v21, %v16806_v7  ;;  %v1416_v55 = vmul.f32 %v7759_v17, %v11055_v31  ;;  %v626_v35 = vmul.f32 %v10910_v63, %v612_v22  ;;  %v4012_v8 = vmul.f32 %v11044_v52, %v11044_v52  ;;  %v11066_v7 = vld [vmem:[#allocation5 + $0x10] ss:$0 sm:$0xff]  ;;  %v11071_v17 = vld [vmem:[#allocation5 + $0x11] ss:$0 sm:$0xff] }
 0x1b3   : > { %16802 = vst [vmem:[#allocation43_spill] sm:$0xff] %v11044_v52  ;;  %v3615_v24 = vadd.f32 %v10958_v15, %v3541_v14  ;;  %v1223_v36 = vadd.f32 %v1207_v57, %v1149_v28  ;;  %v16811_v15 = vld [vmem:[#allocation41_spill] sm:$0xff]  ;;  %v1638_v20 = vmul.f32 %v11071_v17, %v16813_v56  ;;  %v654_v22 = vrot.slane %v10915_v42, 4 }
 0x1b4   : > { %16803 = vst [vmem:[#allocation34_spill] sm:$0xff] %v11046_v39  ;;  %v1564_v14 = vmul.f32 %v11066_v7, %v16811_v15  ;;  %v15810_v57 = vrot.slane %v10918_v9, 4  ;;  %4028 = vadd.xlane.f32.xlu0 %v4012_v8  ;;  %v642_v44 = vadd.f32 %v626_v35, %v567_v5  ;;  %v729_v52 = vrot.slane %v10915_v42, 5  ;;  %v11085_v8 = vld [vmem:[#allocation5 + $0x12] ss:$0 sm:$0xff] }
 0x1b5   : > { %16805 = vst [vmem:[#allocation39_spill] sm:$0xff] %v11050_v21  ;;  %v3689_v62 = vadd.f32 %v10962_v51, %v3615_v24  ;;  %v1297_v28 = vadd.f32 %v1281_v16, %v1223_v36  ;;  %v15811_v15 = vrot.slane %v10918_v9, 5  ;;  %v3948_v51 = vpop.xlane.xlu1 %3947  ;;  %v804_v56 = vrot.slane %v10915_v42, 6  ;;  %v16815_v16 = vld [vmem:[#allocation87_spill] sm:$0xff]  ;;  %v11116_v9 = vld [vmem:[#allocation5 + $0x14] ss:$0 sm:$0xff] }
 0x1b6   : > { %16807 = vst [vmem:[#allocation55_spill] sm:$0xff] %v11055_v31  ;;  %v687_v24 = vsel %vm674_vm3, %v654_v22, %v15810_v57  ;;  %v1712_v5 = vmul.f32 %v11085_v8, %v16815_v16  ;;  %v11098_v36 = vld [vmem:[%s8415_s9 + $0x80] sm:$0xff]  ;;  %v11100_v22 = vld [vmem:[#allocation5 + $0x13] ss:$0 sm:$0xff]  ;;  %v3983_v16 = vmul.f32 %v11027_v23, %v3948_v51 }
 0x1b7   : > { %16808 = vst [vmem:[#allocation57_spill] sm:$0xff] %v11062_v45  ;;  %v3763_v63 = vadd.f32 %v3747_v30, %v3689_v62  ;;  %v1371_v58 = vadd.f32 %v1355_v11, %v1297_v28  ;;  %v701_v35 = vmul.f32 %v10940_v19, %v687_v24  ;;  %v762_v30 = vsel %vm749_vm4, %v729_v52, %v15811_v15  ;;  %v11095_v62 = vld [vmem:[%s8415_s9 + $0x78] sm:$0xff] }
 0x1b8   : > { %16810 = vst [vmem:[#allocation46_spill] sm:$0xff] %v11066_v7  ;;  %v16817_v11 = vld [vmem:[#allocation67_spill] sm:$0xff]  ;;  %v776_v57 = vmul.f32 %v10952_v50, %v762_v30  ;;  %v837_v24 = vsel %vm824_vm5, %v804_v56, %v15820_v3  ;;  %v1014_v30 = vrot.slane %v11095_v62, 2  ;;  %v16820_v50 = vld [vmem:[#allocation76_spill] sm:$0xff]  ;;  %v1310_v3 = vrot.slane %v11095_v62, 6 }
 0x1b9   : > { %16812 = vst [vmem:[#allocation26_spill] sm:$0xff] %v11071_v17  ;;  %v3837_v42 = vadd.f32 %v3821_v18, %v3763_v63  ;;  %v1786_v28 = vmul.f32 %v11100_v22, %v16817_v11  ;;  %v1432_v52 = vadd.f32 %v1416_v55, %v1371_v58  ;;  %v717_v15 = vadd.f32 %v701_v35, %v642_v44  ;;  %v16823_v35 = vld [vmem:[#allocation79_spill] sm:$0xff] }
 0x1ba   : > { %16814 = vst [vmem:[#allocation48_spill] sm:$0xff] %v11085_v8  ;;  %v851_v19 = vmul.f32 %v10970_v27, %v837_v24  ;;  %v940_v63 = vrot.slane %v11095_v62, 1  ;;  %v11113_v18 = vrot.slane %v11098_v36, 1  ;;  %v1860_v56 = vmul.f32 %v11116_v9, %v16820_v50  ;;  %v11236_v27 = vld [vmem:[#allocation5 + $0x1d] ss:$0 sm:$0xff] }
 0x1bb   : > { %16816 = vst [vmem:[#allocation50_spill] sm:$0xff] %v11100_v22  ;;  %v3911_v53 = vadd.f32 %v3895_v32, %v3837_v42  ;;  %v1506_v11 = vadd.f32 %v1490_v25, %v1432_v52  ;;  %v792_v51 = vadd.f32 %v776_v57, %v717_v15  ;;  %v912_v58 = vmul.f32 %v10977_v13, %v11095_v62  ;;  %v11135_v57 = vld [vmem:[#allocation5 + $0x15] ss:$0 sm:$0xff]  ;;  %v7767_v15 = vld [vmem:[%s8415_s9 + $0x98] sm:$0xff] }
 0x1bc   : > { %16818 = vst [vmem:[#allocation40_spill] sm:$0xff] %v11113_v18  ;;  %v972_v55 = vsel %vm449_vm0, %v940_v63, %v11113_v18  ;;  %v11129_v44 = vrot.slane %v11098_v36, 2  ;;  %v1088_v25 = vrot.slane %v11095_v62, 3  ;;  %v11133_v42 = vsub.f32 %v16823_v35, %v3983_v16  ;;  %v7775_v13 = vld [vmem:[%s8415_s9 + $0xb0] sm:$0xff] }
 0x1bd   : > { %16819 = vst [vmem:[#allocation61_spill] sm:$0xff] %v11116_v9  ;;  %v11123_v32 = vadd.f32 %v16766_v60, %v3911_v53  ;;  %v1580_v50 = vadd.f32 %v1564_v14, %v1506_v11  ;;  %v1921_v24 = vmul.f32 %v7767_v15, %v11135_v57  ;;  %v867_v60 = vadd.f32 %v851_v19, %v792_v51 }
 0x1be   : > { %16822 = vst [vmem:[#allocation54_spill] sm:$0xff] %v11129_v44  ;;  %v986_v53 = vmul.f32 %v10989_v49, %v972_v55  ;;  %v1046_v52 = vsel %vm524_vm1, %v1014_v30, %v11129_v44  ;;  %v11145_v63 = vrot.slane %v11098_v36, 3  ;;  %v1162_v14 = vrot.slane %v11095_v62, 4 }
 0x1bf   : > { %16821 = vst [vmem:[#allocation63_spill] sm:$0xff] %v11123_v32  ;;  %3953 = vadd.xlane.f32.xlu2 %v11123_v32  ;;  %v3982_v16 = vmul.f32 %v11027_v23, %v11007_v0  ;;  %v1654_v11 = vadd.f32 %v1638_v20, %v1580_v50  ;;  %v928_v35 = vadd.f32 %v912_v58, %v867_v60  ;;  %v11155_v55 = vrot.slane %v11098_v36, 4  ;;  %v11165_v60 = vld [vmem:[%s8415_s9 + $0x90] sm:$0xff] }
 0x1c0   : > { %16824 = vst [vmem:[#allocation51_spill] sm:$0xff] %v11133_v42  ;;  %v1060_v19 = vmul.f32 %v11003_v10, %v1046_v52  ;;  %v1120_v51 = vsel %vm599_vm2, %v1088_v25, %v11145_v63  ;;  %v1236_v30 = vrot.slane %v11095_v62, 5  ;;  %v11159_v15 = vrot.slane %v11098_v36, 5  ;;  %v11189_v62 = vld [vmem:[#allocation5 + $0x18] ss:$0 sm:$0xff] }
 0x1c1   : > { %16825 = vst [vmem:[#allocation32_spill] sm:$0xff] %v11135_v57  ;;  %v4015_v0 = vmul.f32 %v11133_v42, %v11133_v42  ;;  %v1728_v20 = vadd.f32 %v1712_v5, %v1654_v11  ;;  %v1002_v58 = vadd.f32 %v986_v53, %v928_v35  ;;  %v1134_v50 = vmul.f32 %v11016_v12, %v1120_v51  ;;  %v11177_v5 = vld [vmem:[#allocation5 + $0x16] ss:$0 sm:$0xff]  ;;  %v11183_v51 = vld [vmem:[%s8415_s9 + $0x98] sm:$0xff] }
 0x1c2   : > { %16826 = vst [vmem:[#allocation62_spill] sm:$0xff] %v11145_v63  ;;  %v1194_v25 = vsel %vm674_vm3, %v1162_v14, %v11155_v55  ;;  %v1268_v52 = vsel %vm749_vm4, %v1236_v30, %v11159_v15  ;;  %v11175_v32 = vrot.slane %v11098_v36, 6  ;;  %v1995_v53 = vmul.f32 %v11177_v5, %v10677_v41  ;;  %v11185_v14 = vld [vmem:[#allocation5 + $0x17] ss:$0 sm:$0xff]  ;;  %v16835_v12 = vld [vmem:[#allocation47_spill] sm:$0xff] }
 0x1c3   : > { %16827 = vst [vmem:[#allocation29_spill] sm:$0xff] %v11155_v55  ;;  %v1802_v42 = vadd.f32 %v1786_v28, %v1728_v20  ;;  %v1076_v11 = vadd.f32 %v1060_v19, %v1002_v58  ;;  %v1208_v35 = vmul.f32 %v11032_v6, %v1194_v25  ;;  %v2069_v30 = vmul.f32 %v11185_v14, %v10683_v43  ;;  %v11197_v58 = vld [vmem:[#allocation5 + $0x19] ss:$0 sm:$0xff] }
 0x1c4   : > { %16828 = vst [vmem:[#allocation65_spill] sm:$0xff] %v11159_v15  ;;  %v2159_v28 = vmul.f32 %v11189_v62, %v10697_v34  ;;  %v1342_v20 = vsel %vm824_vm5, %v1310_v3, %v11175_v32  ;;  %v1445_v41 = vrot.slane %v11165_v60, 1  ;;  %v2233_v25 = vmul.f32 %v11197_v58, %v10703_v29  ;;  %v11205_v34 = vld [vmem:[#allocation5 + $0x1a] ss:$0 sm:$0xff]  ;;  %v11363_v15 = vld [vmem:[#allocation5 + $0x29] ss:$0 sm:$0xff] }
 0x1c5   : > { %16829 = vst [vmem:[#allocation96_spill] sm:$0xff] %v11175_v32  ;;  %v1876_v19 = vadd.f32 %v1860_v56, %v1802_v42  ;;  %v1150_v6 = vadd.f32 %v1134_v50, %v1076_v11  ;;  %v1282_v43 = vmul.f32 %v11046_v39, %v1268_v52  ;;  %v11203_v10 = vsub.f32 %v16835_v12, %v3982_v16  ;;  %v3944_v42 = vpop.xlane.xlu0 %3943  ;;  %v11217_v16 = vld [vmem:[#allocation5 + $0x1b] ss:$0 sm:$0xff]  ;;  %v11267_v32 = vld [vmem:[#allocation5 + $0x1f] ss:$0 sm:$0xff] }
 0x1c6   : > { %16830 = vst [vmem:[#allocation58_spill] sm:$0xff] %v11177_v5  ;;  %v2307_v3 = vmul.f32 %v11205_v34, %v10718_v2  ;;  %v11210_v49 = vrot.slane %v11183_v51, 1  ;;  %v1519_v56 = vrot.slane %v11165_v60, 2  ;;  %v1356_v52 = vmul.f32 %v11050_v21, %v1342_v20 }
 0x1c7   : > { %16831 = vst [vmem:[#allocation30_spill] sm:$0xff] %v11183_v51  ;;  %4034 = vadd.xlane.f32.xlu2 %v4015_v0  ;;  %v1937_v29 = vadd.f32 %v1921_v24, %v1876_v19  ;;  %v1224_v50 = vadd.f32 %v1208_v35, %v1150_v6  ;;  %v11215_v12 = vrot.slane %v11183_v51, 2  ;;  %v16840_v0 = vld [vmem:[#allocation91_spill] sm:$0xff]  ;;  %v1417_v2 = vmul.f32 %v11055_v31, %v11165_v60 }
 0x1c8   : > { %16832 = vst [vmem:[#allocation70_spill] sm:$0xff] %v11185_v14  ;;  %v2381_v11 = vmul.f32 %v11217_v16, %v16840_v0  ;;  %v1477_v39 = vsel %vm449_vm0, %v1445_v41, %v11210_v49  ;;  %v1593_v24 = vrot.slane %v11165_v60, 3  ;;  %v1667_v19 = vrot.slane %v11165_v60, 4  ;;  %v11232_v0 = vld [vmem:[#allocation5 + $0x1c] ss:$0 sm:$0xff]  ;;  %v16843_v41 = vld [vmem:[#allocation77_spill] sm:$0xff] }
 0x1c9   : > { %16833 = vst [vmem:[#allocation59_spill] sm:$0xff] %v11189_v62  ;;  %v2011_v6 = vadd.f32 %v1995_v53, %v1937_v29  ;;  %v1298_v35 = vadd.f32 %v1282_v43, %v1224_v50  ;;  %v1551_v20 = vsel %vm524_vm1, %v1519_v56, %v11215_v12  ;;  %v3981_v21 = vmul.f32 %v11027_v23, %v3944_v42  ;;  %v11249_v50 = vld [vmem:[#allocation5 + $0x1e] ss:$0 sm:$0xff] }
 0x1ca   : > { %16834 = vst [vmem:[#allocation68_spill] sm:$0xff] %v11197_v58  ;;  %v2442_v31 = vmul.f32 %v7775_v13, %v11232_v0  ;;  %v11243_v53 = vrot.slane %v11183_v51, 3  ;;  %v1491_v29 = vmul.f32 %v11062_v45, %v1477_v39  ;;  %v11247_v42 = vrot.slane %v11183_v51, 4  ;;  %v16847_v45 = vld [vmem:[#allocation53_spill] sm:$0xff] }
 0x1cb   : > { %16836 = vst [vmem:[#allocation64_spill] sm:$0xff] %v11203_v10  ;;  %v2085_v43 = vadd.f32 %v2069_v30, %v2011_v6  ;;  %v1372_v56 = vadd.f32 %v1356_v52, %v1298_v35  ;;  %v11253_v13 = vmul.f32 %v11249_v50, %v10752_v54  ;;  %v1741_v30 = vrot.slane %v11165_v60, 5 }
 0x1cc   : > { %16837 = vst [vmem:[#allocation69_spill] sm:$0xff] %v11210_v49  ;;  %v11240_v49 = vmul.f32 %v11236_v27, %v16843_v41  ;;  %v1565_v41 = vmul.f32 %v11066_v7, %v1551_v20  ;;  %v1699_v6 = vsel %vm674_vm3, %v1667_v19, %v11247_v42  ;;  %v1815_v35 = vrot.slane %v11165_v60, 6  ;;  %v11283_v19 = vld [vmem:[%s8415_s9 + $0xa8] sm:$0xff]  ;;  %v11298_v7 = vld [vmem:[#allocation5 + $0x22] ss:$0 sm:$0xff] }
 0x1cd   : > { %16838 = vst [vmem:[#allocation75_spill] sm:$0xff] %v11215_v12  ;;  %v1625_v12 = vsel %vm599_vm2, %v1593_v24, %v11243_v53  ;;  %v2175_v39 = vadd.f32 %v2159_v28, %v2085_v43  ;;  %v1433_v52 = vadd.f32 %v1417_v2, %v1372_v56  ;;  %v11265_v54 = vsub.f32 %v16847_v45, %v3981_v21  ;;  %v11273_v24 = vld [vmem:[#allocation5 + $0x20] ss:$0 sm:$0xff]  ;;  %v11292_v56 = vld [vmem:[#allocation5 + $0x21] ss:$0 sm:$0xff] }
 0x1ce   : > { %16839 = vst [vmem:[#allocation71_spill] sm:$0xff] %v11217_v16  ;;  %v11271_v20 = vmul.f32 %v11267_v32, %v10758_v37  ;;  %v11277_v28 = vmul.f32 %v11273_v24, %v10772_v40  ;;  %v11280_v2 = vrot.slane %v11183_v51, 5  ;;  %v1639_v45 = vmul.f32 %v11071_v17, %v1625_v12  ;;  %v11290_v37 = vld [vmem:[%s8415_s9 + $0xb0] sm:$0xff] }
 0x1cf   : > { %16841 = vst [vmem:[#allocation41_spill] sm:$0xff] %v11232_v0  ;;  %v2249_v60 = vadd.f32 %v2233_v25, %v2175_v39  ;;  %v1507_v21 = vadd.f32 %v1491_v29, %v1433_v52  ;;  %v11287_v43 = vrot.slane %v11183_v51, 6  ;;  %v11296_v40 = vmul.f32 %v11292_v56, %v10778_v59  ;;  %v11318_v51 = vld [vmem:[#allocation5 + $0x24] ss:$0 sm:$0xff] }
 0x1d0   : > { %16842 = vst [vmem:[#allocation87_spill] sm:$0xff] %v11236_v27  ;;  %v11302_v25 = vmul.f32 %v11298_v7, %v10793_v61  ;;  %v1713_v12 = vmul.f32 %v11085_v8, %v1699_v6  ;;  %v1773_v29 = vsel %vm749_vm4, %v1741_v30, %v11280_v2  ;;  %v1950_v17 = vrot.slane %v11283_v19, 1 }
 0x1d1   : > { %16844 = vst [vmem:[#allocation67_spill] sm:$0xff] %v11243_v53  ;;  %v2323_v39 = vadd.f32 %v2307_v3, %v2249_v60  ;;  %v1581_v52 = vadd.f32 %v1565_v41, %v1507_v21  ;;  %v1847_v59 = vsel %vm824_vm5, %v1815_v35, %v11287_v43  ;;  %v7783_v53 = vld [vmem:[%s8415_s9 + $0xc8] sm:$0xff]  ;;  %v11322_v6 = vmul.f32 %v11318_v51, %v10807_v48  ;;  %v11324_v3 = vld [vmem:[#allocation5 + $0x25] ss:$0 sm:$0xff] }
 0x1d2   : > { %16845 = vst [vmem:[#allocation76_spill] sm:$0xff] %v11247_v42  ;;  %v11312_v42 = vld [vmem:[#allocation5 + $0x23] ss:$0 sm:$0xff]  ;;  %v11328_v41 = vmul.f32 %v11324_v3, %v10815_v46  ;;  %v11331_v30 = vrot.slane %v11290_v37, 1  ;;  %v11334_v60 = vld [vmem:[%s8415_s9 + $0xe8] sm:$0xff]  ;;  %v1787_v21 = vmul.f32 %v11100_v22, %v1773_v29  ;;  %v2024_v8 = vrot.slane %v11283_v19, 2 }
 0x1d3   : > { %16846 = vst [vmem:[#allocation79_spill] sm:$0xff] %v11249_v50  ;;  %v11316_v61 = vmul.f32 %v7783_v53, %v11312_v42  ;;  %v2397_v35 = vadd.f32 %v2381_v11, %v2323_v39  ;;  %v1655_v53 = vadd.f32 %v1639_v45, %v1581_v52  ;;  %v11350_v11 = vld [vmem:[#allocation5 + $0x28] ss:$0 sm:$0xff]  ;;  %v1861_v29 = vmul.f32 %v11116_v9, %v1847_v59 }
 0x1d4   : > { %16848 = vst [vmem:[#allocation47_spill] sm:$0xff] %v11265_v54  ;;  %v11354_v45 = vmul.f32 %v11350_v11, %v10847_v47  ;;  %v11361_v22 = vrot.slane %v11290_v37, 2  ;;  %v15868_v47 = vrot.slane %v11334_v60, 1  ;;  %v1922_v59 = vmul.f32 %v11135_v57, %v11283_v19  ;;  %v16866_v9 = vld [vmem:[#allocation88_spill] sm:$0xff] }
 0x1d5   : > { %16849 = vst [vmem:[#allocation91_spill] sm:$0xff] %v11267_v32  ;;  %v2458_v39 = vadd.f32 %v2442_v31, %v2397_v35  ;;  %v1729_v52 = vadd.f32 %v1713_v12, %v1655_v53  ;;  %v2098_v31 = vrot.slane %v11283_v19, 3  ;;  %v11374_v35 = vld [vmem:[#allocation5 + $0x2a] ss:$0 sm:$0xff] }
 0x1d6   : > { %16850 = vst [vmem:[#allocation77_spill] sm:$0xff] %v11273_v24  ;;  %v3504_v57 = vsel %vm449_vm0, %v16866_v9, %v15868_v47  ;;  %v2262_v9 = vrot.slane %v11283_v19, 5 }
 0x1d7   : > { %16851 = vst [vmem:[#allocation53_spill] sm:$0xff] %v11280_v2  ;;  %v11344_v2 = vld [vmem:[#allocation5 + $0x27] ss:$0 sm:$0xff]  ;;  %v2532_v12 = vadd.f32 %v11240_v49, %v2458_v39  ;;  %v1803_v53 = vadd.f32 %v1787_v21, %v1729_v52  ;;  %v11390_v49 = vrot.slane %v11290_v37, 3  ;;  %v2188_v39 = vrot.slane %v11283_v19, 4 }
 0x1d8   : > { %16852 = vst [vmem:[#allocation97_spill] sm:$0xff] %v11287_v43  ;;  %v11338_v43 = vld [vmem:[#allocation5 + $0x26] ss:$0 sm:$0xff]  ;;  %v11348_v46 = vmul.f32 %v11344_v2, %v10835_v38  ;;  %v11367_v38 = vmul.f32 %v11363_v15, %v10853_v4  ;;  %v2056_v4 = vsel %vm524_vm1, %v2024_v8, %v11361_v22  ;;  %v15873_v21 = vrot.slane %v11334_v60, 2 }
 0x1d9   : > { %16853 = vst [vmem:[#allocation98_spill] sm:$0xff] %v11290_v37  ;;  %v11342_v48 = vmul.f32 %v11338_v43, %v10827_v26  ;;  %v1982_v26 = vsel %vm449_vm0, %v1950_v17, %v11331_v30  ;;  %v11378_v17 = vmul.f32 %v11374_v35, %v10865_v33  ;;  %v2606_v33 = vadd.f32 %v11253_v13, %v2532_v12  ;;  %v16870_v12 = vld [vmem:[#allocation90_spill] sm:$0xff] }
 0x1da   : > { %16854 = vst [vmem:[#allocation99_spill] sm:$0xff] %v11292_v56  ;;  %v15874_v52 = vrot.slane %v11334_v60, 3  ;;  %v1877_v8 = vadd.f32 %v1861_v29, %v1803_v53  ;;  %v11400_v47 = vsel %vm599_vm2, %v2098_v31, %v11390_v49  ;;  %v3578_v29 = vsel %vm524_vm1, %v16870_v12, %v15873_v21  ;;  %v16871_v53 = vld [vmem:[#allocation83_spill] sm:$0xff] }
 0x1db   : > { %16855 = vst [vmem:[#allocation100_spill] sm:$0xff] %v11298_v7  ;;  %v2680_v13 = vadd.f32 %v11271_v20, %v2606_v33  ;;  %v11426_v33 = vrot.slane %v11290_v37, 5  ;;  %v2336_v21 = vrot.slane %v11283_v19, 6  ;;  %v11448_v19 = vrot.slane %v11290_v37, 6 }
 0x1dc   : > { %16856 = vst [vmem:[#allocation101_spill] sm:$0xff] %v11312_v42  ;;  %v3652_v31 = vsel %vm599_vm2, %v16871_v53, %v15874_v52  ;;  %v15886_v52 = vrot.slane %v11334_v60, 4  ;;  %v11434_v53 = vld [vmem:[#allocation5 + $0x2c] ss:$0 sm:$0xff] }
 0x1dd   : > { %16857 = vst [vmem:[#allocation102_spill] sm:$0xff] %v11318_v51  ;;  %v2754_v12 = vadd.f32 %v11277_v28, %v2680_v13  ;;  %v2294_v28 = vsel %vm749_vm4, %v2262_v9, %v11426_v33  ;;  %v16877_v13 = vld [vmem:[#allocation38_spill] sm:$0xff]  ;;  %v2368_v9 = vsel %vm824_vm5, %v2336_v21, %v11448_v19 }
 0x1de   : > { %16858 = vst [vmem:[#allocation103_spill] sm:$0xff] %v11324_v3 }
 0x1df   : > { %16859 = vst [vmem:[#allocation104_spill] sm:$0xff] %v11331_v30  ;;  %v1996_v30 = vmul.f32 %v11177_v5, %v1982_v26  ;;  %v11403_v26 = vrot.slane %v11290_v37, 4  ;;  %v4013_v37 = vmul.f32 %v11265_v54, %v11265_v54 }
 0x1e0   : > { %16860 = vst [vmem:[#allocation105_spill] sm:$0xff] %v11338_v43 }
 0x1e1   : > { %16861 = vst [vmem:[#allocation106_spill] sm:$0xff] %v11344_v2  ;;  %v2220_v20 = vsel %vm674_vm3, %v2188_v39, %v11403_v26  ;;  %v11439_v39 = vld [vmem:[#allocation5 + $0x2d] ss:$0 sm:$0xff]  ;;  %4030 = vadd.xlane.f32.xlu1 %v4013_v37 }
 0x1e2   : > { %16862 = vst [vmem:[#allocation107_spill] sm:$0xff] %v11350_v11 }
 0x1e3   : > { %16863 = vst [vmem:[#allocation108_spill] sm:$0xff] %v11361_v22  ;;  %v2070_v22 = vmul.f32 %v11185_v14, %v2056_v4  ;;  %v1938_v4 = vadd.f32 %v1922_v59, %v1877_v8  ;;  %v11417_v14 = vld [vmem:[#allocation5 + $0x2b] ss:$0 sm:$0xff]  ;;  %v2160_v8 = vmul.f32 %v11189_v62, %v11400_v47  ;;  %v15892_v62 = vrot.slane %v11334_v60, 5 }
 0x1e4   : > { %16864 = vst [vmem:[#allocation109_spill] sm:$0xff] %v11363_v15  ;;  %v11420_v5 = vmul.f32 %v11417_v14, %v3504_v57  ;;  %v6928_v57 = vld [vmem:[%s8415_s9 + $0xc0] sm:$0xff] }
 0x1e5   : > { %16865 = vst [vmem:[#allocation110_spill] sm:$0xff] %v11374_v35  ;;  %v2012_v59 = vadd.f32 %v1996_v30, %v1938_v4  ;;  %v2828_v30 = vadd.f32 %v11296_v40, %v2754_v12  ;;  %v2471_v40 = vrot.slane %v6928_v57, 1  ;;  %v2693_v37 = vrot.slane %v6928_v57, 4 }
 0x1e6   : > { %16867 = vst [vmem:[#allocation111_spill] sm:$0xff] %v11390_v49  ;;  %v11437_v49 = vmul.f32 %v11434_v53, %v3578_v29  ;;  %v3726_v29 = vsel %vm674_vm3, %v16877_v13, %v15886_v52  ;;  %v3950_v52 = vpop.xlane.xlu2 %3949 }
 0x1e7   : > { %16868 = vst [vmem:[#allocation112_spill] sm:$0xff] %v11400_v47  ;;  %v2086_v4 = vadd.f32 %v2070_v22, %v2012_v59  ;;  %v2234_v47 = vmul.f32 %v11197_v58, %v2220_v20  ;;  %v2902_v12 = vadd.f32 %v11302_v25, %v2828_v30  ;;  %v2308_v20 = vmul.f32 %v11205_v34, %v2294_v28  ;;  %v16879_v59 = vld [vmem:[#allocation80_spill] sm:$0xff] }
 0x1e8   : > { %16869 = vst [vmem:[#allocation113_spill] sm:$0xff] %v11403_v26  ;;  %v11442_v26 = vmul.f32 %v11439_v39, %v3652_v31  ;;  %v11458_v31 = vld [vmem:[%s8415_s9 + $0xc8] sm:$0xff]  ;;  %v3800_v13 = vsel %vm749_vm4, %v16879_v59, %v15892_v62  ;;  %v3984_v21 = vmul.f32 %v11027_v23, %v3950_v52  ;;  %v2545_v58 = vrot.slane %v6928_v57, 2 }
 0x1e9   : > { %16872 = vst [vmem:[#allocation114_spill] sm:$0xff] %v11417_v14  ;;  %v2176_v22 = vadd.f32 %v2160_v8, %v2086_v4  ;;  %v2963_v25 = vadd.f32 %v11316_v61, %v2902_v12  ;;  %v2382_v28 = vmul.f32 %v11217_v16, %v2368_v9  ;;  %v16881_v4 = vld [vmem:[#allocation78_spill] sm:$0xff]  ;;  %v11488_v52 = vrot.slane %v11458_v31, 2 }
 0x1ea   : > { %16873 = vst [vmem:[#allocation115_spill] sm:$0xff] %v11426_v33  ;;  %v2443_v33 = vmul.f32 %v11232_v0, %v6928_v57  ;;  %v11476_v0 = vrot.slane %v11458_v31, 1  ;;  %v11482_v54 = vsub.f32 %v16881_v4, %v3984_v21  ;;  %v2619_v59 = vrot.slane %v6928_v57, 3 }
 0x1eb   : > { %16874 = vst [vmem:[#allocation116_spill] sm:$0xff] %v11434_v53  ;;  %v2250_v8 = vadd.f32 %v2234_v47, %v2176_v22  ;;  %v3037_v23 = vadd.f32 %v11322_v6, %v2963_v25  ;;  %v11492_v12 = vrot.slane %v11458_v31, 3  ;;  %v2577_v9 = vsel %vm524_vm1, %v2545_v58, %v11488_v52  ;;  %v16887_v25 = vld [vmem:[#allocation28_spill] sm:$0xff] }
 0x1ec   : > { %16875 = vst [vmem:[#allocation117_spill] sm:$0xff] %v11439_v39  ;;  %v2503_v62 = vsel %vm449_vm0, %v2471_v40, %v11476_v0  ;;  %v4016_v47 = vmul.f32 %v11482_v54, %v11482_v54  ;;  %v2767_v22 = vrot.slane %v6928_v57, 5  ;;  %v2841_v40 = vrot.slane %v6928_v57, 6 }
 0x1ed   : > { %16876 = vst [vmem:[#allocation118_spill] sm:$0xff] %v11448_v19  ;;  %v2324_v61 = vadd.f32 %v2308_v20, %v2250_v8  ;;  %v3111_v21 = vadd.f32 %v11328_v41, %v3037_v23  ;;  %v2517_v30 = vmul.f32 %v11236_v27, %v2503_v62  ;;  %v11502_v6 = vrot.slane %v11458_v31, 4 }
 0x1ee   : > { %16878 = vst [vmem:[#allocation119_spill] sm:$0xff] %v11458_v31  ;;  %v16886_v20 = vrot.slane %v11334_v60, 6  ;;  %4036 = vadd.xlane.f32.xlu2 %v4016_v47  ;;  %v2651_v58 = vsel %vm599_vm2, %v2619_v59, %v11492_v12  ;;  %v11513_v57 = vrot.slane %v11458_v31, 5  ;;  %v11516_v23 = vrot.slane %v11458_v31, 6  ;;  %v11523_v47 = vld [vmem:[#allocation5 + $0x2e] ss:$0 sm:$0xff] }
 0x1ef   : > { %16880 = vst [vmem:[#allocation120_spill] sm:$0xff] %v11476_v0  ;;  %v2398_v4 = vadd.f32 %v2382_v28, %v2324_v61  ;;  %v3185_v62 = vadd.f32 %v11342_v48, %v3111_v21  ;;  %v2591_v28 = vmul.f32 %v11249_v50, %v2577_v9  ;;  %v2725_v61 = vsel %vm674_vm3, %v2693_v37, %v11502_v6  ;;  %v11540_v9 = vld [vmem:[#allocation5 + $0x30] ss:$0 sm:$0xff] }
 0x1f0   : > { %16882 = vst [vmem:[#allocation78_spill] sm:$0xff] %v11482_v54  ;;  %v3874_v8 = vsel %vm824_vm5, %v16887_v25, %v16886_v20  ;;  %v11526_v59 = vmul.f32 %v11523_v47, %v3726_v29  ;;  %v11528_v20 = vld [vmem:[#allocation5 + $0x2f] ss:$0 sm:$0xff]  ;;  %v2799_v48 = vsel %vm749_vm4, %v2767_v22, %v11513_v57 }
 0x1f1   : > { %16883 = vst [vmem:[#allocation121_spill] sm:$0xff] %v11488_v52  ;;  %v2459_v41 = vadd.f32 %v2443_v33, %v2398_v4  ;;  %v11531_v54 = vmul.f32 %v11528_v20, %v3800_v13  ;;  %v2873_v33 = vsel %vm824_vm5, %v2841_v40, %v11516_v23  ;;  %v3259_v37 = vadd.f32 %v11348_v46, %v3185_v62  ;;  %v16893_v25 = vld [vmem:[#allocation73_spill] sm:$0xff]  ;;  %v16895_v40 = vld [vmem:[#allocation94_spill] sm:$0xff] }
 0x1f2   : > { %16884 = vst [vmem:[#allocation122_spill] sm:$0xff] %v11492_v12  ;;  %v11543_v29 = vmul.f32 %v11540_v9, %v3874_v8  ;;  %v2665_v13 = vmul.f32 %v11267_v32, %v2651_v58  ;;  %v2739_v4 = vmul.f32 %v11273_v24, %v2725_v61  ;;  %v2948_v22 = vmul.f32 %v11312_v42, %v16893_v25  ;;  %v16894_v50 = vld [vmem:[#allocation93_spill] sm:$0xff]  ;;  %v11562_v61 = vld [vmem:[%s8415_s9 + $0xf8] sm:$0xff] }
 0x1f3   : > { %16885 = vst [vmem:[#allocation123_spill] sm:$0xff] %v11502_v6  ;;  %v2533_v21 = vadd.f32 %v2517_v30, %v2459_v41  ;;  %v3022_v27 = vmul.f32 %v11318_v51, %v16894_v50  ;;  %v11553_v46 = vmul.f32 %v11324_v3, %v16895_v40  ;;  %v11556_v62 = vld [vmem:[%s8415_s9 + $0xf0] sm:$0xff]  ;;  %v3333_v8 = vadd.f32 %v11354_v45, %v3259_v37  ;;  %v16899_v40 = vld [vmem:[#allocation31_spill] sm:$0xff] }
 0x1f4   : > { %16888 = vst [vmem:[#allocation124_spill] sm:$0xff] %v11513_v57  ;;  %v2813_v41 = vmul.f32 %v11292_v56, %v2799_v48  ;;  %v2887_v58 = vmul.f32 %v11298_v7, %v2873_v33  ;;  %v16897_v24 = vld [vmem:[#allocation82_spill] sm:$0xff]  ;;  %v16898_v50 = vld [vmem:[#allocation89_spill] sm:$0xff]  ;;  %v11574_v3 = vmul.f32 %v11350_v11, %v16899_v40  ;;  %v16900_v45 = vld [vmem:[#allocation27_spill] sm:$0xff]  ;;  %v3555_v40 = vrot.slane %v11556_v62, 2 }
 0x1f5   : > { %16889 = vst [vmem:[#allocation125_spill] sm:$0xff] %v11516_v23  ;;  %v2607_v30 = vadd.f32 %v2591_v28, %v2533_v21  ;;  %v11566_v25 = vmul.f32 %v11338_v43, %v16897_v24  ;;  %v11570_v51 = vmul.f32 %v11344_v2, %v16898_v50  ;;  %v11578_v28 = vmul.f32 %v11363_v15, %v16900_v45  ;;  %v398_v48 = vld [vmem:[%s8415_s9 + $0x88] sm:$0xff] }
 0x1f6   : > { %16890 = vst [vmem:[#allocation126_spill] sm:$0xff] %v11523_v47  ;;  %v3407_v33 = vadd.f32 %v11367_v38, %v3333_v8  ;;  %v11584_v24 = vmul.f32 %v11374_v35, %v11556_v62  ;;  %v3481_v21 = vrot.slane %v11556_v62, 1  ;;  %v11588_v50 = vrot.slane %v11562_v61, 1 }
 0x1f7   : > { %16891 = vst [vmem:[#allocation127_spill] sm:$0xff] %v11528_v20  ;;  %v2681_v37 = vadd.f32 %v2665_v13, %v2607_v30  ;;  %v11592_v11 = vrot.slane %v11562_v61, 2  ;;  %v3629_v45 = vrot.slane %v11556_v62, 3  ;;  %v11597_v13 = vrot.slane %v11562_v61, 3  ;;  %v16904_v30 = vld [vmem:[#allocation74_spill] sm:$0xff] }
 0x1f8   : > { %16892 = vst [vmem:[#allocation128_spill] sm:$0xff] %v11540_v9  ;;  %v3468_v15 = vadd.f32 %v11378_v17, %v3407_v33  ;;  %v444_v8 = vrot.slane %v398_v48, 1  ;;  %v418_v35 = vmul.f32 %v16904_v30, %v11098_v36  ;;  %v521_v2 = vrot.slane %v398_v48, 2 }
 0x1f9   : > { %16896 = vst [vmem:[#allocation73_spill] sm:$0xff] %v11562_v61  ;;  %v2755_v38 = vadd.f32 %v2739_v4, %v2681_v37  ;;  %v596_v43 = vrot.slane %v398_v48, 3  ;;  %v671_v42 = vrot.slane %v398_v48, 4  ;;  %v3513_v32 = vsel %vm449_vm0, %v3481_v21, %v11588_v50  ;;  %v16905_v4 = vld [vmem:[#allocation81_spill] sm:$0xff] }
 0x1fa   : > { %16901 = vst [vmem:[#allocation93_spill] sm:$0xff] %v11588_v50  ;;  %v3542_v7 = vadd.f32 %v11420_v5, %v3468_v15  ;;  %v11608_v17 = vsel %vm449_vm0, %v11113_v18, %v444_v8  ;;  %v11615_v37 = vsel %vm524_vm1, %v11129_v44, %v521_v2  ;;  %v16909_v8 = vld [vmem:[#allocation52_spill] sm:$0xff]  ;;  %v746_v18 = vrot.slane %v398_v48, 5 }
 0x1fb   : > { %16902 = vst [vmem:[#allocation94_spill] sm:$0xff] %v11592_v11  ;;  %v2829_v56 = vadd.f32 %v2813_v41, %v2755_v38  ;;  %v479_v33 = vmul.f32 %v16905_v4, %v11608_v17  ;;  %v11620_v15 = vsel %vm599_vm2, %v11145_v63, %v596_v43  ;;  %v11625_v5 = vsel %vm674_vm3, %v11155_v55, %v671_v42  ;;  %v16910_v63 = vld [vmem:[#allocation92_spill] sm:$0xff] }
 0x1fc   : > { %16903 = vst [vmem:[#allocation82_spill] sm:$0xff] %v11597_v13  ;;  %v3616_v41 = vadd.f32 %v11437_v49, %v3542_v7  ;;  %v4014_v38 = vmul.f32 %v11203_v10, %v11203_v10  ;;  %v554_v2 = vmul.f32 %v16909_v8, %v11615_v37  ;;  %v3587_v4 = vsel %vm524_vm1, %v3555_v40, %v11592_v11  ;;  %v11638_v42 = vld [vmem:[%s8415_s9 + $0xa0] sm:$0xff] }
 0x1fd   : > { %16906 = vst [vmem:[#allocation89_spill] sm:$0xff] %v11615_v37  ;;  %v2903_v21 = vadd.f32 %v2887_v58, %v2829_v56  ;;  %v495_v43 = vadd.f32 %v479_v33, %v418_v35  ;;  %v629_v44 = vmul.f32 %v16910_v63, %v11620_v15  ;;  %v3703_v49 = vrot.slane %v11556_v62, 4  ;;  %v16912_v40 = vld [vmem:[#allocation95_spill] sm:$0xff]  ;;  %v16913_v33 = vld [vmem:[#allocation65_spill] sm:$0xff] }
 0x1fe   : > { %16907 = vst [vmem:[#allocation31_spill] sm:$0xff] %v11620_v15  ;;  %v3690_v7 = vadd.f32 %v11442_v26, %v3616_v41  ;;  %4032 = vadd.xlane.f32.xlu1 %v4014_v38  ;;  %v821_v58 = vrot.slane %v398_v48, 6  ;;  %v11643_v10 = vrot.slane %v11562_v61, 4  ;;  %v704_v35 = vmul.f32 %v16912_v40, %v11625_v5 }
 0x1ff   : > { %16908 = vst [vmem:[#allocation27_spill] sm:$0xff] %v11625_v5  ;;  %v2964_v56 = vadd.f32 %v2948_v22, %v2903_v21  ;;  %v570_v55 = vadd.f32 %v554_v2, %v495_v43  ;;  %v11650_v15 = vsel %vm749_vm4, %v16913_v33, %v746_v18  ;;  %v16914_v22 = vld [vmem:[#allocation96_spill] sm:$0xff]  ;;  %v957_v48 = vrot.slane %v11638_v42, 1  ;;  %v16916_v2 = vld [vmem:[#allocation86_spill] sm:$0xff] }
 0x200   : > { %16911 = vst [vmem:[#allocation74_spill] sm:$0xff] %v11643_v10  ;;  %v3764_v37 = vadd.f32 %v11526_v59, %v3690_v7  ;;  %v11656_v41 = vsel %vm824_vm5, %v16914_v22, %v821_v58  ;;  %v3527_v21 = vmul.f32 %v11417_v14, %v3513_v32  ;;  %v779_v43 = vmul.f32 %v16916_v2, %v11650_v15  ;;  %v16921_v33 = vld [vmem:[#allocation30_spill] sm:$0xff]  ;;  %v16929_v14 = vld [vmem:[#allocation67_spill] sm:$0xff] }
 0x201   : > { %v3038_v26 = vadd.f32 %v3022_v27, %v2964_v56  ;;  %16915 = vst [vmem:[#allocation81_spill] sm:$0xff] %v11656_v41  ;;  %v645_v38 = vadd.f32 %v629_v44, %v570_v55  ;;  %v1031_v5 = vrot.slane %v11638_v42, 2  ;;  %v3601_v27 = vmul.f32 %v11434_v53, %v3587_v4  ;;  %v16918_v55 = vld [vmem:[#allocation23_spill] sm:$0xff] }
 0x202   : > { %v3838_v18 = vadd.f32 %v11531_v54, %v3764_v37  ;;  %v3661_v7 = vsel %vm599_vm2, %v3629_v45, %v11597_v13  ;;  %v3777_v56 = vrot.slane %v11556_v62, 5  ;;  %v11671_v32 = vrot.slane %v11562_v61, 5  ;;  %v16923_v53 = vld [vmem:[#allocation75_spill] sm:$0xff] }
 0x203   : > { %v3112_v59 = vadd.f32 %v11553_v46, %v3038_v26  ;;  %v720_v44 = vadd.f32 %v704_v35, %v645_v38  ;;  %v854_v58 = vmul.f32 %v16918_v55, %v11656_v41  ;;  %v16919_v46 = vld [vmem:[#allocation69_spill] sm:$0xff]  ;;  %v1105_v45 = vrot.slane %v11638_v42, 3 }
 0x204   : > { %16917 = vst [vmem:[#allocation52_spill] sm:$0xff] %v11671_v32  ;;  %v3912_v22 = vadd.f32 %v11543_v29, %v3838_v18  ;;  %v11680_v37 = vsel %vm449_vm0, %v16919_v46, %v957_v48  ;;  %v3851_v4 = vrot.slane %v11556_v62, 6  ;;  %v16922_v35 = vld [vmem:[#allocation33_spill] sm:$0xff]  ;;  %v11689_v29 = vsel %vm524_vm1, %v16923_v53, %v1031_v5  ;;  %v6881_v46 = vld [vmem:[%s8415_s9 + $0xb8] sm:$0xff] }
 0x205   : > { %v3186_v54 = vadd.f32 %v11566_v25, %v3112_v59  ;;  %16920 = vst [vmem:[#allocation92_spill] sm:$0xff] %v11680_v37  ;;  %v795_v26 = vadd.f32 %v779_v43, %v720_v44  ;;  %v915_v38 = vmul.f32 %v16922_v35, %v16921_v33  ;;  %v11694_v25 = vld [vmem:[%s15463_s2] ss:$0 sm:$0xff]  ;;  %v1179_v62 = vrot.slane %v11638_v42, 4  ;;  %v16928_v35 = vld [vmem:[#allocation36_spill] sm:$0xff]  ;;  %v16949_v41 = vld [vmem:[#allocation113_spill] sm:$0xff] }
 0x206   : > { %16924 = vst [vmem:[#allocation95_spill] sm:$0xff] %v11689_v29  ;;  %v11697_v48 = vadd.f32 %v11694_v25, %v3912_v22  ;;  %v1253_v43 = vrot.slane %v11638_v42, 5  ;;  %v3735_v59 = vsel %vm674_vm3, %v3703_v49, %v11643_v10  ;;  %v11706_v5 = vrot.slane %v11562_v61, 6 }
 0x207   : > { %16925 = vst [vmem:[#allocation86_spill] sm:$0xff] %v11694_v25  ;;  %v3260_v18 = vadd.f32 %v11570_v51, %v3186_v54  ;;  %v870_v44 = vadd.f32 %v854_v58, %v795_v26  ;;  %v989_v53 = vmul.f32 %v16928_v35, %v11680_v37  ;;  %v3675_v22 = vmul.f32 %v11439_v39, %v3661_v7  ;;  %v16931_v35 = vld [vmem:[#allocation37_spill] sm:$0xff]  ;;  %v16937_v37 = vld [vmem:[#allocation35_spill] sm:$0xff] }
 0x208   : > { %16926 = vst [vmem:[#allocation23_spill] sm:$0xff] %v11697_v48  ;;  %3955 = vadd.xlane.f32.xlu0 %v11697_v48  ;;  %v3809_v54 = vsel %vm749_vm4, %v3777_v56, %v11671_v32  ;;  %v11720_v49 = vsel %vm599_vm2, %v16929_v14, %v1105_v45  ;;  %v3883_v58 = vsel %vm824_vm5, %v3851_v4, %v11706_v5  ;;  %v16934_v45 = vld [vmem:[#allocation53_spill] sm:$0xff]  ;;  %v1462_v4 = vrot.slane %v6881_v46, 1 }
 0x209   : > { %16927 = vst [vmem:[#allocation33_spill] sm:$0xff] %v11706_v5  ;;  %v3334_v51 = vadd.f32 %v11574_v3, %v3260_v18  ;;  %v931_v26 = vadd.f32 %v915_v38, %v870_v44  ;;  %v1063_v48 = vmul.f32 %v16931_v35, %v11689_v29  ;;  %v1327_v3 = vrot.slane %v11638_v42, 6  ;;  %v16932_v18 = vld [vmem:[#allocation76_spill] sm:$0xff]  ;;  %v16936_v44 = vld [vmem:[#allocation45_spill] sm:$0xff] }
 0x20a   : > { %16930 = vst [vmem:[#allocation36_spill] sm:$0xff] %v11720_v49  ;;  %v11732_v56 = vsel %vm674_vm3, %v16932_v18, %v1179_v62  ;;  %v11737_v14 = vsel %vm749_vm4, %v16934_v45, %v1253_v43  ;;  %v1137_v35 = vmul.f32 %v16936_v44, %v11720_v49  ;;  %v1536_v39 = vrot.slane %v6881_v46, 2  ;;  %v16938_v45 = vld [vmem:[#allocation34_spill] sm:$0xff] }
 0x20b   : > { %v3408_v7 = vadd.f32 %v11578_v28, %v3334_v51  ;;  %16933 = vst [vmem:[#allocation37_spill] sm:$0xff] %v11732_v56  ;;  %v1005_v38 = vadd.f32 %v989_v53, %v931_v26  ;;  %v1610_v42 = vrot.slane %v6881_v46, 3  ;;  %v3749_v51 = vmul.f32 %v11523_v47, %v3735_v59  ;;  %v16939_v26 = vld [vmem:[#allocation97_spill] sm:$0xff] }
 0x20c   : > { %16935 = vst [vmem:[#allocation129_spill] sm:$0xff] %v11737_v14  ;;  %v3823_v29 = vmul.f32 %v11528_v20, %v3809_v54  ;;  %v3897_v62 = vmul.f32 %v11540_v9, %v3883_v58  ;;  %v1211_v43 = vmul.f32 %v16937_v37, %v11732_v56  ;;  %v1285_v53 = vmul.f32 %v16938_v45, %v11737_v14  ;;  %v6907_v49 = vld [vmem:[%s8415_s9 + $0xd0] sm:$0xff]  ;;  %v16943_v45 = vld [vmem:[#allocation111_spill] sm:$0xff] }
 0x20d   : > { %v3469_v28 = vadd.f32 %v11584_v24, %v3408_v7  ;;  %v1079_v18 = vadd.f32 %v1063_v48, %v1005_v38  ;;  %v11752_v44 = vsel %vm824_vm5, %v16939_v26, %v1327_v3  ;;  %v16940_v7 = vld [vmem:[#allocation104_spill] sm:$0xff]  ;;  %v1684_v54 = vrot.slane %v6881_v46, 4 }
 0x20e   : > { %v11758_v59 = vsel %vm449_vm0, %v16940_v7, %v1462_v4  ;;  %v1758_v48 = vrot.slane %v6881_v46, 5  ;;  %v16941_v38 = vld [vmem:[#allocation108_spill] sm:$0xff]  ;;  %v11768_v3 = vsel %vm599_vm2, %v16943_v45, %v1610_v42  ;;  %v1832_v26 = vrot.slane %v6881_v46, 6  ;;  %v16945_v7 = vld [vmem:[#allocation39_spill] sm:$0xff]  ;;  %v16965_v45 = vld [vmem:[#allocation70_spill] sm:$0xff] }
 0x20f   : > { %v3543_v24 = vadd.f32 %v3527_v21, %v3469_v28  ;;  %v1153_v58 = vadd.f32 %v1137_v35, %v1079_v18  ;;  %v11763_v37 = vsel %vm524_vm1, %v16941_v38, %v1536_v39  ;;  %16944 = vst [vmem:[#allocation35_spill] sm:$0xff] %v11768_v3  ;;  %v1967_v28 = vrot.slane %v6907_v49, 1  ;;  %v16946_v18 = vld [vmem:[#allocation98_spill] sm:$0xff]  ;;  %v16947_v35 = vld [vmem:[#allocation55_spill] sm:$0xff]  ;;  %v16948_v38 = vld [vmem:[#allocation57_spill] sm:$0xff] }
 0x210   : > { %16942 = vst [vmem:[#allocation45_spill] sm:$0xff] %v11763_v37  ;;  %v2041_v9 = vrot.slane %v6907_v49, 2  ;;  %v2115_v20 = vrot.slane %v6907_v49, 3  ;;  %v1359_v47 = vmul.f32 %v16945_v7, %v11752_v44  ;;  %v1420_v14 = vmul.f32 %v16947_v35, %v16946_v18 }
 0x211   : > { %v3617_v21 = vadd.f32 %v3601_v27, %v3543_v24  ;;  %v1227_v4 = vadd.f32 %v1211_v43, %v1153_v58  ;;  %v2205_v56 = vrot.slane %v6907_v49, 4  ;;  %v1494_v33 = vmul.f32 %v16948_v38, %v11758_v59  ;;  %v16951_v27 = vld [vmem:[#allocation115_spill] sm:$0xff]  ;;  %v16953_v24 = vld [vmem:[#allocation46_spill] sm:$0xff] }
 0x212   : > { %v11779_v46 = vsel %vm674_vm3, %v16949_v41, %v1684_v54  ;;  %v11784_v42 = vsel %vm749_vm4, %v16951_v27, %v1758_v48  ;;  %v1568_v7 = vmul.f32 %v16953_v24, %v11763_v37  ;;  %v11798_v48 = vsel %vm449_vm0, %v11476_v0, %v1967_v28  ;;  %v16963_v0 = vld [vmem:[#allocation32_spill] sm:$0xff]  ;;  %v16964_v27 = vld [vmem:[#allocation58_spill] sm:$0xff] }
 0x213   : > { %v3691_v39 = vadd.f32 %v3675_v22, %v3617_v21  ;;  %16950 = vst [vmem:[#allocation34_spill] sm:$0xff] %v11779_v46  ;;  %v1301_v43 = vadd.f32 %v1285_v53, %v1227_v4  ;;  %v16954_v22 = vld [vmem:[#allocation26_spill] sm:$0xff]  ;;  %v11793_v21 = vsel %vm824_vm5, %v11448_v19, %v1832_v26  ;;  %v11803_v53 = vsel %vm524_vm1, %v11488_v52, %v2041_v9  ;;  %v16959_v26 = vld [vmem:[#allocation48_spill] sm:$0xff]  ;;  %v16962_v9 = vld [vmem:[#allocation61_spill] sm:$0xff] }
 0x214   : > { %16952 = vst [vmem:[#allocation39_spill] sm:$0xff] %v11784_v42  ;;  %v1642_v58 = vmul.f32 %v16954_v22, %v11768_v3  ;;  %v11808_v4 = vsel %vm599_vm2, %v11492_v12, %v2115_v20  ;;  %v1716_v24 = vmul.f32 %v16959_v26, %v11779_v46  ;;  %v11817_v28 = vsel %vm674_vm3, %v11502_v6, %v2205_v56  ;;  %v395_v12 = vld [vmem:[%s8415_s9 + $0x70] sm:$0xff] }
 0x215   : > { %16955 = vst [vmem:[#allocation98_spill] sm:$0xff] %v11793_v21  ;;  %v3765_v54 = vadd.f32 %v3749_v51, %v3691_v39  ;;  %v1375_v35 = vadd.f32 %v1359_v47, %v1301_v43  ;;  %v16960_v51 = vld [vmem:[#allocation50_spill] sm:$0xff]  ;;  %v1864_v52 = vmul.f32 %v16962_v9, %v11793_v21  ;;  %v11823_v20 = vmul.f32 %v16963_v0, %v11458_v31  ;;  %v6932_v43 = vld [vmem:[%s8415_s9 + $0xe0] sm:$0xff]  ;;  %v16968_v46 = vld [vmem:[#allocation41_spill] sm:$0xff] }
 0x216   : > { %16956 = vst [vmem:[#allocation55_spill] sm:$0xff] %v11798_v48  ;;  %v1790_v39 = vmul.f32 %v16960_v51, %v11784_v42  ;;  %v2279_v47 = vrot.slane %v6907_v49, 5  ;;  %v11829_v41 = vmul.f32 %v16964_v27, %v11798_v48  ;;  %v11833_v56 = vmul.f32 %v16965_v45, %v11803_v53  ;;  %v16967_v31 = vld [vmem:[#allocation68_spill] sm:$0xff] }
 0x217   : > { %16957 = vst [vmem:[#allocation57_spill] sm:$0xff] %v11803_v53  ;;  %v3839_v22 = vadd.f32 %v3823_v29, %v3765_v54  ;;  %v1436_v19 = vadd.f32 %v1420_v14, %v1375_v35  ;;  %v16966_v29 = vld [vmem:[#allocation59_spill] sm:$0xff]  ;;  %v11841_v21 = vmul.f32 %v16967_v31, %v11817_v28  ;;  %v2353_v42 = vrot.slane %v6907_v49, 6 }
 0x218   : > { %16958 = vst [vmem:[#allocation46_spill] sm:$0xff] %v11808_v4  ;;  %v11837_v54 = vmul.f32 %v16966_v29, %v11808_v4  ;;  %v11844_v14 = vmul.f32 %v16968_v46, %v6932_v43  ;;  %v11846_v48 = vrot.slane %v6932_v43, 1  ;;  %v443_v3 = vrot.slane %v395_v12, 1 }
 0x219   : > { %16961 = vst [vmem:[#allocation26_spill] sm:$0xff] %v11817_v28  ;;  %v3913_v6 = vadd.f32 %v3897_v62, %v3839_v22  ;;  %v1510_v35 = vadd.f32 %v1494_v33, %v1436_v19  ;;  %v520_v37 = vrot.slane %v395_v12, 2  ;;  %v11854_v62 = vsel %vm749_vm4, %v11513_v57, %v2279_v47  ;;  %v16972_v22 = vld [vmem:[#allocation72_spill] sm:$0xff] }
 0x21a   : > { %16969 = vst [vmem:[#allocation48_spill] sm:$0xff] %v11846_v48  ;;  %v416_v28 = vmul.f32 %v16904_v30, %v16972_v22  ;;  %v595_v49 = vrot.slane %v395_v12, 3  ;;  %v11858_v46 = vrot.slane %v6932_v43, 2  ;;  %v16974_v19 = vrot.slane %v16972_v22, 1 }
 0x21b   : > { %v11849_v53 = vadd.f32 %v11694_v25, %v3913_v6  ;;  %16971 = vst [vmem:[#allocation61_spill] sm:$0xff] %v11854_v62  ;;  %v1584_v4 = vadd.f32 %v1568_v7, %v1510_v35  ;;  %v16975_v6 = vrot.slane %v16972_v22, 2  ;;  %v11872_v30 = vsel %vm824_vm5, %v11516_v23, %v2353_v42  ;;  %v11874_v7 = vld [vmem:[#allocation5 + $0x1] ss:$0 sm:$0xff] }
 0x21c   : > { %16973 = vst [vmem:[#allocation32_spill] sm:$0xff] %v11858_v46  ;;  %v454_v33 = vsel %vm449_vm0, %v16974_v19, %v443_v3  ;;  %v16977_v3 = vrot.slane %v16972_v22, 3  ;;  %v745_v23 = vrot.slane %v395_v12, 5 }
 0x21d   : > { %16970 = vst [vmem:[#allocation50_spill] sm:$0xff] %v11849_v53  ;;  %v529_v25 = vsel %vm524_vm1, %v16975_v6, %v520_v37  ;;  %3957 = vadd.xlane.f32.xlu0 %v11849_v53  ;;  %v477_v47 = vmul.f32 %v11874_v7, %v454_v33  ;;  %v1658_v57 = vadd.f32 %v1642_v58, %v1584_v4  ;;  %v16978_v6 = vrot.slane %v11334_v60, 1 }
 0x21e   : > { %16976 = vst [vmem:[#allocation58_spill] sm:$0xff] %v11872_v30  ;;  %v552_v35 = vmul.f32 %v16909_v8, %v529_v25  ;;  %v604_v19 = vsel %vm599_vm2, %v16977_v3, %v595_v49  ;;  %v11884_v37 = vmul.f32 %v11205_v34, %v11854_v62  ;;  %v11891_v33 = vrot.slane %v6932_v43, 3 }
 0x21f   : > { %v2496_v42 = vsel %vm449_vm0, %v11846_v48, %v16978_v6  ;;  %v493_v8 = vadd.f32 %v477_v47, %v416_v28  ;;  %v627_v25 = vmul.f32 %v16910_v63, %v604_v19  ;;  %v670_v53 = vrot.slane %v395_v12, 4  ;;  %v16981_v48 = vld [vmem:[#allocation87_spill] sm:$0xff] }
 0x220   : > { %16979 = vst [vmem:[#allocation70_spill] sm:$0xff] %v11891_v33  ;;  %v1732_v49 = vadd.f32 %v1716_v24, %v1658_v57  ;;  %v11896_v58 = vmul.f32 %v11217_v16, %v11872_v30  ;;  %v16980_v4 = vrot.slane %v11334_v60, 2  ;;  %v820_v6 = vrot.slane %v395_v12, 6 }
 0x221   : > { %v11904_v62 = vmul.f32 %v16981_v48, %v2496_v42  ;;  %v16982_v28 = vrot.slane %v11334_v60, 3  ;;  %v568_v57 = vadd.f32 %v552_v35, %v493_v8  ;;  %v16983_v24 = vrot.slane %v16972_v22, 4  ;;  %v16986_v48 = vld [vmem:[#allocation79_spill] sm:$0xff] }
 0x222   : > { %v2570_v3 = vsel %vm524_vm1, %v11858_v46, %v16980_v4  ;;  %v1806_v19 = vadd.f32 %v1790_v39, %v1732_v49  ;;  %v11915_v30 = vrot.slane %v6932_v43, 4  ;;  %v6959_v4 = vld [vmem:[%s8415_s9 + $0x100] sm:$0xff]  ;;  %v16985_v42 = vrot.slane %v16972_v22, 5 }
 0x223   : > { %v2644_v63 = vsel %vm599_vm2, %v11891_v33, %v16982_v28  ;;  %v679_v47 = vsel %vm674_vm3, %v16983_v24, %v670_v53  ;;  %v11924_v16 = vmul.f32 %v16986_v48, %v2570_v3  ;;  %v11926_v35 = vrot.slane %v6932_v43, 5  ;;  %v3952_v3 = vpop.xlane.xlu2 %3951  ;;  %v12059_v33 = vld [vmem:[#allocation5 + $0xc] ss:$0 sm:$0xff] }
 0x224   : > { %16984 = vst [vmem:[#allocation59_spill] sm:$0xff] %v11915_v30  ;;  %v702_v12 = vmul.f32 %v16912_v40, %v679_v47  ;;  %v754_v46 = vsel %vm749_vm4, %v16985_v42, %v745_v23  ;;  %v643_v8 = vadd.f32 %v627_v25, %v568_v57  ;;  %v1880_v53 = vadd.f32 %v1864_v52, %v1806_v19 }
 0x225   : > { %16987 = vst [vmem:[#allocation68_spill] sm:$0xff] %v11926_v35  ;;  %v777_v28 = vmul.f32 %v16916_v2, %v754_v46  ;;  %v16988_v39 = vrot.slane %v11334_v60, 4  ;;  %v11934_v49 = vrot.slane %v6932_v43, 6  ;;  %v16990_v24 = vrot.slane %v16972_v22, 6  ;;  %v16992_v43 = vld [vmem:[#allocation91_spill] sm:$0xff] }
 0x226   : > { %v16991_v47 = vrot.slane %v11334_v60, 5  ;;  %v2993_v2 = vrot.slane %v6959_v4, 1  ;;  %v718_v46 = vadd.f32 %v702_v12, %v643_v8  ;;  %v1941_v57 = vadd.f32 %v11823_v20, %v1880_v53  ;;  %v16994_v12 = vld [vmem:[#allocation42_spill] sm:$0xff]  ;;  %v16995_v8 = vld [vmem:[#allocation77_spill] sm:$0xff] }
 0x227   : > { %v2718_v40 = vsel %vm674_vm3, %v11915_v30, %v16988_v39  ;;  %16989 = vst [vmem:[#allocation72_spill] sm:$0xff] %v11934_v49  ;;  %v829_v23 = vsel %vm824_vm5, %v16990_v24, %v820_v6  ;;  %v11948_v19 = vmul.f32 %v16992_v43, %v2644_v63  ;;  %v3067_v22 = vrot.slane %v6959_v4, 2 }
 0x228   : > { %v2792_v52 = vsel %vm749_vm4, %v11926_v35, %v16991_v47  ;;  %v852_v25 = vmul.f32 %v16918_v55, %v829_v23  ;;  %v3141_v42 = vrot.slane %v6959_v4, 3  ;;  %v16993_v6 = vrot.slane %v11334_v60, 6  ;;  %v11955_v47 = vld [vmem:[#allocation5 + $0x7] ss:$0 sm:$0xff]  ;;  %v16996_v60 = vld [vmem:[#allocation99_spill] sm:$0xff]  ;;  %v17011_v35 = vld [vmem:[#allocation105_spill] sm:$0xff] }
 0x229   : > { %v3215_v24 = vrot.slane %v6959_v4, 4  ;;  %v793_v30 = vadd.f32 %v777_v28, %v718_v46  ;;  %v913_v55 = vmul.f32 %v11955_v47, %v11098_v36  ;;  %v3985_v20 = vmul.f32 %v16994_v12, %v3952_v3 }
 0x22a   : > { %v2866_v39 = vsel %vm824_vm5, %v11934_v49, %v16993_v6  ;;  %v2015_v63 = vadd.f32 %v11829_v41, %v1941_v57  ;;  %v11962_v53 = vmul.f32 %v16995_v8, %v2718_v40  ;;  %v11965_v23 = vmul.f32 %v16996_v60, %v2792_v52  ;;  %v11972_v49 = vld [vmem:[#allocation5 + $0x8] ss:$0 sm:$0xff]  ;;  %v11996_v57 = vld [vmem:[#allocation5 + $0x9] ss:$0 sm:$0xff] }
 0x22b   : > { %v11970_v28 = vsel %vm449_vm0, %v11588_v50, %v2993_v2  ;;  %v3289_v46 = vrot.slane %v6959_v4, 5  ;;  %v868_v6 = vadd.f32 %v852_v25, %v793_v30  ;;  %v987_v36 = vmul.f32 %v11972_v49, %v11608_v17  ;;  %v16998_v40 = vld [vmem:[#allocation100_spill] sm:$0xff] }
 0x22c   : > { %16997 = vst [vmem:[#allocation79_spill] sm:$0xff] %v11970_v28  ;;  %v2089_v41 = vadd.f32 %v11833_v56, %v2015_v63  ;;  %v11978_v3 = vmul.f32 %v16998_v40, %v2866_v39  ;;  %v11983_v52 = vsel %vm524_vm1, %v11592_v11, %v3067_v22  ;;  %v11988_v30 = vsel %vm599_vm2, %v11597_v13, %v3141_v42  ;;  %v6984_v56 = vld [vmem:[%s8415_s9 + $0x110] sm:$0xff]  ;;  %v17003_v22 = vld [vmem:[#allocation84_spill] sm:$0xff] }
 0x22d   : > { %16999 = vst [vmem:[#allocation91_spill] sm:$0xff] %v11983_v52  ;;  %v11993_v2 = vsel %vm674_vm3, %v11643_v10, %v3215_v24  ;;  %v3363_v17 = vrot.slane %v6959_v4, 6  ;;  %v929_v25 = vadd.f32 %v913_v55, %v868_v6  ;;  %v17002_v39 = vld [vmem:[#allocation89_spill] sm:$0xff]  ;;  %v12001_v11 = vsub.f32 %v17003_v22, %v3985_v20  ;;  %v17006_v24 = vld [vmem:[#allocation102_spill] sm:$0xff]  ;;  %v17007_v55 = vld [vmem:[#allocation103_spill] sm:$0xff] }
 0x22e   : > { %17000 = vst [vmem:[#allocation77_spill] sm:$0xff] %v11988_v30  ;;  %v1061_v63 = vmul.f32 %v11996_v57, %v17002_v39  ;;  %v2179_v50 = vadd.f32 %v11837_v54, %v2089_v41  ;;  %v17005_v42 = vld [vmem:[#allocation101_spill] sm:$0xff]  ;;  %v12010_v10 = vmul.f32 %v17006_v24, %v11970_v28  ;;  %v12013_v4 = vld [vmem:[%s8415_s9 + $0x118] sm:$0xff]  ;;  %v12017_v6 = vmul.f32 %v17007_v55, %v11983_v52  ;;  %v12024_v41 = vld [vmem:[#allocation5 + $0xa] ss:$0 sm:$0xff] }
 0x22f   : > { %17001 = vst [vmem:[#allocation99_spill] sm:$0xff] %v11993_v2  ;;  %v12006_v13 = vmul.f32 %v17005_v42, %v11562_v61  ;;  %v12022_v20 = vsel %vm749_vm4, %v11671_v32, %v3289_v46  ;;  %v1003_v54 = vadd.f32 %v987_v36, %v929_v25  ;;  %v17010_v39 = vld [vmem:[#allocation31_spill] sm:$0xff]  ;;  %v12031_v28 = vmul.f32 %v17011_v35, %v11988_v30  ;;  %v17012_v55 = vld [vmem:[#allocation106_spill] sm:$0xff] }
 0x230   : > { %17004 = vst [vmem:[#allocation100_spill] sm:$0xff] %v12001_v11  ;;  %v1135_v22 = vmul.f32 %v12024_v41, %v17010_v39  ;;  %v2253_v12 = vadd.f32 %v11841_v21, %v2179_v50  ;;  %v12035_v52 = vmul.f32 %v17012_v55, %v11993_v2  ;;  %v12037_v61 = vrot.slane %v6984_v56, 1  ;;  %v12045_v39 = vld [vmem:[#allocation5 + $0xb] ss:$0 sm:$0xff]  ;;  %v17016_v50 = vld [vmem:[#allocation27_spill] sm:$0xff]  ;;  %v17025_v24 = vld [vmem:[#allocation30_spill] sm:$0xff] }
 0x231   : > { %17008 = vst [vmem:[#allocation89_spill] sm:$0xff] %v12022_v20  ;;  %v12042_v46 = vsel %vm824_vm5, %v11706_v5, %v3363_v17  ;;  %v3498_v36 = vrot.slane %v12013_v4, 1  ;;  %v1077_v25 = vadd.f32 %v1061_v63, %v1003_v54  ;;  %v1209_v21 = vmul.f32 %v12045_v39, %v17016_v50  ;;  %v17017_v55 = vld [vmem:[#allocation107_spill] sm:$0xff]  ;;  %v12063_v54 = vld [vmem:[#allocation5 + $0xd] ss:$0 sm:$0xff] }
 0x232   : > { %17009 = vst [vmem:[#allocation84_spill] sm:$0xff] %v12024_v41  ;;  %v2327_v35 = vadd.f32 %v11884_v37, %v2253_v12  ;;  %v12052_v32 = vmul.f32 %v17017_v55, %v12022_v20  ;;  %v12054_v2 = vrot.slane %v6984_v56, 2  ;;  %v3572_v30 = vrot.slane %v12013_v4, 2  ;;  %v17022_v50 = vld [vmem:[#allocation81_spill] sm:$0xff] }
 0x233   : > { %17013 = vst [vmem:[#allocation101_spill] sm:$0xff] %v12037_v61  ;;  %v12057_v17 = vrot.slane %v6984_v56, 3  ;;  %v1151_v5 = vadd.f32 %v1135_v22, %v1077_v25  ;;  %v1283_v63 = vmul.f32 %v12059_v33, %v11650_v15  ;;  %v1357_v37 = vmul.f32 %v12063_v54, %v17022_v50  ;;  %v17023_v55 = vld [vmem:[#allocation109_spill] sm:$0xff]  ;;  %v17026_v25 = vld [vmem:[#allocation92_spill] sm:$0xff] }
 0x234   : > { %17014 = vst [vmem:[#allocation103_spill] sm:$0xff] %v12042_v46  ;;  %v2401_v12 = vadd.f32 %v11896_v58, %v2327_v35  ;;  %v12070_v20 = vmul.f32 %v17023_v55, %v12042_v46  ;;  %v1492_v15 = vmul.f32 %v16948_v38, %v17026_v25  ;;  %v12081_v50 = vrot.slane %v6984_v56, 4  ;;  %v12083_v35 = vld [vmem:[#allocation5 + $0x10] ss:$0 sm:$0xff]  ;;  %v17029_v55 = vld [vmem:[#allocation95_spill] sm:$0xff] }
 0x235   : > { %17015 = vst [vmem:[#allocation31_spill] sm:$0xff] %v12045_v39  ;;  %v12072_v39 = vld [vmem:[#allocation5 + $0xe] ss:$0 sm:$0xff]  ;;  %v1225_v58 = vadd.f32 %v1209_v21, %v1151_v5  ;;  %v1566_v46 = vmul.f32 %v12083_v35, %v17029_v55  ;;  %v3580_v38 = vsel %vm524_vm1, %v12054_v2, %v3572_v30  ;;  %v12094_v25 = vld [vmem:[#allocation5 + $0x11] ss:$0 sm:$0xff]  ;;  %v3646_v21 = vrot.slane %v12013_v4, 3 }
 0x236   : > { %17018 = vst [vmem:[#allocation105_spill] sm:$0xff] %v12054_v2  ;;  %v1418_v22 = vmul.f32 %v12072_v39, %v17025_v24  ;;  %v17030_v24 = vld [vmem:[#allocation110_spill] sm:$0xff]  ;;  %v17034_v41 = vld [vmem:[#allocation37_spill] sm:$0xff]  ;;  %v12110_v2 = vrot.slane %v6984_v56, 5 }
 0x237   : > { %17019 = vst [vmem:[#allocation106_spill] sm:$0xff] %v12057_v17  ;;  %v1714_v55 = vmul.f32 %v16959_v26, %v17034_v41  ;;  %v12122_v41 = vrot.slane %v6984_v56, 6 }
 0x238   : > { %17020 = vst [vmem:[#allocation27_spill] sm:$0xff] %v12059_v33  ;;  %v3506_v33 = vsel %vm449_vm0, %v12037_v61, %v3498_v36  ;;  %v17033_v36 = vld [vmem:[#allocation36_spill] sm:$0xff]  ;;  %v1299_v61 = vadd.f32 %v1283_v63, %v1225_v58  ;;  %v12117_v63 = vld [vmem:[%s8415_s9 + $0x98] sm:$0xff] }
 0x239   : > { %17021 = vst [vmem:[#allocation107_spill] sm:$0xff] %v12063_v54  ;;  %v2462_v54 = vadd.f32 %v11844_v14, %v2401_v12  ;;  %v1640_v5 = vmul.f32 %v12094_v25, %v17033_v36  ;;  %v12104_v12 = vld [vmem:[%s8415_s9 + $0x90] sm:$0xff]  ;;  %v12114_v36 = vmul.f32 %v16962_v9, %v11752_v44  ;;  %v17039_v58 = vld [vmem:[#allocation116_spill] sm:$0xff] }
 0x23a   : > { %17024 = vst [vmem:[#allocation81_spill] sm:$0xff] %v12072_v39  ;;  %v12089_v39 = vmul.f32 %v17030_v24, %v6984_v56  ;;  %v12120_v26 = vmul.f32 %v17039_v58, %v3580_v38  ;;  %v17041_v44 = vld [vmem:[#allocation45_spill] sm:$0xff]  ;;  %v3720_v56 = vrot.slane %v12013_v4, 4  ;;  %v17042_v38 = vld [vmem:[#allocation35_spill] sm:$0xff] }
 0x23b   : > { %17027 = vst [vmem:[#allocation109_spill] sm:$0xff] %v12081_v50  ;;  %v2536_v24 = vadd.f32 %v11904_v62, %v2462_v54  ;;  %v12126_v62 = vmul.f32 %v16963_v0, %v16946_v18  ;;  %v12135_v9 = vmul.f32 %v16965_v45, %v17041_v44  ;;  %v16006_v54 = vrot.slane %v12104_v12, 1 }
 0x23c   : > { %17028 = vst [vmem:[#allocation30_spill] sm:$0xff] %v12083_v35  ;;  %v17035_v35 = vld [vmem:[#allocation129_spill] sm:$0xff]  ;;  %v16005_v18 = vrot.slane %v12117_v63, 1  ;;  %v16010_v45 = vrot.slane %v12104_v12, 2 }
 0x23d   : > { %17031 = vst [vmem:[#allocation92_spill] sm:$0xff] %v12089_v39  ;;  %v1788_v14 = vmul.f32 %v16960_v51, %v17035_v35  ;;  %v17036_v39 = vld [vmem:[#allocation114_spill] sm:$0xff]  ;;  %v1373_v51 = vadd.f32 %v1357_v37, %v1299_v61  ;;  %v3654_v61 = vsel %vm599_vm2, %v12057_v17, %v3646_v21  ;;  %v12144_v37 = vld [vmem:[#allocation5] ss:$0 sm:$0xff]  ;;  %v12152_v21 = vmul.f32 %v16966_v29, %v17042_v38  ;;  %v12515_v38 = vld [vmem:[#allocation5 + $0x28] ss:$0 sm:$0xff] }
 0x23e   : > { %17032 = vst [vmem:[#allocation95_spill] sm:$0xff] %v12094_v25  ;;  %v12108_v30 = vmul.f32 %v17036_v39, %v3506_v33  ;;  %v2610_v33 = vadd.f32 %v11924_v16, %v2536_v24  ;;  %v12131_v39 = vmul.f32 %v16964_v27, %v11758_v59  ;;  %v419_v59 = vmul.f32 %v12144_v37, %v12104_v12 }
 0x23f   : > { %17037 = vst [vmem:[#allocation110_spill] sm:$0xff] %v12110_v2  ;;  %v1434_v0 = vadd.f32 %v1418_v22, %v1373_v51  ;;  %v16007_v27 = vrot.slane %v12117_v63, 2  ;;  %v16009_v22 = vrot.slane %v12104_v12, 3  ;;  %v17043_v51 = vld [vmem:[#allocation117_spill] sm:$0xff] }
 0x240   : > { %17038 = vst [vmem:[#allocation36_spill] sm:$0xff] %v12117_v63  ;;  %v2684_v16 = vadd.f32 %v11948_v19, %v2610_v33  ;;  %v464_v19 = vsel %vm449_vm0, %v16006_v54, %v16005_v18  ;;  %v12171_v33 = vmul.f32 %v17043_v51, %v3654_v61 }
 0x241   : > { %17040 = vst [vmem:[#allocation37_spill] sm:$0xff] %v12122_v41  ;;  %v1508_v35 = vadd.f32 %v1492_v15, %v1434_v0  ;;  %v480_v58 = vmul.f32 %v11874_v7, %v464_v19  ;;  %v539_v29 = vsel %vm524_vm1, %v16010_v45, %v16007_v27  ;;  %v16008_v15 = vrot.slane %v12117_v63, 3  ;;  %v12173_v0 = vld [vmem:[#allocation5 + $0x2] ss:$0 sm:$0xff]  ;;  %v12215_v45 = vld [vmem:[#allocation5 + $0x4] ss:$0 sm:$0xff] }
 0x242   : > { %v2758_v24 = vadd.f32 %v11962_v53, %v2684_v16  ;;  %v555_v18 = vmul.f32 %v12173_v0, %v539_v29  ;;  %v16040_v53 = vrot.slane %v12104_v12, 4  ;;  %v4017_v19 = vmul.f32 %v12001_v11, %v12001_v11  ;;  %v12189_v29 = vld [vmem:[#allocation5 + $0x3] ss:$0 sm:$0xff] }
 0x243   : > { %v1582_v44 = vadd.f32 %v1566_v46, %v1508_v35  ;;  %v496_v54 = vadd.f32 %v480_v58, %v419_v59  ;;  %v614_v61 = vsel %vm599_vm2, %v16009_v22, %v16008_v15  ;;  %v3728_v46 = vsel %vm674_vm3, %v12081_v50, %v3720_v56 }
 0x244   : > { %v2832_v16 = vadd.f32 %v11965_v23, %v2758_v24  ;;  %v630_v23 = vmul.f32 %v12189_v29, %v614_v61  ;;  %v16011_v24 = vrot.slane %v12117_v63, 4  ;;  %v3794_v58 = vrot.slane %v12013_v4, 5  ;;  %4038 = vadd.xlane.f32.xlu0 %v4017_v19  ;;  %v17046_v19 = vld [vmem:[#allocation98_spill] sm:$0xff]  ;;  %v17047_v61 = vld [vmem:[#allocation71_spill] sm:$0xff] }
 0x245   : > { %v1656_v35 = vadd.f32 %v1640_v5, %v1582_v44  ;;  %v571_v51 = vadd.f32 %v555_v18, %v496_v54  ;;  %v16013_v27 = vrot.slane %v12104_v12, 5  ;;  %v3868_v15 = vrot.slane %v12013_v4, 6  ;;  %v17044_v44 = vld [vmem:[#allocation34_spill] sm:$0xff]  ;;  %v17045_v54 = vld [vmem:[#allocation39_spill] sm:$0xff] }
 0x246   : > { %v2906_v59 = vadd.f32 %v11978_v3, %v2832_v16  ;;  %v689_v5 = vsel %vm674_vm3, %v16040_v53, %v16011_v24  ;;  %v16012_v56 = vrot.slane %v12117_v63, 5  ;;  %v2235_v16 = vmul.f32 %v16967_v31, %v17044_v44  ;;  %v17049_v44 = vld [vmem:[#allocation119_spill] sm:$0xff]  ;;  %v17091_v53 = vld [vmem:[#allocation32_spill] sm:$0xff] }
 0x247   : > { %v1730_v22 = vadd.f32 %v1714_v55, %v1656_v35  ;;  %v12209_v18 = vmul.f32 %v11205_v34, %v17045_v54  ;;  %v646_v4 = vadd.f32 %v630_v23, %v571_v51  ;;  %v12213_v35 = vmul.f32 %v17047_v61, %v17046_v19  ;;  %v12231_v23 = vld [vmem:[#allocation5 + $0x5] ss:$0 sm:$0xff]  ;;  %v17050_v54 = vld [vmem:[#allocation41_spill] sm:$0xff]  ;;  %v17051_v19 = vld [vmem:[#allocation55_spill] sm:$0xff] }
 0x248   : > { %v2967_v3 = vadd.f32 %v12006_v13, %v2906_v59  ;;  %v705_v24 = vmul.f32 %v12215_v45, %v689_v5  ;;  %v764_v31 = vsel %vm749_vm4, %v16013_v27, %v16012_v56  ;;  %v17048_v13 = vld [vmem:[#allocation126_spill] sm:$0xff]  ;;  %v3876_v51 = vsel %vm824_vm5, %v12122_v41, %v3868_v15  ;;  %v17052_v61 = vld [vmem:[#allocation87_spill] sm:$0xff]  ;;  %v12250_v56 = vld [vmem:[%s8415_s9 + $0xa8] sm:$0xff] }
 0x249   : > { %v1804_v55 = vadd.f32 %v1788_v14, %v1730_v22  ;;  %v12226_v14 = vmul.f32 %v17048_v13, %v3728_v46  ;;  %v3802_v22 = vsel %vm749_vm4, %v12110_v2, %v3794_v58  ;;  %v780_v59 = vmul.f32 %v12231_v23, %v764_v31  ;;  %17053 = vst [vmem:[#allocation129_spill] sm:$0xff] %v12250_v56  ;;  %v17054_v15 = vld [vmem:[#allocation127_spill] sm:$0xff] }
 0x24a   : > { %v3041_v34 = vadd.f32 %v12010_v10, %v2967_v3  ;;  %v721_v10 = vadd.f32 %v705_v24, %v646_v4  ;;  %v16015_v46 = vrot.slane %v12104_v12, 6  ;;  %v12242_v58 = vmul.f32 %v17050_v54, %v17049_v44  ;;  %v17055_v4 = vld [vmem:[#allocation57_spill] sm:$0xff]  ;;  %v17057_v54 = vld [vmem:[#allocation128_spill] sm:$0xff] }
 0x24b   : > { %v1878_v5 = vadd.f32 %v12114_v36, %v1804_v55  ;;  %v12246_v13 = vmul.f32 %v17052_v61, %v17051_v19  ;;  %v16014_v31 = vrot.slane %v12117_v63, 6  ;;  %v12253_v36 = vmul.f32 %v17054_v15, %v3802_v22  ;;  %v17058_v61 = vld [vmem:[#allocation46_spill] sm:$0xff]  ;;  %v12272_v22 = vld [vmem:[%s8415_s9 + $0xe8] sm:$0xff]  ;;  %v12644_v63 = vld [vmem:[#allocation5 + $0x1f] ss:$0 sm:$0xff] }
 0x24c   : > { %v3115_v3 = vadd.f32 %v12017_v6, %v3041_v34  ;;  %v12258_v6 = vmul.f32 %v16986_v48, %v17055_v4  ;;  %v796_v55 = vadd.f32 %v780_v59, %v721_v10  ;;  %v12261_v34 = vld [vmem:[%s8415_s9 + $0xb0] sm:$0xff]  ;;  %v12265_v19 = vmul.f32 %v17057_v54, %v3876_v51  ;;  %v12281_v59 = vld [vmem:[#allocation5 + $0x6] ss:$0 sm:$0xff] }
 0x24d   : > { %v1939_v24 = vadd.f32 %v12126_v62, %v1878_v5  ;;  %17056 = vst [vmem:[#allocation114_spill] sm:$0xff] %v12261_v34  ;;  %v12269_v27 = vmul.f32 %v16992_v43, %v17058_v61  ;;  %v839_v48 = vsel %vm824_vm5, %v16015_v46, %v16014_v31  ;;  %v916_v43 = vmul.f32 %v11955_v47, %v12250_v56  ;;  %v17059_v10 = vld [vmem:[#allocation26_spill] sm:$0xff]  ;;  %v17060_v15 = vld [vmem:[#allocation61_spill] sm:$0xff] }
 0x24e   : > { %v3189_v44 = vadd.f32 %v12031_v28, %v3115_v3  ;;  %v855_v28 = vmul.f32 %v12281_v59, %v839_v48  ;;  %v16039_v51 = vrot.slane %v12250_v56, 1  ;;  %v12290_v3 = vmul.f32 %v16995_v8, %v17059_v10 }
 0x24f   : > { %v2013_v62 = vadd.f32 %v12131_v39, %v1939_v24  ;;  %v12294_v4 = vmul.f32 %v16996_v60, %v17060_v15  ;;  %v16019_v39 = vrot.slane %v12261_v34, 1  ;;  %v2992_v54 = vrot.slane %v12272_v22, 1 }
 0x250   : > { %v3263_v5 = vadd.f32 %v12035_v52, %v3189_v44  ;;  %v871_v48 = vadd.f32 %v855_v28, %v796_v55  ;;  %v16036_v31 = vrot.slane %v12250_v56, 2  ;;  %v17061_v52 = vld [vmem:[#allocation58_spill] sm:$0xff]  ;;  %v16018_v60 = vrot.slane %v12261_v34, 2  ;;  %v7815_v55 = vld [vmem:[%s8415_s9 + $0xe0] sm:$0xff] }
 0x251   : > { %v2087_v24 = vadd.f32 %v12135_v9, %v2013_v62  ;;  %v12303_v44 = vmul.f32 %v16998_v40, %v17061_v52  ;;  %v974_v8 = vsel %vm449_vm0, %v16039_v51, %v16019_v39  ;;  %v12315_v62 = vmul.f32 %v7815_v55, %v17005_v42  ;;  %v17086_v51 = vld [vmem:[#allocation48_spill] sm:$0xff] }
 0x252   : > { %v3337_v46 = vadd.f32 %v12052_v32, %v3263_v5  ;;  %v932_v32 = vadd.f32 %v916_v43, %v871_v48  ;;  %v990_v28 = vmul.f32 %v11972_v49, %v974_v8  ;;  %v1048_v5 = vsel %vm524_vm1, %v16036_v31, %v16018_v60 }
 0x253   : > { %v2177_v9 = vadd.f32 %v12152_v21, %v2087_v24  ;;  %v16035_v10 = vrot.slane %v12250_v56, 3  ;;  %v16016_v21 = vrot.slane %v12261_v34, 3  ;;  %v17062_v24 = vld [vmem:[#allocation88_spill] sm:$0xff]  ;;  %v1064_v48 = vmul.f32 %v11996_v57, %v1048_v5 }
 0x254   : > { %v3411_v40 = vadd.f32 %v12070_v20, %v3337_v46  ;;  %v3000_v42 = vsel %vm449_vm0, %v17062_v24, %v2992_v54  ;;  %v1006_v43 = vadd.f32 %v990_v28, %v932_v32  ;;  %v17063_v20 = vld [vmem:[#allocation92_spill] sm:$0xff]  ;;  %v16022_v8 = vrot.slane %v12250_v56, 4 }
 0x255   : > { %v2251_v15 = vadd.f32 %v2235_v16, %v2177_v9  ;;  %v1122_v52 = vsel %vm599_vm2, %v16035_v10, %v16016_v21  ;;  %v16017_v16 = vrot.slane %v12261_v34, 4  ;;  %v3066_v54 = vrot.slane %v12272_v22, 2  ;;  %v17064_v32 = vld [vmem:[#allocation84_spill] sm:$0xff]  ;;  %v12478_v10 = vld [vmem:[#allocation5 + $0x14] ss:$0 sm:$0xff] }
 0x256   : > { %v3472_v46 = vadd.f32 %v17063_v20, %v3411_v40  ;;  %v1080_v55 = vadd.f32 %v1064_v48, %v1006_v43  ;;  %v1138_v28 = vmul.f32 %v17064_v32, %v1122_v52  ;;  %v16021_v24 = vrot.slane %v12250_v56, 5  ;;  %v17066_v52 = vld [vmem:[#allocation31_spill] sm:$0xff]  ;;  %17083 = vst [vmem:[#allocation119_spill] sm:$0xff] %v12478_v10 }
 0x257   : > { %v2325_v9 = vadd.f32 %v12209_v18, %v2251_v15  ;;  %v1196_v5 = vsel %vm674_vm3, %v16022_v8, %v16017_v16  ;;  %v16020_v20 = vrot.slane %v12261_v34, 5  ;;  %v17065_v15 = vld [vmem:[#allocation102_spill] sm:$0xff]  ;;  %v16024_v60 = vrot.slane %v12250_v56, 6 }
 0x258   : > { %v3546_v40 = vadd.f32 %v12108_v30, %v3472_v46  ;;  %v12354_v43 = vmul.f32 %v17065_v15, %v3000_v42  ;;  %v1154_v48 = vadd.f32 %v1138_v28, %v1080_v55  ;;  %v1212_v30 = vmul.f32 %v17066_v52, %v1196_v5  ;;  %v12358_v46 = vld [vmem:[%s8415_s9 + $0xc0] sm:$0xff]  ;;  %v12373_v15 = vld [vmem:[%s8415_s9 + $0xc8] sm:$0xff] }
 0x259   : > { %v2399_v18 = vadd.f32 %v12213_v35, %v2325_v9  ;;  %17067 = vst [vmem:[#allocation116_spill] sm:$0xff] %v12358_v46  ;;  %v1270_v16 = vsel %vm749_vm4, %v16021_v24, %v16020_v20  ;;  %v16023_v35 = vrot.slane %v12261_v34, 6  ;;  %v3140_v9 = vrot.slane %v12272_v22, 3  ;;  %v17068_v28 = vld [vmem:[#allocation27_spill] sm:$0xff] }
 0x25a   : > { %v3620_v21 = vadd.f32 %v12120_v26, %v3546_v40  ;;  %v1228_v55 = vadd.f32 %v1212_v30, %v1154_v48  ;;  %v1286_v5 = vmul.f32 %v17068_v28, %v1270_v16  ;;  %17069 = vst [vmem:[#allocation45_spill] sm:$0xff] %v12373_v15  ;;  %v17070_v40 = vld [vmem:[#allocation90_spill] sm:$0xff]  ;;  %v17071_v30 = vld [vmem:[#allocation107_spill] sm:$0xff]  ;;  %v16025_v8 = vrot.slane %v12373_v15, 2 }
 0x25b   : > { %v2460_v42 = vadd.f32 %v12242_v58, %v2399_v18  ;;  %v3074_v39 = vsel %vm524_vm1, %v17070_v40, %v3066_v54  ;;  %v1344_v58 = vsel %vm824_vm5, %v16024_v60, %v16023_v35  ;;  %v16030_v18 = vrot.slane %v12358_v46, 1  ;;  %v17073_v60 = vld [vmem:[#allocation83_spill] sm:$0xff] }
 0x25c   : > { %v3694_v26 = vadd.f32 %v12171_v33, %v3620_v21  ;;  %v1302_v16 = vadd.f32 %v1286_v5, %v1228_v55  ;;  %v1360_v20 = vmul.f32 %v17071_v30, %v1344_v58  ;;  %v17072_v33 = vld [vmem:[#allocation81_spill] sm:$0xff]  ;;  %v16026_v54 = vrot.slane %v12373_v15, 1 }
 0x25d   : > { %v2534_v48 = vadd.f32 %v12246_v13, %v2460_v42  ;;  %v1421_v21 = vmul.f32 %v17072_v33, %v12358_v46  ;;  %v16027_v40 = vrot.slane %v12358_v46, 2  ;;  %v3148_v13 = vsel %vm599_vm2, %v17073_v60, %v3140_v9  ;;  %v12415_v9 = vld [vmem:[#allocation5 + $0xf] ss:$0 sm:$0xff] }
 0x25e   : > { %v3768_v24 = vadd.f32 %v12226_v14, %v3694_v26  ;;  %v1376_v42 = vadd.f32 %v1360_v20, %v1302_v16  ;;  %v16029_v55 = vrot.slane %v12358_v46, 3  ;;  %v1479_v14 = vsel %vm449_vm0, %v16030_v18, %v16026_v54  ;;  %17074 = vst [vmem:[#allocation117_spill] sm:$0xff] %v12415_v9  ;;  %v12431_v54 = vld [vmem:[%s8415_s9 + $0xd8] sm:$0xff] }
 0x25f   : > { %v2608_v35 = vadd.f32 %v12258_v6, %v2534_v48  ;;  %v1553_v6 = vsel %vm524_vm1, %v16027_v40, %v16025_v8  ;;  %v16028_v60 = vrot.slane %v12373_v15, 3  ;;  %v1495_v26 = vmul.f32 %v12415_v9, %v1479_v14  ;;  %v17075_v48 = vld [vmem:[#allocation30_spill] sm:$0xff]  ;;  %17076 = vst [vmem:[#allocation34_spill] sm:$0xff] %v12431_v54 }
 0x260   : > { %v3842_v5 = vadd.f32 %v12253_v36, %v3768_v24  ;;  %v3214_v36 = vrot.slane %v12272_v22, 4  ;;  %v1437_v24 = vadd.f32 %v1421_v21, %v1376_v42  ;;  %v1569_v16 = vmul.f32 %v17075_v48, %v1553_v6  ;;  %v17125_v48 = vld [vmem:[#allocation103_spill] sm:$0xff] }
 0x261   : > { %v2682_v20 = vadd.f32 %v12269_v27, %v2608_v35  ;;  %v1627_v8 = vsel %vm599_vm2, %v16029_v55, %v16028_v60  ;;  %v16032_v27 = vrot.slane %v12358_v46, 4  ;;  %v16031_v14 = vrot.slane %v12373_v15, 4 }
 0x262   : > { %v3916_v58 = vadd.f32 %v12265_v19, %v3842_v5  ;;  %v1511_v21 = vadd.f32 %v1495_v26, %v1437_v24  ;;  %v1643_v42 = vmul.f32 %v12094_v25, %v1627_v8  ;;  %v17077_v19 = vld [vmem:[#allocation86_spill] sm:$0xff]  ;;  %v16034_v6 = vrot.slane %v12358_v46, 5  ;;  %v12449_v24 = vld [vmem:[#allocation5 + $0x12] ss:$0 sm:$0xff]  ;;  %v12629_v25 = vld [vmem:[#allocation5 + $0x30] ss:$0 sm:$0xff] }
 0x263   : > { %v2756_v35 = vadd.f32 %v12290_v3, %v2682_v20  ;;  %v16033_v40 = vrot.slane %v12373_v15, 5  ;;  %v16038_v60 = vrot.slane %v12358_v46, 6  ;;  %v1701_v3 = vsel %vm674_vm3, %v16032_v27, %v16031_v14  ;;  %17079 = vst [vmem:[#allocation98_spill] sm:$0xff] %v12449_v24  ;;  %v12469_v27 = vld [vmem:[#allocation5 + $0x25] ss:$0 sm:$0xff]  ;;  %v17109_v46 = vld [vmem:[#allocation77_spill] sm:$0xff] }
 0x264   : > { %v12434_v5 = vadd.f32 %v17077_v19, %v3916_v58  ;;  %v1585_v18 = vadd.f32 %v1569_v16, %v1511_v21  ;;  %v16037_v8 = vrot.slane %v12373_v15, 6  ;;  %v3288_v20 = vrot.slane %v12272_v22, 5  ;;  %v12460_v21 = vld [vmem:[#allocation5 + $0x13] ss:$0 sm:$0xff]  ;;  %17081 = vst [vmem:[#allocation126_spill] sm:$0xff] %v12469_v27  ;;  %v17101_v15 = vld [vmem:[#allocation79_spill] sm:$0xff] }
 0x265   : > { %v2830_v55 = vadd.f32 %v12294_v4, %v2756_v35  ;;  %v1717_v26 = vmul.f32 %v12449_v24, %v1701_v3  ;;  %v1775_v4 = vsel %vm749_vm4, %v16034_v6, %v16033_v40  ;;  %v1952_v58 = vrot.slane %v12431_v54, 1  ;;  %17080 = vst [vmem:[#allocation71_spill] sm:$0xff] %v12460_v21 }
 0x266   : > { %17078 = vst [vmem:[#allocation39_spill] sm:$0xff] %v12434_v5  ;;  %3963 = vadd.xlane.f32.xlu2 %v12434_v5  ;;  %v1659_v35 = vadd.f32 %v1643_v42, %v1585_v18  ;;  %v1791_v14 = vmul.f32 %v12460_v21, %v1775_v4  ;;  %v1849_v3 = vsel %vm824_vm5, %v16038_v60, %v16037_v8  ;;  %v3362_v6 = vrot.slane %v12272_v22, 6  ;;  %v12481_v8 = vld [vmem:[#allocation5 + $0x26] ss:$0 sm:$0xff]  ;;  %v17097_v5 = vld [vmem:[#allocation59_spill] sm:$0xff]  ;;  %v12616_v21 = vld [vmem:[%s8415_s9 + $0x108] sm:$0xff] }
 0x267   : > { %v2904_v16 = vadd.f32 %v12303_v44, %v2830_v55  ;;  %v3097_v40 = vmul.f32 %v12469_v27, %v3074_v39  ;;  %v2026_v44 = vrot.slane %v12431_v54, 2  ;;  %v17082_v55 = vld [vmem:[#allocation38_spill] sm:$0xff]  ;;  %v1865_v31 = vmul.f32 %v12478_v10, %v1849_v3  ;;  %17084 = vst [vmem:[#allocation41_spill] sm:$0xff] %v12481_v8  ;;  %v17085_v39 = vld [vmem:[#allocation80_spill] sm:$0xff] }
 0x268   : > { %v3222_v42 = vsel %vm674_vm3, %v17082_v55, %v3214_v36  ;;  %v1733_v4 = vadd.f32 %v1717_v26, %v1659_v35  ;;  %v3171_v60 = vmul.f32 %v12481_v8, %v3148_v13  ;;  %v3296_v22 = vsel %vm749_vm4, %v17085_v39, %v3288_v20  ;;  %v12494_v35 = vld [vmem:[#allocation5 + $0x15] ss:$0 sm:$0xff]  ;;  %v12499_v55 = vld [vmem:[#allocation5 + $0x27] ss:$0 sm:$0xff]  ;;  %v12594_v10 = vld [vmem:[#allocation5 + $0x1b] ss:$0 sm:$0xff] }
 0x269   : > { %v2965_v18 = vadd.f32 %v12315_v62, %v2904_v16  ;;  %v12490_v62 = vsel %vm449_vm0, %v1952_v58, %v17086_v51  ;;  %v2100_v36 = vrot.slane %v12431_v54, 3  ;;  %17088 = vst [vmem:[#allocation87_spill] sm:$0xff] %v12494_v35  ;;  %v1926_v3 = vmul.f32 %v12494_v35, %v12431_v54  ;;  %v17090_v39 = vld [vmem:[#allocation28_spill] sm:$0xff]  ;;  %v12537_v51 = vld [vmem:[%s8415_s9 + $0xf8] sm:$0xff] }
 0x26a   : > { %17087 = vst [vmem:[#allocation55_spill] sm:$0xff] %v12490_v62  ;;  %v1807_v16 = vadd.f32 %v1791_v14, %v1733_v4  ;;  %v2190_v13 = vrot.slane %v12431_v54, 4  ;;  %v3245_v20 = vmul.f32 %v12499_v55, %v3222_v42  ;;  %v3370_v58 = vsel %vm824_vm5, %v17090_v39, %v3362_v6  ;;  %v12510_v4 = vld [vmem:[#allocation5 + $0x16] ss:$0 sm:$0xff]  ;;  %v17106_v35 = vld [vmem:[#allocation72_spill] sm:$0xff] }
 0x26b   : > { %v3039_v26 = vadd.f32 %v12354_v43, %v2965_v18  ;;  %17089 = vst [vmem:[#allocation127_spill] sm:$0xff] %v12499_v55  ;;  %v12508_v43 = vsel %vm524_vm1, %v2026_v44, %v17091_v53  ;;  %v2000_v61 = vmul.f32 %v12510_v4, %v12490_v62  ;;  %v2264_v42 = vrot.slane %v12431_v54, 5  ;;  %v17094_v39 = vld [vmem:[#allocation70_spill] sm:$0xff] }
 0x26c   : > { %17092 = vst [vmem:[#allocation57_spill] sm:$0xff] %v12508_v43  ;;  %v1881_v18 = vadd.f32 %v1865_v31, %v1807_v16  ;;  %v3319_v6 = vmul.f32 %v12515_v38, %v3296_v22  ;;  %v12521_v11 = vsel %vm599_vm2, %v2100_v36, %v17094_v39  ;;  %v2338_v44 = vrot.slane %v12431_v54, 6  ;;  %v12534_v22 = vld [vmem:[%s8415_s9 + $0xf0] sm:$0xff]  ;;  %v12539_v36 = vld [vmem:[#allocation5 + $0x29] ss:$0 sm:$0xff] }
 0x26d   : > { %v3113_v14 = vadd.f32 %v3097_v40, %v3039_v26  ;;  %17093 = vst [vmem:[#allocation128_spill] sm:$0xff] %v12510_v4  ;;  %v12524_v26 = vld [vmem:[#allocation5 + $0x17] ss:$0 sm:$0xff]  ;;  %v12531_v53 = vsel %vm674_vm3, %v2190_v13, %v17097_v5  ;;  %v3393_v39 = vmul.f32 %v12539_v36, %v3370_v58  ;;  %v12550_v62 = vld [vmem:[#allocation5 + $0x18] ss:$0 sm:$0xff]  ;;  %v17120_v34 = vrot.slane %v12534_v22, 2 }
 0x26e   : > { %17095 = vst [vmem:[#allocation26_spill] sm:$0xff] %v12521_v11  ;;  %v1942_v31 = vadd.f32 %v1926_v3, %v1881_v18  ;;  %v2074_v16 = vmul.f32 %v12524_v26, %v12508_v43  ;;  %v17100_v3 = vld [vmem:[#allocation73_spill] sm:$0xff]  ;;  %v12546_v18 = vld [vmem:[#allocation5 + $0x2b] ss:$0 sm:$0xff]  ;;  %v2164_v54 = vmul.f32 %v12550_v62, %v12521_v11  ;;  %v12559_v4 = vld [vmem:[#allocation5 + $0x19] ss:$0 sm:$0xff]  ;;  %v3898_v9 = vmul.f32 %v12629_v25, %v17125_v48 }
 0x26f   : > { %v3187_v40 = vadd.f32 %v3171_v60, %v3113_v14  ;;  %17096 = vst [vmem:[#allocation61_spill] sm:$0xff] %v12524_v26  ;;  %v12542_v60 = vld [vmem:[#allocation5 + $0x2a] ss:$0 sm:$0xff]  ;;  %v3528_v43 = vmul.f32 %v12546_v18, %v17101_v15  ;;  %v12566_v15 = vsel %vm824_vm5, %v2338_v44, %v17106_v35  ;;  %v12590_v35 = vld [vmem:[#allocation5 + $0x2f] ss:$0 sm:$0xff]  ;;  %v17123_v24 = vrot.slane %v12534_v22, 3 }
 0x270   : > { %17098 = vst [vmem:[#allocation58_spill] sm:$0xff] %v12531_v53  ;;  %v3454_v14 = vmul.f32 %v12542_v60, %v17100_v3  ;;  %v2016_v5 = vadd.f32 %v2000_v61, %v1942_v31  ;;  %v17103_v26 = vld [vmem:[#allocation68_spill] sm:$0xff]  ;;  %v2238_v3 = vmul.f32 %v12559_v4, %v12531_v53  ;;  %v17129_v56 = vrot.slane %v12537_v51, 4 }
 0x271   : > { %17099 = vst [vmem:[#allocation88_spill] sm:$0xff] %v12537_v51  ;;  %v3261_v13 = vadd.f32 %v3245_v20, %v3187_v40  ;;  %v12557_v58 = vsel %vm749_vm4, %v2264_v42, %v17103_v26  ;;  %v12572_v26 = vld [vmem:[#allocation5 + $0x2c] ss:$0 sm:$0xff]  ;;  %v12586_v42 = vld [vmem:[#allocation5 + $0x1a] ss:$0 sm:$0xff] }
 0x272   : > { %17102 = vst [vmem:[#allocation92_spill] sm:$0xff] %v12550_v62  ;;  %v2090_v31 = vadd.f32 %v2074_v16, %v2016_v5  ;;  %v17108_v62 = vld [vmem:[#allocation91_spill] sm:$0xff]  ;;  %v12582_v5 = vld [vmem:[#allocation5 + $0x2e] ss:$0 sm:$0xff] }
 0x273   : > { %17104 = vst [vmem:[#allocation84_spill] sm:$0xff] %v12557_v58  ;;  %v3335_v40 = vadd.f32 %v3319_v6, %v3261_v13  ;;  %v3602_v53 = vmul.f32 %v12572_v26, %v17108_v62  ;;  %v17111_v16 = vld [vmem:[#allocation99_spill] sm:$0xff]  ;;  %v2312_v62 = vmul.f32 %v12586_v42, %v12557_v58 }
 0x274   : > { %17105 = vst [vmem:[#allocation102_spill] sm:$0xff] %v12559_v4  ;;  %v12576_v4 = vld [vmem:[#allocation5 + $0x2d] ss:$0 sm:$0xff]  ;;  %v3750_v13 = vmul.f32 %v12582_v5, %v17111_v16  ;;  %v2180_v11 = vadd.f32 %v2164_v54, %v2090_v31  ;;  %v17117_v31 = vrot.slane %v12537_v51, 1  ;;  %v17118_v16 = vrot.slane %v12534_v22, 1 }
 0x275   : > { %17107 = vst [vmem:[#allocation31_spill] sm:$0xff] %v12566_v15  ;;  %v3676_v44 = vmul.f32 %v12576_v4, %v17109_v46  ;;  %v3409_v6 = vadd.f32 %v3393_v39, %v3335_v40  ;;  %v17114_v46 = vld [vmem:[#allocation89_spill] sm:$0xff]  ;;  %v2386_v39 = vmul.f32 %v12594_v10, %v12566_v15  ;;  %v12598_v40 = vld [vmem:[#allocation5 + $0x1c] ss:$0 sm:$0xff] }
 0x276   : > { %17110 = vst [vmem:[#allocation27_spill] sm:$0xff] %v12582_v5  ;;  %v3824_v61 = vmul.f32 %v12590_v35, %v17114_v46  ;;  %v2447_v54 = vmul.f32 %v12598_v40, %v12534_v22  ;;  %v2505_v20 = vsel %vm449_vm0, %v17118_v16, %v17117_v31  ;;  %v17119_v46 = vrot.slane %v12537_v51, 2  ;;  %v3954_v16 = vpop.xlane.xlu2 %3953 }
 0x277   : > { %17112 = vst [vmem:[#allocation90_spill] sm:$0xff] %v12586_v42  ;;  %v3470_v58 = vadd.f32 %v3454_v14, %v3409_v6  ;;  %v2254_v42 = vadd.f32 %v2238_v3, %v2180_v11  ;;  %v3126_v14 = vrot.slane %v12616_v21, 3 }
 0x278   : > { %17113 = vst [vmem:[#allocation107_spill] sm:$0xff] %v12590_v35  ;;  %v2579_v15 = vsel %vm524_vm1, %v17120_v34, %v17119_v46 }
 0x279   : > { %17115 = vst [vmem:[#allocation83_spill] sm:$0xff] %v12594_v10  ;;  %v3544_v6 = vadd.f32 %v3528_v43, %v3470_v58  ;;  %v2328_v34 = vadd.f32 %v2312_v62, %v2254_v42  ;;  %v12636_v43 = vld [vmem:[#allocation5 + $0x1d] ss:$0 sm:$0xff]  ;;  %v3200_v42 = vrot.slane %v12616_v21, 4  ;;  %v17126_v62 = vld [vmem:[#allocation42_spill] sm:$0xff] }
 0x27a   : > { %17116 = vst [vmem:[#allocation86_spill] sm:$0xff] %v12598_v40  ;;  %v17122_v40 = vrot.slane %v12537_v51, 3  ;;  %v2521_v58 = vmul.f32 %v12636_v43, %v2505_v20  ;;  %v3986_v46 = vmul.f32 %v17126_v62, %v3954_v16  ;;  %v12641_v10 = vld [vmem:[#allocation5 + $0x1e] ss:$0 sm:$0xff]  ;;  %v17132_v16 = vrot.slane %v12534_v22, 5 }
 0x27b   : > { %17121 = vst [vmem:[#allocation38_spill] sm:$0xff] %v12616_v21  ;;  %v3618_v11 = vadd.f32 %v3602_v53, %v3544_v6  ;;  %v2402_v3 = vadd.f32 %v2386_v39, %v2328_v34  ;;  %v2595_v48 = vmul.f32 %v12641_v10, %v2579_v15  ;;  %v17130_v53 = vrot.slane %v12534_v22, 4 }
 0x27c   : > { %v2653_v31 = vsel %vm599_vm2, %v17123_v24, %v17122_v40  ;;  %17124 = vst [vmem:[#allocation80_spill] sm:$0xff] %v12629_v25  ;;  %v2978_v24 = vrot.slane %v12616_v21, 1  ;;  %v3052_v40 = vrot.slane %v12616_v21, 2  ;;  %v17131_v34 = vrot.slane %v12537_v51, 5 }
 0x27d   : > { %17127 = vst [vmem:[#allocation28_spill] sm:$0xff] %v12641_v10  ;;  %v2669_v33 = vmul.f32 %v12644_v63, %v2653_v31  ;;  %v2727_v39 = vsel %vm674_vm3, %v17130_v53, %v17129_v56  ;;  %v3692_v20 = vadd.f32 %v3676_v44, %v3618_v11  ;;  %v2463_v6 = vadd.f32 %v2447_v54, %v2402_v3  ;;  %v17135_v10 = vld [vmem:[#allocation101_spill] sm:$0xff] }
 0x27e   : > { %17128 = vst [vmem:[#allocation73_spill] sm:$0xff] %v12644_v63  ;;  %v2801_v15 = vsel %vm749_vm4, %v17132_v16, %v17131_v34  ;;  %v17133_v62 = vrot.slane %v12537_v51, 6  ;;  %v17134_v31 = vrot.slane %v12534_v22, 6  ;;  %v12668_v56 = vsel %vm449_vm0, %v2978_v24, %v17135_v10  ;;  %v17137_v44 = vld [vmem:[#allocation105_spill] sm:$0xff]  ;;  %v17141_v16 = vld [vmem:[#allocation63_spill] sm:$0xff] }
 0x27f   : > { %17136 = vst [vmem:[#allocation79_spill] sm:$0xff] %v12668_v56  ;;  %v12673_v54 = vsel %vm524_vm1, %v3052_v40, %v17137_v44  ;;  %v12678_v11 = vsel %vm599_vm2, %v3126_v14, %v12057_v17  ;;  %v3274_v3 = vrot.slane %v12616_v21, 5  ;;  %v3766_v53 = vadd.f32 %v3750_v13, %v3692_v20  ;;  %v12693_v17 = vld [vmem:[#allocation5 + $0x21] ss:$0 sm:$0xff]  ;;  %v12703_v44 = vld [vmem:[#allocation5 + $0x22] ss:$0 sm:$0xff] }
 0x280   : > { %v2875_v63 = vsel %vm824_vm5, %v17134_v31, %v17133_v62  ;;  %17138 = vst [vmem:[#allocation91_spill] sm:$0xff] %v12673_v54  ;;  %v2537_v62 = vadd.f32 %v2521_v58, %v2463_v6  ;;  %v12684_v34 = vsel %vm674_vm3, %v3200_v42, %v12081_v50  ;;  %v3348_v24 = vrot.slane %v12616_v21, 6  ;;  %v12690_v31 = vld [vmem:[#allocation5 + $0x20] ss:$0 sm:$0xff]  ;;  %v12696_v58 = vld [vmem:[#allocation5 + $0x23] ss:$0 sm:$0xff] }
 0x281   : > { %17139 = vst [vmem:[#allocation77_spill] sm:$0xff] %v12678_v11  ;;  %v12688_v40 = vsub.f32 %v17141_v16, %v3986_v46  ;;  %v2743_v14 = vmul.f32 %v12690_v31, %v2727_v39  ;;  %v2817_v13 = vmul.f32 %v12693_v17, %v2801_v15  ;;  %v2952_v42 = vmul.f32 %v12696_v58, %v12616_v21  ;;  %v12701_v20 = vld [vmem:[%s8415_s9 + $0x120] sm:$0xff]  ;;  %v12711_v10 = vld [vmem:[%s8415_s9 + $0x128] sm:$0xff]  ;;  %v396_v15 = vld [vmem:[%s8415_s9 + $0x78] sm:$0xff] }
 0x282   : > { %17140 = vst [vmem:[#allocation99_spill] sm:$0xff] %v12684_v34  ;;  %v3840_v6 = vadd.f32 %v3824_v61, %v3766_v53  ;;  %v2611_v50 = vadd.f32 %v2595_v48, %v2537_v62  ;;  %v2891_v46 = vmul.f32 %v12703_v44, %v2875_v63  ;;  %v12706_v16 = vld [vmem:[#allocation5 + $0x24] ss:$0 sm:$0xff]  ;;  %v3100_v51 = vmul.f32 %v12469_v27, %v12673_v54  ;;  %v17151_v27 = vld [vmem:[#allocation62_spill] sm:$0xff] }
 0x283   : > { %17142 = vst [vmem:[#allocation89_spill] sm:$0xff] %v12688_v40  ;;  %v3026_v39 = vmul.f32 %v12706_v16, %v12668_v56  ;;  %v3174_v21 = vmul.f32 %v12481_v8, %v12678_v11  ;;  %v12720_v61 = vmul.f32 %v12499_v55, %v12684_v34  ;;  %v12725_v63 = vsel %vm749_vm4, %v3274_v3, %v12110_v2 }
 0x284   : > { %17143 = vst [vmem:[#allocation103_spill] sm:$0xff] %v12703_v44  ;;  %v3914_v48 = vadd.f32 %v3898_v9, %v3840_v6  ;;  %v2685_v53 = vadd.f32 %v2669_v33, %v2611_v50  ;;  %v12730_v62 = vsel %vm824_vm5, %v3348_v24, %v12122_v41  ;;  %v3483_v54 = vrot.slane %v12701_v20, 1  ;;  %v17149_v24 = vld [vmem:[#allocation40_spill] sm:$0xff] }
 0x285   : > { %17144 = vst [vmem:[#allocation63_spill] sm:$0xff] %v12706_v16  ;;  %v3557_v56 = vrot.slane %v12701_v20, 2  ;;  %v428_v55 = vrot.slane %v396_v15, 1  ;;  %v417_v50 = vmul.f32 %v12144_v37, %v396_v15  ;;  %v505_v33 = vrot.slane %v396_v15, 2 }
 0x286   : > { %17145 = vst [vmem:[#allocation130_spill] sm:$0xff] %v12711_v10  ;;  %v12737_v8 = vadd.f32 %v17077_v19, %v3914_v48  ;;  %v2759_v3 = vadd.f32 %v2743_v14, %v2685_v53  ;;  %v3631_v9 = vrot.slane %v12701_v20, 3  ;;  %v580_v41 = vrot.slane %v396_v15, 3  ;;  %v17150_v48 = vld [vmem:[#allocation54_spill] sm:$0xff] }
 0x287   : > { %17146 = vst [vmem:[#allocation131_spill] sm:$0xff] %v12725_v63  ;;  %v463_v6 = vsel %vm449_vm0, %v428_v55, %v17149_v24  ;;  %v655_v11 = vrot.slane %v396_v15, 4  ;;  %v4018_v19 = vmul.f32 %v12688_v40, %v12688_v40  ;;  %v538_v53 = vsel %vm524_vm1, %v505_v33, %v17150_v48  ;;  %v17152_v24 = vld [vmem:[#allocation29_spill] sm:$0xff] }
 0x288   : > { %17147 = vst [vmem:[#allocation132_spill] sm:$0xff] %v12730_v62  ;;  %3959 = vadd.xlane.f32.xlu1 %v12737_v8  ;;  %v2833_v2 = vadd.f32 %v2817_v13, %v2759_v3  ;;  %v478_v14 = vmul.f32 %v11874_v7, %v463_v6  ;;  %v613_v55 = vsel %vm599_vm2, %v580_v41, %v17151_v27  ;;  %v730_v13 = vrot.slane %v396_v15, 5  ;;  %v17154_v41 = vld [vmem:[#allocation65_spill] sm:$0xff] }
 0x289   : > { %17148 = vst [vmem:[#allocation133_spill] sm:$0xff] %v12737_v8  ;;  %v688_v8 = vsel %vm674_vm3, %v655_v11, %v17152_v24  ;;  %4040 = vadd.xlane.f32.xlu0 %v4018_v19  ;;  %v553_v40 = vmul.f32 %v12173_v0, %v538_v53  ;;  %v628_v6 = vmul.f32 %v12189_v29, %v613_v55  ;;  %v17153_v16 = vrot.slane %v12711_v10, 1 }
 0x28a   : > { %v2907_v3 = vadd.f32 %v2891_v46, %v2833_v2  ;;  %v494_v34 = vadd.f32 %v478_v14, %v417_v50  ;;  %v3705_v48 = vrot.slane %v12701_v20, 4  ;;  %v763_v27 = vsel %vm749_vm4, %v730_v13, %v17154_v41 }
 0x28b   : > { %v3515_v33 = vsel %vm449_vm0, %v3483_v54, %v17153_v16  ;;  %v805_v11 = vrot.slane %v396_v15, 6  ;;  %v16112_v2 = vrot.slane %v12711_v10, 4  ;;  %v703_v50 = vmul.f32 %v12215_v45, %v688_v8  ;;  %v17155_v54 = vld [vmem:[#allocation96_spill] sm:$0xff] }
 0x28c   : > { %v2968_v24 = vadd.f32 %v2952_v42, %v2907_v3  ;;  %v569_v46 = vadd.f32 %v553_v40, %v494_v34  ;;  %v3779_v19 = vrot.slane %v12701_v20, 5  ;;  %v16111_v14 = vrot.slane %v12711_v10, 5 }
 0x28d   : > { %v3853_v53 = vrot.slane %v12701_v20, 6  ;;  %v838_v16 = vsel %vm824_vm5, %v805_v11, %v17155_v54  ;;  %v778_v42 = vmul.f32 %v12231_v23, %v763_v27  ;;  %v3322_v34 = vmul.f32 %v12515_v38, %v12725_v63  ;;  %v17183_v63 = vld [vmem:[#allocation111_spill] sm:$0xff] }
 0x28e   : > { %v3042_v55 = vadd.f32 %v3026_v39, %v2968_v24  ;;  %v644_v15 = vadd.f32 %v628_v6, %v569_v46  ;;  %v3396_v8 = vmul.f32 %v12539_v36, %v12730_v62  ;;  %v3457_v40 = vmul.f32 %v12542_v60, %v12701_v20  ;;  %v17157_v24 = vld [vmem:[#allocation69_spill] sm:$0xff] }
 0x28f   : > { %v17156_v3 = vrot.slane %v12711_v10, 2  ;;  %v853_v6 = vmul.f32 %v12281_v59, %v838_v16  ;;  %v17158_v27 = vrot.slane %v12104_v12, 1  ;;  %v3531_v54 = vmul.f32 %v12546_v18, %v3515_v33 }
 0x290   : > { %v3116_v39 = vadd.f32 %v3100_v51, %v3042_v55  ;;  %v719_v11 = vadd.f32 %v703_v50, %v644_v15  ;;  %v17159_v13 = vrot.slane %v12711_v10, 3  ;;  %v3737_v51 = vsel %vm674_vm3, %v3705_v48, %v16112_v2  ;;  %v17161_v15 = vld [vmem:[#allocation75_spill] sm:$0xff] }
 0x291   : > { %v3589_v41 = vsel %vm524_vm1, %v3557_v56, %v17156_v3  ;;  %v973_v46 = vsel %vm449_vm0, %v17158_v27, %v17157_v24  ;;  %v3811_v56 = vsel %vm749_vm4, %v3779_v19, %v16111_v14  ;;  %v17160_v16 = vrot.slane %v12711_v10, 6  ;;  %v17163_v19 = vld [vmem:[#allocation67_spill] sm:$0xff] }
 0x292   : > { %v3663_v20 = vsel %vm599_vm2, %v3631_v9, %v17159_v13  ;;  %v3190_v50 = vadd.f32 %v3174_v21, %v3116_v39  ;;  %v794_v55 = vadd.f32 %v778_v42, %v719_v11  ;;  %v914_v9 = vmul.f32 %v11955_v47, %v12104_v12 }
 0x293   : > { %v3885_v33 = vsel %vm824_vm5, %v3853_v53, %v17160_v16  ;;  %v988_v13 = vmul.f32 %v11972_v49, %v973_v46  ;;  %v17162_v48 = vrot.slane %v12104_v12, 2  ;;  %v17164_v21 = vrot.slane %v12104_v12, 3  ;;  %v17165_v53 = vld [vmem:[#allocation76_spill] sm:$0xff]  ;;  %v17167_v46 = vld [vmem:[#allocation53_spill] sm:$0xff] }
 0x294   : > { %v17166_v42 = vrot.slane %v12104_v12, 4  ;;  %v3264_v24 = vadd.f32 %v12720_v61, %v3190_v50  ;;  %v869_v27 = vadd.f32 %v853_v6, %v794_v55  ;;  %v17168_v16 = vrot.slane %v12104_v12, 5 }
 0x295   : > { %v1047_v3 = vsel %vm524_vm1, %v17162_v48, %v17161_v15  ;;  %v1121_v39 = vsel %vm599_vm2, %v17164_v21, %v17163_v19  ;;  %v17169_v48 = vld [vmem:[#allocation97_spill] sm:$0xff]  ;;  %v17170_v14 = vrot.slane %v12104_v12, 6  ;;  %v3605_v21 = vmul.f32 %v12572_v26, %v3589_v41 }
 0x296   : > { %v1195_v11 = vsel %vm674_vm3, %v17166_v42, %v17165_v53  ;;  %v1269_v15 = vsel %vm749_vm4, %v17168_v16, %v17167_v46  ;;  %v3679_v2 = vmul.f32 %v12576_v4, %v3663_v20  ;;  %v3753_v53 = vmul.f32 %v12582_v5, %v3737_v51  ;;  %v401_v46 = vld [vmem:[%s8415_s9 + $0xa0] sm:$0xff] }
 0x297   : > { %v1343_v19 = vsel %vm824_vm5, %v17170_v14, %v17169_v48  ;;  %v3827_v61 = vmul.f32 %v12590_v35, %v3811_v56  ;;  %v3338_v6 = vadd.f32 %v3322_v34, %v3264_v24  ;;  %v12845_v50 = vmul.f32 %v12629_v25, %v3885_v33  ;;  %v17171_v48 = vld [vmem:[#allocation129_spill] sm:$0xff]  ;;  %v17173_v24 = vld [vmem:[#allocation104_spill] sm:$0xff] }
 0x298   : > { %v930_v55 = vadd.f32 %v914_v9, %v869_v27  ;;  %v1062_v42 = vmul.f32 %v11996_v57, %v1047_v3  ;;  %v1136_v12 = vmul.f32 %v17064_v32, %v1121_v39  ;;  %v1210_v14 = vmul.f32 %v17066_v52, %v1195_v11  ;;  %v17172_v56 = vld [vmem:[#allocation81_spill] sm:$0xff]  ;;  %v17175_v3 = vld [vmem:[#allocation108_spill] sm:$0xff] }
 0x299   : > { %v1284_v41 = vmul.f32 %v17068_v28, %v1269_v15  ;;  %v1358_v20 = vmul.f32 %v17071_v30, %v1343_v19  ;;  %v3412_v16 = vadd.f32 %v3396_v8, %v3338_v6  ;;  %v1419_v34 = vmul.f32 %v17172_v56, %v17171_v48  ;;  %v17177_v6 = vld [vmem:[#allocation36_spill] sm:$0xff]  ;;  %v17178_v25 = vld [vmem:[#allocation117_spill] sm:$0xff] }
 0x29a   : > { %v1004_v51 = vadd.f32 %v988_v13, %v930_v55  ;;  %v17174_v33 = vrot.slane %v17171_v48, 1  ;;  %v17176_v39 = vrot.slane %v17171_v48, 2  ;;  %v445_v27 = vrot.slane %v401_v46, 1 }
 0x29b   : > { %v522_v15 = vrot.slane %v401_v46, 2  ;;  %v597_v19 = vrot.slane %v401_v46, 3  ;;  %v3473_v8 = vadd.f32 %v3457_v40, %v3412_v16  ;;  %v420_v55 = vmul.f32 %v12144_v37, %v17177_v6 }
 0x29c   : > { %v1478_v9 = vsel %vm449_vm0, %v17174_v33, %v17173_v24  ;;  %v1552_v11 = vsel %vm524_vm1, %v17176_v39, %v17175_v3  ;;  %v1078_v13 = vadd.f32 %v1062_v42, %v1004_v51  ;;  %v672_v10 = vrot.slane %v401_v46, 4  ;;  %v17182_v51 = vld [vmem:[#allocation30_spill] sm:$0xff] }
 0x29d   : > { %v1493_v62 = vmul.f32 %v17178_v25, %v1478_v9  ;;  %v17179_v35 = vrot.slane %v17177_v6, 1  ;;  %v17180_v33 = vrot.slane %v17177_v6, 2  ;;  %v17181_v40 = vrot.slane %v17177_v6, 3 }
 0x29e   : > { %v3547_v37 = vadd.f32 %v3531_v54, %v3473_v8  ;;  %v1152_v16 = vadd.f32 %v1136_v12, %v1078_v13  ;;  %v1567_v9 = vmul.f32 %v17182_v51, %v1552_v11  ;;  %v17184_v5 = vrot.slane %v17171_v48, 3  ;;  %v17186_v13 = vld [vmem:[#allocation113_spill] sm:$0xff] }
 0x29f   : > { %v456_v24 = vsel %vm449_vm0, %v17179_v35, %v445_v27  ;;  %v531_v3 = vsel %vm524_vm1, %v17180_v33, %v522_v15  ;;  %v606_v42 = vsel %vm599_vm2, %v17181_v40, %v597_v19  ;;  %v17185_v15 = vrot.slane %v17177_v6, 4 }
 0x2a0   : > { %v481_v39 = vmul.f32 %v11874_v7, %v456_v24  ;;  %v1626_v35 = vsel %vm599_vm2, %v17184_v5, %v17183_v63  ;;  %v556_v27 = vmul.f32 %v12173_v0, %v531_v3  ;;  %v747_v19 = vrot.slane %v401_v46, 5  ;;  %v12894_v7 = vld [vmem:[%s8415_s9 + $0xb8] sm:$0xff] }
 0x2a1   : > { %v681_v33 = vsel %vm674_vm3, %v17185_v15, %v672_v10  ;;  %v3621_v54 = vadd.f32 %v3605_v21, %v3547_v37  ;;  %v1226_v12 = vadd.f32 %v1210_v14, %v1152_v16  ;;  %v631_v11 = vmul.f32 %v12189_v29, %v606_v42  ;;  %v17188_v0 = vld [vmem:[#allocation115_spill] sm:$0xff]  ;;  %v17191_v37 = vld [vmem:[#allocation118_spill] sm:$0xff] }
 0x2a2   : > { %v497_v8 = vadd.f32 %v481_v39, %v420_v55  ;;  %v17187_v24 = vrot.slane %v17171_v48, 4  ;;  %v17189_v63 = vrot.slane %v17171_v48, 5  ;;  %v17190_v21 = vrot.slane %v17177_v6, 5 }
 0x2a3   : > { %v822_v29 = vrot.slane %v401_v46, 6  ;;  %v3695_v55 = vadd.f32 %v3679_v2, %v3621_v54  ;;  %v1300_v3 = vadd.f32 %v1284_v41, %v1226_v12  ;;  %v706_v42 = vmul.f32 %v12215_v45, %v681_v33  ;;  %v17194_v33 = vld [vmem:[#allocation95_spill] sm:$0xff] }
 0x2a4   : > { %v1700_v5 = vsel %vm674_vm3, %v17187_v24, %v17186_v13  ;;  %v1774_v10 = vsel %vm749_vm4, %v17189_v63, %v17188_v0  ;;  %v756_v14 = vsel %vm749_vm4, %v17190_v21, %v747_v19  ;;  %v572_v40 = vadd.f32 %v556_v27, %v497_v8  ;;  %v17196_v12 = vld [vmem:[#allocation71_spill] sm:$0xff]  ;;  %v17197_v21 = vld [vmem:[#allocation114_spill] sm:$0xff] }
 0x2a5   : > { %v17192_v16 = vrot.slane %v17171_v48, 6  ;;  %v17193_v39 = vrot.slane %v17177_v6, 6  ;;  %v958_v13 = vrot.slane %v12894_v7, 1  ;;  %v1032_v46 = vrot.slane %v12894_v7, 2  ;;  %v17195_v48 = vld [vmem:[#allocation98_spill] sm:$0xff] }
 0x2a6   : > { %v3769_v2 = vadd.f32 %v3753_v53, %v3695_v55  ;;  %v1374_v41 = vadd.f32 %v1358_v20, %v1300_v3  ;;  %v647_v27 = vadd.f32 %v631_v11, %v572_v40  ;;  %v781_v45 = vmul.f32 %v12231_v23, %v756_v14  ;;  %v17199_v20 = vld [vmem:[#allocation119_spill] sm:$0xff]  ;;  %v17201_v55 = vld [vmem:[#allocation120_spill] sm:$0xff] }
 0x2a7   : > { %v1848_v51 = vsel %vm824_vm5, %v17192_v16, %v17191_v37  ;;  %v831_v15 = vsel %vm824_vm5, %v17193_v39, %v822_v29  ;;  %v1641_v19 = vmul.f32 %v17194_v33, %v1626_v35  ;;  %v1715_v54 = vmul.f32 %v17195_v48, %v1700_v5  ;;  %v17202_v3 = vld [vmem:[#allocation116_spill] sm:$0xff] }
 0x2a8   : > { %v1789_v8 = vmul.f32 %v17196_v12, %v1774_v10  ;;  %v856_v6 = vmul.f32 %v12281_v59, %v831_v15  ;;  %v3843_v24 = vadd.f32 %v3827_v61, %v3769_v2  ;;  %v1435_v0 = vadd.f32 %v1419_v34, %v1374_v41  ;;  %v12962_v15 = vld [vmem:[%s15463_s2] ss:$0 sm:$0xff] }
 0x2a9   : > { %v722_v63 = vadd.f32 %v706_v42, %v647_v27  ;;  %v17198_v29 = vrot.slane %v17197_v21, 1  ;;  %v1863_v11 = vmul.f32 %v17199_v20, %v1848_v51  ;;  %v917_v23 = vmul.f32 %v11955_v47, %v17197_v21  ;;  %v17204_v47 = vld [vmem:[#allocation121_spill] sm:$0xff]  ;;  %v17206_v51 = vld [vmem:[#allocation122_spill] sm:$0xff]  ;;  %17209 = vst [vmem:[#allocation54_spill] sm:$0xff] %v12962_v15  ;;  %v17211_v27 = vld [vmem:[#allocation123_spill] sm:$0xff] }
 0x2aa   : > { %v17200_v35 = vrot.slane %v17197_v21, 2  ;;  %v1106_v59 = vrot.slane %v12894_v7, 3  ;;  %v3917_v61 = vadd.f32 %v12845_v50, %v3843_v24  ;;  %v1509_v34 = vadd.f32 %v1493_v62, %v1435_v0 }
 0x2ab   : > { %v966_v53 = vsel %vm449_vm0, %v17198_v29, %v958_v13  ;;  %v797_v10 = vadd.f32 %v781_v45, %v722_v63  ;;  %v1180_v14 = vrot.slane %v12894_v7, 4  ;;  %v17203_v40 = vrot.slane %v17202_v3, 1 }
 0x2ac   : > { %v1040_v5 = vsel %vm524_vm1, %v17200_v35, %v1032_v46  ;;  %v17205_v37 = vrot.slane %v17202_v3, 2  ;;  %v17207_v39 = vrot.slane %v17202_v3, 3  ;;  %v991_v50 = vmul.f32 %v11972_v49, %v966_v53  ;;  %v17213_v49 = vld [vmem:[#allocation124_spill] sm:$0xff] }
 0x2ad   : > { %v1983_v42 = vsel %vm449_vm0, %v17203_v40, %v17201_v55  ;;  %v12965_v13 = vadd.f32 %v12962_v15, %v3917_v61  ;;  %v1583_v46 = vadd.f32 %v1567_v9, %v1509_v34  ;;  %v872_v2 = vadd.f32 %v856_v6, %v797_v10  ;;  %v17217_v10 = vld [vmem:[#allocation87_spill] sm:$0xff]  ;;  %v17219_v40 = vld [vmem:[#allocation61_spill] sm:$0xff] }
 0x2ae   : > { %v2057_v16 = vsel %vm524_vm1, %v17205_v37, %v17204_v47  ;;  %v12956_v62 = vsel %vm599_vm2, %v17207_v39, %v17206_v51  ;;  %v1254_v41 = vrot.slane %v12894_v7, 5  ;;  %v17212_v45 = vrot.slane %v17202_v3, 4  ;;  %v17220_v37 = vld [vmem:[#allocation125_spill] sm:$0xff] }
 0x2af   : > { %17208 = vst [vmem:[#allocation40_spill] sm:$0xff] %v12956_v62  ;;  %v17214_v24 = vrot.slane %v17202_v3, 5  ;;  %v1065_v63 = vmul.f32 %v11996_v57, %v1040_v5  ;;  %v17215_v9 = vrot.slane %v17197_v21, 3  ;;  %3965 = vadd.xlane.f32.xlu2 %v12965_v13  ;;  %v1657_v29 = vadd.f32 %v1641_v19, %v1583_v46  ;;  %v17218_v57 = vld [vmem:[#allocation128_spill] sm:$0xff] }
 0x2b0   : > { %17210 = vst [vmem:[#allocation62_spill] sm:$0xff] %v12965_v13  ;;  %v2221_v33 = vsel %vm674_vm3, %v17212_v45, %v17211_v27  ;;  %v933_v53 = vadd.f32 %v917_v23, %v872_v2  ;;  %v17216_v35 = vrot.slane %v17197_v21, 4  ;;  %v1328_v34 = vrot.slane %v12894_v7, 6  ;;  %v12999_v23 = vld [vmem:[%s8415_s9 + $0xd0] sm:$0xff]  ;;  %v17247_v13 = vld [vmem:[#allocation63_spill] sm:$0xff] }
 0x2b1   : > { %v2295_v0 = vsel %vm749_vm4, %v17214_v24, %v17213_v49  ;;  %v1114_v6 = vsel %vm599_vm2, %v17215_v9, %v1106_v59  ;;  %v1924_v55 = vmul.f32 %v17217_v10, %v17202_v3  ;;  %v1998_v5 = vmul.f32 %v17218_v57, %v1983_v42  ;;  %v17223_v42 = vld [vmem:[#allocation92_spill] sm:$0xff]  ;;  %v17224_v2 = vld [vmem:[#allocation102_spill] sm:$0xff] }
 0x2b2   : > { %v1188_v61 = vsel %vm674_vm3, %v17216_v35, %v1180_v14  ;;  %v2072_v47 = vmul.f32 %v17219_v40, %v2057_v16  ;;  %v17221_v59 = vrot.slane %v17202_v3, 6  ;;  %v1731_v51 = vadd.f32 %v1715_v54, %v1657_v29  ;;  %v17225_v3 = vld [vmem:[#allocation90_spill] sm:$0xff] }
 0x2b3   : > { %v1007_v39 = vadd.f32 %v991_v50, %v933_v53  ;;  %v1139_v14 = vmul.f32 %v17064_v32, %v1114_v6  ;;  %v17222_v7 = vrot.slane %v17197_v21, 5  ;;  %v2162_v16 = vmul.f32 %v17223_v42, %v12956_v62  ;;  %v17227_v6 = vld [vmem:[#allocation83_spill] sm:$0xff]  ;;  %v17228_v29 = vld [vmem:[#allocation34_spill] sm:$0xff] }
 0x2b4   : > { %v2369_v19 = vsel %vm824_vm5, %v17221_v59, %v17220_v37  ;;  %v2236_v27 = vmul.f32 %v17224_v2, %v2221_v33  ;;  %v2310_v45 = vmul.f32 %v17225_v3, %v2295_v0  ;;  %v1213_v49 = vmul.f32 %v17066_v52, %v1188_v61  ;;  %v17229_v53 = vld [vmem:[#allocation86_spill] sm:$0xff]  ;;  %v17230_v33 = vld [vmem:[#allocation55_spill] sm:$0xff]  ;;  %v17232_v37 = vld [vmem:[#allocation28_spill] sm:$0xff] }
 0x2b5   : > { %v1262_v46 = vsel %vm749_vm4, %v17222_v7, %v1254_v41  ;;  %v1805_v24 = vadd.f32 %v1789_v8, %v1731_v51  ;;  %v1081_v9 = vadd.f32 %v1065_v63, %v1007_v39  ;;  %v17226_v54 = vrot.slane %v17197_v21, 6  ;;  %v17234_v51 = vld [vmem:[#allocation73_spill] sm:$0xff]  ;;  %v17235_v7 = vld [vmem:[#allocation58_spill] sm:$0xff] }
 0x2b6   : > { %v1463_v50 = vrot.slane %v12999_v23, 1  ;;  %v13017_v41 = vmul.f32 %v17227_v6, %v2369_v19  ;;  %v13021_v35 = vmul.f32 %v17229_v53, %v17228_v29  ;;  %v13025_v0 = vmul.f32 %v12636_v43, %v17230_v33  ;;  %v17233_v19 = vld [vmem:[#allocation26_spill] sm:$0xff]  ;;  %v17238_v33 = vld [vmem:[#allocation84_spill] sm:$0xff] }
 0x2b7   : > { %v1336_v32 = vsel %vm824_vm5, %v17226_v54, %v1328_v34  ;;  %v1287_v52 = vmul.f32 %v17068_v28, %v1262_v46  ;;  %v1879_v8 = vadd.f32 %v1863_v11, %v1805_v24  ;;  %v1155_v21 = vadd.f32 %v1139_v14, %v1081_v9  ;;  %v17231_v34 = vld [vmem:[#allocation57_spill] sm:$0xff] }
 0x2b8   : > { %v1537_v63 = vrot.slane %v12999_v23, 2  ;;  %v1611_v61 = vrot.slane %v12999_v23, 3  ;;  %v13032_v59 = vmul.f32 %v17232_v37, %v17231_v34  ;;  %v13036_v39 = vmul.f32 %v17234_v51, %v17233_v19  ;;  %v17236_v46 = vld [vmem:[#allocation45_spill] sm:$0xff]  ;;  %v17239_v19 = vld [vmem:[#allocation31_spill] sm:$0xff] }
 0x2b9   : > { %v13040_v54 = vmul.f32 %v12690_v31, %v17235_v7  ;;  %v1361_v28 = vmul.f32 %v17071_v30, %v1336_v32  ;;  %v1940_v11 = vadd.f32 %v1924_v55, %v1879_v8  ;;  %v1229_v14 = vadd.f32 %v1213_v49, %v1155_v21  ;;  %v17240_v7 = vld [vmem:[#allocation93_spill] sm:$0xff] }
 0x2ba   : > { %v17237_v24 = vrot.slane %v17236_v46, 1  ;;  %v1685_v29 = vrot.slane %v12999_v23, 4  ;;  %v13050_v34 = vmul.f32 %v12693_v17, %v17238_v33  ;;  %v13054_v62 = vmul.f32 %v12703_v44, %v17239_v19  ;;  %v13072_v33 = vld [vmem:[%s8415_s9 + $0xe8] sm:$0xff]  ;;  %v13093_v44 = vld [vmem:[#allocation5 + $0x10] ss:$0 sm:$0xff] }
 0x2bb   : > { %v17241_v30 = vrot.slane %v12534_v22, 1  ;;  %v1422_v49 = vmul.f32 %v17172_v56, %v17236_v46  ;;  %v2014_v32 = vadd.f32 %v1998_v5, %v1940_v11  ;;  %v17242_v8 = vrot.slane %v17236_v46, 2  ;;  %17248 = vst [vmem:[#allocation29_spill] sm:$0xff] %v13093_v44 }
 0x2bc   : > { %v1471_v9 = vsel %vm449_vm0, %v17237_v24, %v1463_v50  ;;  %v1303_v50 = vadd.f32 %v1287_v52, %v1229_v14  ;;  %v17243_v24 = vrot.slane %v17236_v46, 3  ;;  %v17245_v56 = vrot.slane %v12534_v22, 2 }
 0x2bd   : > { %v3009_v55 = vsel %vm449_vm0, %v17241_v30, %v17240_v7  ;;  %v1545_v21 = vsel %vm524_vm1, %v17242_v8, %v1537_v63  ;;  %v13076_v7 = vmul.f32 %v12696_v58, %v12534_v22  ;;  %v17244_v30 = vld [vmem:[#allocation94_spill] sm:$0xff]  ;;  %v1496_v52 = vmul.f32 %v17178_v25, %v1471_v9  ;;  %v13096_v25 = vld [vmem:[#allocation5 + $0x11] ss:$0 sm:$0xff] }
 0x2be   : > { %v1619_v19 = vsel %vm599_vm2, %v17243_v24, %v1611_v61  ;;  %v3083_v5 = vsel %vm524_vm1, %v17245_v56, %v17244_v30  ;;  %v1759_v63 = vrot.slane %v12999_v23, 5  ;;  %v2088_v11 = vadd.f32 %v2072_v47, %v2014_v32  ;;  %17249 = vst [vmem:[#allocation65_spill] sm:$0xff] %v13096_v25  ;;  %v17250_v32 = vld [vmem:[#allocation126_spill] sm:$0xff] }
 0x2bf   : > { %v1377_v14 = vadd.f32 %v1361_v28, %v1303_v50  ;;  %v17246_v61 = vrot.slane %v17236_v46, 4  ;;  %v1833_v24 = vrot.slane %v12999_v23, 6  ;;  %v13091_v15 = vmul.f32 %v17247_v13, %v3009_v55  ;;  %v17251_v55 = vld [vmem:[#allocation82_spill] sm:$0xff] }
 0x2c0   : > { %v1570_v30 = vmul.f32 %v13093_v44, %v1545_v21  ;;  %v1644_v47 = vmul.f32 %v13096_v25, %v1619_v19  ;;  %v1968_v28 = vrot.slane %v13072_v33, 1  ;;  %v2178_v9 = vadd.f32 %v2162_v16, %v2088_v11 }
 0x2c1   : > { %v1693_v8 = vsel %vm674_vm3, %v17246_v61, %v1685_v29  ;;  %v13101_v50 = vmul.f32 %v17250_v32, %v3083_v5  ;;  %v1438_v29 = vadd.f32 %v1422_v49, %v1377_v14  ;;  %v2042_v23 = vrot.slane %v13072_v33, 2  ;;  %v17253_v61 = vld [vmem:[#allocation74_spill] sm:$0xff]  ;;  %v17256_v14 = vld [vmem:[#allocation52_spill] sm:$0xff] }
 0x2c2   : > { %v17252_v56 = vrot.slane %v12534_v22, 3  ;;  %v17254_v44 = vrot.slane %v12534_v22, 4  ;;  %v1718_v16 = vmul.f32 %v17195_v48, %v1693_v8  ;;  %v17255_v5 = vrot.slane %v17236_v46, 5  ;;  %v7851_v48 = vld [vmem:[%s8415_s9 + $0xe0] sm:$0xff] }
 0x2c3   : > { %v2252_v11 = vadd.f32 %v2236_v27, %v2178_v9  ;;  %v17257_v25 = vrot.slane %v12534_v22, 5  ;;  %v17258_v32 = vrot.slane %v17236_v46, 6  ;;  %v1927_v8 = vmul.f32 %v7851_v48, %v17217_v10  ;;  %v17261_v46 = vld [vmem:[#allocation32_spill] sm:$0xff] }
 0x2c4   : > { %v3157_v21 = vsel %vm599_vm2, %v17252_v56, %v17251_v55  ;;  %v3231_v19 = vsel %vm674_vm3, %v17254_v44, %v17253_v61  ;;  %v1767_v49 = vsel %vm749_vm4, %v17255_v5, %v1759_v63  ;;  %v1512_v56 = vadd.f32 %v1496_v52, %v1438_v29  ;;  %v17259_v61 = vld [vmem:[#allocation48_spill] sm:$0xff] }
 0x2c5   : > { %v3305_v55 = vsel %vm749_vm4, %v17257_v25, %v17256_v14  ;;  %v1841_v44 = vsel %vm824_vm5, %v17258_v32, %v1833_v24  ;;  %v1976_v27 = vsel %vm449_vm0, %v17259_v61, %v1968_v28  ;;  %v2116_v63 = vrot.slane %v13072_v33, 3  ;;  %v17260_v25 = vld [vmem:[#allocation41_spill] sm:$0xff]  ;;  %v17262_v32 = vld [vmem:[#allocation127_spill] sm:$0xff] }
 0x2c6   : > { %v2206_v9 = vrot.slane %v13072_v33, 4  ;;  %v2326_v5 = vadd.f32 %v2310_v45, %v2252_v11  ;;  %v13136_v14 = vmul.f32 %v17260_v25, %v3157_v21  ;;  %v1586_v52 = vadd.f32 %v1570_v30, %v1512_v56  ;;  %v6936_v61 = vld [vmem:[%s8415_s9 + $0x100] sm:$0xff]  ;;  %v17263_v21 = vld [vmem:[#allocation33_spill] sm:$0xff] }
 0x2c7   : > { %v2050_v24 = vsel %vm524_vm1, %v17261_v46, %v2042_v23  ;;  %v13142_v29 = vmul.f32 %v17262_v32, %v3231_v19  ;;  %v13145_v10 = vmul.f32 %v12515_v38, %v3305_v55  ;;  %v1792_v28 = vmul.f32 %v17196_v12, %v1767_v49  ;;  %v17265_v55 = vld [vmem:[#allocation70_spill] sm:$0xff] }
 0x2c8   : > { %v1866_v48 = vmul.f32 %v17199_v20, %v1841_v44  ;;  %v2400_v45 = vadd.f32 %v13017_v41, %v2326_v5  ;;  %v17264_v30 = vrot.slane %v12534_v22, 6  ;;  %v1660_v23 = vadd.f32 %v1644_v47, %v1586_v52  ;;  %v17267_v20 = vld [vmem:[#allocation59_spill] sm:$0xff] }
 0x2c9   : > { %v2001_v19 = vmul.f32 %v17218_v57, %v1976_v27  ;;  %v2075_v56 = vmul.f32 %v17219_v40, %v2050_v24  ;;  %v13161_v12 = vsel %vm599_vm2, %v17265_v55, %v2116_v63  ;;  %v2214_v41 = vsel %vm674_vm3, %v17267_v20, %v2206_v9  ;;  %v17268_v24 = vld [vmem:[#allocation88_spill] sm:$0xff] }
 0x2ca   : > { %v3379_v11 = vsel %vm824_vm5, %v17264_v30, %v17263_v21  ;;  %17266 = vst [vmem:[#allocation96_spill] sm:$0xff] %v13161_v12  ;;  %v2280_v49 = vrot.slane %v13072_v33, 5  ;;  %v2461_v22 = vadd.f32 %v13021_v35, %v2400_v45  ;;  %v1734_v44 = vadd.f32 %v1718_v16, %v1660_v23  ;;  %v17269_v30 = vld [vmem:[#allocation38_spill] sm:$0xff]  ;;  %v17270_v45 = vld [vmem:[#allocation68_spill] sm:$0xff] }
 0x2cb   : > { %v2354_v47 = vrot.slane %v13072_v33, 6  ;;  %v2489_v5 = vrot.slane %v6936_v61, 1  ;;  %v13170_v57 = vmul.f32 %v12539_v36, %v3379_v11  ;;  %v2563_v40 = vrot.slane %v6936_v61, 2 }
 0x2cc   : > { %v2637_v27 = vrot.slane %v6936_v61, 3  ;;  %v2711_v52 = vrot.slane %v6936_v61, 4  ;;  %v2535_v63 = vadd.f32 %v13025_v0, %v2461_v22  ;;  %v1808_v46 = vadd.f32 %v1792_v28, %v1734_v44 }
 0x2cd   : > { %v13175_v9 = vmul.f32 %v17229_v53, %v17268_v24  ;;  %v2785_v21 = vrot.slane %v6936_v61, 5  ;;  %v13179_v35 = vmul.f32 %v12542_v60, %v17269_v30  ;;  %v2165_v33 = vmul.f32 %v17223_v42, %v13161_v12  ;;  %v17271_v53 = vld [vmem:[#allocation72_spill] sm:$0xff]  ;;  %v17273_v42 = vld [vmem:[#allocation79_spill] sm:$0xff] }
 0x2ce   : > { %v2239_v16 = vmul.f32 %v17224_v2, %v2214_v41  ;;  %v2288_v11 = vsel %vm749_vm4, %v17270_v45, %v2280_v49  ;;  %v2609_v0 = vadd.f32 %v13032_v59, %v2535_v63  ;;  %v1882_v28 = vadd.f32 %v1866_v48, %v1808_v46  ;;  %v17278_v30 = vld [vmem:[#allocation91_spill] sm:$0xff] }
 0x2cf   : > { %v2362_v23 = vsel %vm824_vm5, %v17271_v53, %v2354_v47  ;;  %v17272_v55 = vrot.slane %v17268_v24, 1  ;;  %v13197_v2 = vmul.f32 %v12546_v18, %v17273_v42  ;;  %v17274_v41 = vrot.slane %v17268_v24, 2  ;;  %v13714_v12 = vld [vmem:[#allocation5 + $0x22] ss:$0 sm:$0xff] }
 0x2d0   : > { %v17275_v48 = vrot.slane %v17268_v24, 3  ;;  %v17276_v22 = vrot.slane %v17268_v24, 4  ;;  %v2683_v47 = vadd.f32 %v13036_v39, %v2609_v0  ;;  %v17277_v63 = vrot.slane %v17268_v24, 5  ;;  %v13226_v39 = vld [vmem:[%s8415_s9 + $0xa8] sm:$0xff]  ;;  %17327 = vst [vmem:[#allocation120_spill] sm:$0xff] %v13714_v12 }
 0x2d1   : > { %v2497_v20 = vsel %vm449_vm0, %v17272_v55, %v2489_v5  ;;  %v2571_v59 = vsel %vm524_vm1, %v17274_v41, %v2563_v40  ;;  %v1943_v5 = vadd.f32 %v1927_v8, %v1882_v28  ;;  %v2859_v40 = vrot.slane %v6936_v61, 6  ;;  %v17279_v0 = vld [vmem:[#allocation77_spill] sm:$0xff] }
 0x2d2   : > { %v2645_v49 = vsel %vm599_vm2, %v17275_v48, %v2637_v27  ;;  %v2719_v44 = vsel %vm674_vm3, %v17276_v22, %v2711_v52  ;;  %v2793_v46 = vsel %vm749_vm4, %v17277_v63, %v2785_v21  ;;  %v13218_v45 = vmul.f32 %v12572_v26, %v17278_v30 }
 0x2d3   : > { %v2313_v27 = vmul.f32 %v17225_v3, %v2288_v11  ;;  %v2387_v53 = vmul.f32 %v17227_v6, %v2362_v23  ;;  %v13223_v52 = vmul.f32 %v12636_v43, %v2497_v20  ;;  %v2757_v8 = vadd.f32 %v13040_v54, %v2683_v47  ;;  %v13237_v3 = vld [vmem:[%s8415_s9 + $0xb0] sm:$0xff]  ;;  %v17280_v11 = vld [vmem:[#allocation99_spill] sm:$0xff] }
 0x2d4   : > { %v13231_v61 = vmul.f32 %v12576_v4, %v17279_v0  ;;  %v2017_v21 = vadd.f32 %v2001_v19, %v1943_v5  ;;  %v13234_v26 = vmul.f32 %v17232_v37, %v2571_v59  ;;  %v17281_v6 = vld [vmem:[#allocation27_spill] sm:$0xff]  ;;  %v13244_v43 = vmul.f32 %v17234_v51, %v2645_v49  ;;  %v7852_v51 = vld [vmem:[%s8415_s9 + $0x110] sm:$0xff] }
 0x2d5   : > { %v13241_v28 = vmul.f32 %v17281_v6, %v17280_v11  ;;  %v13247_v23 = vmul.f32 %v12690_v31, %v2719_v44  ;;  %v13250_v54 = vmul.f32 %v12693_v17, %v2793_v46  ;;  %v2831_v4 = vadd.f32 %v13050_v34, %v2757_v8  ;;  %v13258_v20 = vld [vmem:[%s8415_s9 + $0x118] sm:$0xff]  ;;  %v13269_v59 = vld [vmem:[#allocation5] ss:$0 sm:$0xff] }
 0x2d6   : > { %v2091_v19 = vadd.f32 %v2075_v56, %v2017_v21  ;;  %v17282_v37 = vrot.slane %v17268_v24, 6  ;;  %v430_v42 = vrot.slane %v13226_v39, 1  ;;  %v13263_v41 = vmul.f32 %v7852_v51, %v12696_v58  ;;  %v17283_v47 = vld [vmem:[#allocation131_spill] sm:$0xff]  ;;  %v17286_v51 = vld [vmem:[#allocation101_spill] sm:$0xff] }
 0x2d7   : > { %v16153_v31 = vrot.slane %v13237_v3, 1  ;;  %v507_v17 = vrot.slane %v13226_v39, 2  ;;  %v16151_v34 = vrot.slane %v13237_v3, 2  ;;  %v2905_v56 = vadd.f32 %v13054_v62, %v2831_v4  ;;  %v17284_v5 = vld [vmem:[#allocation107_spill] sm:$0xff] }
 0x2d8   : > { %v2867_v55 = vsel %vm824_vm5, %v17282_v37, %v2859_v40  ;;  %v2181_v24 = vadd.f32 %v2165_v33, %v2091_v19  ;;  %v421_v48 = vmul.f32 %v13269_v59, %v13226_v39  ;;  %v582_v49 = vrot.slane %v13226_v39, 3  ;;  %v13289_v40 = vld [vmem:[#allocation5 + $0x1] ss:$0 sm:$0xff]  ;;  %v13294_v21 = vld [vmem:[#allocation5 + $0x2] ss:$0 sm:$0xff] }
 0x2d9   : > { %v2994_v22 = vrot.slane %v13258_v20, 1  ;;  %v465_v58 = vsel %vm449_vm0, %v430_v42, %v16153_v31  ;;  %v540_v62 = vsel %vm524_vm1, %v507_v17, %v16151_v34  ;;  %v16149_v33 = vrot.slane %v13237_v3, 3  ;;  %v17285_v37 = vld [vmem:[#allocation103_spill] sm:$0xff] }
 0x2da   : > { %v2966_v44 = vadd.f32 %v13076_v7, %v2905_v56  ;;  %v13287_v63 = vmul.f32 %v17284_v5, %v17283_v47  ;;  %v2255_v46 = vadd.f32 %v2239_v16, %v2181_v24  ;;  %v482_v30 = vmul.f32 %v13289_v40, %v465_v58  ;;  %v13309_v56 = vld [vmem:[#allocation5 + $0x3] ss:$0 sm:$0xff]  ;;  %v17290_v5 = vld [vmem:[#allocation106_spill] sm:$0xff]  ;;  %v13696_v31 = vld [vmem:[#allocation5 + $0x20] ss:$0 sm:$0xff] }
 0x2db   : > { %v3068_v8 = vrot.slane %v13258_v20, 2  ;;  %v3142_v0 = vrot.slane %v13258_v20, 3  ;;  %v557_v11 = vmul.f32 %v13294_v21, %v540_v62  ;;  %v615_v7 = vsel %vm599_vm2, %v582_v49, %v16149_v33  ;;  %v13675_v33 = vld [vmem:[#allocation5 + $0x1e] ss:$0 sm:$0xff]  ;;  %17324 = vst [vmem:[#allocation71_spill] sm:$0xff] %v13696_v31 }
 0x2dc   : > { %v3040_v6 = vadd.f32 %v13091_v15, %v2966_v44  ;;  %v2329_v16 = vadd.f32 %v2313_v27, %v2255_v46  ;;  %v3216_v4 = vrot.slane %v13258_v20, 4  ;;  %v498_v19 = vadd.f32 %v482_v30, %v421_v48  ;;  %v17287_v15 = vld [vmem:[#allocation132_spill] sm:$0xff]  ;;  %17321 = vst [vmem:[#allocation118_spill] sm:$0xff] %v13675_v33 }
 0x2dd   : > { %v13304_v42 = vmul.f32 %v17285_v37, %v2867_v55  ;;  %v3002_v17 = vsel %vm449_vm0, %v17286_v51, %v2994_v22  ;;  %v632_v24 = vmul.f32 %v13309_v56, %v615_v7  ;;  %v657_v58 = vrot.slane %v13226_v39, 4  ;;  %v17288_v27 = vld [vmem:[#allocation80_spill] sm:$0xff]  ;;  %v17289_v55 = vld [vmem:[#allocation105_spill] sm:$0xff] }
 0x2de   : > { %v3114_v49 = vadd.f32 %v13101_v50, %v3040_v6  ;;  %v13316_v62 = vmul.f32 %v17288_v27, %v17287_v15  ;;  %v2403_v48 = vadd.f32 %v2387_v53, %v2329_v16  ;;  %v573_v44 = vadd.f32 %v557_v11, %v498_v19  ;;  %v17291_v6 = vld [vmem:[#allocation109_spill] sm:$0xff] }
 0x2df   : > { %v3076_v47 = vsel %vm524_vm1, %v17289_v55, %v3068_v8  ;;  %v3150_v22 = vsel %vm599_vm2, %v17290_v5, %v3142_v0  ;;  %v16148_v46 = vrot.slane %v13237_v3, 4  ;;  %v732_v30 = vrot.slane %v13226_v39, 5  ;;  %v17294_v55 = vld [vmem:[#allocation37_spill] sm:$0xff] }
 0x2e0   : > { %v3188_v50 = vadd.f32 %v13136_v14, %v3114_v49  ;;  %v2464_v7 = vadd.f32 %v13175_v9, %v2403_v48  ;;  %v3224_v53 = vsel %vm674_vm3, %v17291_v6, %v3216_v4  ;;  %v648_v11 = vadd.f32 %v632_v24, %v573_v44  ;;  %v13343_v4 = vld [vmem:[#allocation5 + $0x4] ss:$0 sm:$0xff]  ;;  %v13366_v48 = vld [vmem:[%s8415_s9 + $0xc8] sm:$0xff] }
 0x2e1   : > { %v3290_v8 = vrot.slane %v13258_v20, 5  ;;  %v3364_v16 = vrot.slane %v13258_v20, 6  ;;  %v690_v0 = vsel %vm674_vm3, %v657_v58, %v16148_v46  ;;  %v16147_v14 = vrot.slane %v13237_v3, 5  ;;  %v17292_v20 = vld [vmem:[#allocation126_spill] sm:$0xff]  ;;  %v13358_v58 = vld [vmem:[%s8415_s9 + $0xc0] sm:$0xff] }
 0x2e2   : > { %v3262_v9 = vadd.f32 %v13142_v29, %v3188_v50  ;;  %v2538_v19 = vadd.f32 %v13223_v52, %v2464_v7  ;;  %v13341_v37 = vmul.f32 %v17247_v13, %v3002_v17  ;;  %v707_v51 = vmul.f32 %v13343_v4, %v690_v0 }
 0x2e3   : > { %v13347_v24 = vmul.f32 %v17292_v20, %v3076_v47  ;;  %v13350_v49 = vmul.f32 %v17260_v25, %v3150_v22  ;;  %v765_v29 = vsel %vm749_vm4, %v732_v30, %v16147_v14  ;;  %v807_v52 = vrot.slane %v13226_v39, 6  ;;  %v17293_v25 = vld [vmem:[#allocation110_spill] sm:$0xff]  ;;  %v13374_v47 = vld [vmem:[#allocation5 + $0x5] ss:$0 sm:$0xff]  ;;  %v13380_v22 = vld [vmem:[#allocation5 + $0x7] ss:$0 sm:$0xff] }
 0x2e4   : > { %v3336_v13 = vadd.f32 %v13145_v10, %v3262_v9  ;;  %v2612_v17 = vadd.f32 %v13234_v26, %v2538_v19  ;;  %v13363_v15 = vmul.f32 %v17262_v32, %v3224_v53  ;;  %v723_v27 = vadd.f32 %v707_v51, %v648_v11 }
 0x2e5   : > { %v3298_v44 = vsel %vm749_vm4, %v17293_v25, %v3290_v8  ;;  %v3372_v39 = vsel %vm824_vm5, %v17294_v55, %v3364_v16  ;;  %v782_v10 = vmul.f32 %v13374_v47, %v765_v29  ;;  %v16145_v26 = vrot.slane %v13237_v3, 6  ;;  %v13393_v8 = vld [vmem:[#allocation5 + $0x6] ss:$0 sm:$0xff] }
 0x2e6   : > { %v3410_v32 = vadd.f32 %v13170_v57, %v3336_v13  ;;  %v2686_v5 = vadd.f32 %v13244_v43, %v2612_v17  ;;  %v918_v30 = vmul.f32 %v13380_v22, %v13358_v58  ;;  %v943_v50 = vrot.slane %v13358_v58, 1 }
 0x2e7   : > { %v798_v7 = vadd.f32 %v782_v10, %v723_v27  ;;  %v840_v6 = vsel %vm824_vm5, %v807_v52, %v16145_v26  ;;  %v16144_v53 = vrot.slane %v13366_v48, 1  ;;  %v1017_v11 = vrot.slane %v13358_v58, 2  ;;  %v13406_v52 = vld [vmem:[#allocation5 + $0x8] ss:$0 sm:$0xff]  ;;  %v13422_v10 = vld [vmem:[%s8415_s9 + $0x130] sm:$0xff] }
 0x2e8   : > { %v3471_v57 = vadd.f32 %v13179_v35, %v3410_v32  ;;  %v2760_v43 = vadd.f32 %v13247_v23, %v2686_v5  ;;  %v857_v16 = vmul.f32 %v13393_v8, %v840_v6  ;;  %v16142_v0 = vrot.slane %v13366_v48, 2  ;;  %v13424_v5 = vld [vmem:[#allocation5 + $0x9] ss:$0 sm:$0xff] }
 0x2e9   : > { %v975_v9 = vsel %vm449_vm0, %v943_v50, %v16144_v53  ;;  %v1091_v19 = vrot.slane %v13358_v58, 3  ;;  %v16139_v51 = vrot.slane %v13366_v48, 3  ;;  %v1165_v35 = vrot.slane %v13358_v58, 4  ;;  %v13659_v53 = vld [vmem:[#allocation5 + $0x1c] ss:$0 sm:$0xff] }
 0x2ea   : > { %v3545_v23 = vadd.f32 %v13197_v2, %v3471_v57  ;;  %v2834_v20 = vadd.f32 %v13250_v54, %v2760_v43  ;;  %v873_v29 = vadd.f32 %v857_v16, %v798_v7  ;;  %v992_v13 = vmul.f32 %v13406_v52, %v975_v9  ;;  %v13436_v43 = vld [vmem:[#allocation5 + $0xa] ss:$0 sm:$0xff]  ;;  %v13440_v9 = vld [vmem:[%s8415_s9 + $0xd8] sm:$0xff]  ;;  %17319 = vst [vmem:[#allocation113_spill] sm:$0xff] %v13659_v53 }
 0x2eb   : > { %v1049_v17 = vsel %vm524_vm1, %v1017_v11, %v16142_v0  ;;  %v1123_v27 = vsel %vm599_vm2, %v1091_v19, %v16139_v51  ;;  %v16137_v25 = vrot.slane %v13366_v48, 4  ;;  %v1239_v2 = vrot.slane %v13358_v58, 5  ;;  %v13626_v51 = vld [vmem:[#allocation5 + $0x18] ss:$0 sm:$0xff]  ;;  %v13651_v0 = vld [vmem:[#allocation5 + $0x1b] ss:$0 sm:$0xff] }
 0x2ec   : > { %v3619_v54 = vadd.f32 %v13218_v45, %v3545_v23  ;;  %v2908_v55 = vadd.f32 %v13304_v42, %v2834_v20  ;;  %v934_v32 = vadd.f32 %v918_v30, %v873_v29  ;;  %v1066_v50 = vmul.f32 %v13424_v5, %v1049_v17  ;;  %v13454_v20 = vld [vmem:[#allocation5 + $0xb] ss:$0 sm:$0xff]  ;;  %17314 = vst [vmem:[#allocation108_spill] sm:$0xff] %v13626_v51 }
 0x2ed   : > { %v3323_v7 = vmul.f32 %v12515_v38, %v3298_v44  ;;  %v1197_v6 = vsel %vm674_vm3, %v1165_v35, %v16137_v25  ;;  %v16135_v11 = vrot.slane %v13366_v48, 5  ;;  %v1313_v45 = vrot.slane %v13358_v58, 6  ;;  %v13443_v38 = vld [vmem:[%s8415_s9 + $0xe0] sm:$0xff]  ;;  %17318 = vst [vmem:[#allocation111_spill] sm:$0xff] %v13651_v0 }
 0x2ee   : > { %v3693_v42 = vadd.f32 %v13231_v61, %v3619_v54  ;;  %v2969_v57 = vadd.f32 %v13263_v41, %v2908_v55  ;;  %v1008_v30 = vadd.f32 %v992_v13, %v934_v32  ;;  %v1140_v16 = vmul.f32 %v13436_v43, %v1123_v27  ;;  %v17295_v13 = vld [vmem:[#allocation130_spill] sm:$0xff]  ;;  %v13467_v54 = vld [vmem:[#allocation5 + $0xc] ss:$0 sm:$0xff] }
 0x2ef   : > { %v3397_v44 = vmul.f32 %v12539_v36, %v3372_v39  ;;  %v3499_v19 = vrot.slane %v13422_v10, 1  ;;  %v1271_v61 = vsel %vm749_vm4, %v1239_v2, %v16135_v11  ;;  %v16130_v41 = vrot.slane %v13366_v48, 6  ;;  %v13603_v11 = vld [vmem:[#allocation5 + $0x16] ss:$0 sm:$0xff] }
 0x2f0   : > { %v3767_v58 = vadd.f32 %v13241_v28, %v3693_v42  ;;  %v3043_v35 = vadd.f32 %v13341_v37, %v2969_v57  ;;  %v1082_v23 = vadd.f32 %v1066_v50, %v1008_v30  ;;  %v1214_v29 = vmul.f32 %v13454_v20, %v1197_v6  ;;  %v13479_v57 = vld [vmem:[#allocation5 + $0xd] ss:$0 sm:$0xff]  ;;  %17310 = vst [vmem:[#allocation97_spill] sm:$0xff] %v13603_v11 }
 0x2f1   : > { %v3458_v36 = vmul.f32 %v12542_v60, %v17295_v13  ;;  %v1345_v39 = vsel %vm824_vm5, %v1313_v45, %v16130_v41  ;;  %v1448_v17 = vrot.slane %v13440_v9, 1  ;;  %v16129_v27 = vrot.slane %v13443_v38, 1 }
 0x2f2   : > { %v3841_v28 = vadd.f32 %v13287_v63, %v3767_v58  ;;  %v3117_v37 = vadd.f32 %v13347_v24, %v3043_v35  ;;  %v1156_v2 = vadd.f32 %v1140_v16, %v1082_v23  ;;  %v1288_v55 = vmul.f32 %v13467_v54, %v1271_v61  ;;  %v17297_v35 = vld [vmem:[#allocation54_spill] sm:$0xff] }
 0x2f3   : > { %v17296_v60 = vrot.slane %v17295_v13, 1  ;;  %v3573_v50 = vrot.slane %v13422_v10, 2  ;;  %v1522_v6 = vrot.slane %v13440_v9, 2  ;;  %v16127_v45 = vrot.slane %v13443_v38, 2 }
 0x2f4   : > { %v3915_v63 = vadd.f32 %v13316_v62, %v3841_v28  ;;  %v3191_v24 = vadd.f32 %v13350_v49, %v3117_v37  ;;  %v1230_v42 = vadd.f32 %v1214_v29, %v1156_v2  ;;  %v1362_v30 = vmul.f32 %v13479_v57, %v1345_v39  ;;  %v13493_v29 = vld [vmem:[#allocation5 + $0xe] ss:$0 sm:$0xff] }
 0x2f5   : > { %v3507_v32 = vsel %vm449_vm0, %v17296_v60, %v3499_v19  ;;  %v3647_v16 = vrot.slane %v13422_v10, 3  ;;  %v1480_v19 = vsel %vm449_vm0, %v1448_v17, %v16129_v27  ;;  %v1596_v61 = vrot.slane %v13440_v9, 3 }
 0x2f6   : > { %v16128_v58 = vrot.slane %v13443_v38, 3  ;;  %v13490_v62 = vadd.f32 %v17297_v35, %v3915_v63  ;;  %v3265_v49 = vadd.f32 %v13363_v15, %v3191_v24  ;;  %v1304_v23 = vadd.f32 %v1288_v55, %v1230_v42  ;;  %v13509_v24 = vld [vmem:[#allocation5 + $0xf] ss:$0 sm:$0xff] }
 0x2f7   : > { %v1423_v39 = vmul.f32 %v13493_v29, %v13440_v9  ;;  %v3532_v28 = vmul.f32 %v12546_v18, %v3507_v32  ;;  %v1554_v17 = vsel %vm524_vm1, %v1522_v6, %v16127_v45  ;;  %v1670_v37 = vrot.slane %v13440_v9, 4 }
 0x2f8   : > { %17298 = vst [vmem:[#allocation69_spill] sm:$0xff] %v13490_v62  ;;  %v16131_v2 = vrot.slane %v13443_v38, 4  ;;  %3961 = vadd.xlane.f32.xlu1 %v13490_v62  ;;  %v3339_v15 = vadd.f32 %v3323_v7, %v3265_v49  ;;  %v17299_v55 = vrot.slane %v17295_v13, 2  ;;  %v1378_v63 = vadd.f32 %v1362_v30, %v1304_v23  ;;  %v17301_v23 = vld [vmem:[#allocation29_spill] sm:$0xff] }
 0x2f9   : > { %v1497_v18 = vmul.f32 %v13509_v24, %v1480_v19  ;;  %v3721_v32 = vrot.slane %v13422_v10, 4  ;;  %v1628_v6 = vsel %vm599_vm2, %v1596_v61, %v16128_v58  ;;  %v1744_v7 = vrot.slane %v13440_v9, 5 }
 0x2fa   : > { %v3581_v60 = vsel %vm524_vm1, %v17299_v55, %v3573_v50  ;;  %v16133_v42 = vrot.slane %v13443_v38, 5  ;;  %v3413_v49 = vadd.f32 %v3397_v44, %v3339_v15  ;;  %v17300_v50 = vrot.slane %v17295_v13, 3  ;;  %v13531_v15 = vld [vmem:[#allocation5 + $0x2c] ss:$0 sm:$0xff] }
 0x2fb   : > { %v1439_v19 = vadd.f32 %v1423_v39, %v1378_v63  ;;  %v1571_v55 = vmul.f32 %v17301_v23, %v1554_v17  ;;  %v3795_v45 = vrot.slane %v13422_v10, 5  ;;  %v1702_v61 = vsel %vm674_vm3, %v1670_v37, %v16131_v2  ;;  %v17302_v39 = vld [vmem:[#allocation65_spill] sm:$0xff] }
 0x2fc   : > { %v3655_v30 = vsel %vm599_vm2, %v17300_v50, %v3647_v16  ;;  %v1818_v58 = vrot.slane %v13440_v9, 6  ;;  %v16132_v27 = vrot.slane %v13443_v38, 6  ;;  %v3474_v44 = vadd.f32 %v3458_v36, %v3413_v49  ;;  %v13536_v17 = vld [vmem:[%s8415_s9 + $0xf0] sm:$0xff]  ;;  %v13539_v50 = vld [vmem:[%s8415_s9 + $0xf8] sm:$0xff] }
 0x2fd   : > { %v3606_v41 = vmul.f32 %v13531_v15, %v3581_v60  ;;  %v1513_v16 = vadd.f32 %v1497_v18, %v1439_v19  ;;  %v1645_v63 = vmul.f32 %v17302_v39, %v1628_v6  ;;  %17303 = vst [vmem:[#allocation75_spill] sm:$0xff] %v13539_v50  ;;  %v17304_v23 = vrot.slane %v17295_v13, 4  ;;  %v13550_v18 = vld [vmem:[#allocation5 + $0x2d] ss:$0 sm:$0xff]  ;;  %v13553_v19 = vld [vmem:[#allocation5 + $0x12] ss:$0 sm:$0xff] }
 0x2fe   : > { %v3869_v9 = vrot.slane %v13422_v10, 6  ;;  %v1776_v36 = vsel %vm749_vm4, %v1744_v7, %v16133_v42  ;;  %v3548_v60 = vadd.f32 %v3532_v28, %v3474_v44  ;;  %v3680_v6 = vmul.f32 %v13550_v18, %v3655_v30 }
 0x2ff   : > { %v3729_v37 = vsel %vm674_vm3, %v17304_v23, %v3721_v32  ;;  %v1587_v49 = vadd.f32 %v1571_v55, %v1513_v16  ;;  %v1719_v39 = vmul.f32 %v13553_v19, %v1702_v61  ;;  %v17305_v2 = vrot.slane %v17295_v13, 5  ;;  %v13566_v55 = vld [vmem:[#allocation5 + $0x2e] ss:$0 sm:$0xff]  ;;  %v13569_v16 = vld [vmem:[#allocation5 + $0x13] ss:$0 sm:$0xff] }
 0x300   : > { %v1850_v32 = vsel %vm824_vm5, %v1818_v58, %v16132_v27  ;;  %v1953_v28 = vrot.slane %v13536_v17, 1  ;;  %v16134_v7 = vrot.slane %v13539_v50, 1  ;;  %v3622_v30 = vadd.f32 %v3606_v41, %v3548_v60  ;;  %17306 = vst [vmem:[#allocation67_spill] sm:$0xff] %v13569_v16  ;;  %v13578_v41 = vld [vmem:[#allocation5 + $0x2f] ss:$0 sm:$0xff] }
 0x301   : > { %v3803_v10 = vsel %vm749_vm4, %v17305_v2, %v3795_v45  ;;  %v3754_v44 = vmul.f32 %v13566_v55, %v3729_v37  ;;  %v1661_v61 = vadd.f32 %v1645_v63, %v1587_v49  ;;  %v1793_v23 = vmul.f32 %v13569_v16, %v1776_v36  ;;  %v13581_v63 = vld [vmem:[#allocation5 + $0x14] ss:$0 sm:$0xff]  ;;  %v7268_v16 = vld [vmem:[#allocation7 + $0x6c] sm:$0xf0] }
 0x302   : > { %v17307_v45 = vrot.slane %v17295_v13, 6  ;;  %v2027_v58 = vrot.slane %v13536_v17, 2  ;;  %v16136_v27 = vrot.slane %v13539_v50, 2  ;;  %v3696_v42 = vadd.f32 %v3680_v6, %v3622_v30  ;;  %17308 = vst [vmem:[#allocation76_spill] sm:$0xff] %v13581_v63  ;;  %v13590_v6 = vld [vmem:[#allocation5 + $0x30] ss:$0 sm:$0xff] }
 0x303   : > { %v3828_v60 = vmul.f32 %v13578_v41, %v3803_v10  ;;  %v1735_v37 = vadd.f32 %v1719_v39, %v1661_v61  ;;  %v1867_v49 = vmul.f32 %v13581_v63, %v1850_v32  ;;  %v1985_v13 = vsel %vm449_vm0, %v1953_v28, %v16134_v7  ;;  %v13593_v39 = vld [vmem:[#allocation5 + $0x15] ss:$0 sm:$0xff] }
 0x304   : > { %v3877_v2 = vsel %vm824_vm5, %v17307_v45, %v3869_v9  ;;  %v2101_v9 = vrot.slane %v13536_v17, 3  ;;  %v16138_v36 = vrot.slane %v13539_v50, 3  ;;  %v3770_v45 = vadd.f32 %v3754_v44, %v3696_v42  ;;  %17309 = vst [vmem:[#allocation53_spill] sm:$0xff] %v13593_v39 }
 0x305   : > { %v3902_v30 = vmul.f32 %v13590_v6, %v3877_v2  ;;  %v1809_v10 = vadd.f32 %v1793_v23, %v1735_v37  ;;  %v1928_v32 = vmul.f32 %v13593_v39, %v13536_v17  ;;  %v2059_v28 = vsel %vm524_vm1, %v2027_v58, %v16136_v27 }
 0x306   : > { %v2191_v61 = vrot.slane %v13536_v17, 4  ;;  %v16140_v7 = vrot.slane %v13539_v50, 4  ;;  %v3844_v42 = vadd.f32 %v3828_v60, %v3770_v45  ;;  %v2002_v23 = vmul.f32 %v13603_v11, %v1985_v13  ;;  %v13614_v60 = vld [vmem:[#allocation5 + $0x17] ss:$0 sm:$0xff]  ;;  %v13765_v11 = vld [vmem:[#allocation5 + $0x27] ss:$0 sm:$0xff] }
 0x307   : > { %v1883_v44 = vadd.f32 %v1867_v49, %v1809_v10  ;;  %v13610_v2 = vsel %vm599_vm2, %v2101_v9, %v16138_v36  ;;  %v2265_v58 = vrot.slane %v13536_v17, 5  ;;  %v16141_v37 = vrot.slane %v13539_v50, 5  ;;  %17312 = vst [vmem:[#allocation81_spill] sm:$0xff] %v13614_v60 }
 0x308   : > { %17311 = vst [vmem:[#allocation129_spill] sm:$0xff] %v13610_v2  ;;  %v3918_v27 = vadd.f32 %v3902_v30, %v3844_v42  ;;  %v2076_v49 = vmul.f32 %v13614_v60, %v2059_v28  ;;  %v2223_v13 = vsel %vm674_vm3, %v2191_v61, %v16140_v7  ;;  %v2339_v45 = vrot.slane %v13536_v17, 6  ;;  %v13632_v28 = vld [vmem:[%s8415_s9 + $0x110] sm:$0xff]  ;;  %v13639_v42 = vld [vmem:[#allocation5 + $0x19] ss:$0 sm:$0xff] }
 0x309   : > { %v1944_v25 = vadd.f32 %v1928_v32, %v1883_v44  ;;  %v16143_v9 = vrot.slane %v13539_v50, 6  ;;  %v2166_v30 = vmul.f32 %v13626_v51, %v13610_v2  ;;  %v6937_v32 = vld [vmem:[%s8415_s9 + $0x108] sm:$0xff]  ;;  %17315 = vst [vmem:[#allocation36_spill] sm:$0xff] %v13632_v28  ;;  %v2297_v61 = vsel %vm749_vm4, %v2265_v58, %v16141_v37  ;;  %v13647_v7 = vld [vmem:[#allocation5 + $0x1a] ss:$0 sm:$0xff] }
 0x30a   : > { %v13624_v10 = vadd.f32 %v17297_v35, %v3918_v27  ;;  %17316 = vst [vmem:[#allocation117_spill] sm:$0xff] %v13639_v42  ;;  %v2474_v35 = vrot.slane %v6937_v32, 1  ;;  %v16146_v44 = vrot.slane %v13632_v28, 1  ;;  %v2314_v58 = vmul.f32 %v13647_v7, %v2297_v61  ;;  %v13760_v51 = vld [vmem:[#allocation5 + $0x26] ss:$0 sm:$0xff] }
 0x30b   : > { %v2018_v36 = vadd.f32 %v2002_v23, %v1944_v25  ;;  %v2240_v25 = vmul.f32 %v13639_v42, %v2223_v13  ;;  %v2371_v27 = vsel %vm824_vm5, %v2339_v45, %v16143_v9  ;;  %17317 = vst [vmem:[#allocation30_spill] sm:$0xff] %v13647_v7  ;;  %v2548_v37 = vrot.slane %v6937_v32, 2  ;;  %v7116_v7 = vld [vmem:[#allocation7 + $0xf8] sm:$0xf0]  ;;  %v7090_v42 = vld [vmem:[#allocation7 + $0xc0] sm:$0xf] }
 0x30c   : > { %17313 = vst [vmem:[#allocation104_spill] sm:$0xff] %v13624_v10  ;;  %3967 = vadd.xlane.f32.xlu0 %v13624_v10  ;;  %v2388_v13 = vmul.f32 %v13651_v0, %v2371_v27  ;;  %v2506_v45 = vsel %vm449_vm0, %v2474_v35, %v16146_v44  ;;  %v2622_v9 = vrot.slane %v6937_v32, 3  ;;  %v2449_v61 = vmul.f32 %v13659_v53, %v6937_v32  ;;  %v13667_v35 = vld [vmem:[#allocation5 + $0x1d] ss:$0 sm:$0xff]  ;;  %v13757_v53 = vld [vmem:[#allocation5 + $0x25] ss:$0 sm:$0xff] }
 0x30d   : > { %v2092_v17 = vadd.f32 %v2076_v49, %v2018_v36  ;;  %v16150_v36 = vrot.slane %v13632_v28, 2  ;;  %v2696_v27 = vrot.slane %v6937_v32, 4  ;;  %17320 = vst [vmem:[#allocation115_spill] sm:$0xff] %v13667_v35  ;;  %v2523_v44 = vmul.f32 %v13667_v35, %v2506_v45  ;;  %v7285_v35 = vld [vmem:[#allocation7 + $0xf4] sm:$0xf0] }
 0x30e   : > { %v16154_v14 = vrot.slane %v13632_v28, 5  ;;  %v16158_v45 = vrot.slane %v13632_v28, 6  ;;  %17333 = vst [vmem:[#allocation121_spill] sm:$0xff] %v13757_v53  ;;  %v7283_v0 = vld [vmem:[#allocation7 + $0xec] sm:$0xf] }
 0x30f   : > { %v2182_v23 = vadd.f32 %v2166_v30, %v2092_v17  ;;  %v16152_v30 = vrot.slane %v13632_v28, 3  ;;  %17334 = vst [vmem:[#allocation122_spill] sm:$0xff] %v13760_v51  ;;  %v7271_v50 = vld [vmem:[#allocation7 + $0x8c] sm:$0xf] }
 0x310   : > { %17335 = vst [vmem:[#allocation123_spill] sm:$0xff] %v13765_v11 }
 0x311   : > { %v2256_v49 = vadd.f32 %v2240_v25, %v2182_v23  ;;  %v2580_v25 = vsel %vm524_vm1, %v2548_v37, %v16150_v36  ;;  %v16155_v23 = vrot.slane %v13632_v28, 4  ;;  %v13684_v36 = vld [vmem:[%s8415_s9 + $0x120] sm:$0xff] }
 0x312   : > { %v2597_v37 = vmul.f32 %v13675_v33, %v2580_v25 }
 0x313   : > { %v2330_v17 = vadd.f32 %v2314_v58, %v2256_v49  ;;  %v2654_v58 = vsel %vm599_vm2, %v2622_v9, %v16152_v30  ;;  %v2770_v49 = vrot.slane %v6937_v32, 5  ;;  %v13686_v9 = vld [vmem:[#allocation5 + $0x1f] ss:$0 sm:$0xff] }
 0x314   : > { %17322 = vst [vmem:[#allocation95_spill] sm:$0xff] %v13686_v9  ;;  %v2671_v30 = vmul.f32 %v13686_v9, %v2654_v58  ;;  %v3053_v58 = vrot.slane %v13684_v36, 2  ;;  %v7282_v9 = vld [vmem:[#allocation7 + $0xe4] sm:$0xf] }
 0x315   : > { %v2404_v26 = vadd.f32 %v2388_v13, %v2330_v17  ;;  %v2728_v13 = vsel %vm674_vm3, %v2696_v27, %v16155_v23  ;;  %v2844_v17 = vrot.slane %v6937_v32, 6  ;;  %v2979_v27 = vrot.slane %v13684_v36, 1 }
 0x316   : > { %v2745_v32 = vmul.f32 %v13696_v31, %v2728_v13 }
 0x317   : > { %v2465_v46 = vadd.f32 %v2449_v61, %v2404_v26  ;;  %v13690_v26 = vld [vmem:[%s8415_s9 + $0x128] sm:$0xff]  ;;  %v2802_v61 = vsel %vm749_vm4, %v2770_v49, %v16154_v14  ;;  %v13710_v14 = vld [vmem:[#allocation5 + $0x23] ss:$0 sm:$0xff]  ;;  %v13720_v49 = vld [vmem:[%s8415_s9 + $0x138] sm:$0xff] }
 0x318   : > { %17323 = vst [vmem:[#allocation98_spill] sm:$0xff] %v13690_v26  ;;  %v2954_v23 = vmul.f32 %v13710_v14, %v13684_v36  ;;  %v17329_v10 = vrot.slane %v13690_v26, 2  ;;  %v17332_v33 = vrot.slane %v13690_v26, 4  ;;  %v17346_v39 = vrot.slane %v13720_v49, 2 }
 0x319   : > { %v2539_v34 = vadd.f32 %v2523_v44, %v2465_v46  ;;  %v2876_v46 = vsel %vm824_vm5, %v2844_v17, %v16158_v45  ;;  %17326 = vst [vmem:[#allocation119_spill] sm:$0xff] %v13710_v14  ;;  %v3127_v45 = vrot.slane %v13684_v36, 3  ;;  %v3275_v44 = vrot.slane %v13684_v36, 5  ;;  %v13749_v14 = vpop.xlane.xlu0 %4028 }
 0x31a   : > { %v2893_v17 = vmul.f32 %v13714_v12, %v2876_v46  ;;  %v3201_v46 = vrot.slane %v13684_v36, 4  ;;  %v3349_v12 = vrot.slane %v13684_v36, 6  ;;  %v7106_v36 = vld [vmem:[#allocation7 + $0xe0] sm:$0xf] }
 0x31b   : > { %v2613_v25 = vadd.f32 %v2597_v37, %v2539_v34  ;;  %v13707_v37 = vld [vmem:[#allocation5 + $0x21] ss:$0 sm:$0xff] }
 0x31c   : > { %17325 = vst [vmem:[#allocation114_spill] sm:$0xff] %v13707_v37  ;;  %v2819_v13 = vmul.f32 %v13707_v37, %v2802_v61  ;;  %v17328_v61 = vrot.slane %v13690_v26, 1  ;;  %v7284_v37 = vld [vmem:[#allocation7 + $0xec] sm:$0xf0]  ;;  %v3233_v31 = vsel %vm674_vm3, %v3201_v46, %v17332_v33  ;;  %v7058_v46 = vld [vmem:[#allocation7 + $0x80] sm:$0xf] }
 0x31d   : > { %v2687_v34 = vadd.f32 %v2671_v30, %v2613_v25  ;;  %v13723_v30 = vld [vmem:[%s8415_s9 + $0x140] sm:$0xff] }
 0x31e   : > { %v3011_v25 = vsel %vm449_vm0, %v2979_v27, %v17328_v61  ;;  %v3484_v27 = vrot.slane %v13720_v49, 1  ;;  %v7114_v61 = vld [vmem:[#allocation7 + $0xe8] sm:$0xf] }
 0x31f   : > { %v2761_v2 = vadd.f32 %v2745_v32, %v2687_v34  ;;  %v3085_v32 = vsel %vm524_vm1, %v3053_v58, %v17329_v10  ;;  %v13742_v58 = vld [vmem:[#allocation5 + $0x24] ss:$0 sm:$0xff]  ;;  %v7115_v28 = vor.u32 %v7285_v35, %v7114_v61  ;;  %v3250_v35 = vmul.f32 %v13765_v11, %v3233_v31  ;;  %v7098_v61 = vld [vmem:[#allocation7 + $0xc8] sm:$0xf] }
 0x320   : > { %17330 = vst [vmem:[#allocation116_spill] sm:$0xff] %v13742_v58  ;;  %v3028_v34 = vmul.f32 %v13742_v58, %v3011_v25  ;;  %v13755_v25 = vpop.xlane.xlu1 %4030 }
 0x321   : > { %v2835_v62 = vadd.f32 %v2819_v13, %v2761_v2  ;;  %v17331_v2 = vrot.slane %v13690_v26, 3  ;;  %4576 = vmatpush.bf16.msra.mxu2 %v7115_v28  ;;  %v7100_v28 = vld [vmem:[#allocation7 + $0xd8] sm:$0xf0] }
 0x323   : > { %v2909_v10 = vadd.f32 %v2893_v17, %v2835_v62  ;;  %v3159_v13 = vsel %vm599_vm2, %v3127_v45, %v17331_v2  ;;  %v7107_v62 = vor.u32 %v7284_v37, %v7106_v36  ;;  %v7108_v17 = vld [vmem:[#allocation7 + $0xf0] sm:$0xf0]  ;;  %v3102_v45 = vmul.f32 %v13757_v53, %v3085_v32  ;;  %v7277_v37 = vld [vmem:[#allocation7 + $0xb4] sm:$0xf0]  ;;  %v7270_v53 = vld [vmem:[#allocation7 + $0x84] sm:$0xf] }
 0x324   : > { %v7111_v2 = vor.u32 %v7282_v9, %v7108_v17  ;;  %v3176_v33 = vmul.f32 %v13760_v51, %v3159_v13  ;;  %v7119_v36 = vor.u32 %v7283_v0, %v7116_v7  ;;  %v7092_v32 = vld [vmem:[#allocation7 + $0xd0] sm:$0xf0]  ;;  %v7281_v13 = vld [vmem:[#allocation7 + $0xd4] sm:$0xf0]  ;;  %v17336_v17 = vrot.slane %v13690_v26, 5 }
 0x325   : > { %v2970_v58 = vadd.f32 %v2954_v23, %v2909_v10  ;;  %4478 = vmatpush.bf16.msra.mxu0 %v7107_v62  ;;  %v7280_v23 = vld [vmem:[#allocation7 + $0xcc] sm:$0xf0]  ;;  %v7278_v10 = vld [vmem:[#allocation7 + $0xc4] sm:$0xf]  ;;  %v17337_v0 = vrot.slane %v13690_v26, 6  ;;  %v7099_v31 = vor.u32 %v7281_v13, %v7098_v61  ;;  %v17339_v51 = vrot.slane %v13723_v30, 1 }
 0x326   : > { %4527 = vmatpush.bf16.msra.mxu1 %v7111_v2  ;;  %v7091_v9 = vor.u32 %v7280_v23, %v7090_v42  ;;  %v3307_v62 = vsel %vm749_vm4, %v3275_v44, %v17336_v17  ;;  %4625 = vmatpush.bf16.msra.mxu3 %v7119_v36  ;;  %v13776_v42 = vpop.xlane.xlu2 %4034  ;;  %v7074_v2 = vld [vmem:[#allocation7 + $0xa0] sm:$0xf]  ;;  %v7276_v44 = vld [vmem:[#allocation7 + $0xac] sm:$0xf0]  ;;  %v7082_v61 = vld [vmem:[#allocation7 + $0xa8] sm:$0xf] }
 0x327   : > { %v3044_v60 = vadd.f32 %v3028_v34, %v2970_v58  ;;  %v3381_v7 = vsel %vm824_vm5, %v3349_v12, %v17337_v0  ;;  %v7095_v34 = vor.u32 %v7278_v10, %v7092_v32  ;;  %v7279_v58 = vld [vmem:[#allocation7 + $0xcc] sm:$0xf]  ;;  %17338 = vst [vmem:[#allocation124_spill] sm:$0xff] %v13776_v42  ;;  %v13781_v17 = vld [vmem:[%s8415_s9 + $0xb8] sm:$0xff]  ;;  %v3516_v12 = vsel %vm449_vm0, %v3484_v27, %v17339_v51  ;;  %v7076_v32 = vld [vmem:[#allocation7 + $0xb0] sm:$0xf0] }
 0x328   : > { %v7103_v11 = vor.u32 %v7279_v58, %v7100_v28  ;;  %v7075_v36 = vor.u32 %v7276_v44, %v7074_v2  ;;  %v7274_v10 = vld [vmem:[#allocation7 + $0xa4] sm:$0xf]  ;;  %v13790_v0 = vld [vmem:[#allocation5 + $0x2a] ss:$0 sm:$0xff]  ;;  %4577 = vmatpush.bf16.msra.mxu2 %v7099_v31  ;;  %v3956_v28 = vpop.xlane.xlu0 %3955  ;;  %v7275_v51 = vld [vmem:[#allocation7 + $0xac] sm:$0xf] }
 0x329   : > { %v3118_v23 = vadd.f32 %v3102_v45, %v3044_v60  ;;  %4479 = vmatpush.bf16.msra.mxu0 %v7091_v9  ;;  %v13787_v60 = vld [vmem:[#allocation5 + $0x28] ss:$0 sm:$0xff]  ;;  %17341 = vst [vmem:[#allocation128_spill] sm:$0xff] %v13790_v0  ;;  %v3459_v58 = vmul.f32 %v13790_v0, %v13720_v49  ;;  %v7084_v27 = vld [vmem:[#allocation7 + $0xb8] sm:$0xf0]  ;;  %v7079_v44 = vor.u32 %v7274_v10, %v7076_v32  ;;  %v17345_v31 = vrot.slane %v13723_v30, 2 }
 0x32a   : > { %17340 = vst [vmem:[#allocation87_spill] sm:$0xff] %v13787_v60  ;;  %v3324_v45 = vmul.f32 %v13787_v60, %v3307_v62  ;;  %4528 = vmatpush.bf16.msra.mxu1 %v7095_v34  ;;  %v13794_v9 = vld [vmem:[#allocation5 + $0x29] ss:$0 sm:$0xff]  ;;  %4626 = vmatpush.bf16.msra.mxu3 %v7103_v11  ;;  %v7083_v62 = vor.u32 %v7277_v37, %v7082_v61  ;;  %v13798_v0 = vld [vmem:[#allocation5 + $0x2b] ss:$0 sm:$0xff]  ;;  %v13807_v37 = vpop.xlane.xlu1 %4032  ;;  %v17348_v32 = vrot.slane %v13723_v30, 3 }
 0x32b   : > { %v3192_v13 = vadd.f32 %v3176_v33, %v3118_v23  ;;  %17342 = vst [vmem:[#allocation61_spill] sm:$0xff] %v13794_v9  ;;  %v3398_v2 = vmul.f32 %v13794_v9, %v3381_v7  ;;  %v17343_v33 = vld [vmem:[#allocation42_spill] sm:$0xff]  ;;  %v7272_v60 = vld [vmem:[#allocation7 + $0x8c] sm:$0xf0]  ;;  %v3533_v34 = vmul.f32 %v13798_v0, %v3516_v12  ;;  %v3590_v7 = vsel %vm524_vm1, %v17346_v39, %v17345_v31  ;;  %v7060_v9 = vld [vmem:[#allocation7 + $0x90] sm:$0xf0] }
 0x32c   : > { %v3987_v23 = vmul.f32 %v17343_v33, %v3956_v28  ;;  %17344 = vst [vmem:[#allocation125_spill] sm:$0xff] %v13798_v0  ;;  %v7087_v11 = vor.u32 %v7275_v51, %v7084_v27  ;;  %v7066_v28 = vld [vmem:[#allocation7 + $0x88] sm:$0xf]  ;;  %v7273_v10 = vld [vmem:[#allocation7 + $0x94] sm:$0xf0]  ;;  %v7059_v0 = vor.u32 %v7272_v60, %v7058_v46  ;;  %v446_v51 = vrot.slane %v13781_v17, 1  ;;  %4578 = vmatpush.bf16.msra.mxu2 %v7083_v62 }
 0x32d   : > { %v3266_v26 = vadd.f32 %v3250_v35, %v3192_v13  ;;  %17347 = vst [vmem:[#allocation92_spill] sm:$0xff] %v13807_v37  ;;  %v17349_v35 = vrot.slane %v13720_v49, 3  ;;  %v17350_v61 = vld [vmem:[#allocation23_spill] sm:$0xff]  ;;  %4480 = vmatpush.bf16.msra.mxu0 %v7075_v36  ;;  %v7068_v39 = vld [vmem:[#allocation7 + $0x98] sm:$0xf0]  ;;  %v16192_v31 = vrot.slane %v13723_v30, 4  ;;  %v7063_v37 = vor.u32 %v7270_v53, %v7060_v9 }
 0x32e   : > { %v13816_v13 = vsub.f32 %v17350_v61, %v3987_v23  ;;  %4529 = vmatpush.bf16.msra.mxu1 %v7079_v44  ;;  %v7067_v63 = vor.u32 %v7273_v10, %v7066_v28  ;;  %v7042_v42 = vld [vmem:[#allocation7 + $0x60] sm:$0xf]  ;;  %v16193_v23 = vrot.slane %v13723_v30, 5  ;;  %4627 = vmatpush.bf16.msra.mxu3 %v7087_v11  ;;  %v7071_v36 = vor.u32 %v7271_v50, %v7068_v39  ;;  %v7266_v60 = vld [vmem:[#allocation7 + $0x64] sm:$0xf]  ;;  %v13828_v62 = vpop.xlane.xlu2 %4036 }
 0x32f   : > { %v3664_v12 = vsel %vm599_vm2, %v17349_v35, %v17348_v32  ;;  %v3340_v27 = vadd.f32 %v3324_v45, %v3266_v26  ;;  %v3780_v32 = vrot.slane %v13720_v49, 5  ;;  %v7044_v35 = vld [vmem:[#allocation7 + $0x70] sm:$0xf0]  ;;  %v3854_v45 = vrot.slane %v13720_v49, 6  ;;  %v7050_v28 = vld [vmem:[#allocation7 + $0x68] sm:$0xf] }
 0x330   : > { %17351 = vst [vmem:[#allocation102_spill] sm:$0xff] %v13816_v13  ;;  %v4019_v46 = vmul.f32 %v13816_v13, %v13816_v13  ;;  %v523_v53 = vrot.slane %v13781_v17, 2  ;;  %v3607_v9 = vmul.f32 %v13531_v15, %v3590_v7  ;;  %v7043_v11 = vor.u32 %v7268_v16, %v7042_v42  ;;  %v7269_v10 = vld [vmem:[#allocation7 + $0x74] sm:$0xf0]  ;;  %v7267_v61 = vld [vmem:[#allocation7 + $0x6c] sm:$0xf]  ;;  %4579 = vmatpush.bf16.msra.mxu2 %v7067_v63  ;;  %v3958_v44 = vpop.xlane.xlu0 %3957 }
 0x331   : > { %v3414_v26 = vadd.f32 %v3398_v2, %v3340_v27  ;;  %4481 = vmatpush.bf16.msra.mxu0 %v7059_v0  ;;  %v17352_v50 = vrot.slane %v13237_v3, 1  ;;  %v3681_v27 = vmul.f32 %v13550_v18, %v3664_v12  ;;  %v7047_v15 = vor.u32 %v7266_v60, %v7044_v35  ;;  %v7052_v7 = vld [vmem:[#allocation7 + $0x78] sm:$0xf0]  ;;  %v7026_v0 = vld [vmem:[#allocation7 + $0x40] sm:$0xf] }
 0x332   : > { %4042 = vadd.xlane.f32.xlu1 %v4019_v46  ;;  %4530 = vmatpush.bf16.msra.mxu1 %v7063_v37  ;;  %v7264_v46 = vld [vmem:[#allocation7 + $0x4c] sm:$0xf0]  ;;  %v17353_v16 = vrot.slane %v13720_v49, 4  ;;  %v3988_v18 = vmul.f32 %v17343_v33, %v3958_v44  ;;  %v7262_v63 = vld [vmem:[#allocation7 + $0x44] sm:$0xf]  ;;  %v7051_v35 = vor.u32 %v7269_v10, %v7050_v28 }
 0x333   : > { %v457_v2 = vsel %vm449_vm0, %v17352_v50, %v446_v51  ;;  %v3475_v39 = vadd.f32 %v3459_v58, %v3414_v26  ;;  %v3812_v58 = vsel %vm749_vm4, %v3780_v32, %v16193_v23  ;;  %4628 = vmatpush.bf16.msra.mxu3 %v7071_v36  ;;  %v7028_v37 = vld [vmem:[#allocation7 + $0x50] sm:$0xf0]  ;;  %v7034_v12 = vld [vmem:[#allocation7 + $0x48] sm:$0xf]  ;;  %v422_v51 = vmul.f32 %v13269_v59, %v13237_v3  ;;  %v7265_v49 = vld [vmem:[#allocation7 + $0x54] sm:$0xf0] }
 0x334   : > { %v3738_v42 = vsel %vm674_vm3, %v17353_v16, %v16192_v31  ;;  %v7263_v26 = vld [vmem:[#allocation7 + $0x4c] sm:$0xf]  ;;  %v7036_v50 = vld [vmem:[#allocation7 + $0x58] sm:$0xf0]  ;;  %v483_v16 = vmul.f32 %v13289_v40, %v457_v2  ;;  %v17354_v31 = vrot.slane %v13237_v3, 2  ;;  %v7055_v23 = vor.u32 %v7267_v61, %v7052_v7  ;;  %4580 = vmatpush.bf16.msra.mxu2 %v7051_v35  ;;  %v3960_v40 = vpop.xlane.xlu1 %3959 }
 0x335   : > { %v3549_v60 = vadd.f32 %v3533_v34, %v3475_v39  ;;  %v17355_v36 = vld [vmem:[#allocation50_spill] sm:$0xff]  ;;  %4482 = vmatpush.bf16.msra.mxu0 %v7043_v11  ;;  %v7027_v13 = vor.u32 %v7264_v46, %v7026_v0  ;;  %v598_v59 = vrot.slane %v13781_v17, 3  ;;  %v3755_v28 = vmul.f32 %v13566_v55, %v3738_v42  ;;  %v7260_v46 = vld [vmem:[#allocation7 + $0x2c] sm:$0xf0]  ;;  %v7258_v42 = vld [vmem:[#allocation7 + $0x24] sm:$0xf] }
 0x336   : > { %v532_v32 = vsel %vm524_vm1, %v17354_v31, %v523_v53  ;;  %v13854_v44 = vsub.f32 %v17355_v36, %v3988_v18  ;;  %4531 = vmatpush.bf16.msra.mxu1 %v7047_v15  ;;  %v7031_v10 = vor.u32 %v7262_v63, %v7028_v37  ;;  %v17356_v2 = vrot.slane %v13723_v30, 6  ;;  %v7010_v0 = vld [vmem:[#allocation7 + $0x20] sm:$0xf]  ;;  %v7261_v63 = vld [vmem:[#allocation7 + $0x34] sm:$0xf0] }
 0x337   : > { %v3623_v34 = vadd.f32 %v3607_v9, %v3549_v60  ;;  %4629 = vmatpush.bf16.msra.mxu3 %v7055_v23  ;;  %v7035_v11 = vor.u32 %v7265_v49, %v7034_v12  ;;  %v7039_v61 = vor.u32 %v7263_v26, %v7036_v50  ;;  %v3829_v9 = vmul.f32 %v13578_v41, %v3812_v58  ;;  %v7012_v41 = vld [vmem:[#allocation7 + $0x30] sm:$0xf0]  ;;  %v7018_v58 = vld [vmem:[#allocation7 + $0x28] sm:$0xf]  ;;  %v7259_v12 = vld [vmem:[#allocation7 + $0x2c] sm:$0xf] }
 0x338   : > { %v3886_v31 = vsel %vm824_vm5, %v3854_v45, %v17356_v2  ;;  %v4020_v53 = vmul.f32 %v13854_v44, %v13854_v44  ;;  %v499_v7 = vadd.f32 %v483_v16, %v422_v51  ;;  %v558_v55 = vmul.f32 %v13294_v21, %v532_v32  ;;  %v3964_v21 = vpop.xlane.xlu2 %3963  ;;  %v7020_v51 = vld [vmem:[#allocation7 + $0x38] sm:$0xf0] }
 0x339   : > { %v3697_v39 = vadd.f32 %v3681_v27, %v3623_v34  ;;  %4483 = vmatpush.bf16.msra.mxu0 %v7027_v13  ;;  %v3989_v15 = vmul.f32 %v17343_v33, %v3960_v40  ;;  %v17357_v23 = vrot.slane %v13237_v3, 3  ;;  %v3903_v27 = vmul.f32 %v13590_v6, %v3886_v31  ;;  %4581 = vmatpush.bf16.msra.mxu2 %v7035_v11  ;;  %v17358_v13 = vld [vmem:[#allocation133_spill] sm:$0xff] }
 0x33a   : > { %4044 = vadd.xlane.f32.xlu1 %v4020_v53  ;;  %4532 = vmatpush.bf16.msra.mxu1 %v7031_v10  ;;  %v574_v35 = vadd.f32 %v558_v55, %v499_v7  ;;  %v7011_v26 = vor.u32 %v7260_v46, %v7010_v0  ;;  %v7015_v50 = vor.u32 %v7258_v42, %v7012_v41  ;;  %v673_v34 = vrot.slane %v13781_v17, 4  ;;  %v6861_v2 = vld [vmem:[%s8415_s9 + $0xd0] sm:$0xff] }
 0x33b   : > { %v607_v45 = vsel %vm599_vm2, %v17357_v23, %v598_v59  ;;  %v3771_v18 = vadd.f32 %v3755_v28, %v3697_v39  ;;  %4630 = vmatpush.bf16.msra.mxu3 %v7039_v61  ;;  %v13873_v37 = vsub.f32 %v17358_v13, %v3989_v15  ;;  %v7019_v6 = vor.u32 %v7261_v63, %v7018_v58  ;;  %v13883_v28 = vld [vmem:[%s15463_s2] ss:$0 sm:$0xff] }
 0x33c   : > { %v633_v49 = vmul.f32 %v13309_v56, %v607_v45  ;;  %v3991_v32 = vmul.f32 %v17343_v33, %v3964_v21  ;;  %v7023_v36 = vor.u32 %v7259_v12, %v7020_v51  ;;  %v748_v40 = vrot.slane %v13781_v17, 5  ;;  %v17360_v61 = vld [vmem:[#allocation39_spill] sm:$0xff] }
 0x33d   : > { %v3845_v60 = vadd.f32 %v3829_v9, %v3771_v18  ;;  %4484 = vmatpush.bf16.msra.mxu0 %v7011_v26  ;;  %v4021_v59 = vmul.f32 %v13873_v37, %v13873_v37  ;;  %4582 = vmatpush.bf16.msra.mxu2 %v7019_v6  ;;  %v17359_v31 = vrot.slane %v13237_v3, 4  ;;  %v823_v11 = vrot.slane %v13781_v17, 6 }
 0x33e   : > { %4533 = vmatpush.bf16.msra.mxu1 %v7015_v50  ;;  %v649_v10 = vadd.f32 %v633_v49, %v574_v35  ;;  %v13897_v39 = vsub.f32 %v17360_v61, %v3991_v32  ;;  %v17361_v7 = vrot.slane %v13237_v3, 5  ;;  %v17362_v0 = vrot.slane %v13237_v3, 6 }
 0x33f   : > { %v3919_v16 = vadd.f32 %v3903_v27, %v3845_v60  ;;  %4631 = vmatpush.bf16.msra.mxu3 %v7023_v36  ;;  %4046 = vadd.xlane.f32.xlu2 %v4021_v59  ;;  %v682_v53 = vsel %vm674_vm3, %v17359_v31, %v673_v34  ;;  %v959_v17 = vrot.slane %v6861_v2, 1  ;;  %v1033_v42 = vrot.slane %v6861_v2, 2 }
 0x340   : > { %v708_v9 = vmul.f32 %v13343_v4, %v682_v53  ;;  %v757_v55 = vsel %vm749_vm4, %v17361_v7, %v748_v40  ;;  %v832_v46 = vsel %vm824_vm5, %v17362_v0, %v823_v11  ;;  %v17363_v18 = vrot.slane %v13366_v48, 1 }
 0x341   : > { %v13886_v56 = vadd.f32 %v13883_v28, %v3919_v16  ;;  %v783_v15 = vmul.f32 %v13374_v47, %v757_v55  ;;  %v858_v45 = vmul.f32 %v13393_v8, %v832_v46  ;;  %v1107_v27 = vrot.slane %v6861_v2, 3 }
 0x342   : > { %v724_v23 = vadd.f32 %v708_v9, %v649_v10  ;;  %v967_v4 = vsel %vm449_vm0, %v17363_v18, %v959_v17  ;;  %v4023_v41 = vmul.f32 %v13897_v39, %v13897_v39  ;;  %v919_v3 = vmul.f32 %v13380_v22, %v13366_v48 }
 0x343   : > { %3969 = vadd.xlane.f32.xlu0 %v13886_v56  ;;  %v17364_v58 = vrot.slane %v13366_v48, 2  ;;  %v1181_v8 = vrot.slane %v6861_v2, 4  ;;  %v993_v13 = vmul.f32 %v13406_v52, %v967_v4  ;;  %v17365_v12 = vrot.slane %v13366_v48, 3  ;;  %v6887_v52 = vld [vmem:[%s8415_s9 + $0xe8] sm:$0xff] }
 0x344   : > { %v799_v47 = vadd.f32 %v783_v15, %v724_v23  ;;  %v1255_v60 = vrot.slane %v6861_v2, 5  ;;  %v17366_v22 = vrot.slane %v13366_v48, 4  ;;  %v1329_v50 = vrot.slane %v6861_v2, 6 }
 0x345   : > { %v1041_v63 = vsel %vm524_vm1, %v17364_v58, %v1033_v42  ;;  %v1115_v51 = vsel %vm599_vm2, %v17365_v12, %v1107_v27  ;;  %v17367_v32 = vrot.slane %v13366_v48, 5  ;;  %v1464_v40 = vrot.slane %v6887_v52, 1 }
 0x346   : > { %v874_v21 = vadd.f32 %v858_v45, %v799_v47  ;;  %v1067_v49 = vmul.f32 %v13424_v5, %v1041_v63  ;;  %v1189_v26 = vsel %vm674_vm3, %v17366_v22, %v1181_v8  ;;  %v1141_v16 = vmul.f32 %v13436_v43, %v1115_v51  ;;  %v7901_v45 = vld [vmem:[#allocation5 + $0x10] ss:$0 sm:$0xff]  ;;  %v6913_v63 = vld [vmem:[%s8415_s9 + $0x100] sm:$0xff] }
 0x347   : > { %v1263_v36 = vsel %vm749_vm4, %v17367_v32, %v1255_v60  ;;  %v1215_v34 = vmul.f32 %v13454_v20, %v1189_v26  ;;  %v17368_v5 = vrot.slane %v13366_v48, 6  ;;  %v1538_v53 = vrot.slane %v6887_v52, 2  ;;  %v17375_v22 = vld [vmem:[#allocation67_spill] sm:$0xff]  ;;  %v17377_v32 = vld [vmem:[#allocation76_spill] sm:$0xff] }
 0x348   : > { %v935_v35 = vadd.f32 %v919_v3, %v874_v21  ;;  %v1289_v2 = vmul.f32 %v13467_v54, %v1263_v36  ;;  %v17369_v61 = vrot.slane %v13443_v38, 1  ;;  %v1612_v7 = vrot.slane %v6887_v52, 3  ;;  %v7902_v3 = vld [vmem:[#allocation5 + $0x11] ss:$0 sm:$0xff]  ;;  %v17378_v36 = vld [vmem:[#allocation75_spill] sm:$0xff] }
 0x349   : > { %v1337_v10 = vsel %vm824_vm5, %v17368_v5, %v1329_v50  ;;  %v1424_v48 = vmul.f32 %v13493_v29, %v13443_v38  ;;  %v17370_v55 = vrot.slane %v13443_v38, 2  ;;  %v1686_v54 = vrot.slane %v6887_v52, 4  ;;  %v17376_v50 = vld [vmem:[#allocation124_spill] sm:$0xff] }
 0x34a   : > { %v1009_v6 = vadd.f32 %v993_v13, %v935_v35  ;;  %v1363_v11 = vmul.f32 %v13479_v57, %v1337_v10  ;;  %v1472_v9 = vsel %vm449_vm0, %v17369_v61, %v1464_v40  ;;  %v17371_v46 = vrot.slane %v13443_v38, 3  ;;  %v17380_v5 = vld [vmem:[#allocation92_spill] sm:$0xff] }
 0x34b   : > { %4050 = vadd.xlane.f32.xlu0 %v4023_v41  ;;  %v1546_v15 = vsel %vm524_vm1, %v17370_v55, %v1538_v53  ;;  %v1498_v57 = vmul.f32 %v13509_v24, %v1472_v9  ;;  %v1760_v42 = vrot.slane %v6887_v52, 5  ;;  %v4061_v23 = vmul.f32 %v13755_v25, %v17343_v33 }
 0x34c   : > { %v1083_v59 = vadd.f32 %v1067_v49, %v1009_v6  ;;  %v1620_v17 = vsel %vm599_vm2, %v17371_v46, %v1612_v7  ;;  %v1572_v18 = vmul.f32 %v7901_v45, %v1546_v15  ;;  %v4060_v4 = vmul.f32 %v13749_v14, %v17343_v33  ;;  %v17383_v7 = vld [vmem:[#allocation97_spill] sm:$0xff] }
 0x34d   : > { %v17372_v27 = vrot.slane %v13443_v38, 4  ;;  %v1834_v41 = vrot.slane %v6887_v52, 6  ;;  %v1646_v58 = vmul.f32 %v7902_v3, %v1620_v17  ;;  %v17373_v8 = vrot.slane %v13443_v38, 5  ;;  %v17386_v46 = vld [vmem:[#allocation81_spill] sm:$0xff] }
 0x34e   : > { %v1157_v31 = vadd.f32 %v1141_v16, %v1083_v59  ;;  %v13973_v21 = vadd.f32 1e-06, %v4061_v23  ;;  %v13976_v12 = vadd.f32 1e-06, %v4060_v4  ;;  %v17374_v51 = vrot.slane %v13443_v38, 6  ;;  %v17388_v4 = vld [vmem:[#allocation108_spill] sm:$0xff] }
 0x34f   : > { %v1694_v24 = vsel %vm674_vm3, %v17372_v27, %v1686_v54  ;;  %v1768_v25 = vsel %vm749_vm4, %v17373_v8, %v1760_v42  ;;  %v1969_v35 = vrot.slane %v6913_v63, 1  ;;  %v4063_v6 = vmul.f32 %v17376_v50, %v17343_v33 }
 0x350   : > { %v1231_v43 = vadd.f32 %v1215_v34, %v1157_v31  ;;  %v1720_v14 = vmul.f32 %v13553_v19, %v1694_v24  ;;  %v1842_v60 = vsel %vm824_vm5, %v17374_v51, %v1834_v41  ;;  %v1794_v26 = vmul.f32 %v17375_v22, %v1768_v25  ;;  %v17381_v31 = vld [vmem:[#allocation53_spill] sm:$0xff]  ;;  %v6939_v24 = vld [vmem:[%s8415_s9 + $0x118] sm:$0xff] }
 0x351   : > { %v2043_v16 = vrot.slane %v6913_v63, 2  ;;  %7526 = vrsqrt.f32 %v13973_v21  ;;  %v1868_v19 = vmul.f32 %v17377_v32, %v1842_v60  ;;  %v17379_v38 = vrot.slane %v17378_v36, 1 }
 0x352   : > { %v1305_v20 = vadd.f32 %v1289_v2, %v1231_v43  ;;  %7528 = vrsqrt.f32 %v13976_v12  ;;  %v2117_v34 = vrot.slane %v6913_v63, 3  ;;  %v4062_v10 = vmul.f32 %v17380_v5, %v17343_v33 }
 0x353   : > { %v1977_v59 = vsel %vm449_vm0, %v17379_v38, %v1969_v35  ;;  %v1929_v2 = vmul.f32 %v17381_v31, %v17378_v36  ;;  %v13996_v53 = vadd.f32 1e-06, %v4063_v6  ;;  %v17382_v43 = vrot.slane %v17378_v36, 2  ;;  %v17392_v35 = vld [vmem:[#allocation30_spill] sm:$0xff] }
 0x354   : > { %v1379_v0 = vadd.f32 %v1363_v11, %v1305_v20  ;;  %v2207_v61 = vrot.slane %v6913_v63, 4  ;;  %v2003_v20 = vmul.f32 %v17383_v7, %v1977_v59  ;;  %v2281_v15 = vrot.slane %v6913_v63, 5 }
 0x355   : > { %v2051_v11 = vsel %vm524_vm1, %v17382_v43, %v2043_v16  ;;  %7530 = vrsqrt.f32 %v13996_v53  ;;  %v17387_v23 = vrot.slane %v17378_v36, 4  ;;  %v2355_v45 = vrot.slane %v6913_v63, 6  ;;  %v17390_v63 = vld [vmem:[#allocation117_spill] sm:$0xff] }
 0x356   : > { %v1440_v29 = vadd.f32 %v1424_v48, %v1379_v0  ;;  %v17384_v48 = vrot.slane %v17378_v36, 3  ;;  %v14011_v0 = vadd.f32 1e-06, %v4062_v10  ;;  %v2077_v17 = vmul.f32 %v17386_v46, %v2051_v11 }
 0x357   : > { %v14009_v54 = vpop.eup %7526  ;;  %v2490_v51 = vrot.slane %v6939_v24, 1  ;;  %v2564_v50 = vrot.slane %v6939_v24, 2  ;;  %v2638_v59 = vrot.slane %v6939_v24, 3  ;;  %v4064_v7 = vmul.f32 %v13828_v62, %v17343_v33 }
 0x358   : > { %v1514_v47 = vadd.f32 %v1498_v57, %v1440_v29  ;;  %v14007_v55 = vsel %vm599_vm2, %v17384_v48, %v2117_v34  ;;  %v14014_v42 = vpop.eup %7528  ;;  %v2215_v29 = vsel %vm674_vm3, %v17387_v23, %v2207_v61  ;;  %v4103_v41 = vmul.f32 %v14009_v54, %v13973_v21  ;;  %v17398_v48 = vld [vmem:[#allocation115_spill] sm:$0xff] }
 0x359   : > { %17385 = vst [vmem:[#allocation90_spill] sm:$0xff] %v14007_v55  ;;  %v2167_v27 = vmul.f32 %v17388_v4, %v14007_v55  ;;  %7532 = vrsqrt.f32 %v14011_v0  ;;  %v2241_v25 = vmul.f32 %v17390_v63, %v2215_v29  ;;  %v2712_v61 = vrot.slane %v6939_v24, 4  ;;  %v17400_v4 = vld [vmem:[#allocation118_spill] sm:$0xff] }
 0x35a   : > { %v1588_v13 = vadd.f32 %v1572_v18, %v1514_v47  ;;  %v17389_v47 = vrot.slane %v17378_v36, 5  ;;  %v2786_v23 = vrot.slane %v6939_v24, 5  ;;  %vm4108_vm7 = vweird.f32 %v13973_v21  ;;  %v17409_v21 = vld [vmem:[#allocation120_spill] sm:$0xff] }
 0x35b   : > { %v14039_v22 = vpop.eup %7530  ;;  %vm4109_vm8 = vweird.f32 %v14009_v54  ;;  %vm4098_vm9 = vweird.f32 %v13976_v12  ;;  %vm4099_vm10 = vweird.f32 %v14014_v42  ;;  %vm4128_vm11 = vweird.f32 %v13996_v53 }
 0x35c   : > { %v1662_v49 = vadd.f32 %v1646_v58, %v1588_v13  ;;  %v2289_v3 = vsel %vm749_vm4, %v17389_v47, %v2281_v15  ;;  %v4093_v58 = vmul.f32 %v14014_v42, %v13976_v12  ;;  %v17391_v13 = vrot.slane %v17378_v36, 6  ;;  %vm14105_vm12 = vmor %vm4108_vm7, %vm4109_vm8 }
 0x35d   : > { %v4123_v5 = vmul.f32 %v14039_v22, %v13996_v53  ;;  %vm4129_vm13 = vweird.f32 %v14039_v22  ;;  %vm4118_vm14 = vweird.f32 %v14011_v0  ;;  %vm14119_vm15 = vmor %vm4098_vm9, %vm4099_vm10 }
 0x35e   : > { %v1736_v52 = vadd.f32 %v1720_v14, %v1662_v49  ;;  %v2363_v14 = vsel %vm824_vm5, %v17391_v13, %v2355_v45  ;;  %v2315_v49 = vmul.f32 %v17392_v35, %v2289_v3  ;;  %v4094_v6 = vmul.f32 %v14014_v42, %v4093_v58  ;;  %v4039_v45 = vpop.xlane.xlu0 %4038  ;;  %vm14176_vm7 = vmor %vm4128_vm11, %vm4129_vm13 }
 0x35f   : > { %v14048_v34 = vpop.eup %7532  ;;  %v4124_v29 = vmul.f32 %v14039_v22, %v4123_v5  ;;  %v2860_v3 = vrot.slane %v6939_v24, 6 }
 0x360   : > { %v1810_v40 = vadd.f32 %v1794_v26, %v1736_v52  ;;  %v4104_v26 = vmul.f32 %v14009_v54, %v4103_v41  ;;  %v17393_v52 = vld [vmem:[#allocation111_spill] sm:$0xff]  ;;  %vm4119_vm6 = vweird.f32 %v14048_v34 }
 0x361   : > { %v2389_v32 = vmul.f32 %v17393_v52, %v2363_v14  ;;  %v14078_v14 = vld [vmem:[%s8415_s9 + $0x130] sm:$0xff]  ;;  %v14088_v24 = vmul.f32 0.5, %v4124_v29  ;;  %v17415_v29 = vld [vmem:[#allocation119_spill] sm:$0xff]  ;;  %vm14191_vm8 = vmor %vm4118_vm14, %vm4119_vm6 }
 0x362   : > { %v1884_v9 = vadd.f32 %v1868_v19, %v1810_v40  ;;  %v17394_v19 = vld [vmem:[#allocation36_spill] sm:$0xff]  ;;  %v17396_v40 = vld [vmem:[#allocation113_spill] sm:$0xff]  ;;  %v3143_v12 = vrot.slane %v14078_v14, 3 }
 0x363   : > { %v17395_v38 = vrot.slane %v17394_v19, 1  ;;  %v2450_v31 = vmul.f32 %v17396_v40, %v17394_v19  ;;  %v17397_v43 = vrot.slane %v17394_v19, 2  ;;  %v17399_v46 = vrot.slane %v17394_v19, 3 }
 0x364   : > { %v1945_v57 = vadd.f32 %v1929_v2, %v1884_v9  ;;  %v4105_v2 = vmul.f32 0.5, %v4104_v26  ;;  %v4095_v9 = vmul.f32 0.5, %v4094_v6  ;;  %v17401_v41 = vrot.slane %v17394_v19, 4 }
 0x365   : > { %v2498_v36 = vsel %vm449_vm0, %v17395_v38, %v2490_v51  ;;  %v2572_v11 = vsel %vm524_vm1, %v17397_v43, %v2564_v50  ;;  %v17403_v35 = vrot.slane %v17394_v19, 5  ;;  %v17404_v50 = vld [vmem:[#allocation71_spill] sm:$0xff]  ;;  %v17405_v52 = vrot.slane %v17394_v19, 6 }
 0x366   : > { %v2019_v18 = vadd.f32 %v2003_v20, %v1945_v57  ;;  %v2524_v15 = vmul.f32 %v17398_v48, %v2498_v36  ;;  %v4113_v57 = vmul.f32 %v14048_v34, %v14011_v0  ;;  %v4106_v62 = vsub.f32 1.5, %v4105_v2 }
 0x367   : > { %v2720_v47 = vsel %vm674_vm3, %v17401_v41, %v2712_v61  ;;  %v4096_v58 = vsub.f32 1.5, %v4095_v9  ;;  %v2995_v38 = vrot.slane %v14078_v14, 1  ;;  %v3069_v36 = vrot.slane %v14078_v14, 2 }
 0x368   : > { %v2093_v8 = vadd.f32 %v2077_v17, %v2019_v18  ;;  %v2646_v17 = vsel %vm599_vm2, %v17399_v46, %v2638_v59  ;;  %v4114_v51 = vmul.f32 %v14048_v34, %v4113_v57  ;;  %v2746_v6 = vmul.f32 %v17404_v50, %v2720_v47  ;;  %v17417_v47 = vld [vmem:[#allocation121_spill] sm:$0xff]  ;;  %v7002_v50 = vld [vmem:[#allocation7 + $0x8] sm:$0xf] }
 0x369   : > { %v4097_v59 = vmul.f32 %v14014_v42, %v4096_v58  ;;  %v4126_v43 = vsub.f32 1.5, %v14088_v24  ;;  %v6994_v58 = vld [vmem:[#allocation7] sm:$0xf] }
 0x36a   : > { %v2183_v60 = vadd.f32 %v2167_v27, %v2093_v8  ;;  %v2598_v27 = vmul.f32 %v17400_v4, %v2572_v11  ;;  %v14074_v8 = vadd.f32 1e-06, %v4064_v7  ;;  %v3291_v4 = vrot.slane %v14078_v14, 5 }
 0x36c   : > { %v2257_v16 = vadd.f32 %v2241_v25, %v2183_v60  ;;  %v17402_v25 = vld [vmem:[#allocation95_spill] sm:$0xff]  ;;  %v4065_v60 = vmul.f32 %v4039_v45, %v17343_v33  ;;  %7534 = vrsqrt.f32 %v14074_v8  ;;  %v3217_v45 = vrot.slane %v14078_v14, 4 }
 0x36d   : > { %v2672_v13 = vmul.f32 %v17402_v25, %v2646_v17  ;;  %v4101_v17 = vsel %vm14119_vm15, %v14014_v42, %v4097_v59  ;;  %v7256_v42 = vld [vmem:[#allocation7 + $0xc] sm:$0xf0]  ;;  %v3962_v25 = vpop.xlane.xlu1 %3961 }
 0x36e   : > { %v2331_v10 = vadd.f32 %v2315_v49, %v2257_v16  ;;  %v2794_v49 = vsel %vm749_vm4, %v17403_v35, %v2786_v23  ;;  %v4107_v16 = vmul.f32 %v14009_v54, %v4106_v62  ;;  %v14112_v2 = vadd.f32 1e-06, %v4065_v60  ;;  %v17416_v62 = vld [vmem:[#allocation116_spill] sm:$0xff] }
 0x36f   : > { %v6995_v24 = vor.u32 %v7256_v42, %v6994_v58  ;;  %v17431_v58 = vld [vmem:[#allocation87_spill] sm:$0xff] }
 0x370   : > { %v2405_v20 = vadd.f32 %v2389_v32, %v2331_v10  ;;  %v2868_v32 = vsel %vm824_vm5, %v17405_v52, %v2860_v3  ;;  %v17408_v10 = vld [vmem:[#allocation114_spill] sm:$0xff]  ;;  %v4111_v7 = vsel %vm14105_vm12, %v14009_v54, %v4107_v16  ;;  %7536 = vrsqrt.f32 %v14112_v2  ;;  %v14154_v52 = vpop.xlane.xlu0 %4040 }
 0x371   : > { %v2820_v40 = vmul.f32 %v17408_v10, %v2794_v49  ;;  %v2894_v61 = vmul.f32 %v17409_v21, %v2868_v32  ;;  %v3990_v16 = vmul.f32 %v17343_v33, %v3962_v25  ;;  %v17420_v32 = vld [vmem:[#allocation43_spill] sm:$0xff]  ;;  %4485 = vmatpush.bf16.msra.mxu0 %v6995_v24 }
 0x372   : > { %v2466_v18 = vadd.f32 %v2450_v31, %v2405_v20  ;;  %v4115_v31 = vmul.f32 0.5, %v4114_v51  ;;  %v17412_v20 = vld [vmem:[#allocation98_spill] sm:$0xff]  ;;  %v14147_v60 = vpop.eup %7534 }
 0x373   : > { %v17413_v48 = vrot.slane %v17412_v20, 1  ;;  %v17414_v57 = vrot.slane %v17412_v20, 2  ;;  %v2955_v54 = vmul.f32 %v17415_v29, %v17412_v20  ;;  %v17419_v35 = vrot.slane %v17412_v20, 3 }
 0x374   : > { %v2540_v63 = vadd.f32 %v2524_v15, %v2466_v18  ;;  %v4116_v18 = vsub.f32 1.5, %v4115_v31  ;;  %v17421_v59 = vrot.slane %v17412_v20, 4  ;;  %v7004_v31 = vld [vmem:[#allocation7 + $0x18] sm:$0xf0]  ;;  %v17426_v29 = vrot.slane %v17412_v20, 5 }
 0x375   : > { %v3003_v15 = vsel %vm449_vm0, %v17413_v48, %v2995_v38  ;;  %v3077_v46 = vsel %vm524_vm1, %v17414_v57, %v3069_v36  ;;  %v3151_v49 = vsel %vm599_vm2, %v17419_v35, %v3143_v12  ;;  %v4252_v38 = vmul.f32 %v4101_v17, %v17420_v32  ;;  %v17435_v32 = vld [vmem:[#allocation104_spill] sm:$0xff] }
 0x376   : > { %v2614_v26 = vadd.f32 %v2598_v27, %v2540_v63  ;;  %v3029_v41 = vmul.f32 %v17416_v62, %v3003_v15  ;;  %v3103_v3 = vmul.f32 %v17417_v47, %v3077_v46  ;;  %v7254_v63 = vld [vmem:[#allocation7 + $0x4] sm:$0xf]  ;;  %v3225_v5 = vsel %vm674_vm3, %v17421_v59, %v3217_v45  ;;  %v17423_v15 = vld [vmem:[#allocation122_spill] sm:$0xff]  ;;  %v14167_v46 = vld [vmem:[%s8415_s9 + $0x148] sm:$0xff]  ;;  %v14169_v12 = vpop.eup %7536  ;;  %s6662_s9 = sadd.s32 %s7250_s8, %s7249_s24 }
 0x377   : > { %v3177_v57 = vmul.f32 %v17423_v15, %v3151_v49  ;;  %v4127_v17 = vmul.f32 %v14039_v22, %v4126_v43  ;;  %v17430_v62 = vrot.slane %v17412_v20, 6  ;;  %v4143_v42 = vmul.f32 %v14169_v12, %v14112_v2  ;;  %s7251_s14 = sshll.u32 %s6662_s9, 3 }
 0x378   : > { %v2688_v19 = vadd.f32 %v2672_v13, %v2614_v26  ;;  %v17418_v13 = vld [vmem:[#allocation47_spill] sm:$0xff]  ;;  %v6996_v26 = vld [vmem:[#allocation7 + $0x10] sm:$0xf0]  ;;  %v4133_v24 = vmul.f32 %v14147_v60, %v14074_v8  ;;  %s6664_s19 = scalar_lea.hbm %s17584_s18, %s7251_s14 }
 0x379   : > { %v4253_v51 = vmul.f32 %v4111_v7, %v17418_v13  ;;  %s6667_s21 = sshll.u32 %s6664_s19, 4  ;;  %s6668_s21 = int_to_ptr.hbm [resolvable:$true] %s6667_s21 }
 0x37a   : > { %v2762_v11 = vadd.f32 %v2746_v6, %v2688_v19  ;;  %v7257_v6 = vld [vmem:[#allocation7 + $0x14] sm:$0xf0]  ;;  %v6999_v19 = vor.u32 %v7254_v63, %v6996_v26  ;;  %v3574_v63 = vrot.slane %v14167_v46, 2  ;;  %s8072_s23 = sshra.s32 %s6668_s21, 4  ;;  %s8073_s23 = int_to_ptr.hbm [resolvable:$true] %s8072_s23 }
 0x37b   : > { %v7003_v10 = vor.u32 %v7257_v6, %v7002_v50  ;;  %v4268_v7 = vpack.c.bf16 %v4253_v51, %v4252_v38  ;;  %v17432_v51 = vld [vmem:[#allocation61_spill] sm:$0xff]  ;;  %v17434_v50 = vrot.slane %v13723_v30, 1  ;;  %v3648_v6 = vrot.slane %v14167_v46, 3  ;;  %s8074_s7 = scalar_lea.hbm %s8073_s23, 128  ;;  %p8079_p0 = scmp.lt.s32.totalorder %s8073_s23, %s17584_s18 }
 0x37c   : > { %v2836_v23 = vadd.f32 %v2820_v40, %v2762_v11  ;;  %v7255_v40 = vld [vmem:[#allocation7 + $0xc] sm:$0xf]  ;;  %v3365_v11 = vrot.slane %v14078_v14, 6  ;;  %4534 = vmatpush.bf16.msra.mxu1 %v6999_v19  ;;  %p8075_p1 = scmp.ne.s32.totalorder %s8073_s23, %s8074_s7  ;;  %p8080_p2 = scmp.lt.s32.totalorder %s8078_s3, %s8074_s7 }
 0x37d   : > { %v7007_v21 = vor.u32 %v7255_v40, %v7004_v31  ;;  %4583 = vmatpush.bf16.msra.mxu2 %v7003_v10  ;;  %4486 = vmatmul.bf16.vlgmr.msra.gmra.mxu0 %v4268_v7  ;;  %v4144_v10 = vmul.f32 %v14169_v12, %v4143_v42  ;;  %v17438_v40 = vrot.slane %v13723_v30, 2 }
 0x37e   : > { %v2910_v27 = vadd.f32 %v2894_v61, %v2836_v23  ;;  %v17422_v61 = vld [vmem:[#allocation69_spill] sm:$0xff]  ;;  %v4117_v23 = vmul.f32 %v14048_v34, %v4116_v18  ;;  %p8076_p4 = pnand %p8075_p1, %p8313_p6  ;;  %p8081_p3 = por %p8080_p2, %p8079_p0 }
 0x37f   : > { %v14163_v9 = vsub.f32 %v17422_v61, %v3990_v16  ;;  %4632 = vmatpush.bf16.msra.mxu3 %v7007_v21  ;;  %4535 = vmatmul.bf16.vlgmr.msra.gmra.mxu1 %v4268_v7  ;;  %v3968_v25 = vpop.xlane.xlu0 %3967  ;;  %v3582_v31 = vsel %vm524_vm1, %v17438_v40, %v3574_v63  ;;  %v17439_v61 = vld [vmem:[#allocation125_spill] sm:$0xff]  ;;  %v4145_v53 = vmul.f32 0.5, %v4144_v10  ;;  %vm4149_vm1 = vweird.f32 %v14169_v12  ;;  %v17446_v10 = vld [vmem:[#allocation78_spill] sm:$0xff] }
 0x380   : > { %v2971_v36 = vadd.f32 %v2955_v54, %v2910_v27  ;;  %v3299_v54 = vsel %vm749_vm4, %v17426_v29, %v3291_v4  ;;  %v17429_v27 = vld [vmem:[#allocation123_spill] sm:$0xff]  ;;  %v3373_v4 = vsel %vm824_vm5, %v17430_v62, %v3365_v11  ;;  %4584 = vmatmul.bf16.vlgmr.msra.gmra.mxu2 %v4268_v7  ;;  %v4121_v20 = vsel %vm14191_vm8, %v14048_v34, %v4117_v23  ;;  %p8077_p11 = pneg %p8076_p4 }
 0x381   : > { %v4022_v45 = vmul.f32 %v14163_v9, %v14163_v9  ;;  %v3251_v18 = vmul.f32 %v17429_v27, %v3225_v5  ;;  %v3325_v0 = vmul.f32 %v17431_v58, %v3299_v54  ;;  %v3399_v35 = vmul.f32 %v17432_v51, %v3373_v4  ;;  %v17437_v5 = vld [vmem:[#allocation51_spill] sm:$0xff]  ;;  %v7903_v54 = vld [vmem:[#allocation5 + $0x2c] ss:$0 sm:$0xff]  ;;  %v7904_v4 = vld [vmem:[#allocation5 + $0x2d] ss:$0 sm:$0xff] }
 0x382   : > { %v3045_v48 = vadd.f32 %v3029_v41, %v2971_v36  ;;  %v3500_v41 = vrot.slane %v14167_v46, 1  ;;  %4633 = vmatmul.bf16.vlgmr.msra.gmra.mxu3 %v4268_v7  ;;  %v3993_v49 = vmul.f32 %v17343_v33, %v3968_v25  ;;  %v17436_v36 = vld [vmem:[#allocation64_spill] sm:$0xff]  ;;  %v3722_v11 = vrot.slane %v14167_v46, 4  ;;  %p8082_p5 = pnand %p8081_p3, %p8077_p11 }
 0x383   : > { %4048 = vadd.xlane.f32.xlu2 %v4022_v45  ;;  %v4254_v59 = vmul.f32 %v4121_v20, %v17436_v36  ;;  %v3796_v23 = vrot.slane %v14167_v46, 5  ;;  %v3608_v45 = vmul.f32 %v7903_v54, %v3582_v31  ;;  %v17442_v58 = vrot.slane %v13723_v30, 5  ;;  %v7905_v20 = vld [vmem:[#allocation5 + $0x2e] ss:$0 sm:$0xff]  ;;  %v17444_v36 = vld [vmem:[#allocation62_spill] sm:$0xff] }
 0x384   : > { %v3119_v43 = vadd.f32 %v3103_v3, %v3045_v48  ;;  %v4131_v3 = vsel %vm14176_vm7, %v14039_v22, %v4127_v17  ;;  %v17433_v22 = vld [vmem:[#allocation128_spill] sm:$0xff]  ;;  %v3508_v34 = vsel %vm449_vm0, %v17434_v50, %v3500_v41  ;;  %v14223_v38 = vsub.f32 %v17435_v32, %v3993_v49 }
 0x385   : > { %v3460_v26 = vmul.f32 %v17433_v22, %v13723_v30  ;;  %v4255_v19 = vmul.f32 %v4131_v3, %v17437_v5  ;;  %v3534_v7 = vmul.f32 %v17439_v61, %v3508_v34  ;;  %v17440_v17 = vrot.slane %v13723_v30, 3  ;;  %v7907_v22 = vld [vmem:[#allocation5 + $0x30] ss:$0 sm:$0xff]  ;;  %v17445_v5 = vld [vmem:[#allocation100_spill] sm:$0xff] }
 0x386   : > { %v3193_v47 = vadd.f32 %v3177_v57, %v3119_v43  ;;  %v4025_v48 = vmul.f32 %v14223_v38, %v14223_v38  ;;  %v4134_v57 = vmul.f32 %v14147_v60, %v4133_v24  ;;  %v17441_v43 = vrot.slane %v13723_v30, 4 }
 0x387   : > { %v4269_v15 = vpack.c.bf16 %v4255_v19, %v4254_v59  ;;  %v3656_v14 = vsel %vm599_vm2, %v17440_v17, %v3648_v6  ;;  %v4146_v63 = vsub.f32 1.5, %v4145_v53  ;;  %v17443_v25 = vrot.slane %v13723_v30, 6  ;;  %v3966_v30 = vpop.xlane.xlu2 %3965 }
 0x388   : > { %v3267_v13 = vadd.f32 %v3251_v18, %v3193_v47  ;;  %v3730_v27 = vsel %vm674_vm3, %v17441_v43, %v3722_v11  ;;  %v3870_v18 = vrot.slane %v14167_v46, 6  ;;  %v3682_v41 = vmul.f32 %v7904_v4, %v3656_v14  ;;  %v7906_v46 = vld [vmem:[#allocation5 + $0x2f] ss:$0 sm:$0xff] }
 0x389   : > { %v4135_v47 = vmul.f32 0.5, %v4134_v57  ;;  %v3756_v42 = vmul.f32 %v7905_v20, %v3730_v27  ;;  %vm4148_vm0 = vweird.f32 %v14112_v2  ;;  %vm4138_vm2 = vweird.f32 %v14074_v8 }
 0x38a   : > { %v3341_v16 = vadd.f32 %v3325_v0, %v3267_v13  ;;  %v3804_v0 = vsel %vm749_vm4, %v17442_v58, %v3796_v23  ;;  %v3878_v13 = vsel %vm824_vm5, %v17443_v25, %v3870_v18  ;;  %vm4139_vm3 = vweird.f32 %v14147_v60  ;;  %vm4150_vm4 = vmor %vm4148_vm0, %vm4149_vm1 }
 0x38b   : > { %4054 = vadd.xlane.f32.xlu2 %v4025_v48  ;;  %v4136_v49 = vsub.f32 1.5, %v4135_v47  ;;  %v4147_v1 = vmul.f32 %v14169_v12, %v4146_v63  ;;  %vm4140_vm5 = vmor %vm4138_vm2, %vm4139_vm3  ;;  %v3992_v6 = vmul.f32 %v17343_v33, %v3966_v30 }
 0x38c   : > { %v3415_v21 = vadd.f32 %v3399_v35, %v3341_v16  ;;  %v3830_v35 = vmul.f32 %v7906_v46, %v3804_v0 }
 0x38d   : > { %4491 = vmatmul.bf16.gmra.mxu0 %v4269_v15  ;;  %v4137_v34 = vmul.f32 %v14147_v60, %v4136_v49  ;;  %v4151_v16 = vsel %vm4150_vm4, %v14169_v12, %v4147_v1  ;;  %v14269_v59 = vsub.f32 %v17444_v36, %v3992_v6 }
 0x38e   : > { %v3476_v29 = vadd.f32 %v3460_v26, %v3415_v21  ;;  %v3904_v26 = vmul.f32 %v7907_v22, %v3878_v13  ;;  %v4257_v19 = vmul.f32 %v4151_v16, %v17445_v5 }
 0x38f   : > { %4540 = vmatmul.bf16.gmra.mxu1 %v4269_v15  ;;  %v4141_v8 = vsel %vm4140_vm5, %v14147_v60, %v4137_v34  ;;  %v4024_v31 = vmul.f32 %v14269_v59, %v14269_v59 }
 0x390   : > { %v3550_v62 = vadd.f32 %v3534_v7, %v3476_v29  ;;  %4589 = vmatmul.bf16.gmra.mxu2 %v4269_v15  ;;  %v4256_v40 = vmul.f32 %v4141_v8, %v17446_v10  ;;  %v4066_v7 = vmul.f32 %v14154_v52, %v17343_v33  ;;  %v4308_v8 = vld [vmem:[#allocation8] sm:$0xf] }
 0x391   : > { %v14297_v36 = vperm.slane %v4308_v8, 0  ;;  %v14299_v5 = vperm.slane %v4308_v8, 1 }
 0x392   : > { %v3624_v3 = vadd.f32 %v3608_v45, %v3550_v62  ;;  %4638 = vmatmul.bf16.gmra.mxu3 %v4269_v15  ;;  %v4270_v11 = vpack.c.bf16 %v4257_v19, %v4256_v40  ;;  %v4082_v15 = vadd.f32 1e-06, %v4066_v7 }
 0x393   : > { %17449 = vst [vmem:[#allocation83_spill] sm:$0xff] %v14297_v36 }
 0x394   : > { %v3698_v51 = vadd.f32 %v3682_v41, %v3624_v3  ;;  %7538 = vrsqrt.f32 %v4082_v15  ;;  %vm4158_vm9 = vweird.f32 %v4082_v15  ;;  %17450 = vst [vmem:[#allocation34_spill] sm:$0xff] %v14299_v5 }
 0x396   : > { %v3772_v24 = vadd.f32 %v3756_v42, %v3698_v51 }
 0x398   : > { %v3846_v50 = vadd.f32 %v3830_v35, %v3772_v24  ;;  %v17447_v24 = vld [vmem:[#allocation89_spill] sm:$0xff] }
 0x39a   : > { %v3920_v2 = vadd.f32 %v3904_v26, %v3846_v50  ;;  %v7539_v14 = vpop.eup %7538  ;;  %v17448_v26 = vld [vmem:[#allocation102_spill] sm:$0xff] }
 0x39b   : > { %v4153_v45 = vmul.f32 %v7539_v14, %v4082_v15  ;;  %vm4159_vm10 = vweird.f32 %v7539_v14 }
 0x39c   : > { %v14264_v32 = vadd.f32 %v13883_v28, %v3920_v2  ;;  %vm4160_vm12 = vmor %vm4158_vm9, %vm4159_vm10 }
 0x39d   : > { %4496 = vmatmul.bf16.gmra.mxu0 %v4270_v11  ;;  %v4154_v18 = vmul.f32 %v7539_v14, %v4153_v45 }
 0x39e   : > { %3971 = vadd.xlane.f32.xlu1 %v14264_v32 }
 0x39f   : > { %4545 = vmatmul.bf16.gmra.mxu1 %v4270_v11  ;;  %v4155_v62 = vmul.f32 0.5, %v4154_v18 }
 0x3a0   : > { %4594 = vmatmul.bf16.gmra.mxu2 %v4270_v11 }
 0x3a1   : > { %v4156_v47 = vsub.f32 1.5, %v4155_v62 }
 0x3a2   : > { %4643 = vmatmul.bf16.gmra.mxu3 %v4270_v11 }
 0x3a3   : > { %v4157_v20 = vmul.f32 %v7539_v14, %v4156_v47 }
 0x3a5   : > { %v4043_v61 = vpop.xlane.xlu1 %4042  ;;  %v4161_v13 = vsel %vm4160_vm12, %v7539_v14, %v4157_v20 }
 0x3a6   : > { %4052 = vadd.xlane.f32.xlu1 %v4024_v31  ;;  %v4067_v48 = vmul.f32 %v4043_v61, %v17343_v33  ;;  %v4258_v22 = vmul.f32 %v4161_v13, %v17447_v24 }
 0x3a8   : > { %v4083_v57 = vadd.f32 1e-06, %v4067_v48 }
 0x3aa   : > { %7540 = vrsqrt.f32 %v4083_v57  ;;  %vm4168_vm13 = vweird.f32 %v4083_v57 }
 0x3ad   : > { %v4045_v17 = vpop.xlane.xlu1 %4044 }
 0x3b0   : > { %v7541_v29 = vpop.eup %7540 }
 0x3b1   : > { %v4163_v53 = vmul.f32 %v7541_v29, %v4083_v57  ;;  %vm4169_vm11 = vweird.f32 %v7541_v29 }
 0x3b2   : > { %v4047_v23 = vpop.xlane.xlu2 %4046  ;;  %vm4170_vm14 = vmor %vm4168_vm13, %vm4169_vm11 }
 0x3b3   : > { %v4069_v54 = vmul.f32 %v4047_v23, %v17343_v33  ;;  %v4164_v52 = vmul.f32 %v7541_v29, %v4163_v53  ;;  %v14336_v53 = vperm.slane %v4308_v8, 3 }
 0x3b5   : > { %v4085_v27 = vadd.f32 1e-06, %v4069_v54  ;;  %v4165_v4 = vmul.f32 0.5, %v4164_v52  ;;  %v14334_v54 = vperm.slane %v4308_v8, 2  ;;  %17456 = vst [vmem:[#allocation55_spill] sm:$0xff] %v14336_v53 }
 0x3b6   : > { %v3970_v28 = vpop.xlane.xlu0 %3969 }
 0x3b7   : > { %v3994_v60 = vmul.f32 %v17343_v33, %v3970_v28  ;;  %v4166_v58 = vsub.f32 1.5, %v4165_v4  ;;  %vm4188_vm6 = vweird.f32 %v4085_v27  ;;  %17455 = vst [vmem:[#allocation86_spill] sm:$0xff] %v14334_v54 }
 0x3b9   : > { %v14277_v12 = vsub.f32 %v13886_v56, %v3994_v60  ;;  %v4068_v56 = vmul.f32 %v4045_v17, %v17343_v33  ;;  %v4167_v42 = vmul.f32 %v7541_v29, %v4166_v58 }
 0x3bb   : > { %v4026_v21 = vmul.f32 %v14277_v12, %v14277_v12  ;;  %v4084_v43 = vadd.f32 1e-06, %v4068_v56  ;;  %v4171_v51 = vsel %vm4170_vm14, %v7541_v29, %v4167_v42 }
 0x3bc   : > { %v4259_v1 = vmul.f32 %v4171_v51, %v17448_v26 }
 0x3bd   : > { %4056 = vadd.xlane.f32.xlu0 %v4026_v21  ;;  %7542 = vrsqrt.f32 %v4084_v43  ;;  %vm4178_vm8 = vweird.f32 %v4084_v43 }
 0x3be   : > { %7544 = vrsqrt.f32 %v4085_v27  ;;  %v4051_v50 = vpop.xlane.xlu0 %4050  ;;  %v4271_v34 = vpack.c.bf16 %v4259_v1, %v4258_v22 }
 0x3bf   : > { %v4071_v6 = vmul.f32 %v4051_v50, %v17343_v33 }
 0x3c0   : > { %4501 = vmatmul.bf16.gmra.mxu0 %v4271_v34  ;;  %4550 = vmatmul.bf16.gmra.mxu1 %v4271_v34 }
 0x3c1   : > { %4599 = vmatmul.bf16.gmra.mxu2 %v4271_v34  ;;  %4648 = vmatmul.bf16.gmra.mxu3 %v4271_v34  ;;  %v14304_v31 = vadd.f32 1e-06, %v4071_v6 }
 0x3c3   : > { %v14286_v41 = vpop.eup %7542  ;;  %7546 = vrsqrt.f32 %v14304_v31  ;;  %vm4208_vm2 = vweird.f32 %v14304_v31 }
 0x3c4   : > { %v14288_v0 = vpop.eup %7544  ;;  %v4173_v3 = vmul.f32 %v14286_v41, %v4084_v43  ;;  %vm4179_vm15 = vweird.f32 %v14286_v41 }
 0x3c5   : > { %v4183_v63 = vmul.f32 %v14288_v0, %v4085_v27  ;;  %vm4189_vm7 = vweird.f32 %v14288_v0  ;;  %vm14316_vm1 = vmor %vm4178_vm8, %vm4179_vm15 }
 0x3c6   : > { %v4174_v25 = vmul.f32 %v14286_v41, %v4173_v3  ;;  %vm14310_vm0 = vmor %vm4188_vm6, %vm4189_vm7 }
 0x3c7   : > { %v4184_v46 = vmul.f32 %v14288_v0, %v4183_v63 }
 0x3c8   : > { %v4175_v49 = vmul.f32 0.5, %v4174_v25 }
 0x3c9   : > { %v4185_v30 = vmul.f32 0.5, %v4184_v46  ;;  %v14351_v25 = vpop.eup %7546 }
 0x3ca   : > { %v4176_v2 = vsub.f32 1.5, %v4175_v49  ;;  %vm4209_vm3 = vweird.f32 %v14351_v25 }
 0x3cb   : > { %v4186_v16 = vsub.f32 1.5, %v4185_v30  ;;  %v4203_v30 = vmul.f32 %v14351_v25, %v14304_v31  ;;  %vm14423_vm5 = vmor %vm4208_vm2, %vm4209_vm3 }
 0x3cc   : > { %v4177_v40 = vmul.f32 %v14286_v41, %v4176_v2 }
 0x3cd   : > { %v4187_v60 = vmul.f32 %v14288_v0, %v4186_v16 }
 0x3ce   : > { %v4181_v17 = vsel %vm14316_vm1, %v14286_v41, %v4177_v40 }
 0x3cf   : > { %v4191_v29 = vsel %vm14310_vm0, %v14288_v0, %v4187_v60  ;;  %v4260_v58 = vmul.f32 %v4181_v17, %v13854_v44 }
 0x3d0   : > { %v4261_v42 = vmul.f32 %v4191_v29, %v13873_v37 }
 0x3f6   : > { %v4049_v35 = vpop.xlane.xlu2 %4048 }
 0x3f7   : > { %v4070_v21 = vmul.f32 %v4049_v35, %v17343_v33  ;;  %v4272_v35 = vpack.c.bf16 %v4261_v42, %v4260_v58 }
 0x3f9   : > { %v14332_v56 = vadd.f32 1e-06, %v4070_v21  ;;  %4506 = vmatmul.bf16.gmra.mxu0 %v4272_v35  ;;  %4555 = vmatmul.bf16.gmra.mxu1 %v4272_v35 }
 0x3fa   : > { %v4487_v19 = vpop.f32.mrf.mxu0  ;;  %4604 = vmatmul.bf16.gmra.mxu2 %v4272_v35  ;;  %4653 = vmatmul.bf16.gmra.mxu3 %v4272_v35 }
 0x3fb   : > { %v4488_v11 = vadd.f32 %v4487_v19, %v14297_v36  ;;  %7548 = vrsqrt.f32 %v14332_v56  ;;  %vm4198_vm4 = vweird.f32 %v14332_v56 }
 0x3fc   : > { %v4536_v10 = vpop.f32.mrf.mxu1 }
 0x3fd   : > { %v4537_v28 = vadd.f32 %v4536_v10, %v14299_v5 }
 0x3fe   : > { %v4055_v61 = vpop.xlane.xlu2 %4054 }
 0x3ff   : > { %v4674_v48 = vpack.c.bf16 %v4537_v28, %v4488_v11  ;;  %v4073_v57 = vmul.f32 %v4055_v61, %v17343_v33 }
 0x401   : > { %v14325_v14 = vunpack.c.l.bf16 %v4674_v48  ;;  %v14327_v23 = vunpack.c.h.bf16 %v4674_v48  ;;  %v14342_v52 = vadd.f32 1e-06, %v4073_v57  ;;  %v14375_v40 = vpop.eup %7548  ;;  %v4204_v57 = vmul.f32 %v14351_v25, %v4203_v30 }
 0x402   : > { %v4489_v41 = vpop.f32.mrf.mxu0  ;;  %vm4199_vm9 = vweird.f32 %v14375_v40 }
 0x403   : > { %v4585_v45 = vpop.f32.mrf.mxu2  ;;  %v4866_v27 = vmul.f32 %v14325_v14, %v14325_v14  ;;  %v4867_v18 = vmul.f32 %v14327_v23, %v14327_v23  ;;  %v4490_v3 = vadd.f32 %v4489_v41, %v14297_v36  ;;  %7550 = vrsqrt.f32 %v14342_v52  ;;  %vm14442_vm12 = vmor %vm4198_vm4, %vm4199_vm9 }
 0x404   : > { %v4586_v62 = vadd.f32 %v4585_v45, %v14334_v54  ;;  %v4538_v47 = vpop.f32.mrf.mxu1  ;;  %vm4228_vm10 = vweird.f32 %v14342_v52 }
 0x405   : > { %v4634_v43 = vpop.f32.mrf.mxu3  ;;  %v4930_v0 = vpack.c.bf16 %v4867_v18, %v4866_v27  ;;  %v4539_v20 = vadd.f32 %v4538_v47, %v14299_v5 }
 0x406   : > { %v4635_v4 = vadd.f32 %v4634_v43, %v14336_v53 }
 0x407   : > { %v4962_v13 = vunpack.c.l.bf16 %v4930_v0  ;;  %v4963_v51 = vunpack.c.h.bf16 %v4930_v0  ;;  %v4676_v46 = vpack.c.bf16 %v4539_v20, %v4490_v3 }
 0x408   : > { %v4675_v63 = vpack.c.bf16 %v4635_v4, %v4586_v62 }
 0x409   : > { %v5026_v24 = vmul.f32 %v4962_v13, %v14325_v14  ;;  %v5027_v22 = vmul.f32 %v4963_v51, %v14327_v23  ;;  %v14360_v37 = vunpack.c.l.bf16 %v4676_v46  ;;  %v14362_v26 = vunpack.c.h.bf16 %v4676_v46  ;;  %v14382_v15 = vpop.eup %7550 }
 0x40a   : > { %v14354_v49 = vunpack.c.l.bf16 %v4675_v63  ;;  %v14356_v44 = vunpack.c.h.bf16 %v4675_v63  ;;  %v4223_v42 = vmul.f32 %v14382_v15, %v14342_v52  ;;  %vm4229_vm11 = vweird.f32 %v14382_v15 }
 0x40b   : > { %v4587_v2 = vpop.f32.mrf.mxu2  ;;  %v5090_v16 = vpack.c.bf16 %v5027_v22, %v5026_v24  ;;  %v4870_v8 = vmul.f32 %v14360_v37, %v14360_v37  ;;  %v4871_v19 = vmul.f32 %v14362_v26, %v14362_v26  ;;  %v4492_v22 = vpop.f32.mrf.mxu0  ;;  %vm14449_vm13 = vmor %vm4228_vm10, %vm4229_vm11 }
 0x40c   : > { %v4868_v50 = vmul.f32 %v14354_v49, %v14354_v49  ;;  %v4869_v34 = vmul.f32 %v14356_v44, %v14356_v44  ;;  %v4588_v28 = vadd.f32 %v4587_v2, %v14334_v54 }
 0x40d   : > { %v4636_v10 = vpop.f32.mrf.mxu3  ;;  %v5122_v61 = vunpack.c.l.bf16 %v5090_v16  ;;  %v5123_v7 = vunpack.c.h.bf16 %v5090_v16  ;;  %v4932_v48 = vpack.c.bf16 %v4871_v19, %v4870_v8  ;;  %v4541_v16 = vpop.f32.mrf.mxu1 }
 0x40e   : > { %v4931_v11 = vpack.c.bf16 %v4869_v34, %v4868_v50  ;;  %v4637_v60 = vadd.f32 %v4636_v10, %v14336_v53  ;;  %v4205_v34 = vmul.f32 0.5, %v4204_v57  ;;  %v4224_v10 = vmul.f32 %v14382_v15, %v4223_v42 }
 0x40f   : > { %v5186_v27 = vmul.f32 0.044677734, %v5122_v61  ;;  %v5187_v18 = vmul.f32 0.044677734, %v5123_v7  ;;  %v4966_v62 = vunpack.c.l.bf16 %v4932_v48  ;;  %v4967_v47 = vunpack.c.h.bf16 %v4932_v48 }
 0x410   : > { %v4964_v17 = vunpack.c.l.bf16 %v4931_v11  ;;  %v4965_v29 = vunpack.c.h.bf16 %v4931_v11  ;;  %v4677_v45 = vpack.c.bf16 %v4637_v60, %v4588_v28  ;;  %v4493_v11 = vadd.f32 %v4492_v22, %v14297_v36 }
 0x411   : > { %v3972_v1 = vpop.xlane.xlu1 %3971  ;;  %v5250_v58 = vpack.c.bf16 %v5187_v18, %v5186_v27  ;;  %v5030_v0 = vmul.f32 %v4966_v62, %v14360_v37  ;;  %v5031_v13 = vmul.f32 %v4967_v47, %v14362_v26  ;;  %v4225_v62 = vmul.f32 0.5, %v4224_v10 }
 0x412   : > { %v3995_v6 = vmul.f32 %v17343_v33, %v3972_v1  ;;  %v5028_v4 = vmul.f32 %v4964_v17, %v14354_v49  ;;  %v5029_v41 = vmul.f32 %v4965_v29, %v14356_v44  ;;  %v14392_v3 = vunpack.c.l.bf16 %v4677_v45 }
 0x413   : > { %v14394_v20 = vunpack.c.h.bf16 %v4677_v45  ;;  %v5282_v46 = vunpack.c.l.bf16 %v5250_v58  ;;  %v5283_v35 = vunpack.c.h.bf16 %v5250_v58  ;;  %v5092_v50 = vpack.c.bf16 %v5031_v13, %v5030_v0 }
 0x414   : > { %v14380_v21 = vsub.f32 %v14264_v32, %v3995_v6  ;;  %v4193_v32 = vmul.f32 %v14375_v40, %v14332_v56  ;;  %v5091_v63 = vpack.c.bf16 %v5029_v41, %v5028_v4  ;;  %v4872_v24 = vmul.f32 %v14392_v3, %v14392_v3 }
 0x415   : > { %17458 = vst [vmem:[#allocation28_spill] sm:$0xff] %v14394_v20  ;;  %v4873_v6 = vmul.f32 %v14394_v20, %v14394_v20  ;;  %v5346_v19 = vadd.f32 %v5282_v46, %v14325_v14  ;;  %v5347_v28 = vadd.f32 %v5283_v35, %v14327_v23  ;;  %v5126_v48 = vunpack.c.l.bf16 %v5092_v50  ;;  %v4639_v10 = vpop.f32.mrf.mxu3 }
 0x416   : > { %17457 = vst [vmem:[#allocation57_spill] sm:$0xff] %v14380_v21  ;;  %v4027_v43 = vmul.f32 %v14380_v21, %v14380_v21  ;;  %v5124_v1 = vunpack.c.l.bf16 %v5091_v63  ;;  %v5125_v30 = vunpack.c.h.bf16 %v5091_v63  ;;  %v4194_v2 = vmul.f32 %v14375_v40, %v4193_v32 }
 0x417   : > { %v4933_v7 = vpack.c.bf16 %v4873_v6, %v4872_v24  ;;  %v5127_v57 = vunpack.c.h.bf16 %v5092_v50  ;;  %v4542_v17 = vadd.f32 %v4541_v16, %v14299_v5  ;;  %v4206_v29 = vsub.f32 1.5, %v4205_v34 }
 0x418   : > { %4058 = vadd.xlane.f32.xlu1 %v4027_v43  ;;  %v5188_v60 = vmul.f32 0.044677734, %v5124_v1  ;;  %v5189_v61 = vmul.f32 0.044677734, %v5125_v30  ;;  %v4195_v27 = vmul.f32 0.5, %v4194_v2  ;;  %v5410_v4 = vpack.c.bf16 %v5347_v28, %v5346_v19  ;;  %v4590_v19 = vpop.f32.mrf.mxu2 }
 0x419   : > { %v4053_v51 = vpop.xlane.xlu1 %4052  ;;  %v4968_v45 = vunpack.c.l.bf16 %v4933_v7  ;;  %v4969_v43 = vunpack.c.h.bf16 %v4933_v7  ;;  %v4678_v32 = vpack.c.bf16 %v4542_v17, %v4493_v11  ;;  %v5190_v0 = vmul.f32 0.044677734, %v5126_v48 }
 0x41a   : > { %v4072_v8 = vmul.f32 %v4053_v51, %v17343_v33  ;;  %v5251_v41 = vpack.c.bf16 %v5189_v61, %v5188_v60  ;;  %v5191_v42 = vmul.f32 0.044677734, %v5127_v57  ;;  %v4207_v46 = vmul.f32 %v14351_v25, %v4206_v29 }
 0x41b   : > { %v5032_v47 = vmul.f32 %v4968_v45, %v14392_v3  ;;  %v5033_v58 = vmul.f32 %v4969_v43, %v14394_v20  ;;  %v14417_v13 = vunpack.c.l.bf16 %v4678_v32  ;;  %v14419_v51 = vunpack.c.h.bf16 %v4678_v32 }
 0x41c   : > { %v14410_v18 = vadd.f32 1e-06, %v4072_v8  ;;  %v4196_v35 = vsub.f32 1.5, %v4195_v27  ;;  %v4226_v24 = vsub.f32 1.5, %v4225_v62  ;;  %v5442_v31 = vunpack.c.l.bf16 %v5410_v4 }
 0x41d   : > { %v5093_v63 = vpack.c.bf16 %v5033_v58, %v5032_v47  ;;  %17459 = vst [vmem:[#allocation73_spill] sm:$0xff] %v14417_v13  ;;  %v5284_v1 = vunpack.c.l.bf16 %v5251_v41  ;;  %v5285_v30 = vunpack.c.h.bf16 %v5251_v41  ;;  %v5443_v50 = vunpack.c.h.bf16 %v5410_v4  ;;  %v4494_v41 = vpop.f32.mrf.mxu0 }
 0x41e   : > { %17460 = vst [vmem:[#allocation58_spill] sm:$0xff] %v14419_v51  ;;  %7552 = vrsqrt.f32 %v14410_v18  ;;  %v5252_v34 = vpack.c.bf16 %v5191_v42, %v5190_v0  ;;  %v4874_v16 = vmul.f32 %v14417_v13, %v14417_v13  ;;  %v4875_v8 = vmul.f32 %v14419_v51, %v14419_v51 }
 0x41f   : > { %v5128_v2 = vunpack.c.l.bf16 %v5093_v63  ;;  %v5129_v6 = vunpack.c.h.bf16 %v5093_v63  ;;  %v4211_v11 = vsel %vm14423_vm5, %v14351_v25, %v4207_v46  ;;  %v4197_v28 = vmul.f32 %v14375_v40, %v4196_v35  ;;  %v4543_v63 = vpop.f32.mrf.mxu1 }
 0x420   : > { %v14447_v60 = vmul.f32 %v14382_v15, %v4226_v24  ;;  %v5506_v61 = vmul.f32 0.796875, %v5442_v31  ;;  %v5348_v25 = vadd.f32 %v5284_v1, %v14354_v49  ;;  %v5349_v48 = vadd.f32 %v5285_v30, %v14356_v44 }
 0x421   : > { %v4934_v57 = vpack.c.bf16 %v4875_v8, %v4874_v16  ;;  %v5507_v56 = vmul.f32 0.796875, %v5443_v50  ;;  %v5286_v29 = vunpack.c.l.bf16 %v5252_v34  ;;  %v4591_v45 = vadd.f32 %v4590_v19, %v14334_v54 }
 0x422   : > { %v4640_v43 = vadd.f32 %v4639_v10, %v14336_v53  ;;  %v5192_v27 = vmul.f32 0.044677734, %v5128_v2  ;;  %v5193_v62 = vmul.f32 0.044677734, %v5129_v6  ;;  %v4201_v47 = vsel %vm14442_vm12, %v14375_v40, %v4197_v28 }
 0x423   : > { %v4970_v32 = vunpack.c.l.bf16 %v4934_v57  ;;  %v4971_v4 = vunpack.c.h.bf16 %v4934_v57  ;;  %v5287_v0 = vunpack.c.h.bf16 %v5252_v34  ;;  %v4263_v46 = vmul.f32 %v4211_v11, %v13897_v39 }
 0x424   : > { %v14455_v17 = vpop.eup %7552  ;;  %v5411_v24 = vpack.c.bf16 %v5349_v48, %v5348_v25  ;;  %v14471_v1 = vpack.c.bf16 %v5507_v56, %v5506_v61  ;;  %v5350_v40 = vadd.f32 %v5286_v29, %v14360_v37  ;;  %v4679_v50 = vpack.c.bf16 %v4640_v43, %v4591_v45 }
 0x425   : > { %v4213_v35 = vmul.f32 %v14455_v17, %v14410_v18  ;;  %v5034_v31 = vmul.f32 %v4970_v32, %v14417_v13  ;;  %v5035_v30 = vmul.f32 %v4971_v4, %v14419_v51  ;;  %v5253_v2 = vpack.c.bf16 %v5193_v62, %v5192_v27 }
 0x426   : > { %v4495_v39 = vadd.f32 %v4494_v41, %v14297_v36  ;;  %v4544_v6 = vadd.f32 %v4543_v63, %v14299_v5  ;;  %v14479_v8 = vunpack.c.l.bf16 %v4679_v50  ;;  %v14481_v19 = vunpack.c.h.bf16 %v4679_v50  ;;  %v4641_v41 = vpop.f32.mrf.mxu3 }
 0x427   : > { %v5094_v16 = vpack.c.bf16 %v5035_v30, %v5034_v31  ;;  %v4262_v10 = vmul.f32 %v4201_v47, %v14163_v9  ;;  %v4214_v11 = vmul.f32 %v14455_v17, %v4213_v35  ;;  %v5444_v28 = vunpack.c.l.bf16 %v5411_v24  ;;  %v4592_v9 = vpop.f32.mrf.mxu2 }
 0x428   : > { %v5351_v52 = vadd.f32 %v5287_v0, %v14362_v26  ;;  %v4680_v61 = vpack.c.bf16 %v4544_v6, %v4495_v39  ;;  %v4876_v57 = vmul.f32 %v14479_v8, %v14479_v8  ;;  %v4877_v56 = vmul.f32 %v14481_v19, %v14481_v19 }
 0x429   : > { %v5130_v25 = vunpack.c.l.bf16 %v5094_v16  ;;  %v5131_v48 = vunpack.c.h.bf16 %v5094_v16  ;;  %v5445_v29 = vunpack.c.h.bf16 %v5411_v24  ;;  %v5288_v45 = vunpack.c.l.bf16 %v5253_v2 }
 0x42a   : > { %v14490_v43 = vunpack.c.l.bf16 %v4680_v61  ;;  %v14492_v27 = vunpack.c.h.bf16 %v4680_v61  ;;  %v5289_v62 = vunpack.c.h.bf16 %v5253_v2  ;;  %v4935_v32 = vpack.c.bf16 %v4877_v56, %v4876_v57 }
 0x42b   : > { %v4273_v4 = vpack.c.bf16 %v4263_v46, %v4262_v10  ;;  %v5412_v47 = vpack.c.bf16 %v5351_v52, %v5350_v40  ;;  %v5194_v0 = vmul.f32 0.044677734, %v5130_v25  ;;  %v5195_v35 = vmul.f32 0.044677734, %v5131_v48 }
 0x42c   : > { %v4879_v63 = vmul.f32 %v14492_v27, %v14492_v27  ;;  %v4972_v24 = vunpack.c.l.bf16 %v4935_v32  ;;  %v4593_v31 = vadd.f32 %v4592_v9, %v14334_v54  ;;  %v4215_v30 = vmul.f32 0.5, %v4214_v11 }
 0x42d   : > { %4511 = vmatmul.bf16.gmra.mxu0 %v4273_v4  ;;  %4560 = vmatmul.bf16.gmra.mxu1 %v4273_v4  ;;  %vm4218_vm14 = vweird.f32 %v14410_v18  ;;  %vm4219_vm15 = vweird.f32 %v14455_v17  ;;  %v4642_v50 = vadd.f32 %v4641_v41, %v14336_v53  ;;  %v5508_v2 = vmul.f32 0.796875, %v5444_v28  ;;  %v4546_v28 = vpop.f32.mrf.mxu1 }
 0x42e   : > { %4609 = vmatmul.bf16.gmra.mxu2 %v4273_v4  ;;  %4658 = vmatmul.bf16.gmra.mxu3 %v4273_v4  ;;  %v5509_v39 = vmul.f32 0.796875, %v5445_v29  ;;  %v5352_v6 = vadd.f32 %v5288_v45, %v14392_v3  ;;  %v5353_v16 = vadd.f32 %v5289_v62, %v14394_v20  ;;  %v5036_v10 = vmul.f32 %v4972_v24, %v14479_v8  ;;  %vm14537_vm6 = vmor %vm4218_vm14, %vm4219_vm15 }
 0x42f   : > { %v5446_v57 = vunpack.c.l.bf16 %v5412_v47  ;;  %v5254_v56 = vpack.c.bf16 %v5195_v35, %v5194_v0  ;;  %v4681_v9 = vpack.c.bf16 %v4642_v50, %v4593_v31  ;;  %v5447_v29 = vunpack.c.h.bf16 %v5412_v47 }
 0x430   : > { %v4057_v42 = vpop.xlane.xlu0 %4056  ;;  %v4216_v41 = vsub.f32 1.5, %v4215_v30  ;;  %v5413_v0 = vpack.c.bf16 %v5353_v16, %v5352_v6  ;;  %v4547_v47 = vadd.f32 %v4546_v28, %v14299_v5 }
 0x431   : > { %v4074_v22 = vmul.f32 %v4057_v42, %v17343_v33  ;;  %v4878_v42 = vmul.f32 %v14490_v43, %v14490_v43  ;;  %v14517_v24 = vunpack.c.h.bf16 %v4681_v9  ;;  %v5290_v31 = vunpack.c.l.bf16 %v5254_v56 }
 0x432   : > { %v5449_v28 = vunpack.c.h.bf16 %v5413_v0 }
 0x433   : > { %v14475_v34 = vadd.f32 1e-06, %v4074_v22  ;;  %v4973_v22 = vunpack.c.h.bf16 %v4935_v32  ;;  %v4936_v40 = vpack.c.bf16 %v4879_v63, %v4878_v42  ;;  %v4497_v32 = vpop.f32.mrf.mxu0  ;;  %v14513_v42 = vpack.c.bf16 %v5509_v39, %v5508_v2 }
 0x434   : > { %v14515_v63 = vunpack.c.l.bf16 %v4681_v9  ;;  %v4498_v35 = vadd.f32 %v4497_v32, %v14297_v36  ;;  %v5510_v2 = vmul.f32 0.796875, %v5446_v57  ;;  %v5511_v39 = vmul.f32 0.796875, %v5447_v29  ;;  %v4595_v9 = vpop.f32.mrf.mxu2  ;;  %v4644_v57 = vpop.f32.mrf.mxu3 }
 0x435   : > { %7554 = vrsqrt.f32 %v14475_v34  ;;  %v5037_v11 = vmul.f32 %v4973_v22, %v14481_v19  ;;  %v4974_v52 = vunpack.c.l.bf16 %v4936_v40  ;;  %v4975_v61 = vunpack.c.h.bf16 %v4936_v40 }
 0x436   : > { %v5291_v40 = vunpack.c.h.bf16 %v5254_v56  ;;  %v4880_v30 = vmul.f32 %v14515_v63, %v14515_v63  ;;  %v4881_v16 = vmul.f32 %v14517_v24, %v14517_v24  ;;  %v5448_v32 = vunpack.c.l.bf16 %v5413_v0 }
 0x437   : > { %v5095_v4 = vpack.c.bf16 %v5037_v11, %v5036_v10  ;;  %v5038_v45 = vmul.f32 %v4974_v52, %v14490_v43  ;;  %v5039_v62 = vmul.f32 %v4975_v61, %v14492_v27  ;;  %v14526_v52 = vmul.f32 %v14455_v17, %v4216_v41 }
 0x438   : > { %v4682_v48 = vpack.c.bf16 %v4547_v47, %v4498_v35  ;;  %v4937_v41 = vpack.c.bf16 %v4881_v16, %v4880_v30  ;;  %v4596_v0 = vadd.f32 %v4595_v9, %v14334_v54  ;;  %v4645_v18 = vadd.f32 %v4644_v57, %v14336_v53 }
 0x439   : > { %v5132_v50 = vunpack.c.l.bf16 %v5095_v4  ;;  %v5133_v10 = vunpack.c.h.bf16 %v5095_v4  ;;  %v5096_v11 = vpack.c.bf16 %v5039_v62, %v5038_v45  ;;  %v5354_v4 = vadd.f32 %v5290_v31, %v14417_v13 }
 0x43a   : > { %v5355_v45 = vadd.f32 %v5291_v40, %v14419_v51  ;;  %v14543_v61 = vunpack.c.l.bf16 %v4682_v48  ;;  %v4976_v35 = vunpack.c.l.bf16 %v4937_v41  ;;  %v4977_v47 = vunpack.c.h.bf16 %v4937_v41  ;;  %v4548_v41 = vpop.f32.mrf.mxu1 }
 0x43b   : > { %v14508_v25 = vpop.eup %7554  ;;  %v5196_v62 = vmul.f32 0.044677734, %v5132_v50  ;;  %v5197_v6 = vmul.f32 0.044677734, %v5133_v10  ;;  %v14546_v46 = vunpack.c.h.bf16 %v4682_v48  ;;  %v4221_v31 = vsel %vm14537_vm6, %v14455_v17, %v14526_v52  ;;  %v4499_v57 = vpop.f32.mrf.mxu0 }
 0x43c   : > { %v4233_v22 = vmul.f32 %v14508_v25, %v14475_v34  ;;  %v14553_v40 = vpack.c.bf16 %v5511_v39, %v5510_v2  ;;  %v5512_v50 = vmul.f32 0.796875, %v5448_v32  ;;  %v5135_v30 = vunpack.c.h.bf16 %v5096_v11  ;;  %v4597_v7 = vpop.f32.mrf.mxu2 }
 0x43d   : > { %v5040_v10 = vmul.f32 %v4976_v35, %v14515_v63  ;;  %v5041_v16 = vmul.f32 %v4977_v47, %v14517_v24  ;;  %v4882_v9 = vmul.f32 %v14543_v61, %v14543_v61  ;;  %v4883_v48 = vmul.f32 %v14546_v46, %v14546_v46 }
 0x43e   : > { %v4234_v56 = vmul.f32 %v14508_v25, %v4233_v22  ;;  %v5134_v22 = vunpack.c.l.bf16 %v5096_v11  ;;  %v5513_v29 = vmul.f32 0.796875, %v5449_v28  ;;  %v5255_v17 = vpack.c.bf16 %v5197_v6, %v5196_v62 }
 0x43f   : > { %v4683_v2 = vpack.c.bf16 %v4645_v18, %v4596_v0  ;;  %v14563_v39 = vpack.c.bf16 %v5355_v45, %v5354_v4  ;;  %v5097_v52 = vpack.c.bf16 %v5041_v16, %v5040_v10  ;;  %v4938_v32 = vpack.c.bf16 %v4883_v48, %v4882_v9 }
 0x440   : > { %v14561_v58 = vmul.f32 0.5, %v4234_v56  ;;  %v5198_v11 = vmul.f32 0.044677734, %v5134_v22  ;;  %v5199_v35 = vmul.f32 0.044677734, %v5135_v30  ;;  %v4500_v55 = vadd.f32 %v4499_v57, %v14297_v36 }
 0x441   : > { %v14565_v47 = vunpack.c.l.bf16 %v4683_v2  ;;  %v4549_v21 = vadd.f32 %v4548_v41, %v14299_v5  ;;  %v5136_v33 = vunpack.c.l.bf16 %v5097_v52  ;;  %v5137_v51 = vunpack.c.h.bf16 %v5097_v52 }
 0x442   : > { %v4978_v13 = vunpack.c.l.bf16 %v4938_v32  ;;  %v4979_v56 = vunpack.c.h.bf16 %v4938_v32  ;;  %v14569_v20 = vpack.c.bf16 %v5513_v29, %v5512_v50  ;;  %v5292_v6 = vunpack.c.l.bf16 %v5255_v17 }
 0x443   : > { %v5293_v28 = vunpack.c.h.bf16 %v5255_v17  ;;  %v14572_v4 = vmul.f32 0.5, %v14325_v14  ;;  %v5200_v45 = vmul.f32 0.044677734, %v5136_v33  ;;  %v5201_v62 = vmul.f32 0.044677734, %v5137_v51 }
 0x444   : > { %v5042_v22 = vmul.f32 %v4978_v13, %v14543_v61  ;;  %v5043_v0 = vmul.f32 %v4979_v56, %v14546_v46  ;;  %v4236_v18 = vsub.f32 1.5, %v14561_v58  ;;  %v5450_v30 = vunpack.c.l.bf16 %v14563_v39 }
 0x445   : > { %v5451_v10 = vunpack.c.h.bf16 %v14563_v39  ;;  %v14579_v16 = vunpack.c.h.bf16 %v4683_v2  ;;  %v5256_v50 = vpack.c.bf16 %v5199_v35, %v5198_v11  ;;  %v4884_v14 = vmul.f32 %v14565_v47, %v14565_v47 }
 0x446   : > { %v5098_v9 = vpack.c.bf16 %v5043_v0, %v5042_v22  ;;  %v4684_v48 = vpack.c.bf16 %v4549_v21, %v4500_v55  ;;  %v5356_v33 = vadd.f32 %v5292_v6, %v14479_v8  ;;  %v4264_v51 = vmul.f32 %v4221_v31, %v14269_v59 }
 0x447   : > { %17469 = vst [vmem:[#allocation45_spill] sm:$0xff] %v14579_v16  ;;  %v4885_v13 = vmul.f32 %v14579_v16, %v14579_v16  ;;  %v17470_v58 = vsel %vm14449_vm13, %v14382_v15, %v14447_v60  ;;  %vm4238_vm7 = vweird.f32 %v14475_v34  ;;  %vm4239_vm8 = vweird.f32 %v14508_v25  ;;  %v4646_v60 = vpop.f32.mrf.mxu3 }
 0x448   : > { %v4265_v57 = vmul.f32 %v17470_v58, %v14223_v38  ;;  %v5357_v55 = vadd.f32 %v5293_v28, %v14481_v19  ;;  %v5257_v21 = vpack.c.bf16 %v5201_v62, %v5200_v45  ;;  %v5138_v41 = vunpack.c.l.bf16 %v5098_v9  ;;  %v7309_v58 = vld [vmem:[#allocation10 + $0xb8] sm:$0xff]  ;;  %vm14627_vm0 = vmor %vm4238_vm7, %vm4239_vm8 }
 0x449   : > { %v5139_v29 = vunpack.c.h.bf16 %v5098_v9  ;;  %v4939_v17 = vpack.c.bf16 %v4885_v13, %v4884_v14  ;;  %v14596_v2 = vunpack.c.l.bf16 %v4684_v48  ;;  %v14598_v59 = vunpack.c.h.bf16 %v4684_v48  ;;  %6504 = vmatpush.bf16.msrb.mxu2 %v7309_v58 }
 0x44a   : > { %v4274_v31 = vpack.c.bf16 %v4265_v57, %v4264_v51  ;;  %v5294_v11 = vunpack.c.l.bf16 %v5256_v50  ;;  %v5295_v52 = vunpack.c.h.bf16 %v5256_v50  ;;  %v5202_v15 = vmul.f32 0.044677734, %v5138_v41  ;;  %v7293_v57 = vld [vmem:[#allocation10 + $0x38] sm:$0xff] }
 0x44b   : > { %v5203_v38 = vmul.f32 0.044677734, %v5139_v29  ;;  %v4980_v32 = vunpack.c.l.bf16 %v4939_v17  ;;  %v4981_v35 = vunpack.c.h.bf16 %v4939_v17  ;;  %v4886_v56 = vmul.f32 %v14596_v2, %v14596_v2  ;;  %6406 = vmatpush.bf16.msrb.mxu0 %v7293_v57 }
 0x44c   : > { %v4887_v6 = vmul.f32 %v14598_v59, %v14598_v59  ;;  %4516 = vmatmul.bf16.gmra.mxu0 %v4274_v31  ;;  %4565 = vmatmul.bf16.gmra.mxu1 %v4274_v31  ;;  %v5415_v28 = vpack.c.bf16 %v5357_v55, %v5356_v33  ;;  %v5296_v45 = vunpack.c.l.bf16 %v5257_v21  ;;  %v5297_v62 = vunpack.c.h.bf16 %v5257_v21  ;;  %v7317_v55 = vld [vmem:[#allocation10 + $0xf8] sm:$0xff] }
 0x44d   : > { %4614 = vmatmul.bf16.gmra.mxu2 %v4274_v31  ;;  %4663 = vmatmul.bf16.gmra.mxu3 %v4274_v31  ;;  %v4598_v22 = vadd.f32 %v4597_v7, %v14334_v54  ;;  %v5044_v0 = vmul.f32 %v4980_v32, %v14565_v47  ;;  %v5045_v50 = vmul.f32 %v4981_v35, %v14579_v16  ;;  %v7301_v31 = vld [vmem:[#allocation10 + $0x78] sm:$0xff]  ;;  %v14613_v7 = vmul.f32 0.796875, %v5450_v30 }
 0x44e   : > { %v4940_v9 = vpack.c.bf16 %v4887_v6, %v4886_v56  ;;  %v4647_v14 = vadd.f32 %v4646_v60, %v14336_v53  ;;  %v14609_v48 = vmul.f32 %v14508_v25, %v4236_v18  ;;  %v5358_v13 = vadd.f32 %v5294_v11, %v14490_v43  ;;  %v7308_v11 = vld [vmem:[#allocation10 + $0xb0] sm:$0xff]  ;;  %6553 = vmatpush.bf16.msrb.mxu3 %v7317_v55 }
 0x44f   : > { %v5359_v33 = vadd.f32 %v5295_v52, %v14492_v27  ;;  %v5258_v51 = vpack.c.bf16 %v5203_v38, %v5202_v15  ;;  %v5099_v21 = vpack.c.bf16 %v5045_v50, %v5044_v0  ;;  %v5452_v32 = vunpack.c.l.bf16 %v5415_v28  ;;  %6455 = vmatpush.bf16.msrb.mxu1 %v7301_v31  ;;  %6505 = vmatpush.bf16.msrb.mxu2 %v7308_v11 }
 0x450   : > { %v4982_v41 = vunpack.c.l.bf16 %v4940_v9  ;;  %v4983_v29 = vunpack.c.h.bf16 %v4940_v9  ;;  %v4685_v17 = vpack.c.bf16 %v4647_v14, %v4598_v22  ;;  %v5360_v60 = vadd.f32 %v5296_v45, %v14515_v63 }
 0x451   : > { %v5361_v18 = vadd.f32 %v5297_v62, %v14517_v24  ;;  %v5140_v52 = vunpack.c.l.bf16 %v5099_v21  ;;  %v5141_v15 = vunpack.c.h.bf16 %v5099_v21  ;;  %v5416_v56 = vpack.c.bf16 %v5359_v33, %v5358_v13 }
 0x452   : > { %v5046_v38 = vmul.f32 %v4982_v41, %v14596_v2  ;;  %v5047_v35 = vmul.f32 %v4983_v29, %v14598_v59  ;;  %v5298_v6 = vunpack.c.l.bf16 %v5258_v51  ;;  %v14619_v30 = vunpack.c.l.bf16 %v4685_v17 }
 0x453   : > { %v14621_v22 = vunpack.c.h.bf16 %v4685_v17  ;;  %v5299_v62 = vunpack.c.h.bf16 %v5258_v51  ;;  %v5204_v0 = vmul.f32 0.044677734, %v5140_v52  ;;  %v5205_v50 = vmul.f32 0.044677734, %v5141_v15 }
 0x454   : > { %17471 = vst [vmem:[#allocation84_spill] sm:$0xff] %v14619_v30  ;;  %v5100_v9 = vpack.c.bf16 %v5047_v35, %v5046_v38  ;;  %v5515_v14 = vmul.f32 0.796875, %v5451_v10  ;;  %v5453_v13 = vunpack.c.h.bf16 %v5415_v28  ;;  %v4888_v33 = vmul.f32 %v14619_v30, %v14619_v30 }
 0x455   : > { %17472 = vst [vmem:[#allocation31_spill] sm:$0xff] %v14621_v22  ;;  %v4889_v58 = vmul.f32 %v14621_v22, %v14621_v22  ;;  %v5417_v34 = vpack.c.bf16 %v5361_v18, %v5360_v60  ;;  %v5259_v57 = vpack.c.bf16 %v5205_v50, %v5204_v0  ;;  %v4241_v51 = vsel %vm14627_vm0, %v14508_v25, %v14609_v48 }
 0x456   : > { %v5142_v55 = vunpack.c.l.bf16 %v5100_v9  ;;  %v5143_v21 = vunpack.c.h.bf16 %v5100_v9  ;;  %v5516_v41 = vmul.f32 0.796875, %v5452_v32  ;;  %v5454_v39 = vunpack.c.l.bf16 %v5416_v56 }
 0x457   : > { %v4941_v10 = vpack.c.bf16 %v4889_v58, %v4888_v33  ;;  %v5362_v28 = vadd.f32 %v5298_v6, %v14543_v61  ;;  %v5363_v29 = vadd.f32 %v5299_v62, %v14546_v46  ;;  %v5517_v52 = vmul.f32 0.796875, %v5453_v13 }
 0x458   : > { %v5206_v17 = vmul.f32 0.044677734, %v5142_v55  ;;  %v5207_v31 = vmul.f32 0.044677734, %v5143_v21  ;;  %v5455_v11 = vunpack.c.h.bf16 %v5416_v56  ;;  %v5456_v15 = vunpack.c.l.bf16 %v5417_v34 }
 0x459   : > { %v4984_v60 = vunpack.c.l.bf16 %v4941_v10  ;;  %v4985_v18 = vunpack.c.h.bf16 %v4941_v10  ;;  %v5457_v38 = vunpack.c.h.bf16 %v5417_v34  ;;  %v5300_v35 = vunpack.c.l.bf16 %v5259_v57 }
 0x45a   : > { %v5260_v0 = vpack.c.bf16 %v5207_v31, %v5206_v17  ;;  %v5301_v50 = vunpack.c.h.bf16 %v5259_v57  ;;  %v5606_v32 = vunpack.c.l.bf16 %v14553_v40  ;;  %v5518_v6 = vmul.f32 0.796875, %v5454_v39 }
 0x45b   : > { %v5048_v25 = vmul.f32 %v4984_v60, %v14619_v30  ;;  %v5049_v48 = vmul.f32 %v4985_v18, %v14621_v22  ;;  %v5418_v45 = vpack.c.bf16 %v5363_v29, %v5362_v28  ;;  %v5607_v62 = vunpack.c.h.bf16 %v14553_v40 }
 0x45c   : > { %v17475_v9 = vunpack.c.l.bf16 %v14471_v1  ;;  %v5302_v56 = vunpack.c.l.bf16 %v5260_v0  ;;  %v5303_v13 = vunpack.c.h.bf16 %v5260_v0  ;;  %v17476_v58 = vunpack.c.h.bf16 %v14471_v1 }
 0x45d   : > { %v5101_v33 = vpack.c.bf16 %v5049_v48, %v5048_v25  ;;  %v5519_v34 = vmul.f32 0.796875, %v5455_v11  ;;  %v5520_v57 = vmul.f32 0.796875, %v5456_v15  ;;  %v5521_v55 = vmul.f32 0.796875, %v5457_v38 }
 0x45e   : > { %7556 = vtanh.f32 %v17475_v9  ;;  %v5364_v21 = vadd.f32 %v5300_v35, %v14565_v47  ;;  %v5365_v10 = vadd.f32 %v5301_v50, %v14579_v16  ;;  %v14654_v40 = vpack.c.bf16 %v5515_v14, %v14613_v7 }
 0x45f   : > { %7558 = vtanh.f32 %v17476_v58  ;;  %v5144_v39 = vunpack.c.l.bf16 %v5101_v33  ;;  %v5145_v28 = vunpack.c.h.bf16 %v5101_v33  ;;  %v5458_v29 = vunpack.c.l.bf16 %v5418_v45 }
 0x460   : > { %7560 = vtanh.f32 %v5606_v32  ;;  %v5459_v17 = vunpack.c.h.bf16 %v5418_v45  ;;  %v5366_v31 = vadd.f32 %v5302_v56, %v14596_v2  ;;  %v5367_v1 = vadd.f32 %v5303_v13, %v14598_v59 }
 0x461   : > { %7562 = vtanh.f32 %v5607_v62  ;;  %v5208_v11 = vmul.f32 0.044677734, %v5144_v39  ;;  %v5209_v60 = vmul.f32 0.044677734, %v5145_v28  ;;  %v14658_v15 = vpack.c.bf16 %v5517_v52, %v5516_v41 }
 0x462   : > { %v14660_v38 = vpack.c.bf16 %v5519_v34, %v5518_v6  ;;  %v14662_v35 = vpack.c.bf16 %v5521_v55, %v5520_v57  ;;  %v4771_v0 = vmul.f32 0.5, %v14327_v23  ;;  %v5419_v14 = vpack.c.bf16 %v5365_v10, %v5364_v21 }
 0x463   : > { %v5261_v50 = vpack.c.bf16 %v5209_v60, %v5208_v11  ;;  %v14666_v25 = vmul.f32 %v4241_v51, %v14277_v12  ;;  %v17477_v48 = vunpack.c.l.bf16 %v14513_v42  ;;  %v5522_v32 = vmul.f32 0.796875, %v5458_v29 }
 0x464   : > { %v7557_v18 = vpop.eup %7556  ;;  %v5523_v45 = vmul.f32 0.796875, %v5459_v17  ;;  %v4774_v41 = vmul.f32 0.5, %v14360_v37  ;;  %v5420_v62 = vpack.c.bf16 %v5367_v1, %v5366_v31  ;;  %v17478_v23 = vunpack.c.h.bf16 %v14513_v42 }
 0x465   : > { %v7559_v7 = vpop.eup %7558  ;;  %7564 = vtanh.f32 %v17477_v48  ;;  %v5304_v9 = vunpack.c.l.bf16 %v5261_v50  ;;  %v5305_v56 = vunpack.c.h.bf16 %v5261_v50  ;;  %v4775_v33 = vmul.f32 0.5, %v14362_v26 }
 0x466   : > { %v5730_v52 = vpack.c.bf16 %v7559_v7, %v7557_v18  ;;  %v7561_v6 = vpop.eup %7560  ;;  %7566 = vtanh.f32 %v17478_v23  ;;  %v5608_v58 = vunpack.c.l.bf16 %v14569_v20  ;;  %v5460_v34 = vunpack.c.l.bf16 %v5419_v14 }
 0x467   : > { %v7563_v13 = vpop.eup %7562  ;;  %v5461_v57 = vunpack.c.h.bf16 %v5419_v14  ;;  %v5609_v37 = vunpack.c.h.bf16 %v14569_v20  ;;  %v5368_v21 = vadd.f32 %v5304_v9, %v14619_v30  ;;  %v5369_v10 = vadd.f32 %v5305_v56, %v14621_v22  ;;  %v17479_v56 = vld [vmem:[#allocation28_spill] sm:$0xff] }
 0x468   : > { %v5762_v12 = vunpack.c.l.bf16 %v5730_v52  ;;  %v5763_v51 = vunpack.c.h.bf16 %v5730_v52  ;;  %v5732_v55 = vpack.c.bf16 %v7563_v13, %v7561_v6  ;;  %v14679_v39 = vpack.c.bf16 %v4771_v0, %v14572_v4 }
 0x469   : > { %7568 = vtanh.f32 %v5608_v58  ;;  %v5462_v28 = vunpack.c.l.bf16 %v5420_v62  ;;  %v5463_v17 = vunpack.c.h.bf16 %v5420_v62  ;;  %v4836_v31 = vpack.c.bf16 %v4775_v33, %v4774_v41 }
 0x46a   : > { %v5766_v26 = vunpack.c.l.bf16 %v5732_v55  ;;  %v5767_v29 = vunpack.c.h.bf16 %v5732_v55  ;;  %7570 = vtanh.f32 %v5609_v37  ;;  %v5826_v1 = vadd.f32 1.0, %v5762_v12 }
 0x46b   : > { %v7565_v42 = vpop.eup %7564  ;;  %v5827_v11 = vadd.f32 1.0, %v5763_v51  ;;  %v5524_v18 = vmul.f32 0.796875, %v5460_v34  ;;  %v5525_v20 = vmul.f32 0.796875, %v5461_v57  ;;  %v5421_v50 = vpack.c.bf16 %v5369_v10, %v5368_v21 }
 0x46c   : > { %v7567_v60 = vpop.eup %7566  ;;  %v5830_v7 = vadd.f32 1.0, %v5766_v26  ;;  %v5831_v14 = vadd.f32 1.0, %v5767_v29  ;;  %v4772_v48 = vmul.f32 0.5, %v14354_v49  ;;  %v4773_v4 = vmul.f32 0.5, %v14356_v44 }
 0x46d   : > { %v5731_v0 = vpack.c.bf16 %v7567_v60, %v7565_v42  ;;  %v5526_v52 = vmul.f32 0.796875, %v5462_v28  ;;  %v4776_v9 = vmul.f32 0.5, %v14392_v3  ;;  %v4777_v62 = vmul.f32 0.5, %v17479_v56  ;;  %v17482_v60 = vld [vmem:[#allocation58_spill] sm:$0xff] }
 0x46e   : > { %v5892_v6 = vpack.c.bf16 %v5831_v14, %v5830_v7  ;;  %v5527_v23 = vmul.f32 0.796875, %v5463_v17  ;;  %v5890_v13 = vpack.c.bf16 %v5827_v11, %v5826_v1  ;;  %v14685_v58 = vpack.c.bf16 %v5523_v45, %v5522_v32  ;;  %v17481_v11 = vld [vmem:[#allocation73_spill] sm:$0xff] }
 0x46f   : > { %v7569_v41 = vpop.eup %7568  ;;  %v5764_v33 = vunpack.c.l.bf16 %v5731_v0  ;;  %v5765_v12 = vunpack.c.h.bf16 %v5731_v0  ;;  %v5922_v34 = vunpack.c.l.bf16 %v14679_v39  ;;  %v5926_v49 = vunpack.c.l.bf16 %v4836_v31 }
 0x470   : > { %v7571_v51 = vpop.eup %7570  ;;  %v5923_v44 = vunpack.c.h.bf16 %v14679_v39  ;;  %v5464_v57 = vunpack.c.l.bf16 %v5421_v50  ;;  %v14689_v3 = vpack.c.bf16 %v5525_v20, %v5524_v18  ;;  %v5465_v10 = vunpack.c.h.bf16 %v5421_v50 }
 0x471   : > { %v5733_v55 = vpack.c.bf16 %v7571_v51, %v7569_v41  ;;  %v5828_v37 = vadd.f32 1.0, %v5764_v33  ;;  %v5829_v21 = vadd.f32 1.0, %v5765_v12  ;;  %v5990_v42 = vunpack.c.l.bf16 %v5892_v6 }
 0x472   : > { %17480 = vst [vmem:[#allocation93_spill] sm:$0xff] %v14689_v3  ;;  %v5927_v28 = vunpack.c.h.bf16 %v4836_v31  ;;  %v14691_v26 = vpack.c.bf16 %v5527_v23, %v5526_v52  ;;  %v5986_v29 = vunpack.c.l.bf16 %v5890_v13  ;;  %v14693_v17 = vpack.c.bf16 %v4773_v4, %v4772_v48 }
 0x473   : > { %v14695_v32 = vpack.c.bf16 %v4777_v62, %v4776_v9  ;;  %v5987_v45 = vunpack.c.h.bf16 %v5890_v13  ;;  %v5991_v1 = vunpack.c.h.bf16 %v5892_v6  ;;  %v4778_v39 = vmul.f32 0.5, %v17481_v11  ;;  %v7315_v11 = vld [vmem:[#allocation10 + $0xe8] sm:$0xff] }
 0x474   : > { %v4779_v7 = vmul.f32 0.5, %v17482_v60  ;;  %v5528_v14 = vmul.f32 0.796875, %v5464_v57  ;;  %v5768_v0 = vunpack.c.l.bf16 %v5733_v55  ;;  %v5769_v18 = vunpack.c.h.bf16 %v5733_v55  ;;  %v7316_v57 = vld [vmem:[#allocation10 + $0xf0] sm:$0xff] }
 0x475   : > { %v5891_v20 = vpack.c.bf16 %v5829_v21, %v5828_v37  ;;  %v5529_v50 = vmul.f32 0.796875, %v5465_v10  ;;  %v14699_v56 = vmul.f32 %v5990_v42, %v5926_v49  ;;  %v4782_v31 = vmul.f32 0.5, %v14490_v43  ;;  %v7292_v49 = vld [vmem:[#allocation10 + $0x30] sm:$0xff]  ;;  %v4502_v37 = vpop.f32.mrf.mxu0  ;;  %v4551_v21 = vpop.f32.mrf.mxu1  ;;  %6554 = vmatpush.bf16.msrb.mxu3 %v7316_v57 }
 0x476   : > { %v4783_v48 = vmul.f32 0.5, %v14492_v27  ;;  %v5924_v4 = vunpack.c.l.bf16 %v14693_v17  ;;  %v5928_v52 = vunpack.c.l.bf16 %v14695_v32  ;;  %v5925_v6 = vunpack.c.h.bf16 %v14693_v17  ;;  %v7300_v55 = vld [vmem:[#allocation10 + $0x70] sm:$0xff]  ;;  %v7307_v17 = vld [vmem:[#allocation10 + $0xa8] sm:$0xff]  ;;  %6407 = vmatpush.bf16.msrb.mxu0 %v7292_v49 }
 0x477   : > { %v5610_v9 = vunpack.c.l.bf16 %v14654_v40  ;;  %v14707_v62 = vmul.f32 %v5986_v29, %v5922_v34  ;;  %v14709_v41 = vmul.f32 %v5991_v1, %v5927_v28  ;;  %v5929_v23 = vunpack.c.h.bf16 %v14695_v32  ;;  %v7291_v1 = vld [vmem:[#allocation10 + $0x28] sm:$0xff]  ;;  %6456 = vmatpush.bf16.msrb.mxu1 %v7300_v55  ;;  %6506 = vmatpush.bf16.msrb.mxu2 %v7307_v17 }
 0x478   : > { %v14712_v13 = vpack.c.bf16 %v4779_v7, %v4778_v39  ;;  %v5832_v33 = vadd.f32 1.0, %v5768_v0  ;;  %v5833_v43 = vadd.f32 1.0, %v5769_v18  ;;  %v5988_v12 = vunpack.c.l.bf16 %v5891_v20  ;;  %v4649_v0 = vpop.f32.mrf.mxu3  ;;  %v7314_v39 = vld [vmem:[#allocation10 + $0xe0] sm:$0xff] }
 0x479   : > { %v5611_v27 = vunpack.c.h.bf16 %v14654_v40  ;;  %v14715_v51 = vpack.c.bf16 %v5529_v50, %v5528_v14  ;;  %v14719_v10 = vmul.f32 %v5987_v45, %v5923_v44  ;;  %v14721_v42 = vpack.c.bf16 %v4783_v48, %v4782_v31  ;;  %v4600_v14 = vpop.f32.mrf.mxu2  ;;  %v7299_v48 = vld [vmem:[#allocation10 + $0x68] sm:$0xff]  ;;  %6555 = vmatpush.bf16.msrb.mxu3 %v7315_v11 }
 0x47a   : > { %v4503_v28 = vadd.f32 %v4502_v37, %v14297_v36  ;;  %v4552_v29 = vadd.f32 %v4551_v21, %v14299_v5  ;;  %v5989_v40 = vunpack.c.h.bf16 %v5891_v20  ;;  %7572 = vtanh.f32 %v5610_v9  ;;  %6408 = vmatpush.bf16.msrb.mxu0 %v7291_v1 }
 0x47b   : > { %17483 = vst [vmem:[#allocation94_spill] sm:$0xff] %v14715_v51  ;;  %v5614_v60 = vunpack.c.l.bf16 %v14660_v38  ;;  %v5615_v44 = vunpack.c.h.bf16 %v14660_v38  ;;  %v14730_v18 = vpack.c.bf16 %v5833_v43, %v5832_v33  ;;  %v14732_v20 = vmul.f32 %v5988_v12, %v5924_v4  ;;  %6457 = vmatpush.bf16.msrb.mxu1 %v7299_v48 }
 0x47c   : > { %v4686_v7 = vpack.c.bf16 %v4552_v29, %v4503_v28  ;;  %7574 = vtanh.f32 %v5611_v27  ;;  %v4601_v50 = vadd.f32 %v4600_v14, %v14334_v54  ;;  %v4650_v31 = vadd.f32 %v4649_v0, %v14336_v53 }
 0x47d   : > { %v14742_v55 = vmul.f32 %v5989_v40, %v5925_v6  ;;  %v4780_v33 = vmul.f32 0.5, %v14479_v8  ;;  %v4781_v43 = vmul.f32 0.5, %v14481_v19  ;;  %v4784_v12 = vmul.f32 0.5, %v14515_v63  ;;  %v4504_v19 = vpop.f32.mrf.mxu0  ;;  %v4553_v17 = vpop.f32.mrf.mxu1  ;;  %v7306_v8 = vld [vmem:[#allocation10 + $0xa0] sm:$0xff]  ;;  %6556 = vmatpush.bf16.msrb.mxu3 %v7314_v39 }
 0x47e   : > { %v14738_v49 = vunpack.c.l.bf16 %v4686_v7  ;;  %v14740_v57 = vunpack.c.h.bf16 %v4686_v7  ;;  %v4687_v4 = vpack.c.bf16 %v4650_v31, %v4601_v50  ;;  %v4785_v27 = vmul.f32 0.5, %v14517_v24  ;;  %6507 = vmatpush.bf16.msrb.mxu2 %v7306_v8 }
 0x47f   : > { %7576 = vtanh.f32 %v5614_v60  ;;  %v5992_v63 = vunpack.c.l.bf16 %v14730_v18  ;;  %v4505_v1 = vadd.f32 %v4504_v19, %v14297_v36  ;;  %v4554_v11 = vadd.f32 %v4553_v17, %v14299_v5  ;;  %v7290_v19 = vld [vmem:[#allocation10 + $0x20] sm:$0xff] }
 0x480   : > { %v7573_v37 = vpop.eup %7572  ;;  %v4890_v21 = vmul.f32 %v14738_v49, %v14738_v49  ;;  %v4891_v28 = vmul.f32 %v14740_v57, %v14740_v57  ;;  %v14753_v6 = vunpack.c.l.bf16 %v4687_v4  ;;  %v14755_v29 = vunpack.c.h.bf16 %v4687_v4  ;;  %v7298_v17 = vld [vmem:[#allocation10 + $0x60] sm:$0xff]  ;;  %v4651_v38 = vpop.f32.mrf.mxu3  ;;  %6409 = vmatpush.bf16.msrb.mxu0 %v7290_v19 }
 0x481   : > { %7578 = vtanh.f32 %v5615_v44  ;;  %v14765_v50 = vpack.c.bf16 %v4781_v43, %v4780_v33  ;;  %v14767_v31 = vpack.c.bf16 %v4785_v27, %v4784_v12  ;;  %v17486_v44 = vld [vmem:[#allocation42_spill] sm:$0xff]  ;;  %v4602_v7 = vpop.f32.mrf.mxu2  ;;  %v4652_v45 = vadd.f32 %v4651_v38, %v14336_v53  ;;  %6458 = vmatpush.bf16.msrb.mxu1 %v7298_v17 }
 0x482   : > { %17484 = vst [vmem:[#allocation63_spill] sm:$0xff] %v14753_v6  ;;  %v7575_v24 = vpop.eup %7574  ;;  %v4942_v40 = vpack.c.bf16 %v4891_v28, %v4890_v21  ;;  %v4892_v14 = vmul.f32 %v14753_v6, %v14753_v6  ;;  %v4893_v0 = vmul.f32 %v14755_v29, %v14755_v29  ;;  %v4688_v28 = vpack.c.bf16 %v4554_v11, %v4505_v1  ;;  %v7297_v17 = vld [vmem:[#allocation10 + $0x58] sm:$0xff] }
 0x483   : > { %17485 = vst [vmem:[#allocation82_spill] sm:$0xff] %v14755_v29  ;;  %v4603_v34 = vadd.f32 %v4602_v7, %v14334_v54  ;;  %v5993_v33 = vunpack.c.h.bf16 %v14730_v18 }
 0x484   : > { %v4986_v4 = vunpack.c.l.bf16 %v4942_v40  ;;  %v4987_v21 = vunpack.c.h.bf16 %v4942_v40  ;;  %v4943_v9 = vpack.c.bf16 %v4893_v0, %v4892_v14  ;;  %v14779_v1 = vunpack.c.l.bf16 %v4688_v28 }
 0x485   : > { %v14773_v43 = vpop.eup %7576  ;;  %v14781_v7 = vunpack.c.h.bf16 %v4688_v28  ;;  %v4689_v18 = vpack.c.bf16 %v4652_v45, %v4603_v34  ;;  %6459 = vmatpush.bf16.msrb.mxu1 %v7297_v17 }
 0x486   : > { %v5050_v27 = vmul.f32 %v4986_v4, %v14738_v49  ;;  %v5051_v40 = vmul.f32 %v4987_v21, %v14740_v57  ;;  %17487 = vst [vmem:[#allocation74_spill] sm:$0xff] %v14779_v1  ;;  %v4989_v14 = vunpack.c.h.bf16 %v4943_v9  ;;  %v4894_v0 = vmul.f32 %v14779_v1, %v14779_v1 }
 0x487   : > { %v7579_v11 = vpop.eup %7578  ;;  %17488 = vst [vmem:[#allocation52_spill] sm:$0xff] %v14781_v7  ;;  %v14794_v8 = vunpack.c.l.bf16 %v4689_v18  ;;  %v14796_v45 = vunpack.c.h.bf16 %v4689_v18  ;;  %v14798_v21 = vpack.c.bf16 %v7575_v24, %v7573_v37  ;;  %v7313_v24 = vld [vmem:[#allocation10 + $0xd8] sm:$0xff] }
 0x488   : > { %v5102_v38 = vpack.c.bf16 %v5051_v40, %v5050_v27  ;;  %v5053_v4 = vmul.f32 %v4989_v14, %v14755_v29  ;;  %v7305_v27 = vld [vmem:[#allocation10 + $0x98] sm:$0xff]  ;;  %v4507_v40 = vpop.f32.mrf.mxu0  ;;  %v14804_v14 = vmul.f32 %v5993_v33, %v5929_v23  ;;  %6557 = vmatpush.bf16.msrb.mxu3 %v7313_v24 }
 0x489   : > { %v4897_v37 = vmul.f32 %v14796_v45, %v14796_v45  ;;  %v4508_v18 = vadd.f32 %v4507_v40, %v14297_v36  ;;  %6508 = vmatpush.bf16.msrb.mxu2 %v7305_v27  ;;  %v5770_v40 = vunpack.c.l.bf16 %v14798_v21 }
 0x48a   : > { %v5146_v34 = vunpack.c.l.bf16 %v5102_v38  ;;  %v5147_v39 = vunpack.c.h.bf16 %v5102_v38 }
 0x48b   : > { %v4059_v60 = vpop.xlane.xlu1 %4058 }
 0x48c   : > { %v4075_v48 = vmul.f32 %v4059_v60, %v17486_v44  ;;  %v4988_v60 = vunpack.c.l.bf16 %v4943_v9  ;;  %v14788_v44 = vmul.f32 %v5992_v63, %v5928_v52  ;;  %v4895_v9 = vmul.f32 %v14781_v7, %v14781_v7  ;;  %v7289_v63 = vld [vmem:[#allocation10 + $0x18] sm:$0xff] }
 0x48d   : > { %v4896_v52 = vmul.f32 %v14794_v8, %v14794_v8  ;;  %v5210_v22 = vmul.f32 0.044677734, %v5146_v34  ;;  %v5211_v38 = vmul.f32 0.044677734, %v5147_v39  ;;  %6410 = vmatpush.bf16.msrb.mxu0 %v7289_v63 }
 0x48e   : > { %v14775_v12 = vadd.f32 1e-06, %v4075_v48  ;;  %v5052_v48 = vmul.f32 %v4988_v60, %v14753_v6  ;;  %v4944_v19 = vpack.c.bf16 %v4895_v9, %v4894_v0  ;;  %v4556_v60 = vpop.f32.mrf.mxu1 }
 0x48f   : > { %v5262_v51 = vpack.c.bf16 %v5211_v38, %v5210_v22  ;;  %v4945_v16 = vpack.c.bf16 %v4897_v37, %v4896_v52  ;;  %v4557_v32 = vadd.f32 %v4556_v60, %v14299_v5  ;;  %v5736_v37 = vpack.c.bf16 %v7579_v11, %v14773_v43 }
 0x490   : > { %7580 = vrsqrt.f32 %v14775_v12  ;;  %v5103_v28 = vpack.c.bf16 %v5053_v4, %v5052_v48  ;;  %v4990_v4 = vunpack.c.l.bf16 %v4944_v19  ;;  %v4991_v9 = vunpack.c.h.bf16 %v4944_v19 }
 0x491   : > { %v5307_v3 = vunpack.c.h.bf16 %v5262_v51  ;;  %v4992_v17 = vunpack.c.l.bf16 %v4945_v16  ;;  %v4993_v27 = vunpack.c.h.bf16 %v4945_v16  ;;  %vm4248_vm1 = vweird.f32 %v14775_v12 }
 0x492   : > { %v5148_v0 = vunpack.c.l.bf16 %v5103_v28  ;;  %v5149_v48 = vunpack.c.h.bf16 %v5103_v28  ;;  %v5306_v28 = vunpack.c.l.bf16 %v5262_v51  ;;  %v5054_v19 = vmul.f32 %v4990_v4, %v14779_v1 }
 0x493   : > { %v5055_v63 = vmul.f32 %v4991_v9, %v14781_v7  ;;  %v4690_v38 = vpack.c.bf16 %v4557_v32, %v4508_v18  ;;  %v5056_v23 = vmul.f32 %v4992_v17, %v14794_v8  ;;  %v5057_v9 = vmul.f32 %v4993_v27, %v14796_v45  ;;  %v7288_v27 = vld [vmem:[#allocation10 + $0x10] sm:$0xff] }
 0x494   : > { %v5212_v34 = vmul.f32 0.044677734, %v5148_v0  ;;  %v5213_v39 = vmul.f32 0.044677734, %v5149_v48  ;;  %v5371_v16 = vadd.f32 %v5307_v3, %v14740_v57  ;;  %v5771_v3 = vunpack.c.h.bf16 %v14798_v21  ;;  %6411 = vmatpush.bf16.msrb.mxu0 %v7288_v27 }
 0x495   : > { %v5104_v60 = vpack.c.bf16 %v5055_v63, %v5054_v19  ;;  %v14823_v32 = vunpack.c.l.bf16 %v4690_v38  ;;  %v14834_v17 = vunpack.c.h.bf16 %v4690_v38 }
 0x496   : > { %v7581_v30 = vpop.eup %7580  ;;  %v5263_v52 = vpack.c.bf16 %v5213_v39, %v5212_v34  ;;  %v5370_v34 = vadd.f32 %v5306_v28, %v14738_v49  ;;  %v17491_v28 = vld [vmem:[#allocation57_spill] sm:$0xff] }
 0x497   : > { %v4243_v33 = vmul.f32 %v7581_v30, %v14775_v12  ;;  %vm4249_vm2 = vweird.f32 %v7581_v30  ;;  %v5150_v51 = vunpack.c.l.bf16 %v5104_v60  ;;  %v5151_v4 = vunpack.c.h.bf16 %v5104_v60  ;;  %v7296_v60 = vld [vmem:[#allocation10 + $0x50] sm:$0xff] }
 0x498   : > { %v5308_v0 = vunpack.c.l.bf16 %v5263_v52  ;;  %v5309_v48 = vunpack.c.h.bf16 %v5263_v52  ;;  %vm14827_vm3 = vmor %vm4248_vm1, %vm4249_vm2  ;;  %v4898_v38 = vmul.f32 %v14823_v32, %v14823_v32  ;;  %6460 = vmatpush.bf16.msrb.mxu1 %v7296_v60 }
 0x499   : > { %v4244_v22 = vmul.f32 %v7581_v30, %v4243_v33  ;;  %v5214_v43 = vmul.f32 0.044677734, %v5150_v51  ;;  %v5215_v11 = vmul.f32 0.044677734, %v5151_v4  ;;  %v5422_v51 = vpack.c.bf16 %v5371_v16, %v5370_v34  ;;  %v7312_v4 = vld [vmem:[#allocation10 + $0xd0] sm:$0xff] }
 0x49a   : > { %v5372_v39 = vadd.f32 %v5308_v0, %v14753_v6  ;;  %v5373_v18 = vadd.f32 %v5309_v48, %v14755_v29  ;;  %v5774_v0 = vunpack.c.l.bf16 %v5736_v37  ;;  %v5775_v48 = vunpack.c.h.bf16 %v5736_v37  ;;  %v4654_v37 = vpop.f32.mrf.mxu3  ;;  %6558 = vmatpush.bf16.msrb.mxu3 %v7312_v4  ;;  %v7303_v4 = vld [vmem:[#allocation10 + $0x88] sm:$0xff] }
 0x49b   : > { %v4245_v24 = vmul.f32 0.5, %v4244_v22  ;;  %v5105_v22 = vpack.c.bf16 %v5057_v9, %v5056_v23  ;;  %v5264_v52 = vpack.c.bf16 %v5215_v11, %v5214_v43  ;;  %v5834_v9 = vadd.f32 1.0, %v5770_v40  ;;  %v4605_v11 = vpop.f32.mrf.mxu2 }
 0x49c   : > { %v5835_v34 = vadd.f32 1.0, %v5771_v3  ;;  %v4899_v40 = vmul.f32 %v14834_v17, %v14834_v17  ;;  %v4606_v27 = vadd.f32 %v4605_v11, %v14334_v54  ;;  %v4655_v60 = vadd.f32 %v4654_v37, %v14336_v53  ;;  %v7311_v37 = vld [vmem:[#allocation10 + $0xc8] sm:$0xff] }
 0x49d   : > { %v4246_v33 = vsub.f32 1.5, %v4245_v24  ;;  %v7304_v24 = vld [vmem:[#allocation10 + $0x90] sm:$0xff]  ;;  %v5152_v43 = vunpack.c.l.bf16 %v5105_v22  ;;  %v5310_v29 = vunpack.c.l.bf16 %v5264_v52  ;;  %v5311_v63 = vunpack.c.h.bf16 %v5264_v52 }
 0x49e   : > { %6509 = vmatpush.bf16.msrb.mxu2 %v7304_v24  ;;  %v4946_v52 = vpack.c.bf16 %v4899_v40, %v4898_v38  ;;  %v14850_v6 = vpack.c.bf16 %v5835_v34, %v5834_v9  ;;  %6559 = vmatpush.bf16.msrb.mxu3 %v7311_v37  ;;  %v7302_v37 = vld [vmem:[#allocation10 + $0x80] sm:$0xff] }
 0x49f   : > { %v4247_v19 = vmul.f32 %v7581_v30, %v4246_v33  ;;  %v5423_v33 = vpack.c.bf16 %v5373_v18, %v5372_v39  ;;  %v5838_v39 = vadd.f32 1.0, %v5774_v0  ;;  %v5839_v18 = vadd.f32 1.0, %v5775_v48  ;;  %v7287_v48 = vld [vmem:[#allocation10 + $0x8] sm:$0xff] }
 0x4a0   : > { %v5374_v3 = vadd.f32 %v5310_v29, %v14779_v1  ;;  %v4691_v0 = vpack.c.bf16 %v4655_v60, %v4606_v27  ;;  %v4995_v11 = vunpack.c.h.bf16 %v4946_v52  ;;  %6412 = vmatpush.bf16.msrb.mxu0 %v7287_v48 }
 0x4a1   : > { %v4251_v12 = vsel %vm14827_vm3, %v7581_v30, %v4247_v19  ;;  %v5153_v30 = vunpack.c.h.bf16 %v5105_v22  ;;  %v5466_v19 = vunpack.c.l.bf16 %v5422_v51  ;;  %v5469_v23 = vunpack.c.h.bf16 %v5423_v33 }
 0x4a2   : > { %v4267_v21 = vmul.f32 %v4251_v12, %v17491_v28  ;;  %v5467_v28 = vunpack.c.h.bf16 %v5422_v51  ;;  %v5468_v12 = vunpack.c.l.bf16 %v5423_v33  ;;  %v5216_v22 = vmul.f32 0.044677734, %v5152_v43  ;;  %v7295_v51 = vld [vmem:[#allocation10 + $0x48] sm:$0xff]  ;;  %6510 = vmatpush.bf16.msrb.mxu2 %v7303_v4 }
 0x4a3   : > { %v5217_v24 = vmul.f32 0.044677734, %v5153_v30  ;;  %v14852_v33 = vpack.c.bf16 %v5839_v18, %v5838_v39  ;;  %v5530_v43 = vmul.f32 0.796875, %v5466_v19  ;;  %v14854_v40 = vunpack.c.l.bf16 %v4691_v0  ;;  %6461 = vmatpush.bf16.msrb.mxu1 %v7295_v51  ;;  %v4558_v30 = vpop.f32.mrf.mxu1 }
 0x4a4   : > { %v4275_v16 = vpack.c.bf16 %v4267_v21, %v14666_v25  ;;  %v5375_v25 = vadd.f32 %v5311_v63, %v14781_v7  ;;  %v4994_v21 = vunpack.c.l.bf16 %v4946_v52  ;;  %v5531_v38 = vmul.f32 0.796875, %v5467_v28  ;;  %v4509_v63 = vpop.f32.mrf.mxu0 }
 0x4a5   : > { %v14856_v29 = vunpack.c.h.bf16 %v4691_v0  ;;  %v5533_v27 = vmul.f32 0.796875, %v5469_v23  ;;  %v5059_v52 = vmul.f32 %v4995_v11, %v14834_v17  ;;  %v5265_v34 = vpack.c.bf16 %v5217_v24, %v5216_v22  ;;  %v7294_v11 = vld [vmem:[#allocation10 + $0x40] sm:$0xff] }
 0x4a6   : > { %4521 = vmatmul.bf16.gmra.mxu0 %v4275_v16  ;;  %4570 = vmatmul.bf16.gmra.mxu1 %v4275_v16  ;;  %v5058_v60 = vmul.f32 %v4994_v21, %v14823_v32  ;;  %v14860_v9 = vpack.c.bf16 %v5375_v25, %v5374_v3  ;;  %v4900_v39 = vmul.f32 %v14854_v40, %v14854_v40  ;;  %v7286_v21 = vld [vmem:[#allocation10] sm:$0xff] }
 0x4a7   : > { %4619 = vmatmul.bf16.gmra.mxu2 %v4275_v16  ;;  %4668 = vmatmul.bf16.gmra.mxu3 %v4275_v16  ;;  %17492 = vst [vmem:[#allocation48_spill] sm:$0xff] %v14856_v29  ;;  %v5532_v16 = vmul.f32 0.796875, %v5468_v12  ;;  %v4901_v18 = vmul.f32 %v14856_v29, %v14856_v29  ;;  %v4510_v28 = vadd.f32 %v4509_v63, %v14297_v36  ;;  %v5994_v12 = vunpack.c.l.bf16 %v14850_v6 }
 0x4a8   : > { %v5106_v19 = vpack.c.bf16 %v5059_v52, %v5058_v60  ;;  %v4559_v23 = vadd.f32 %v4558_v30, %v14299_v5  ;;  %v14869_v0 = vpack.c.bf16 %v5531_v38, %v5530_v43  ;;  %v5470_v63 = vunpack.c.l.bf16 %v14860_v9  ;;  %v7310_v43 = vld [vmem:[#allocation10 + $0xc0] sm:$0xff]  ;;  %v4607_v38 = vpop.f32.mrf.mxu2  ;;  %6413 = vmatpush.bf16.msrb.mxu0 %v7286_v21  ;;  %6462 = vmatpush.bf16.msrb.mxu1 %v7294_v11 }
 0x4a9   : > { %v4947_v48 = vpack.c.bf16 %v4901_v18, %v4900_v39  ;;  %v14873_v25 = vpack.c.bf16 %v5533_v27, %v5532_v16  ;;  %v5312_v30 = vunpack.c.l.bf16 %v5265_v34  ;;  %v4656_v16 = vpop.f32.mrf.mxu3  ;;  %v5313_v27 = vunpack.c.h.bf16 %v5265_v34  ;;  %6511 = vmatpush.bf16.msrb.mxu2 %v7302_v37  ;;  %6560 = vmatpush.bf16.msrb.mxu3 %v7310_v43 }
 0x4aa   : > { %17493 = vst [vmem:[#allocation41_spill] sm:$0xff] %v14869_v0  ;;  %v5154_v24 = vunpack.c.l.bf16 %v5106_v19  ;;  %v5155_v51 = vunpack.c.h.bf16 %v5106_v19  ;;  %v4692_v4 = vpack.c.bf16 %v4559_v23, %v4510_v28  ;;  %v17495_v23 = vunpack.c.l.bf16 %v14712_v13 }
 0x4ab   : > { %17494 = vst [vmem:[#allocation32_spill] sm:$0xff] %v14873_v25  ;;  %v4996_v60 = vunpack.c.l.bf16 %v4947_v48  ;;  %v4997_v52 = vunpack.c.h.bf16 %v4947_v48  ;;  %v4608_v21 = vadd.f32 %v4607_v38, %v14334_v54  ;;  %v5471_v34 = vunpack.c.h.bf16 %v14860_v9 }
 0x4ac   : > { %v5218_v39 = vmul.f32 0.044677734, %v5154_v24  ;;  %v5219_v18 = vmul.f32 0.044677734, %v5155_v51  ;;  %v14876_v3 = vunpack.c.l.bf16 %v4692_v4  ;;  %v14878_v22 = vunpack.c.h.bf16 %v4692_v4  ;;  %v4512_v7 = vpop.f32.mrf.mxu0 }
 0x4ad   : > { %v5060_v19 = vmul.f32 %v4996_v60, %v14854_v40  ;;  %v5061_v28 = vmul.f32 %v4997_v52, %v14856_v29  ;;  %v14884_v48 = vmul.f32 %v5994_v12, %v17495_v23  ;;  %v5534_v11 = vmul.f32 0.796875, %v5470_v63 }
 0x4ae   : > { %v5266_v24 = vpack.c.bf16 %v5219_v18, %v5218_v39  ;;  %v4902_v51 = vmul.f32 %v14876_v3, %v14876_v3  ;;  %v4903_v4 = vmul.f32 %v14878_v22, %v14878_v22  ;;  %v4657_v37 = vadd.f32 %v4656_v16, %v14336_v53 }
 0x4af   : > { %v5107_v60 = vpack.c.bf16 %v5061_v28, %v5060_v19  ;;  %v5376_v52 = vadd.f32 %v5312_v30, %v14794_v8  ;;  %v5377_v39 = vadd.f32 %v5313_v27, %v14796_v45  ;;  %v17496_v16 = vpack.c.bf16 %v14699_v56, %v14707_v62  ;;  %v4561_v19 = vpop.f32.mrf.mxu1 }
 0x4b0   : > { %v5314_v43 = vunpack.c.l.bf16 %v5266_v24  ;;  %v5315_v12 = vunpack.c.h.bf16 %v5266_v24  ;;  %v4948_v23 = vpack.c.bf16 %v4903_v4, %v4902_v51  ;;  %v4693_v0 = vpack.c.bf16 %v4657_v37, %v4608_v21 }
 0x4b1   : > { %v5156_v18 = vunpack.c.l.bf16 %v5107_v60  ;;  %v5157_v25 = vunpack.c.h.bf16 %v5107_v60  ;;  %v17497_v30 = vpack.c.bf16 %v14709_v41, %v14719_v10  ;;  %v17498_v24 = vpack.c.bf16 %v14788_v44, %v14732_v20 }
 0x4b2   : > { %v5378_v1 = vadd.f32 %v5314_v43, %v14823_v32  ;;  %v5379_v38 = vadd.f32 %v5315_v12, %v14834_v17  ;;  %v4998_v9 = vunpack.c.l.bf16 %v4948_v23  ;;  %v4999_v63 = vunpack.c.h.bf16 %v4948_v23 }
 0x4b3   : > { %v5220_v27 = vmul.f32 0.044677734, %v5156_v18  ;;  %v5221_v28 = vmul.f32 0.044677734, %v5157_v25  ;;  %v17499_v51 = vpack.c.bf16 %v14804_v14, %v14742_v55  ;;  %v14909_v4 = vunpack.c.l.bf16 %v4693_v0 }
 0x4b4   : > { %v14911_v21 = vunpack.c.h.bf16 %v4693_v0  ;;  %v5535_v56 = vmul.f32 0.796875, %v5471_v34  ;;  %v5062_v62 = vmul.f32 %v4998_v9, %v14876_v3  ;;  %v5063_v41 = vmul.f32 %v4999_v63, %v14878_v22 }
 0x4b5   : > { %v4513_v10 = vadd.f32 %v4512_v7, %v14297_v36  ;;  %v5267_v25 = vpack.c.bf16 %v5221_v28, %v5220_v27  ;;  %v4904_v20 = vmul.f32 %v14909_v4, %v14909_v4  ;;  %v4562_v55 = vadd.f32 %v4561_v19, %v14299_v5 }
 0x4b6   : > { %6414 = vmatmul.bf16.vlgmr.msrb.gmra.mxu0 %v17496_v16  ;;  %6463 = vmatmul.bf16.vlgmr.msrb.gmra.mxu1 %v17497_v30  ;;  %v4905_v44 = vmul.f32 %v14911_v21, %v14911_v21  ;;  %v5425_v14 = vpack.c.bf16 %v5377_v39, %v5376_v52  ;;  %v5108_v60 = vpack.c.bf16 %v5063_v41, %v5062_v62  ;;  %v17500_v0 = vunpack.c.l.bf16 %v14721_v42 }
 0x4b7   : > { %6512 = vmatmul.bf16.vlgmr.msrb.gmra.mxu2 %v17498_v24  ;;  %6561 = vmatmul.bf16.vlgmr.msrb.gmra.mxu3 %v17499_v51  ;;  %v17501_v34 = vunpack.c.l.bf16 %v14852_v33  ;;  %v5999_v43 = vunpack.c.h.bf16 %v14852_v33  ;;  %v5426_v12 = vpack.c.bf16 %v5379_v38, %v5378_v1  ;;  %v4694_v23 = vpack.c.bf16 %v4562_v55, %v4513_v10  ;;  %v4659_v10 = vpop.f32.mrf.mxu3 }
 0x4b8   : > { %v4949_v7 = vpack.c.bf16 %v4905_v44, %v4904_v20  ;;  %v14927_v9 = vpack.c.bf16 %v5535_v56, %v5534_v11  ;;  %v5158_v63 = vunpack.c.l.bf16 %v5108_v60  ;;  %v5159_v16 = vunpack.c.h.bf16 %v5108_v60 }
 0x4b9   : > { %v6062_v37 = vmul.f32 %v17501_v34, %v17500_v0  ;;  %v17502_v30 = vunpack.c.h.bf16 %v14712_v13  ;;  %v17503_v52 = vunpack.c.h.bf16 %v14850_v6  ;;  %v5316_v19 = vunpack.c.l.bf16 %v5267_v25  ;;  %v4610_v6 = vpop.f32.mrf.mxu2 }
 0x4ba   : > { %v5317_v27 = vunpack.c.h.bf16 %v5267_v25  ;;  %v5000_v28 = vunpack.c.l.bf16 %v4949_v7  ;;  %v5001_v24 = vunpack.c.h.bf16 %v4949_v7  ;;  %v5472_v51 = vunpack.c.l.bf16 %v5425_v14 }
 0x4bb   : > { %v6059_v39 = vmul.f32 %v17503_v52, %v17502_v30  ;;  %v5473_v33 = vunpack.c.h.bf16 %v5425_v14  ;;  %v14933_v1 = vunpack.c.l.bf16 %v4694_v23  ;;  %v17505_v38 = vunpack.c.h.bf16 %v14721_v42 }
 0x4bc   : > { %v5474_v11 = vunpack.c.l.bf16 %v5426_v12  ;;  %v5064_v56 = vmul.f32 %v5000_v28, %v14909_v4  ;;  %v5065_v41 = vmul.f32 %v5001_v24, %v14911_v21  ;;  %v14939_v13 = vunpack.c.h.bf16 %v4694_v23 }
 0x4bd   : > { %17504 = vst [vmem:[#allocation127_spill] sm:$0xff] %v14933_v1  ;;  %v6063_v62 = vmul.f32 %v5999_v43, %v17505_v38  ;;  %v5475_v20 = vunpack.c.h.bf16 %v5426_v12  ;;  %v5222_v25 = vmul.f32 0.044677734, %v5158_v63  ;;  %v5223_v44 = vmul.f32 0.044677734, %v5159_v16 }
 0x4be   : > { %17506 = vst [vmem:[#allocation33_spill] sm:$0xff] %v14939_v13  ;;  %v4906_v55 = vmul.f32 %v14933_v1, %v14933_v1  ;;  %v5380_v14 = vadd.f32 %v5316_v19, %v14854_v40  ;;  %v5381_v42 = vadd.f32 %v5317_v27, %v14856_v29  ;;  %v5109_v60 = vpack.c.bf16 %v5065_v41, %v5064_v56 }
 0x4bf   : > { %v4907_v0 = vmul.f32 %v14939_v13, %v14939_v13  ;;  %v5536_v34 = vmul.f32 0.796875, %v5472_v51  ;;  %v4611_v43 = vadd.f32 %v4610_v6, %v14334_v54  ;;  %v4660_v7 = vadd.f32 %v4659_v10, %v14336_v53 }
 0x4c0   : > { %v6118_v12 = vpack.c.bf16 %v6062_v37, %v14884_v48  ;;  %v5538_v23 = vmul.f32 0.796875, %v5474_v11  ;;  %v5160_v63 = vunpack.c.l.bf16 %v5109_v60  ;;  %v5161_v16 = vunpack.c.h.bf16 %v5109_v60 }
 0x4c1   : > { %v6119_v30 = vpack.c.bf16 %v6063_v62, %v6059_v39  ;;  %v5539_v52 = vmul.f32 0.796875, %v5475_v20  ;;  %v5268_v28 = vpack.c.bf16 %v5223_v44, %v5222_v25  ;;  %v4950_v19 = vpack.c.bf16 %v4907_v0, %v4906_v55  ;;  %v4514_v39 = vpop.f32.mrf.mxu0  ;;  %v4563_v44 = vpop.f32.mrf.mxu1 }
 0x4c2   : > { %v4695_v24 = vpack.c.bf16 %v4660_v7, %v4611_v43  ;;  %v5537_v27 = vmul.f32 0.796875, %v5473_v33  ;;  %v5427_v38 = vpack.c.bf16 %v5381_v42, %v5380_v14  ;;  %v5224_v56 = vmul.f32 0.044677734, %v5160_v63 }
 0x4c3   : > { %v5225_v41 = vmul.f32 0.044677734, %v5161_v16  ;;  %v5002_v18 = vunpack.c.l.bf16 %v4950_v19  ;;  %v5003_v51 = vunpack.c.h.bf16 %v4950_v19  ;;  %v17508_v48 = vunpack.c.l.bf16 %v14658_v15 }
 0x4c4   : > { %v14950_v29 = vunpack.c.l.bf16 %v4695_v24  ;;  %v14954_v11 = vunpack.c.h.bf16 %v4695_v24  ;;  %v5617_v62 = vunpack.c.h.bf16 %v14662_v35  ;;  %v17510_v33 = vunpack.c.h.bf16 %v14658_v15 }
 0x4c5   : > { %7582 = vtanh.f32 %v17508_v48  ;;  %v5269_v37 = vpack.c.bf16 %v5225_v41, %v5224_v56  ;;  %v14959_v6 = vpack.c.bf16 %v5539_v52, %v5538_v23  ;;  %v5318_v10 = vunpack.c.l.bf16 %v5268_v28 }
 0x4c6   : > { %17507 = vst [vmem:[#allocation70_spill] sm:$0xff] %v14950_v29  ;;  %6419 = vmatmul.bf16.gmra.mxu0 %v6118_v12  ;;  %6468 = vmatmul.bf16.gmra.mxu1 %v6119_v30  ;;  %7584 = vtanh.f32 %v17510_v33  ;;  %v5066_v20 = vmul.f32 %v5002_v18, %v14933_v1  ;;  %v5067_v25 = vmul.f32 %v5003_v51, %v14939_v13  ;;  %v5476_v55 = vunpack.c.l.bf16 %v5427_v38 }
 0x4c7   : > { %17509 = vst [vmem:[#allocation59_spill] sm:$0xff] %v14954_v11  ;;  %v5319_v14 = vunpack.c.h.bf16 %v5268_v28  ;;  %v4908_v42 = vmul.f32 %v14950_v29, %v14950_v29  ;;  %v4909_v60 = vmul.f32 %v14954_v11, %v14954_v11  ;;  %v5477_v0 = vunpack.c.h.bf16 %v5427_v38 }
 0x4c8   : > { %v5110_v43 = vpack.c.bf16 %v5067_v25, %v5066_v20  ;;  %v4515_v15 = vadd.f32 %v4514_v39, %v14297_v36  ;;  %v17511_v7 = vunpack.c.l.bf16 %v14662_v35  ;;  %v5320_v12 = vunpack.c.l.bf16 %v5269_v37 }
 0x4c9   : > { %v5321_v18 = vunpack.c.h.bf16 %v5269_v37  ;;  %v4951_v23 = vpack.c.bf16 %v4909_v60, %v4908_v42  ;;  %v4564_v63 = vadd.f32 %v4563_v44, %v14299_v5  ;;  %v5382_v30 = vadd.f32 %v5318_v10, %v14876_v3 }
 0x4ca   : > { %7586 = vtanh.f32 %v17511_v7  ;;  %v5162_v52 = vunpack.c.l.bf16 %v5110_v43  ;;  %v5163_v28 = vunpack.c.h.bf16 %v5110_v43  ;;  %v5383_v24 = vadd.f32 %v5319_v14, %v14878_v22 }
 0x4cb   : > { %v7583_v16 = vpop.eup %7582  ;;  %7588 = vtanh.f32 %v5617_v62  ;;  %v5004_v38 = vunpack.c.l.bf16 %v4951_v23  ;;  %v5005_v56 = vunpack.c.h.bf16 %v4951_v23  ;;  %v4696_v41 = vpack.c.bf16 %v4564_v63, %v4515_v15 }
 0x4cc   : > { %v7585_v19 = vpop.eup %7584  ;;  %v14973_v51 = vpack.c.bf16 %v5537_v27, %v5536_v34  ;;  %v5226_v48 = vmul.f32 0.044677734, %v5162_v52  ;;  %v5227_v37 = vmul.f32 0.044677734, %v5163_v28  ;;  %v5384_v39 = vadd.f32 %v5320_v12, %v14909_v4 }
 0x4cd   : > { %v5385_v33 = vadd.f32 %v5321_v18, %v14911_v21  ;;  %v5068_v10 = vmul.f32 %v5004_v38, %v14950_v29  ;;  %v5069_v62 = vmul.f32 %v5005_v56, %v14954_v11  ;;  %v14980_v44 = vunpack.c.l.bf16 %v4696_v41 }
 0x4ce   : > { %v5270_v25 = vpack.c.bf16 %v5227_v37, %v5226_v48  ;;  %v14982_v14 = vunpack.c.h.bf16 %v4696_v41  ;;  %v5735_v34 = vpack.c.bf16 %v7585_v19, %v7583_v16  ;;  %v5540_v27 = vmul.f32 0.796875, %v5476_v55 }
 0x4cf   : > { %v5541_v42 = vmul.f32 0.796875, %v5477_v0  ;;  %v5428_v60 = vpack.c.bf16 %v5383_v24, %v5382_v30  ;;  %v5111_v43 = vpack.c.bf16 %v5069_v62, %v5068_v10  ;;  %v4910_v18 = vmul.f32 %v14980_v44, %v14980_v44 }
 0x4d0   : > { %v7587_v20 = vpop.eup %7586  ;;  %v5322_v7 = vunpack.c.l.bf16 %v5270_v25  ;;  %v5323_v12 = vunpack.c.h.bf16 %v5270_v25  ;;  %v4911_v23 = vmul.f32 %v14982_v14, %v14982_v14  ;;  %v5429_v63 = vpack.c.bf16 %v5385_v33, %v5384_v39 }
 0x4d1   : > { %v7589_v15 = vpop.eup %7588  ;;  %v5164_v52 = vunpack.c.l.bf16 %v5111_v43  ;;  %v5165_v28 = vunpack.c.h.bf16 %v5111_v43  ;;  %v5772_v16 = vunpack.c.l.bf16 %v5735_v34  ;;  %v5478_v30 = vunpack.c.l.bf16 %v5428_v60 }
 0x4d2   : > { %v5737_v38 = vpack.c.bf16 %v7589_v15, %v7587_v20  ;;  %v5386_v56 = vadd.f32 %v5322_v7, %v14933_v1  ;;  %v5387_v55 = vadd.f32 %v5323_v12, %v14939_v13  ;;  %v4952_v0 = vpack.c.bf16 %v4911_v23, %v4910_v18 }
 0x4d3   : > { %v5479_v19 = vunpack.c.h.bf16 %v5428_v60  ;;  %v5228_v24 = vmul.f32 0.044677734, %v5164_v52  ;;  %v5229_v41 = vmul.f32 0.044677734, %v5165_v28  ;;  %v5773_v62 = vunpack.c.h.bf16 %v5735_v34 }
 0x4d4   : > { %v5430_v48 = vpack.c.bf16 %v5387_v55, %v5386_v56  ;;  %v5006_v37 = vunpack.c.l.bf16 %v4952_v0  ;;  %v5007_v10 = vunpack.c.h.bf16 %v4952_v0  ;;  %v5776_v35 = vunpack.c.l.bf16 %v5737_v38 }
 0x4d5   : > { %v5271_v25 = vpack.c.bf16 %v5229_v41, %v5228_v24  ;;  %v5777_v39 = vunpack.c.h.bf16 %v5737_v38  ;;  %v5836_v33 = vadd.f32 1.0, %v5772_v16  ;;  %v5480_v43 = vunpack.c.l.bf16 %v5429_v63 }
 0x4d6   : > { %v5481_v20 = vunpack.c.h.bf16 %v5429_v63  ;;  %v5070_v15 = vmul.f32 %v5006_v37, %v14980_v44  ;;  %v5071_v7 = vmul.f32 %v5007_v10, %v14982_v14  ;;  %v5837_v23 = vadd.f32 1.0, %v5773_v62 }
 0x4d7   : > { %v5324_v12 = vunpack.c.l.bf16 %v5271_v25  ;;  %v5325_v18 = vunpack.c.h.bf16 %v5271_v25  ;;  %v5840_v60 = vadd.f32 1.0, %v5776_v35  ;;  %v14992_v52 = vpack.c.bf16 %v5541_v42, %v5540_v27  ;;  %v4612_v35 = vpop.f32.mrf.mxu2 }
 0x4d8   : > { %v5482_v28 = vunpack.c.l.bf16 %v5430_v48  ;;  %v5112_v56 = vpack.c.bf16 %v5071_v7, %v5070_v15  ;;  %v5841_v55 = vadd.f32 1.0, %v5777_v39  ;;  %v5542_v34 = vmul.f32 0.796875, %v5478_v30  ;;  %v4661_v30 = vpop.f32.mrf.mxu3 }
 0x4d9   : > { %v5543_v0 = vmul.f32 0.796875, %v5479_v19  ;;  %v5483_v24 = vunpack.c.h.bf16 %v5430_v48  ;;  %v5895_v38 = vpack.c.bf16 %v5837_v23, %v5836_v33  ;;  %v5544_v16 = vmul.f32 0.796875, %v5480_v43 }
 0x4da   : > { %v5166_v41 = vunpack.c.l.bf16 %v5112_v56  ;;  %v5167_v63 = vunpack.c.h.bf16 %v5112_v56  ;;  %v5897_v13 = vpack.c.bf16 %v5841_v55, %v5840_v60  ;;  %v5545_v37 = vmul.f32 0.796875, %v5481_v20 }
 0x4db   : > { %v5388_v10 = vadd.f32 %v5324_v12, %v14950_v29  ;;  %v5389_v25 = vadd.f32 %v5325_v18, %v14954_v11  ;;  %v5996_v62 = vunpack.c.l.bf16 %v5895_v38  ;;  %v5546_v27 = vmul.f32 0.796875, %v5482_v28 }
 0x4dc   : > { %v5230_v42 = vmul.f32 0.044677734, %v5166_v41  ;;  %v5231_v1 = vmul.f32 0.044677734, %v5167_v63  ;;  %v5932_v39 = vunpack.c.l.bf16 %v14765_v50  ;;  %v5547_v19 = vmul.f32 0.796875, %v5483_v24 }
 0x4dd   : > { %v5936_v48 = vunpack.c.l.bf16 %v14767_v31  ;;  %v6000_v33 = vunpack.c.l.bf16 %v5897_v13  ;;  %v5933_v43 = vunpack.c.h.bf16 %v14765_v50  ;;  %v5937_v20 = vunpack.c.h.bf16 %v14767_v31 }
 0x4de   : > { %v5997_v15 = vunpack.c.h.bf16 %v5895_v38  ;;  %v6001_v7 = vunpack.c.h.bf16 %v5897_v13  ;;  %v4613_v12 = vadd.f32 %v4612_v35, %v14334_v54  ;;  %v5431_v18 = vpack.c.bf16 %v5389_v25, %v5388_v10  ;;  %v4517_v38 = vpop.f32.mrf.mxu0  ;;  %v4566_v13 = vpop.f32.mrf.mxu1 }
 0x4df   : > { %v6060_v23 = vmul.f32 %v5996_v62, %v5932_v39  ;;  %v6064_v60 = vmul.f32 %v6000_v33, %v5936_v48  ;;  %v4662_v28 = vadd.f32 %v4661_v30, %v14336_v53  ;;  %v15002_v56 = vpack.c.bf16 %v5543_v0, %v5542_v34 }
 0x4e0   : > { %v5272_v55 = vpack.c.bf16 %v5231_v1, %v5230_v42  ;;  %v6061_v24 = vmul.f32 %v5997_v15, %v5933_v43  ;;  %v6065_v41 = vmul.f32 %v6001_v7, %v5937_v20  ;;  %v15006_v29 = vpack.c.bf16 %v5545_v37, %v5544_v16  ;;  %v4615_v15 = vpop.f32.mrf.mxu2  ;;  %v4664_v7 = vpop.f32.mrf.mxu3 }
 0x4e1   : > { %v6120_v11 = vpack.c.bf16 %v6064_v60, %v6060_v23  ;;  %v4697_v31 = vpack.c.bf16 %v4662_v28, %v4613_v12  ;;  %v15008_v10 = vpack.c.bf16 %v5547_v19, %v5546_v27  ;;  %v4518_v62 = vadd.f32 %v4517_v38, %v14297_v36 }
 0x4e2   : > { %v6121_v25 = vpack.c.bf16 %v6065_v41, %v6061_v24  ;;  %v5484_v1 = vunpack.c.l.bf16 %v5431_v18  ;;  %v5326_v39 = vunpack.c.l.bf16 %v5272_v55  ;;  %v5327_v30 = vunpack.c.h.bf16 %v5272_v55 }
 0x4e3   : > { %17512 = vst [vmem:[#allocation88_spill] sm:$0xff] %v15008_v10  ;;  %6517 = vmatmul.bf16.gmra.mxu2 %v6120_v11  ;;  %v15012_v0 = vunpack.c.l.bf16 %v4697_v31  ;;  %v15014_v35 = vunpack.c.h.bf16 %v4697_v31  ;;  %v4567_v16 = vadd.f32 %v4566_v13, %v14299_v5  ;;  %v5485_v27 = vunpack.c.h.bf16 %v5431_v18 }
 0x4e4   : > { %6566 = vmatmul.bf16.gmra.mxu3 %v6121_v25  ;;  %v15026_v12 = vmul.f32 0.796875, %v5484_v1  ;;  %v4616_v18 = vadd.f32 %v4615_v15, %v14334_v54  ;;  %v4665_v60 = vadd.f32 %v4664_v7, %v14336_v53  ;;  %v5390_v28 = vadd.f32 %v5326_v39, %v14980_v44 }
 0x4e5   : > { %17513 = vst [vmem:[#allocation38_spill] sm:$0xff] %v15012_v0  ;;  %v4912_v19 = vmul.f32 %v15012_v0, %v15012_v0  ;;  %v4913_v11 = vmul.f32 %v15014_v35, %v15014_v35  ;;  %v4698_v20 = vpack.c.bf16 %v4567_v16, %v4518_v62  ;;  %v5391_v55 = vadd.f32 %v5327_v30, %v14982_v14 }
 0x4e6   : > { %17514 = vst [vmem:[#allocation68_spill] sm:$0xff] %v15014_v35  ;;  %v5549_v31 = vmul.f32 0.796875, %v5485_v27  ;;  %v4699_v25 = vpack.c.bf16 %v4665_v60, %v4616_v18  ;;  %v4519_v62 = vpop.f32.mrf.mxu0  ;;  %v4568_v1 = vpop.f32.mrf.mxu1  ;;  %v5618_v30 = vunpack.c.l.bf16 %v14685_v58  ;;  %v5619_v60 = vunpack.c.h.bf16 %v14685_v58 }
 0x4e7   : > { %v4953_v23 = vpack.c.bf16 %v4913_v11, %v4912_v19  ;;  %v15032_v24 = vunpack.c.l.bf16 %v4698_v20  ;;  %v15034_v41 = vunpack.c.h.bf16 %v4698_v20  ;;  %v4520_v39 = vadd.f32 %v4519_v62, %v14297_v36 }
 0x4e8   : > { %v15044_v27 = vunpack.c.l.bf16 %v4699_v25  ;;  %v15046_v15 = vunpack.c.h.bf16 %v4699_v25  ;;  %v15048_v7 = vpack.c.bf16 %v5391_v55, %v5390_v28  ;;  %v4569_v18 = vadd.f32 %v4568_v1, %v14299_v5 }
 0x4e9   : > { %17515 = vst [vmem:[#allocation72_spill] sm:$0xff] %v15034_v41  ;;  %v5008_v38 = vunpack.c.l.bf16 %v4953_v23  ;;  %v5009_v13 = vunpack.c.h.bf16 %v4953_v23  ;;  %v4914_v16 = vmul.f32 %v15032_v24, %v15032_v24  ;;  %v4915_v19 = vmul.f32 %v15034_v41, %v15034_v41 }
 0x4ea   : > { %17516 = vst [vmem:[#allocation79_spill] sm:$0xff] %v15044_v27  ;;  %v4916_v62 = vmul.f32 %v15044_v27, %v15044_v27  ;;  %v4700_v25 = vpack.c.bf16 %v4569_v18, %v4520_v39  ;;  %v5623_v28 = vunpack.c.h.bf16 %v14691_v26  ;;  %7590 = vtanh.f32 %v5618_v30 }
 0x4eb   : > { %v5072_v11 = vmul.f32 %v5008_v38, %v15012_v0  ;;  %v5073_v20 = vmul.f32 %v5009_v13, %v15014_v35  ;;  %17517 = vst [vmem:[#allocation91_spill] sm:$0xff] %v15046_v15  ;;  %v4954_v23 = vpack.c.bf16 %v4915_v19, %v4914_v16  ;;  %v4917_v38 = vmul.f32 %v15046_v15, %v15046_v15 }
 0x4ec   : > { %v5622_v13 = vunpack.c.l.bf16 %v14691_v26  ;;  %7592 = vtanh.f32 %v5619_v60 }
 0x4ed   : > { %v5113_v43 = vpack.c.bf16 %v5073_v20, %v5072_v11  ;;  %v5010_v33 = vunpack.c.l.bf16 %v4954_v23  ;;  %v5011_v48 = vunpack.c.h.bf16 %v4954_v23  ;;  %v4955_v19 = vpack.c.bf16 %v4917_v38, %v4916_v62 }
 0x4ee   : > { %v15060_v11 = vunpack.c.l.bf16 %v4700_v25  ;;  %v15062_v20 = vunpack.c.h.bf16 %v4700_v25  ;;  %7594 = vtanh.f32 %v5622_v13 }
 0x4ef   : > { %v5168_v55 = vunpack.c.l.bf16 %v5113_v43  ;;  %v5169_v16 = vunpack.c.h.bf16 %v5113_v43  ;;  %v5074_v58 = vmul.f32 %v5010_v33, %v15032_v24  ;;  %v5075_v1 = vmul.f32 %v5011_v48, %v15034_v41 }
 0x4f0   : > { %17518 = vst [vmem:[#allocation77_spill] sm:$0xff] %v15060_v11  ;;  %v5012_v37 = vunpack.c.l.bf16 %v4955_v19  ;;  %v5013_v42 = vunpack.c.h.bf16 %v4955_v19  ;;  %v4918_v26 = vmul.f32 %v15060_v11, %v15060_v11  ;;  %v4919_v43 = vmul.f32 %v15062_v20, %v15062_v20  ;;  %v7591_v38 = vpop.eup %7590 }
 0x4f1   : > { %17519 = vst [vmem:[#allocation99_spill] sm:$0xff] %v15062_v20  ;;  %v5232_v34 = vmul.f32 0.044677734, %v5168_v55  ;;  %v5233_v50 = vmul.f32 0.044677734, %v5169_v16  ;;  %v5114_v23 = vpack.c.bf16 %v5075_v1, %v5074_v58  ;;  %7596 = vtanh.f32 %v5623_v28 }
 0x4f2   : > { %v5076_v33 = vmul.f32 %v5012_v37, %v15044_v27  ;;  %v5077_v48 = vmul.f32 %v5013_v42, %v15046_v15  ;;  %v4956_v62 = vpack.c.bf16 %v4919_v43, %v4918_v26  ;;  %v4786_v37 = vmul.f32 0.5, %v14543_v61  ;;  %v7593_v13 = vpop.eup %7592 }
 0x4f3   : > { %v5273_v39 = vpack.c.bf16 %v5233_v50, %v5232_v34  ;;  %v5170_v30 = vunpack.c.l.bf16 %v5114_v23  ;;  %v5171_v18 = vunpack.c.h.bf16 %v5114_v23  ;;  %v15072_v50 = vpack.c.bf16 %v5549_v31, %v15026_v12 }
 0x4f4   : > { %v5115_v19 = vpack.c.bf16 %v5077_v48, %v5076_v33  ;;  %v5014_v63 = vunpack.c.l.bf16 %v4956_v62  ;;  %v5015_v60 = vunpack.c.h.bf16 %v4956_v62  ;;  %v5486_v28 = vunpack.c.l.bf16 %v15048_v7 }
 0x4f5   : > { %v5328_v55 = vunpack.c.l.bf16 %v5273_v39  ;;  %v5329_v16 = vunpack.c.h.bf16 %v5273_v39  ;;  %v5234_v58 = vmul.f32 0.044677734, %v5170_v30  ;;  %v5235_v1 = vmul.f32 0.044677734, %v5171_v18  ;;  %v7595_v39 = vpop.eup %7594 }
 0x4f6   : > { %v5172_v34 = vunpack.c.l.bf16 %v5115_v19  ;;  %v5173_v42 = vunpack.c.h.bf16 %v5115_v19  ;;  %v5078_v26 = vmul.f32 %v5014_v63, %v15060_v11  ;;  %v5079_v43 = vmul.f32 %v5015_v60, %v15062_v20 }
 0x4f7   : > { %v5274_v23 = vpack.c.bf16 %v5235_v1, %v5234_v58  ;;  %v5392_v33 = vadd.f32 %v5328_v55, %v15012_v0  ;;  %v5393_v48 = vadd.f32 %v5329_v16, %v15014_v35  ;;  %v7597_v31 = vpop.eup %7596  ;;  %v5487_v18 = vunpack.c.h.bf16 %v15048_v7 }
 0x4f8   : > { %v5236_v30 = vmul.f32 0.044677734, %v5172_v34  ;;  %v5237_v12 = vmul.f32 0.044677734, %v5173_v42  ;;  %v5116_v19 = vpack.c.bf16 %v5079_v43, %v5078_v26  ;;  %v4787_v58 = vmul.f32 0.5, %v14546_v46 }
 0x4f9   : > { %v5330_v62 = vunpack.c.l.bf16 %v5274_v23  ;;  %v5331_v61 = vunpack.c.h.bf16 %v5274_v23  ;;  %v5738_v1 = vpack.c.bf16 %v7593_v13, %v7591_v38  ;;  %v5740_v63 = vpack.c.bf16 %v7597_v31, %v7595_v39 }
 0x4fa   : > { %v5275_v25 = vpack.c.bf16 %v5237_v12, %v5236_v30  ;;  %v5174_v55 = vunpack.c.l.bf16 %v5116_v19  ;;  %v5175_v36 = vunpack.c.h.bf16 %v5116_v19  ;;  %v5550_v16 = vmul.f32 0.796875, %v5486_v28 }
 0x4fb   : > { %v5394_v60 = vadd.f32 %v5330_v62, %v15032_v24  ;;  %v5395_v5 = vadd.f32 %v5331_v61, %v15034_v41  ;;  %v5433_v34 = vpack.c.bf16 %v5393_v48, %v5392_v33  ;;  %v5551_v0 = vmul.f32 0.796875, %v5487_v18 }
 0x4fc   : > { %v5332_v42 = vunpack.c.l.bf16 %v5275_v25  ;;  %v5333_v35 = vunpack.c.h.bf16 %v5275_v25  ;;  %v5238_v10 = vmul.f32 0.044677734, %v5174_v55  ;;  %v5239_v23 = vmul.f32 0.044677734, %v5175_v36 }
 0x4fd   : > { %v5434_v7 = vpack.c.bf16 %v5395_v5, %v5394_v60  ;;  %v5778_v38 = vunpack.c.l.bf16 %v5738_v1  ;;  %v5779_v13 = vunpack.c.h.bf16 %v5738_v1  ;;  %v4790_v39 = vmul.f32 0.5, %v14596_v2 }
 0x4fe   : > { %v5396_v26 = vadd.f32 %v5332_v42, %v15044_v27  ;;  %v5397_v46 = vadd.f32 %v5333_v35, %v15046_v15  ;;  %v5276_v43 = vpack.c.bf16 %v5239_v23, %v5238_v10  ;;  %v4791_v30 = vmul.f32 0.5, %v14598_v59  ;;  %v17520_v10 = vld [vmem:[#allocation93_spill] sm:$0xff] }
 0x4ff   : > { %v5782_v12 = vunpack.c.l.bf16 %v5740_v63  ;;  %v5488_v33 = vunpack.c.l.bf16 %v5433_v34  ;;  %v5489_v25 = vunpack.c.h.bf16 %v5433_v34  ;;  %v5783_v48 = vunpack.c.h.bf16 %v5740_v63 }
 0x500   : > { %v5490_v5 = vunpack.c.l.bf16 %v5434_v7  ;;  %v5491_v31 = vunpack.c.h.bf16 %v5434_v7  ;;  %v5334_v36 = vunpack.c.l.bf16 %v5276_v43  ;;  %v5335_v18 = vunpack.c.h.bf16 %v5276_v43 }
 0x501   : > { %v15089_v62 = vpack.c.bf16 %v5551_v0, %v5550_v16  ;;  %v5435_v35 = vpack.c.bf16 %v5397_v46, %v5396_v26  ;;  %v5842_v61 = vadd.f32 1.0, %v5778_v38  ;;  %v5843_v19 = vadd.f32 1.0, %v5779_v13 }
 0x502   : > { %v4842_v2 = vpack.c.bf16 %v4787_v58, %v4786_v37  ;;  %v4844_v1 = vpack.c.bf16 %v4791_v30, %v4790_v39  ;;  %v5846_v59 = vadd.f32 1.0, %v5782_v12  ;;  %v5552_v60 = vmul.f32 0.796875, %v5488_v33 }
 0x503   : > { %v5553_v55 = vmul.f32 0.796875, %v5489_v25  ;;  %v5847_v42 = vadd.f32 1.0, %v5783_v48  ;;  %v5898_v23 = vpack.c.bf16 %v5843_v19, %v5842_v61  ;;  %v5554_v34 = vmul.f32 0.796875, %v5490_v5 }
 0x504   : > { %v5555_v63 = vmul.f32 0.796875, %v5491_v31  ;;  %v5398_v7 = vadd.f32 %v5334_v36, %v15060_v11  ;;  %v5399_v43 = vadd.f32 %v5335_v18, %v15062_v20  ;;  %v5492_v16 = vunpack.c.l.bf16 %v5435_v35  ;;  %v17530_v11 = vld [vmem:[#allocation82_spill] sm:$0xff] }
 0x505   : > { %v5900_v26 = vpack.c.bf16 %v5847_v42, %v5846_v59  ;;  %v6002_v46 = vunpack.c.l.bf16 %v5898_v23  ;;  %v5938_v37 = vunpack.c.l.bf16 %v4842_v2  ;;  %v5942_v58 = vunpack.c.l.bf16 %v4844_v1 }
 0x506   : > { %v6003_v13 = vunpack.c.h.bf16 %v5898_v23  ;;  %v15096_v39 = vpack.c.bf16 %v5553_v55, %v5552_v60  ;;  %v5493_v30 = vunpack.c.h.bf16 %v5435_v35  ;;  %v5939_v33 = vunpack.c.h.bf16 %v4842_v2  ;;  %v17521_v35 = vld [vmem:[#allocation45_spill] sm:$0xff]  ;;  %v17522_v2 = vld [vmem:[#allocation94_spill] sm:$0xff] }
 0x507   : > { %v6006_v12 = vunpack.c.l.bf16 %v5900_v26  ;;  %v15098_v25 = vpack.c.bf16 %v5555_v63, %v5554_v34  ;;  %v5436_v48 = vpack.c.bf16 %v5399_v43, %v5398_v7  ;;  %v5943_v5 = vunpack.c.h.bf16 %v4844_v1  ;;  %v4617_v1 = vpop.f32.mrf.mxu2  ;;  %v4666_v7 = vpop.f32.mrf.mxu3 }
 0x508   : > { %v6007_v31 = vunpack.c.h.bf16 %v5900_v26  ;;  %v5556_v36 = vmul.f32 0.796875, %v5492_v16  ;;  %v6066_v18 = vmul.f32 %v6002_v46, %v5938_v37  ;;  %v4788_v19 = vmul.f32 0.5, %v14565_v47 }
 0x509   : > { %v6070_v61 = vmul.f32 %v6006_v12, %v5942_v58  ;;  %v6067_v59 = vmul.f32 %v6003_v13, %v5939_v33  ;;  %v5620_v28 = vunpack.c.l.bf16 %v17520_v10  ;;  %v5621_v60 = vunpack.c.h.bf16 %v17520_v10  ;;  %v17523_v12 = vld [vmem:[#allocation84_spill] sm:$0xff]  ;;  %v17524_v33 = vld [vmem:[#allocation31_spill] sm:$0xff] }
 0x50a   : > { %v6071_v42 = vmul.f32 %v6007_v31, %v5943_v5  ;;  %v4789_v23 = vmul.f32 0.5, %v17521_v35  ;;  %v5624_v34 = vunpack.c.l.bf16 %v17522_v2  ;;  %v5625_v63 = vunpack.c.h.bf16 %v17522_v2  ;;  %v17526_v35 = vld [vmem:[#allocation52_spill] sm:$0xff] }
 0x50b   : > { %v6122_v55 = vpack.c.bf16 %v6070_v61, %v6066_v18  ;;  %v5557_v43 = vmul.f32 0.796875, %v5493_v30  ;;  %v5494_v16 = vunpack.c.l.bf16 %v5436_v48  ;;  %7598 = vtanh.f32 %v5620_v28 }
 0x50c   : > { %v6123_v26 = vpack.c.bf16 %v6071_v42, %v6067_v59  ;;  %7600 = vtanh.f32 %v5621_v60  ;;  %v5495_v10 = vunpack.c.h.bf16 %v5436_v48  ;;  %v4618_v58 = vadd.f32 %v4617_v1, %v14334_v54  ;;  %v17525_v60 = vld [vmem:[#allocation74_spill] sm:$0xff] }
 0x50d   : > { %6424 = vmatmul.bf16.gmra.mxu0 %v6122_v55  ;;  %7602 = vtanh.f32 %v5624_v34  ;;  %v4667_v13 = vadd.f32 %v4666_v7, %v14336_v53  ;;  %v4792_v30 = vmul.f32 0.5, %v17523_v12  ;;  %v4793_v5 = vmul.f32 0.5, %v17524_v33 }
 0x50e   : > { %6473 = vmatmul.bf16.gmra.mxu1 %v6123_v26  ;;  %v15113_v28 = vpack.c.bf16 %v4789_v23, %v4788_v19  ;;  %7604 = vtanh.f32 %v5625_v63  ;;  %v15116_v18 = vpack.c.bf16 %v5557_v43, %v5556_v36  ;;  %v15118_v61 = vmul.f32 0.796875, %v5494_v16  ;;  %v17527_v23 = vld [vmem:[#allocation41_spill] sm:$0xff] }
 0x50f   : > { %v4701_v48 = vpack.c.bf16 %v4667_v13, %v4618_v58  ;;  %v4794_v59 = vmul.f32 0.5, %v14738_v49  ;;  %v4795_v42 = vmul.f32 0.5, %v14740_v57  ;;  %v4798_v55 = vmul.f32 0.5, %v17525_v60 }
 0x510   : > { %v4799_v2 = vmul.f32 0.5, %v17526_v35  ;;  %v5626_v63 = vunpack.c.l.bf16 %v17527_v23  ;;  %v5627_v36 = vunpack.c.h.bf16 %v17527_v23  ;;  %v15130_v43 = vmul.f32 0.796875, %v5495_v10 }
 0x511   : > { %v7599_v34 = vpop.eup %7598  ;;  %v15124_v1 = vunpack.c.l.bf16 %v4701_v48  ;;  %v15126_v19 = vunpack.c.h.bf16 %v4701_v48  ;;  %v4845_v16 = vpack.c.bf16 %v4793_v5, %v4792_v30  ;;  %v5940_v49 = vunpack.c.l.bf16 %v15113_v28 }
 0x512   : > { %v7601_v7 = vpop.eup %7600  ;;  %v5630_v57 = vunpack.c.l.bf16 %v14927_v9  ;;  %7606 = vtanh.f32 %v5626_v63  ;;  %v15138_v48 = vpack.c.bf16 %v4795_v42, %v4794_v59  ;;  %v15140_v60 = vpack.c.bf16 %v4799_v2, %v4798_v55 }
 0x513   : > { %v7603_v26 = vpop.eup %7602  ;;  %v5739_v58 = vpack.c.bf16 %v7601_v7, %v7599_v34  ;;  %v4920_v13 = vmul.f32 %v15124_v1, %v15124_v1  ;;  %v4921_v12 = vmul.f32 %v15126_v19, %v15126_v19  ;;  %v5631_v10 = vunpack.c.h.bf16 %v14927_v9 }
 0x514   : > { %v7605_v33 = vpop.eup %7604  ;;  %7608 = vtanh.f32 %v5627_v36  ;;  %v5944_v34 = vunpack.c.l.bf16 %v4845_v16  ;;  %v5941_v7 = vunpack.c.h.bf16 %v15113_v28  ;;  %v5945_v31 = vunpack.c.h.bf16 %v4845_v16 }
 0x515   : > { %v5741_v30 = vpack.c.bf16 %v7605_v33, %v7603_v26  ;;  %v5780_v5 = vunpack.c.l.bf16 %v5739_v58  ;;  %v5781_v35 = vunpack.c.h.bf16 %v5739_v58  ;;  %v4957_v23 = vpack.c.bf16 %v4921_v12, %v4920_v13 }
 0x516   : > { %7610 = vtanh.f32 %v5630_v57  ;;  %v5946_v55 = vunpack.c.l.bf16 %v15138_v48  ;;  %v5947_v57 = vunpack.c.h.bf16 %v15138_v48  ;;  %v4797_v41 = vmul.f32 0.5, %v17530_v11 }
 0x517   : > { %v5784_v37 = vunpack.c.l.bf16 %v5741_v30  ;;  %v5785_v46 = vunpack.c.h.bf16 %v5741_v30  ;;  %v5844_v63 = vadd.f32 1.0, %v5780_v5  ;;  %v5845_v47 = vadd.f32 1.0, %v5781_v35 }
 0x518   : > { %v5016_v59 = vunpack.c.l.bf16 %v4957_v23  ;;  %v5017_v42 = vunpack.c.h.bf16 %v4957_v23  ;;  %7612 = vtanh.f32 %v5631_v10  ;;  %v7607_v9 = vpop.eup %7606 }
 0x519   : > { %v5848_v2 = vadd.f32 1.0, %v5784_v37  ;;  %v5849_v36 = vadd.f32 1.0, %v5785_v46  ;;  %v5899_v26 = vpack.c.bf16 %v5845_v47, %v5844_v63  ;;  %v17528_v37 = vld [vmem:[#allocation63_spill] sm:$0xff]  ;;  %v17529_v47 = vld [vmem:[#allocation32_spill] sm:$0xff] }
 0x51a   : > { %v7609_v13 = vpop.eup %7608  ;;  %v5080_v28 = vmul.f32 %v5016_v59, %v15124_v1  ;;  %v5081_v16 = vmul.f32 %v5017_v42, %v15126_v19  ;;  %v4796_v46 = vmul.f32 0.5, %v17528_v37  ;;  %v5628_v63 = vunpack.c.l.bf16 %v17529_v47 }
 0x51b   : > { %v5901_v33 = vpack.c.bf16 %v5849_v36, %v5848_v2  ;;  %v6004_v30 = vunpack.c.l.bf16 %v5899_v26  ;;  %v6005_v10 = vunpack.c.h.bf16 %v5899_v26  ;;  %v5742_v5 = vpack.c.bf16 %v7609_v13, %v7607_v9 }
 0x51c   : > { %v7611_v35 = vpop.eup %7610  ;;  %v5117_v23 = vpack.c.bf16 %v5081_v16, %v5080_v28  ;;  %v5629_v38 = vunpack.c.h.bf16 %v17529_v47  ;;  %v5632_v42 = vunpack.c.l.bf16 %v14973_v51  ;;  %7614 = vtanh.f32 %v5628_v63 }
 0x51d   : > { %v6008_v0 = vunpack.c.l.bf16 %v5901_v33  ;;  %v6068_v59 = vmul.f32 %v6004_v30, %v5940_v49  ;;  %v6009_v58 = vunpack.c.h.bf16 %v5901_v33  ;;  %v5786_v2 = vunpack.c.l.bf16 %v5742_v5 }
 0x51e   : > { %v7613_v48 = vpop.eup %7612  ;;  %v5176_v53 = vunpack.c.l.bf16 %v5117_v23  ;;  %v5177_v12 = vunpack.c.h.bf16 %v5117_v23  ;;  %v5787_v36 = vunpack.c.h.bf16 %v5742_v5  ;;  %v6069_v9 = vmul.f32 %v6005_v10, %v5941_v7 }
 0x51f   : > { %v6072_v26 = vmul.f32 %v6008_v0, %v5944_v34  ;;  %v6073_v13 = vmul.f32 %v6009_v58, %v5945_v31  ;;  %v5744_v28 = vpack.c.bf16 %v7613_v48, %v7611_v35  ;;  %v5850_v54 = vadd.f32 1.0, %v5786_v2 }
 0x520   : > { %v5240_v16 = vmul.f32 0.044677734, %v5176_v53  ;;  %v5241_v37 = vmul.f32 0.044677734, %v5177_v12  ;;  %v5851_v15 = vadd.f32 1.0, %v5787_v36  ;;  %v5633_v31 = vunpack.c.h.bf16 %v14973_v51 }
 0x521   : > { %v6124_v27 = vpack.c.bf16 %v6072_v26, %v6068_v59  ;;  %v6125_v47 = vpack.c.bf16 %v6073_v13, %v6069_v9  ;;  %v5790_v20 = vunpack.c.l.bf16 %v5744_v28  ;;  %v5791_v49 = vunpack.c.h.bf16 %v5744_v28 }
 0x522   : > { %v5277_v33 = vpack.c.bf16 %v5241_v37, %v5240_v16  ;;  %v5902_v30 = vpack.c.bf16 %v5851_v15, %v5850_v54  ;;  %7616 = vtanh.f32 %v5629_v38  ;;  %v4800_v10 = vmul.f32 0.5, %v14794_v8  ;;  %v7615_v23 = vpop.eup %7614 }
 0x523   : > { %6522 = vmatmul.bf16.gmra.mxu2 %v6124_v27  ;;  %6571 = vmatmul.bf16.gmra.mxu3 %v6125_v47  ;;  %v5854_v5 = vadd.f32 1.0, %v5790_v20  ;;  %v5855_v0 = vadd.f32 1.0, %v5791_v49  ;;  %v4801_v35 = vmul.f32 0.5, %v14796_v45  ;;  %7618 = vtanh.f32 %v5632_v42 }
 0x524   : > { %v5336_v53 = vunpack.c.l.bf16 %v5277_v33  ;;  %v5337_v34 = vunpack.c.h.bf16 %v5277_v33  ;;  %v6010_v7 = vunpack.c.l.bf16 %v5902_v30  ;;  %v6011_v58 = vunpack.c.h.bf16 %v5902_v30 }
 0x525   : > { %v5904_v12 = vpack.c.bf16 %v5855_v0, %v5854_v5  ;;  %v15160_v11 = vpack.c.bf16 %v4797_v41, %v4796_v46  ;;  %7620 = vtanh.f32 %v5633_v31  ;;  %v4802_v59 = vmul.f32 0.5, %v14823_v32 }
 0x526   : > { %v5400_v54 = vadd.f32 %v5336_v53, %v15124_v1  ;;  %v5401_v27 = vadd.f32 %v5337_v34, %v15126_v19  ;;  %v6074_v15 = vmul.f32 %v6010_v7, %v5946_v55  ;;  %v6075_v38 = vmul.f32 %v6011_v58, %v5947_v57 }
 0x527   : > { %v6014_v20 = vunpack.c.l.bf16 %v5904_v12  ;;  %v6015_v51 = vunpack.c.h.bf16 %v5904_v12  ;;  %v4803_v8 = vmul.f32 0.5, %v14834_v17  ;;  %v4806_v45 = vmul.f32 0.5, %v14876_v3 }
 0x528   : > { %v5437_v63 = vpack.c.bf16 %v5401_v27, %v5400_v54  ;;  %v7617_v42 = vpop.eup %7616  ;;  %v17531_v48 = vunpack.c.l.bf16 %v15140_v60  ;;  %v17532_v55 = vunpack.c.h.bf16 %v15140_v60  ;;  %v4807_v46 = vmul.f32 0.5, %v14878_v22 }
 0x529   : > { %v17533_v57 = vunpack.c.l.bf16 %v14959_v6  ;;  %v5652_v36 = vunpack.c.l.bf16 %v15116_v18  ;;  %v5653_v32 = vunpack.c.h.bf16 %v15116_v18  ;;  %v15174_v26 = vpack.c.bf16 %v4801_v35, %v4800_v10  ;;  %v7619_v3 = vpop.eup %7618 }
 0x52a   : > { %v6078_v2 = vmul.f32 %v6014_v20, %v17531_v48  ;;  %v6079_v41 = vmul.f32 %v6015_v51, %v17532_v55  ;;  %v5743_v17 = vpack.c.bf16 %v7617_v42, %v7615_v23  ;;  %v15178_v9 = vpack.c.bf16 %v15130_v43, %v15118_v61 }
 0x52b   : > { %7622 = vtanh.f32 %v17533_v57  ;;  %v17534_v28 = vunpack.c.h.bf16 %v14959_v6  ;;  %v5496_v22 = vunpack.c.l.bf16 %v5437_v63  ;;  %v5497_v16 = vunpack.c.h.bf16 %v5437_v63  ;;  %v7621_v49 = vpop.eup %7620 }
 0x52c   : > { %v6126_v13 = vpack.c.bf16 %v6078_v2, %v6074_v15  ;;  %v6127_v60 = vpack.c.bf16 %v6079_v41, %v6075_v38  ;;  %v5788_v37 = vunpack.c.l.bf16 %v5743_v17  ;;  %v5789_v47 = vunpack.c.h.bf16 %v5743_v17 }
 0x52d   : > { %7624 = vtanh.f32 %v17534_v28  ;;  %v5948_v33 = vunpack.c.l.bf16 %v15160_v11  ;;  %v15183_v30 = vpack.c.bf16 %v4803_v8, %v4802_v59  ;;  %v15185_v5 = vpack.c.bf16 %v4807_v46, %v4806_v45 }
 0x52e   : > { %6429 = vmatmul.bf16.gmra.mxu0 %v6126_v13  ;;  %6478 = vmatmul.bf16.gmra.mxu1 %v6127_v60  ;;  %v17535_v61 = vunpack.c.l.bf16 %v15002_v56  ;;  %v5745_v43 = vpack.c.bf16 %v7621_v49, %v7619_v3  ;;  %v5852_v0 = vadd.f32 1.0, %v5788_v37  ;;  %v5853_v6 = vadd.f32 1.0, %v5789_v47 }
 0x52f   : > { %v5952_v31 = vunpack.c.l.bf16 %v15174_v26  ;;  %v5949_v34 = vunpack.c.h.bf16 %v15160_v11  ;;  %v5953_v7 = vunpack.c.h.bf16 %v15174_v26  ;;  %v17536_v58 = vunpack.c.h.bf16 %v15002_v56 }
 0x530   : > { %7626 = vtanh.f32 %v17535_v61  ;;  %v15195_v12 = vmul.f32 0.5, %v14854_v40  ;;  %v5560_v10 = vmul.f32 0.796875, %v5496_v22  ;;  %v5561_v35 = vmul.f32 0.796875, %v5497_v16 }
 0x531   : > { %v7623_v53 = vpop.eup %7622  ;;  %7628 = vtanh.f32 %v17536_v58  ;;  %v5792_v54 = vunpack.c.l.bf16 %v5745_v43  ;;  %v5793_v27 = vunpack.c.h.bf16 %v5745_v43  ;;  %v5903_v20 = vpack.c.bf16 %v5853_v6, %v5852_v0 }
 0x532   : > { %v5954_v51 = vunpack.c.l.bf16 %v15183_v30  ;;  %v5958_v38 = vunpack.c.l.bf16 %v15185_v5  ;;  %v17537_v11 = vunpack.c.l.bf16 %v14992_v52  ;;  %v17538_v59 = vunpack.c.h.bf16 %v14992_v52 }
 0x533   : > { %v7625_v15 = vpop.eup %7624  ;;  %v5856_v23 = vadd.f32 1.0, %v5792_v54  ;;  %v5857_v63 = vadd.f32 1.0, %v5793_v27  ;;  %v6012_v8 = vunpack.c.l.bf16 %v5903_v20  ;;  %v6013_v45 = vunpack.c.h.bf16 %v5903_v20 }
 0x534   : > { %7630 = vtanh.f32 %v17537_v11  ;;  %v5746_v56 = vpack.c.bf16 %v7625_v15, %v7623_v53  ;;  %v5955_v42 = vunpack.c.h.bf16 %v15183_v30  ;;  %v17539_v48 = vunpack.c.l.bf16 %v15006_v29  ;;  %v17541_v30 = vld [vmem:[#allocation48_spill] sm:$0xff] }
 0x535   : > { %7632 = vtanh.f32 %v17538_v59  ;;  %v5905_v2 = vpack.c.bf16 %v5857_v63, %v5856_v23  ;;  %v17540_v46 = vunpack.c.h.bf16 %v15006_v29  ;;  %v15208_v26 = vpack.c.bf16 %v5561_v35, %v5560_v10  ;;  %v17543_v59 = vld [vmem:[#allocation33_spill] sm:$0xff] }
 0x536   : > { %v7627_v40 = vpop.eup %7626  ;;  %7634 = vtanh.f32 %v17539_v48  ;;  %v5794_v55 = vunpack.c.l.bf16 %v5746_v56  ;;  %v5795_v41 = vunpack.c.h.bf16 %v5746_v56  ;;  %v5959_v52 = vunpack.c.h.bf16 %v15185_v5 }
 0x537   : > { %7636 = vtanh.f32 %v17540_v46  ;;  %v7629_v57 = vpop.eup %7628  ;;  %v4808_v17 = vmul.f32 0.5, %v14909_v4  ;;  %v4809_v3 = vmul.f32 0.5, %v14911_v21  ;;  %v6016_v13 = vunpack.c.l.bf16 %v5905_v2  ;;  %v17542_v21 = vld [vmem:[#allocation127_spill] sm:$0xff] }
 0x538   : > { %v6017_v60 = vunpack.c.h.bf16 %v5905_v2  ;;  %v5748_v28 = vpack.c.bf16 %v7629_v57, %v7627_v40  ;;  %v5858_v22 = vadd.f32 1.0, %v5794_v55  ;;  %v6076_v37 = vmul.f32 %v6012_v8, %v5948_v33 }
 0x539   : > { %v6077_v47 = vmul.f32 %v6013_v45, %v5949_v34  ;;  %v5859_v49 = vadd.f32 1.0, %v5795_v41  ;;  %v4805_v29 = vmul.f32 0.5, %v17541_v30  ;;  %v6080_v43 = vmul.f32 %v6016_v13, %v5952_v31 }
 0x53a   : > { %v7631_v16 = vpop.eup %7630  ;;  %v6081_v0 = vmul.f32 %v6017_v60, %v5953_v7  ;;  %v5798_v6 = vunpack.c.l.bf16 %v5748_v28  ;;  %v5799_v53 = vunpack.c.h.bf16 %v5748_v28  ;;  %v4853_v4 = vpack.c.bf16 %v4809_v3, %v4808_v17  ;;  %v17544_v28 = vld [vmem:[#allocation88_spill] sm:$0xff] }
 0x53b   : > { %v7633_v61 = vpop.eup %7632  ;;  %v5906_v10 = vpack.c.bf16 %v5859_v49, %v5858_v22  ;;  %v4810_v54 = vmul.f32 0.5, %v17542_v21  ;;  %v6128_v15 = vpack.c.bf16 %v6080_v43, %v6076_v37  ;;  %v4811_v40 = vmul.f32 0.5, %v17543_v59 }
 0x53c   : > { %v7635_v58 = vpop.eup %7634  ;;  %v5747_v35 = vpack.c.bf16 %v7633_v61, %v7631_v16  ;;  %v6129_v20 = vpack.c.bf16 %v6081_v0, %v6077_v47  ;;  %v5862_v11 = vadd.f32 1.0, %v5798_v6  ;;  %v5863_v33 = vadd.f32 1.0, %v5799_v53 }
 0x53d   : > { %v7637_v27 = vpop.eup %7636  ;;  %v6018_v34 = vunpack.c.l.bf16 %v5906_v10  ;;  %v6019_v23 = vunpack.c.h.bf16 %v5906_v10  ;;  %6527 = vmatmul.bf16.gmra.mxu2 %v6128_v15  ;;  %v4814_v8 = vmul.f32 0.5, %v14980_v44  ;;  %v4815_v55 = vmul.f32 0.5, %v14982_v14 }
 0x53e   : > { %v5749_v63 = vpack.c.bf16 %v7637_v27, %v7635_v58  ;;  %v5796_v56 = vunpack.c.l.bf16 %v5747_v35  ;;  %6576 = vmatmul.bf16.gmra.mxu3 %v6129_v20  ;;  %v5908_v31 = vpack.c.bf16 %v5863_v33, %v5862_v11  ;;  %v5797_v7 = vunpack.c.h.bf16 %v5747_v35 }
 0x53f   : > { %v6082_v45 = vmul.f32 %v6018_v34, %v5954_v51  ;;  %v6083_v3 = vmul.f32 %v6019_v23, %v5955_v42  ;;  %v17545_v22 = vunpack.c.l.bf16 %v17544_v28  ;;  %v17546_v51 = vunpack.c.h.bf16 %v17544_v28 }
 0x540   : > { %v5800_v48 = vunpack.c.l.bf16 %v5749_v63  ;;  %v5801_v2 = vunpack.c.h.bf16 %v5749_v63  ;;  %v6022_v41 = vunpack.c.l.bf16 %v5908_v31  ;;  %v6023_v46 = vunpack.c.h.bf16 %v5908_v31 }
 0x541   : > { %v5860_v57 = vadd.f32 1.0, %v5796_v56  ;;  %v5861_v17 = vadd.f32 1.0, %v5797_v7  ;;  %7638 = vtanh.f32 %v17545_v22  ;;  %v4851_v14 = vpack.c.bf16 %v4805_v29, %v15195_v12  ;;  %v17550_v56 = vld [vmem:[#allocation70_spill] sm:$0xff]  ;;  %v17551_v7 = vld [vmem:[#allocation59_spill] sm:$0xff] }
 0x542   : > { %v5864_v13 = vadd.f32 1.0, %v5800_v48  ;;  %v5865_v60 = vadd.f32 1.0, %v5801_v2  ;;  %v6086_v16 = vmul.f32 %v6022_v41, %v5958_v38  ;;  %v6087_v37 = vmul.f32 %v6023_v46, %v5959_v52  ;;  %v17554_v41 = vld [vmem:[#allocation68_spill] sm:$0xff] }
 0x543   : > { %v5907_v44 = vpack.c.bf16 %v5861_v17, %v5860_v57  ;;  %7640 = vtanh.f32 %v17546_v51  ;;  %v15225_v49 = vpack.c.bf16 %v4811_v40, %v4810_v54  ;;  %v17547_v42 = vunpack.c.l.bf16 %v15089_v62  ;;  %v17552_v40 = vld [vmem:[#allocation38_spill] sm:$0xff] }
 0x544   : > { %v5909_v47 = vpack.c.bf16 %v5865_v60, %v5864_v13  ;;  %v6130_v30 = vpack.c.bf16 %v6086_v16, %v6082_v45  ;;  %v6131_v61 = vpack.c.bf16 %v6087_v37, %v6083_v3  ;;  %v15229_v0 = vpack.c.bf16 %v4815_v55, %v4814_v8 }
 0x545   : > { %7642 = vtanh.f32 %v17547_v42  ;;  %v6020_v43 = vunpack.c.l.bf16 %v5907_v44  ;;  %v6021_v38 = vunpack.c.h.bf16 %v5907_v44  ;;  %v17548_v6 = vunpack.c.h.bf16 %v15089_v62 }
 0x546   : > { %v6024_v5 = vunpack.c.l.bf16 %v5909_v47  ;;  %v6025_v52 = vunpack.c.h.bf16 %v5909_v47  ;;  %v5654_v53 = vunpack.c.l.bf16 %v15178_v9  ;;  %v5655_v12 = vunpack.c.h.bf16 %v15178_v9  ;;  %6434 = vmatmul.bf16.gmra.mxu0 %v6130_v30  ;;  %6483 = vmatmul.bf16.gmra.mxu1 %v6131_v61 }
 0x547   : > { %7644 = vtanh.f32 %v17548_v6  ;;  %v5960_v29 = vunpack.c.l.bf16 %v4853_v4  ;;  %v5961_v58 = vunpack.c.h.bf16 %v4853_v4  ;;  %v7639_v10 = vpop.eup %7638  ;;  %v5656_v35 = vunpack.c.l.bf16 %v15208_v26 }
 0x548   : > { %v5657_v21 = vunpack.c.h.bf16 %v15208_v26  ;;  %v5956_v54 = vunpack.c.l.bf16 %v4851_v14  ;;  %v5957_v27 = vunpack.c.h.bf16 %v4851_v14  ;;  %v5962_v62 = vunpack.c.l.bf16 %v15225_v49 }
 0x549   : > { %v7641_v15 = vpop.eup %7640  ;;  %v6088_v20 = vmul.f32 %v6024_v5, %v5960_v29  ;;  %v6089_v11 = vmul.f32 %v6025_v52, %v5961_v58  ;;  %v17549_v33 = vunpack.c.l.bf16 %v15072_v50  ;;  %v5966_v4 = vunpack.c.l.bf16 %v15229_v0  ;;  %v17559_v5 = vld [vmem:[#allocation72_spill] sm:$0xff] }
 0x54a   : > { %v6084_v34 = vmul.f32 %v6020_v43, %v5956_v54  ;;  %v6085_v23 = vmul.f32 %v6021_v38, %v5957_v27  ;;  %v5750_v63 = vpack.c.bf16 %v7641_v15, %v7639_v10  ;;  %v4812_v31 = vmul.f32 0.5, %v17550_v56 }
 0x54b   : > { %7646 = vtanh.f32 %v17549_v33  ;;  %v7643_v9 = vpop.eup %7642  ;;  %v4813_v59 = vmul.f32 0.5, %v17551_v7  ;;  %v4816_v8 = vmul.f32 0.5, %v17552_v40  ;;  %v17553_v45 = vunpack.c.h.bf16 %v15072_v50 }
 0x54c   : > { %v5802_v2 = vunpack.c.l.bf16 %v5750_v63  ;;  %v5803_v55 = vunpack.c.h.bf16 %v5750_v63  ;;  %v4817_v46 = vmul.f32 0.5, %v17554_v41  ;;  %v17555_v57 = vunpack.c.l.bf16 %v15096_v39 }
 0x54d   : > { %7648 = vtanh.f32 %v17553_v45  ;;  %v7645_v48 = vpop.eup %7644  ;;  %v6132_v17 = vpack.c.bf16 %v6088_v20, %v6084_v34  ;;  %v6133_v3 = vpack.c.bf16 %v6089_v11, %v6085_v23  ;;  %v17556_v60 = vunpack.c.h.bf16 %v15096_v39  ;;  %v17561_v20 = vld [vmem:[#allocation99_spill] sm:$0xff] }
 0x54e   : > { %7650 = vtanh.f32 %v17555_v57  ;;  %v5752_v13 = vpack.c.bf16 %v7645_v48, %v7643_v9  ;;  %v5866_v28 = vadd.f32 1.0, %v5802_v2  ;;  %v5867_v22 = vadd.f32 1.0, %v5803_v55 }
 0x54f   : > { %7652 = vtanh.f32 %v17556_v60  ;;  %v5963_v16 = vunpack.c.h.bf16 %v15225_v49  ;;  %v5967_v50 = vunpack.c.h.bf16 %v15229_v0  ;;  %6532 = vmatmul.bf16.gmra.mxu2 %v6132_v17  ;;  %6581 = vmatmul.bf16.gmra.mxu3 %v6133_v3  ;;  %v15253_v14 = vpack.c.bf16 %v4813_v59, %v4812_v31 }
 0x550   : > { %v5806_v44 = vunpack.c.l.bf16 %v5752_v13  ;;  %v5807_v51 = vunpack.c.h.bf16 %v5752_v13  ;;  %v17557_v47 = vunpack.c.l.bf16 %v15098_v25  ;;  %v5910_v42 = vpack.c.bf16 %v5867_v22, %v5866_v28 }
 0x551   : > { %v7647_v37 = vpop.eup %7646  ;;  %v15257_v30 = vpack.c.bf16 %v4817_v46, %v4816_v8  ;;  %v15260_v39 = vmul.f32 0.5, %v15032_v24  ;;  %v17558_v49 = vunpack.c.h.bf16 %v15098_v25  ;;  %v4819_v38 = vmul.f32 0.5, %v17559_v5  ;;  %v17560_v24 = vld [vmem:[#allocation77_spill] sm:$0xff] }
 0x552   : > { %7654 = vtanh.f32 %v17557_v47  ;;  %v5870_v43 = vadd.f32 1.0, %v5806_v44  ;;  %v5871_v0 = vadd.f32 1.0, %v5807_v51  ;;  %v6026_v6 = vunpack.c.l.bf16 %v5910_v42 }
 0x553   : > { %7656 = vtanh.f32 %v17558_v49  ;;  %v7649_v61 = vpop.eup %7648  ;;  %v6027_v29 = vunpack.c.h.bf16 %v5910_v42  ;;  %v5964_v27 = vunpack.c.l.bf16 %v15253_v14  ;;  %v4822_v15 = vmul.f32 0.5, %v17560_v24 }
 0x554   : > { %7658 = vtanh.f32 %v5654_v53  ;;  %v7651_v52 = vpop.eup %7650  ;;  %v5751_v58 = vpack.c.bf16 %v7649_v61, %v7647_v37  ;;  %v5912_v54 = vpack.c.bf16 %v5871_v0, %v5870_v43  ;;  %v4823_v25 = vmul.f32 0.5, %v17561_v20  ;;  %v17562_v20 = vld [vmem:[#allocation79_spill] sm:$0xff] }
 0x555   : > { %7660 = vtanh.f32 %v5655_v12  ;;  %v7653_v10 = vpop.eup %7652  ;;  %v5968_v9 = vunpack.c.l.bf16 %v15257_v30  ;;  %v5965_v34 = vunpack.c.h.bf16 %v15253_v14  ;;  %v6090_v63 = vmul.f32 %v6026_v6, %v5962_v62 }
 0x556   : > { %v5753_v11 = vpack.c.bf16 %v7653_v10, %v7651_v52  ;;  %v5804_v33 = vunpack.c.l.bf16 %v5751_v58  ;;  %v6030_v23 = vunpack.c.l.bf16 %v5912_v54  ;;  %v6031_v56 = vunpack.c.h.bf16 %v5912_v54  ;;  %v4522_v10 = vpop.f32.mrf.mxu0 }
 0x557   : > { %v5805_v31 = vunpack.c.h.bf16 %v5751_v58  ;;  %v6091_v7 = vmul.f32 %v6027_v29, %v5963_v16  ;;  %v5969_v3 = vunpack.c.h.bf16 %v15257_v30  ;;  %v4860_v13 = vpack.c.bf16 %v4823_v25, %v4822_v15 }
 0x558   : > { %v7655_v53 = vpop.eup %7654  ;;  %v5808_v59 = vunpack.c.l.bf16 %v5753_v11  ;;  %v5809_v40 = vunpack.c.h.bf16 %v5753_v11  ;;  %v5868_v8 = vadd.f32 1.0, %v5804_v33  ;;  %v6094_v48 = vmul.f32 %v6030_v23, %v5966_v4  ;;  %v4571_v11 = vpop.f32.mrf.mxu1 }
 0x559   : > { %v7657_v12 = vpop.eup %7656  ;;  %v6095_v2 = vmul.f32 %v6031_v56, %v5967_v50  ;;  %v5869_v55 = vadd.f32 1.0, %v5805_v31  ;;  %7662 = vtanh.f32 %v5652_v36  ;;  %v4858_v36 = vpack.c.bf16 %v4819_v38, %v15260_v39  ;;  %v17564_v39 = vld [vmem:[#allocation83_spill] sm:$0xff] }
 0x55a   : > { %v7659_v45 = vpop.eup %7658  ;;  %v5754_v41 = vpack.c.bf16 %v7657_v12, %v7655_v53  ;;  %v5872_v57 = vadd.f32 1.0, %v5808_v59  ;;  %v5873_v17 = vadd.f32 1.0, %v5809_v40  ;;  %v6134_v60 = vpack.c.bf16 %v6094_v48, %v6090_v63  ;;  %v17565_v63 = vld [vmem:[#allocation34_spill] sm:$0xff] }
 0x55b   : > { %v7661_v46 = vpop.eup %7660  ;;  %v6135_v62 = vpack.c.bf16 %v6095_v2, %v6091_v7  ;;  %v5911_v28 = vpack.c.bf16 %v5869_v55, %v5868_v8  ;;  %7664 = vtanh.f32 %v5653_v32  ;;  %v4820_v25 = vmul.f32 0.5, %v17562_v20  ;;  %v4620_v2 = vpop.f32.mrf.mxu2 }
 0x55c   : > { %v5756_v22 = vpack.c.bf16 %v7661_v46, %v7659_v45  ;;  %v5913_v37 = vpack.c.bf16 %v5873_v17, %v5872_v57  ;;  %v5810_v16 = vunpack.c.l.bf16 %v5754_v41  ;;  %v5811_v44 = vunpack.c.h.bf16 %v5754_v41  ;;  %6439 = vmatmul.bf16.gmra.mxu0 %v6134_v60  ;;  %v4669_v55 = vpop.f32.mrf.mxu3  ;;  %v17566_v57 = vld [vmem:[#allocation86_spill] sm:$0xff] }
 0x55d   : > { %6488 = vmatmul.bf16.gmra.mxu1 %v6135_v62  ;;  %v6028_v4 = vunpack.c.l.bf16 %v5911_v28  ;;  %v6029_v50 = vunpack.c.h.bf16 %v5911_v28  ;;  %7666 = vtanh.f32 %v5656_v35  ;;  %v5975_v32 = vunpack.c.h.bf16 %v4860_v13 }
 0x55e   : > { %v5814_v51 = vunpack.c.l.bf16 %v5756_v22  ;;  %v5815_v14 = vunpack.c.h.bf16 %v5756_v22  ;;  %v6032_v47 = vunpack.c.l.bf16 %v5913_v37  ;;  %v6033_v42 = vunpack.c.h.bf16 %v5913_v37 }
 0x55f   : > { %v5874_v30 = vadd.f32 1.0, %v5810_v16  ;;  %v5875_v49 = vadd.f32 1.0, %v5811_v44  ;;  %v6092_v61 = vmul.f32 %v6028_v4, %v5964_v27  ;;  %v6093_v43 = vmul.f32 %v6029_v50, %v5965_v34  ;;  %v7663_v54 = vpop.eup %7662  ;;  %v17563_v34 = vld [vmem:[#allocation91_spill] sm:$0xff] }
 0x560   : > { %v5878_v0 = vadd.f32 1.0, %v5814_v51  ;;  %v5879_v5 = vadd.f32 1.0, %v5815_v14  ;;  %v6096_v52 = vmul.f32 %v6032_v47, %v5968_v9  ;;  %v6097_v6 = vmul.f32 %v6033_v42, %v5969_v3  ;;  %v17567_v3 = vld [vmem:[#allocation55_spill] sm:$0xff]  ;;  %v4524_v47 = vpop.f32.mrf.mxu0 }
 0x561   : > { %v5914_v29 = vpack.c.bf16 %v5875_v49, %v5874_v30  ;;  %v5974_v27 = vunpack.c.l.bf16 %v4860_v13  ;;  %v4821_v53 = vmul.f32 0.5, %v17563_v34  ;;  %7668 = vtanh.f32 %v5657_v21  ;;  %v7665_v31 = vpop.eup %7664 }
 0x562   : > { %v5916_v58 = vpack.c.bf16 %v5879_v5, %v5878_v0  ;;  %v6136_v24 = vpack.c.bf16 %v6096_v52, %v6092_v61  ;;  %v6137_v15 = vpack.c.bf16 %v6097_v6, %v6093_v43  ;;  %v4523_v38 = vadd.f32 %v4522_v10, %v17564_v39  ;;  %v4573_v52 = vpop.f32.mrf.mxu1 }
 0x563   : > { %v6034_v18 = vunpack.c.l.bf16 %v5914_v29  ;;  %v6035_v35 = vunpack.c.h.bf16 %v5914_v29  ;;  %v5970_v23 = vunpack.c.l.bf16 %v4858_v36  ;;  %v4572_v56 = vadd.f32 %v4571_v11, %v17565_v63  ;;  %v7667_v8 = vpop.eup %7666 }
 0x564   : > { %v6038_v33 = vunpack.c.l.bf16 %v5916_v58  ;;  %v6039_v9 = vunpack.c.h.bf16 %v5916_v58  ;;  %6537 = vmatmul.bf16.gmra.mxu2 %v6136_v24  ;;  %6586 = vmatmul.bf16.gmra.mxu3 %v6137_v15  ;;  %v5971_v7 = vunpack.c.h.bf16 %v4858_v36  ;;  %v4824_v40 = vmul.f32 0.5, %v15124_v1 }
 0x565   : > { %v4825_v26 = vmul.f32 0.5, %v15126_v19  ;;  %v4859_v21 = vpack.c.bf16 %v4821_v53, %v4820_v25  ;;  %v5755_v45 = vpack.c.bf16 %v7665_v31, %v7663_v54  ;;  %v4702_v48 = vpack.c.bf16 %v4572_v56, %v4523_v38  ;;  %v4622_v56 = vpop.f32.mrf.mxu2  ;;  %v4671_v31 = vpop.f32.mrf.mxu3 }
 0x566   : > { %v6102_v12 = vmul.f32 %v6038_v33, %v5974_v27  ;;  %v6103_v59 = vmul.f32 %v6039_v9, %v5975_v32  ;;  %v6098_v41 = vmul.f32 %v6034_v18, %v5970_v23  ;;  %v6099_v46 = vmul.f32 %v6035_v35, %v5971_v7 }
 0x567   : > { %v4621_v17 = vadd.f32 %v4620_v2, %v17566_v57  ;;  %v4670_v13 = vadd.f32 %v4669_v55, %v17567_v3  ;;  %v7669_v60 = vpop.eup %7668  ;;  %v5812_v62 = vunpack.c.l.bf16 %v5755_v45  ;;  %v5813_v28 = vunpack.c.h.bf16 %v5755_v45 }
 0x568   : > { %v15288_v22 = vunpack.c.l.bf16 %v4702_v48  ;;  %v15290_v1 = vunpack.c.h.bf16 %v4702_v48  ;;  %v6138_v37 = vpack.c.bf16 %v6102_v12, %v6098_v41  ;;  %v6139_v19 = vpack.c.bf16 %v6103_v59, %v6099_v46 }
 0x569   : > { %v5757_v16 = vpack.c.bf16 %v7669_v60, %v7667_v8  ;;  %v4703_v44 = vpack.c.bf16 %v4670_v13, %v4621_v17  ;;  %v5876_v4 = vadd.f32 1.0, %v5812_v62  ;;  %v5877_v50 = vadd.f32 1.0, %v5813_v28 }
 0x56a   : > { %v4922_v51 = vmul.f32 %v15288_v22, %v15288_v22  ;;  %v4923_v14 = vmul.f32 %v15290_v1, %v15290_v1  ;;  %v4861_v43 = vpack.c.bf16 %v4825_v26, %v4824_v40  ;;  %v4525_v36 = vadd.f32 %v4524_v47, %v17564_v39 }
 0x56b   : > { %v5816_v42 = vunpack.c.l.bf16 %v5757_v16  ;;  %v5817_v30 = vunpack.c.h.bf16 %v5757_v16  ;;  %v15296_v49 = vunpack.c.l.bf16 %v4703_v44  ;;  %v15298_v61 = vunpack.c.h.bf16 %v4703_v44  ;;  %v6464_v16 = vpop.f32.mrf.mxu1 }
 0x56c   : > { %6444 = vmatmul.bf16.gmra.mxu0 %v6138_v37  ;;  %v5915_v0 = vpack.c.bf16 %v5877_v50, %v5876_v4  ;;  %v4958_v5 = vpack.c.bf16 %v4923_v14, %v4922_v51  ;;  %v4574_v25 = vadd.f32 %v4573_v52, %v17565_v63  ;;  %v5972_v11 = vunpack.c.l.bf16 %v4859_v21 }
 0x56d   : > { %6493 = vmatmul.bf16.gmra.mxu1 %v6139_v19  ;;  %v5880_v6 = vadd.f32 1.0, %v5816_v42  ;;  %v5881_v29 = vadd.f32 1.0, %v5817_v30  ;;  %v4924_v54 = vmul.f32 %v15296_v49, %v15296_v49  ;;  %v4925_v24 = vmul.f32 %v15298_v61, %v15298_v61  ;;  %v6415_v19 = vpop.f32.mrf.mxu0  ;;  %v6513_v14 = vpop.f32.mrf.mxu2 }
 0x56e   : > { %v5018_v58 = vunpack.c.l.bf16 %v4958_v5  ;;  %v5019_v10 = vunpack.c.h.bf16 %v4958_v5  ;;  %v6036_v27 = vunpack.c.l.bf16 %v5915_v0  ;;  %v6037_v20 = vunpack.c.h.bf16 %v5915_v0  ;;  %v6562_v47 = vpop.f32.mrf.mxu3 }
 0x56f   : > { %v5917_v15 = vpack.c.bf16 %v5881_v29, %v5880_v6  ;;  %v5976_v33 = vunpack.c.l.bf16 %v4861_v43  ;;  %v5973_v18 = vunpack.c.h.bf16 %v4859_v21  ;;  %v5977_v32 = vunpack.c.h.bf16 %v4861_v43 }
 0x570   : > { %v5082_v9 = vmul.f32 %v5018_v58, %v15288_v22  ;;  %v5083_v34 = vmul.f32 %v5019_v10, %v15290_v1  ;;  %v4959_v38 = vpack.c.bf16 %v4925_v24, %v4924_v54  ;;  %v4704_v23 = vpack.c.bf16 %v4574_v25, %v4525_v36 }
 0x571   : > { %v6040_v53 = vunpack.c.l.bf16 %v5917_v15  ;;  %v6041_v35 = vunpack.c.h.bf16 %v5917_v15  ;;  %v6100_v12 = vmul.f32 %v6036_v27, %v5972_v11  ;;  %v6101_v59 = vmul.f32 %v6037_v20, %v5973_v18 }
 0x572   : > { %v5118_v39 = vpack.c.bf16 %v5083_v34, %v5082_v9  ;;  %v15308_v26 = vunpack.c.l.bf16 %v4704_v23  ;;  %v15310_v45 = vunpack.c.h.bf16 %v4704_v23  ;;  %v4623_v21 = vadd.f32 %v4622_v56, %v17566_v57  ;;  %v15321_v57 = vld [vmem:[%s15467_s6] ss:$0 sm:$0xff] }
 0x573   : > { %v6104_v7 = vmul.f32 %v6040_v53, %v5976_v33  ;;  %v6105_v40 = vmul.f32 %v6041_v35, %v5977_v32  ;;  %v5020_v55 = vunpack.c.l.bf16 %v4959_v38  ;;  %v5021_v41 = vunpack.c.h.bf16 %v4959_v38  ;;  %v6466_v9 = vpop.f32.mrf.mxu1 }
 0x574   : > { %v5178_v63 = vunpack.c.l.bf16 %v5118_v39  ;;  %v5179_v8 = vunpack.c.h.bf16 %v5118_v39  ;;  %v4926_v46 = vmul.f32 %v15308_v26, %v15308_v26  ;;  %v4927_v17 = vmul.f32 %v15310_v45, %v15310_v45 }
 0x575   : > { %v6140_v48 = vpack.c.bf16 %v6104_v7, %v6100_v12  ;;  %v6141_v2 = vpack.c.bf16 %v6105_v40, %v6101_v59  ;;  %v4672_v62 = vadd.f32 %v4671_v31, %v17567_v3  ;;  %v5084_v44 = vmul.f32 %v5020_v55, %v15296_v49  ;;  %v6417_v33 = vpop.f32.mrf.mxu0  ;;  %v6515_v32 = vpop.f32.mrf.mxu2 }
 0x576   : > { %v5242_v13 = vmul.f32 0.044677734, %v5178_v63  ;;  %v5243_v60 = vmul.f32 0.044677734, %v5179_v8  ;;  %v4960_v28 = vpack.c.bf16 %v4927_v17, %v4926_v46  ;;  %v5085_v4 = vmul.f32 %v5021_v41, %v15298_v61  ;;  %v6564_v56 = vpop.f32.mrf.mxu3  ;;  %v17568_v41 = vld [vmem:[#allocation44_spill] sm:$0xff] }
 0x577   : > { %6542 = vmatmul.bf16.gmra.mxu2 %v6140_v48  ;;  %6591 = vmatmul.bf16.gmra.mxu3 %v6141_v2  ;;  %v4705_v37 = vpack.c.bf16 %v4672_v62, %v4623_v21  ;;  %v6416_v43 = vadd.f32 %v15321_v57, %v6415_v19  ;;  %v6418_v59 = vadd.f32 %v15321_v57, %v6417_v33 }
 0x578   : > { %v5022_v50 = vunpack.c.l.bf16 %v4960_v28  ;;  %v5023_v51 = vunpack.c.h.bf16 %v4960_v28  ;;  %v5278_v42 = vpack.c.bf16 %v5243_v60, %v5242_v13  ;;  %v5119_v29 = vpack.c.bf16 %v5085_v4, %v5084_v44 }
 0x579   : > { %v15325_v3 = vunpack.c.l.bf16 %v4705_v37  ;;  %v15327_v30 = vunpack.c.h.bf16 %v4705_v37  ;;  %v6465_v24 = vadd.f32 %v6464_v16, %v6416_v43  ;;  %v6467_v62 = vadd.f32 %v6466_v9, %v6418_v59 }
 0x57a   : > { %v5086_v0 = vmul.f32 %v5022_v50, %v15308_v26  ;;  %v5087_v5 = vmul.f32 %v5023_v51, %v15310_v45  ;;  %v5338_v58 = vunpack.c.l.bf16 %v5278_v42  ;;  %v5339_v10 = vunpack.c.h.bf16 %v5278_v42 }
 0x57b   : > { %v4928_v52 = vmul.f32 %v15325_v3, %v15325_v3  ;;  %v4929_v6 = vmul.f32 %v15327_v30, %v15327_v30  ;;  %v6514_v11 = vadd.f32 %v6513_v14, %v6465_v24  ;;  %v5180_v34 = vunpack.c.l.bf16 %v5119_v29  ;;  %v6469_v19 = vpop.f32.mrf.mxu1 }
 0x57c   : > { %v5120_v36 = vpack.c.bf16 %v5087_v5, %v5086_v0  ;;  %v5402_v35 = vadd.f32 %v5338_v58, %v15288_v22  ;;  %v5403_v39 = vadd.f32 %v5339_v10, %v15290_v1  ;;  %v5181_v31 = vunpack.c.h.bf16 %v5119_v29 }
 0x57d   : > { %v4961_v54 = vpack.c.bf16 %v4929_v6, %v4928_v52  ;;  %v6563_v7 = vadd.f32 %v6562_v47, %v6514_v11  ;;  %v5244_v63 = vmul.f32 0.044677734, %v5180_v34  ;;  %v6420_v37 = vpop.f32.mrf.mxu0  ;;  %v6516_v4 = vadd.f32 %v6515_v32, %v6467_v62  ;;  %v6518_v51 = vpop.f32.mrf.mxu2 }
 0x57e   : > { %v5182_v15 = vunpack.c.l.bf16 %v5120_v36  ;;  %v5183_v27 = vunpack.c.h.bf16 %v5120_v36  ;;  %v5438_v2 = vpack.c.bf16 %v5403_v39, %v5402_v35  ;;  %v5245_v17 = vmul.f32 0.044677734, %v5181_v31  ;;  %v6567_v6 = vpop.f32.mrf.mxu3  ;;  %v17569_v36 = vld [vmem:[#allocation49_spill] sm:$0xff] }
 0x57f   : > { %v5024_v20 = vunpack.c.l.bf16 %v4961_v54  ;;  %v5025_v25 = vunpack.c.h.bf16 %v4961_v54  ;;  %v6618_v46 = vadd.f32 %v6563_v7, %v17568_v41  ;;  %v6421_v50 = vadd.f32 %v15321_v57, %v6420_v37 }
 0x580   : > { %v5246_v53 = vmul.f32 0.044677734, %v5182_v15  ;;  %v5247_v18 = vmul.f32 0.044677734, %v5183_v27  ;;  %v5498_v14 = vunpack.c.l.bf16 %v5438_v2  ;;  %v5499_v47 = vunpack.c.h.bf16 %v5438_v2 }
 0x581   : > { %v5088_v38 = vmul.f32 %v5024_v20, %v15325_v3  ;;  %v5089_v23 = vmul.f32 %v5025_v25, %v15327_v30  ;;  %6634 = vst [vmem:[%s15347_s20] sm:$0xff] %v6618_v46  ;;  %v5279_v42 = vpack.c.bf16 %v5245_v17, %v5244_v63  ;;  %v6565_v43 = vadd.f32 %v6564_v56, %v6516_v4  ;;  %v17571_v17 = vld [vmem:[#allocation60_spill] sm:$0xff] }
 0x582   : > { %v5280_v12 = vpack.c.bf16 %v5247_v18, %v5246_v53  ;;  %v6470_v0 = vadd.f32 %v6469_v19, %v6421_v50  ;;  %v5562_v54 = vmul.f32 0.796875, %v5498_v14  ;;  %v5563_v24 = vmul.f32 0.796875, %v5499_v47  ;;  %v17570_v53 = vld [vmem:[#allocation56_spill] sm:$0xff] }
 0x583   : > { %v5121_v40 = vpack.c.bf16 %v5089_v23, %v5088_v38  ;;  %v6619_v58 = vadd.f32 %v6565_v43, %v17569_v36  ;;  %v5340_v15 = vunpack.c.l.bf16 %v5279_v42  ;;  %v5341_v27 = vunpack.c.h.bf16 %v5279_v42  ;;  %v6471_v39 = vpop.f32.mrf.mxu1 }
 0x584   : > { %v5342_v8 = vunpack.c.l.bf16 %v5280_v12  ;;  %v5343_v48 = vunpack.c.h.bf16 %v5280_v12  ;;  %v6519_v10 = vadd.f32 %v6518_v51, %v6470_v0  ;;  %v5598_v35 = vpack.c.bf16 %v5563_v24, %v5562_v54 }
 0x585   : > { %v5184_v21 = vunpack.c.l.bf16 %v5121_v40  ;;  %v5185_v55 = vunpack.c.h.bf16 %v5121_v40  ;;  %6635 = vst [vmem:[%s15347_s20 + $0x8] sm:$0xff] %v6619_v58  ;;  %v6422_v33 = vpop.f32.mrf.mxu0  ;;  %v6520_v38 = vpop.f32.mrf.mxu2  ;;  %v5404_v23 = vadd.f32 %v5340_v15, %v15296_v49  ;;  %v5405_v56 = vadd.f32 %v5341_v27, %v15298_v61 }
 0x586   : > { %v5406_v13 = vadd.f32 %v5342_v8, %v15308_v26  ;;  %v5407_v60 = vadd.f32 %v5343_v48, %v15310_v45  ;;  %v6568_v20 = vadd.f32 %v6567_v6, %v6519_v10  ;;  %v6423_v32 = vadd.f32 %v15321_v57, %v6422_v33  ;;  %v6569_v8 = vpop.f32.mrf.mxu3 }
 0x587   : > { %v5248_v28 = vmul.f32 0.044677734, %v5184_v21  ;;  %v5249_v44 = vmul.f32 0.044677734, %v5185_v55  ;;  %v5658_v63 = vunpack.c.l.bf16 %v5598_v35  ;;  %v5659_v48 = vunpack.c.h.bf16 %v5598_v35 }
 0x588   : > { %v5440_v16 = vpack.c.bf16 %v5407_v60, %v5406_v13  ;;  %v6620_v18 = vadd.f32 %v6568_v20, %v17570_v53  ;;  %v6472_v31 = vadd.f32 %v6471_v39, %v6423_v32  ;;  %v5439_v2 = vpack.c.bf16 %v5405_v56, %v5404_v23 }
 0x589   : > { %v5281_v29 = vpack.c.bf16 %v5249_v44, %v5248_v28  ;;  %7670 = vtanh.f32 %v5658_v63  ;;  %v4826_v47 = vmul.f32 0.5, %v15288_v22  ;;  %v4827_v42 = vmul.f32 0.5, %v15290_v1 }
 0x58a   : > { %v5502_v5 = vunpack.c.l.bf16 %v5440_v16  ;;  %v5503_v52 = vunpack.c.h.bf16 %v5440_v16  ;;  %6636 = vst [vmem:[%s15347_s20 + $0x10] sm:$0xff] %v6620_v18  ;;  %v6521_v40 = vadd.f32 %v6520_v38, %v6472_v31  ;;  %v5500_v60 = vunpack.c.l.bf16 %v5439_v2 }
 0x58b   : > { %v5344_v9 = vunpack.c.l.bf16 %v5281_v29  ;;  %v5345_v34 = vunpack.c.h.bf16 %v5281_v29  ;;  %v5501_v62 = vunpack.c.h.bf16 %v5439_v2  ;;  %7672 = vtanh.f32 %v5659_v48  ;;  %v6474_v15 = vpop.f32.mrf.mxu1 }
 0x58c   : > { %v5566_v25 = vmul.f32 0.796875, %v5502_v5  ;;  %v5567_v11 = vmul.f32 0.796875, %v5503_v52  ;;  %v6570_v21 = vadd.f32 %v6569_v8, %v6521_v40  ;;  %v5564_v16 = vmul.f32 0.796875, %v5500_v60 }
 0x58d   : > { %v5408_v7 = vadd.f32 %v5344_v9, %v15325_v3  ;;  %v5409_v59 = vadd.f32 %v5345_v34, %v15327_v30  ;;  %v6425_v19 = vpop.f32.mrf.mxu0  ;;  %v5565_v44 = vmul.f32 0.796875, %v5501_v62  ;;  %v4830_v6 = vmul.f32 0.5, %v15308_v26 }
 0x58e   : > { %v5600_v12 = vpack.c.bf16 %v5567_v11, %v5566_v25  ;;  %v6621_v13 = vadd.f32 %v6570_v21, %v17571_v17  ;;  %v4831_v29 = vmul.f32 0.5, %v15310_v45  ;;  %v6426_v36 = vadd.f32 %v15321_v57, %v6425_v19 }
 0x58f   : > { %v5441_v46 = vpack.c.bf16 %v5409_v59, %v5408_v7  ;;  %v7671_v4 = vpop.eup %7670  ;;  %v5599_v52 = vpack.c.bf16 %v5565_v44, %v5564_v16  ;;  %v4862_v27 = vpack.c.bf16 %v4827_v42, %v4826_v47 }
 0x590   : > { %v5662_v55 = vunpack.c.l.bf16 %v5600_v12  ;;  %v5663_v41 = vunpack.c.h.bf16 %v5600_v12  ;;  %6637 = vst [vmem:[%s15347_s20 + $0x18] sm:$0xff] %v6621_v13  ;;  %v4864_v33 = vpack.c.bf16 %v4831_v29, %v4830_v6  ;;  %v6475_v9 = vadd.f32 %v6474_v15, %v6426_v36  ;;  %v17573_v29 = vld [vmem:[#allocation66_spill] sm:$0xff] }
 0x591   : > { %v5504_v28 = vunpack.c.l.bf16 %v5441_v46  ;;  %v5505_v37 = vunpack.c.h.bf16 %v5441_v46  ;;  %v7673_v50 = vpop.eup %7672  ;;  %v5660_v11 = vunpack.c.l.bf16 %v5599_v52  ;;  %v5661_v45 = vunpack.c.h.bf16 %v5599_v52 }
 0x592   : > { %7674 = vtanh.f32 %v5662_v55  ;;  %v5758_v0 = vpack.c.bf16 %v7673_v50, %v7671_v4  ;;  %v5978_v23 = vunpack.c.l.bf16 %v4862_v27  ;;  %v5982_v59 = vunpack.c.l.bf16 %v4864_v33 }
 0x593   : > { %7676 = vtanh.f32 %v5663_v41  ;;  %v5568_v51 = vmul.f32 0.796875, %v5504_v28  ;;  %v5569_v14 = vmul.f32 0.796875, %v5505_v37  ;;  %v5979_v40 = vunpack.c.h.bf16 %v4862_v27  ;;  %v17572_v41 = vld [vmem:[#allocation25_spill] sm:$0xff]  ;;  %v6476_v62 = vpop.f32.mrf.mxu1 }
 0x594   : > { %v5818_v10 = vunpack.c.l.bf16 %v5758_v0  ;;  %v5819_v54 = vunpack.c.h.bf16 %v5758_v0  ;;  %v5983_v63 = vunpack.c.h.bf16 %v4864_v33  ;;  %7678 = vtanh.f32 %v5660_v11 }
 0x595   : > { %v5601_v24 = vpack.c.bf16 %v5569_v14, %v5568_v51  ;;  %v6427_v34 = vpop.f32.mrf.mxu0  ;;  %7680 = vtanh.f32 %v5661_v45  ;;  %v4828_v0 = vmul.f32 0.5, %v15296_v49  ;;  %v4832_v52 = vmul.f32 0.5, %v15325_v3 }
 0x596   : > { %v5882_v25 = vadd.f32 1.0, %v5818_v10  ;;  %v5883_v1 = vadd.f32 1.0, %v5819_v54  ;;  %v6428_v48 = vadd.f32 %v15321_v57, %v6427_v34 }
 0x597   : > { %v5664_v32 = vunpack.c.l.bf16 %v5601_v24  ;;  %v5665_v35 = vunpack.c.h.bf16 %v5601_v24 }
 0x598   : > { %v7675_v43 = vpop.eup %7674  ;;  %v5918_v18 = vpack.c.bf16 %v5883_v1, %v5882_v25  ;;  %v6477_v28 = vadd.f32 %v6476_v62, %v6428_v48 }
 0x599   : > { %v7677_v5 = vpop.eup %7676  ;;  %7682 = vtanh.f32 %v5664_v32 }
 0x59a   : > { %v5760_v58 = vpack.c.bf16 %v7677_v5, %v7675_v43  ;;  %v6042_v12 = vunpack.c.l.bf16 %v5918_v18  ;;  %v6043_v7 = vunpack.c.h.bf16 %v5918_v18  ;;  %7684 = vtanh.f32 %v5665_v35  ;;  %v7679_v16 = vpop.eup %7678 }
 0x59b   : > { %v7681_v51 = vpop.eup %7680  ;;  %v4829_v5 = vmul.f32 0.5, %v15298_v61 }
 0x59c   : > { %v5822_v20 = vunpack.c.l.bf16 %v5760_v58  ;;  %v5823_v22 = vunpack.c.h.bf16 %v5760_v58  ;;  %v6106_v55 = vmul.f32 %v6042_v12, %v5978_v23  ;;  %v6107_v13 = vmul.f32 %v6043_v7, %v5979_v40 }
 0x59d   : > { %v5759_v42 = vpack.c.bf16 %v7681_v51, %v7679_v16  ;;  %v4833_v58 = vmul.f32 0.5, %v15327_v30  ;;  %v4863_v1 = vpack.c.bf16 %v4829_v5, %v4828_v0  ;;  %v17575_v16 = vld [vmem:[#allocation85_spill] sm:$0xff]  ;;  %v17576_v0 = vld [vmem:[#allocation112_spill] sm:$0xff] }
 0x59e   : > { %v5886_v53 = vadd.f32 1.0, %v5822_v20  ;;  %v5887_v26 = vadd.f32 1.0, %v5823_v22 }
 0x59f   : > { %v7683_v43 = vpop.eup %7682  ;;  %v5820_v10 = vunpack.c.l.bf16 %v5759_v42  ;;  %v5821_v54 = vunpack.c.h.bf16 %v5759_v42  ;;  %v4865_v49 = vpack.c.bf16 %v4833_v58, %v4832_v52  ;;  %v5981_v32 = vunpack.c.h.bf16 %v4863_v1 }
 0x5a0   : > { %v5920_v31 = vpack.c.bf16 %v5887_v26, %v5886_v53  ;;  %v7685_v6 = vpop.eup %7684  ;;  %v5980_v26 = vunpack.c.l.bf16 %v4863_v1 }
 0x5a1   : > { %v5761_v24 = vpack.c.bf16 %v7685_v6, %v7683_v43  ;;  %v5884_v15 = vadd.f32 1.0, %v5820_v10  ;;  %v5885_v27 = vadd.f32 1.0, %v5821_v54  ;;  %v5984_v18 = vunpack.c.l.bf16 %v4865_v49 }
 0x5a2   : > { %v6046_v2 = vunpack.c.l.bf16 %v5920_v31  ;;  %v6047_v21 = vunpack.c.h.bf16 %v5920_v31  ;;  %v5985_v35 = vunpack.c.h.bf16 %v4865_v49 }
 0x5a3   : > { %v5824_v22 = vunpack.c.l.bf16 %v5761_v24  ;;  %v5825_v25 = vunpack.c.h.bf16 %v5761_v24  ;;  %v5919_v11 = vpack.c.bf16 %v5885_v27, %v5884_v15  ;;  %v17577_v24 = vld [vmem:[#allocation35_spill] sm:$0xff] }
 0x5a4   : > { %v6110_v17 = vmul.f32 %v6046_v2, %v5982_v59  ;;  %v6111_v60 = vmul.f32 %v6047_v21, %v5983_v63 }
 0x5a5   : > { %v5888_v61 = vadd.f32 1.0, %v5824_v22  ;;  %v5889_v33 = vadd.f32 1.0, %v5825_v25  ;;  %v6044_v53 = vunpack.c.l.bf16 %v5919_v11  ;;  %v6045_v30 = vunpack.c.h.bf16 %v5919_v11 }
 0x5a6   : > { %v6523_v39 = vpop.f32.mrf.mxu2  ;;  %v6572_v38 = vpop.f32.mrf.mxu3  ;;  %v6142_v37 = vpack.c.bf16 %v6110_v17, %v6106_v55  ;;  %v6143_v19 = vpack.c.bf16 %v6111_v60, %v6107_v13 }
 0x5a7   : > { %v6524_v56 = vadd.f32 %v6523_v39, %v6475_v9  ;;  %v5921_v34 = vpack.c.bf16 %v5889_v33, %v5888_v61  ;;  %v6108_v23 = vmul.f32 %v6044_v53, %v5980_v26  ;;  %v6109_v31 = vmul.f32 %v6045_v30, %v5981_v32 }
 0x5a8   : > { %6449 = vmatmul.bf16.gmra.mxu0 %v6142_v37  ;;  %6498 = vmatmul.bf16.gmra.mxu1 %v6143_v19 }
 0x5a9   : > { %v6573_v8 = vadd.f32 %v6572_v38, %v6524_v56  ;;  %v6048_v45 = vunpack.c.l.bf16 %v5921_v34  ;;  %v6049_v39 = vunpack.c.h.bf16 %v5921_v34 }
 0x5ab   : > { %v6622_v46 = vadd.f32 %v6573_v8, %v17572_v41  ;;  %v6430_v50 = vpop.f32.mrf.mxu0  ;;  %v6479_v20 = vpop.f32.mrf.mxu1  ;;  %v6112_v56 = vmul.f32 %v6048_v45, %v5984_v18  ;;  %v6113_v12 = vmul.f32 %v6049_v39, %v5985_v35  ;;  %v17574_v41 = vld [vmem:[#allocation24_spill] sm:$0xff]  ;;  %v17579_v35 = vld [vmem:[#allocation46_spill] sm:$0xff] }
 0x5ac   : > { %v6431_v3 = vadd.f32 %v15321_v57, %v6430_v50 }
 0x5ad   : > { %6638 = vst [vmem:[%s15347_s20 + $0x20] sm:$0xff] %v6622_v46  ;;  %v6144_v8 = vpack.c.bf16 %v6112_v56, %v6108_v23  ;;  %v6145_v48 = vpack.c.bf16 %v6113_v12, %v6109_v31 }
 0x5ae   : > { %v6525_v44 = vpop.f32.mrf.mxu2  ;;  %v6574_v14 = vpop.f32.mrf.mxu3  ;;  %v6480_v38 = vadd.f32 %v6479_v20, %v6431_v3  ;;  %v17578_v3 = vld [vmem:[#allocation40_spill] sm:$0xff] }
 0x5af   : > { %v6526_v4 = vadd.f32 %v6525_v44, %v6477_v28  ;;  %6547 = vmatmul.bf16.gmra.mxu2 %v6144_v8  ;;  %6596 = vmatmul.bf16.gmra.mxu3 %v6145_v48  ;;  %v17581_v8 = vld [vmem:[#allocation26_spill] sm:$0xff] }
 0x5b1   : > { %v6575_v47 = vadd.f32 %v6574_v14, %v6526_v4 }
 0x5b3   : > { %v6623_v36 = vadd.f32 %v6575_v47, %v17573_v29  ;;  %v6432_v9 = vpop.f32.mrf.mxu0  ;;  %v6481_v63 = vpop.f32.mrf.mxu1 }
 0x5b4   : > { %v6433_v21 = vadd.f32 %v15321_v57, %v6432_v9 }
 0x5b5   : > { %6639 = vst [vmem:[%s15347_s20 + $0x28] sm:$0xff] %v6623_v36 }
 0x5b6   : > { %v6482_v17 = vadd.f32 %v6481_v63, %v6433_v21 }
 0x5c0   : > { %v6528_v7 = vpop.f32.mrf.mxu2 }
 0x5c1   : > { %v6577_v59 = vpop.f32.mrf.mxu3  ;;  %v6529_v40 = vadd.f32 %v6528_v7, %v6480_v38 }
 0x5c3   : > { %v6578_v2 = vadd.f32 %v6577_v59, %v6529_v40  ;;  %v6435_v55 = vpop.f32.mrf.mxu0  ;;  %v6484_v19 = vpop.f32.mrf.mxu1 }
 0x5c4   : > { %v6436_v37 = vadd.f32 %v15321_v57, %v6435_v55 }
 0x5c5   : > { %v6624_v46 = vadd.f32 %v6578_v2, %v17574_v41 }
 0x5c6   : > { %v6485_v50 = vadd.f32 %v6484_v19, %v6436_v37 }
 0x5c7   : > { %6640 = vst [vmem:[%s15347_s20 + $0x30] sm:$0xff] %v6624_v46 }
 0x5c8   : > { %v6530_v13 = vpop.f32.mrf.mxu2 }
 0x5c9   : > { %v6579_v60 = vpop.f32.mrf.mxu3  ;;  %v6531_v62 = vadd.f32 %v6530_v13, %v6482_v17  ;;  %v17582_v13 = vld [vmem:[#allocation96_spill] sm:$0xff] }
 0x5cb   : > { %v6580_v28 = vadd.f32 %v6579_v60, %v6531_v62  ;;  %v6437_v4 = vpop.f32.mrf.mxu0  ;;  %v6486_v52 = vpop.f32.mrf.mxu1 }
 0x5cc   : > { %v6438_v43 = vadd.f32 %v15321_v57, %v6437_v4 }
 0x5cd   : > { %v6625_v44 = vadd.f32 %v6580_v28, %v17575_v16 }
 0x5ce   : > { %v6487_v6 = vadd.f32 %v6486_v52, %v6438_v43 }
 0x5cf   : > { %6641 = vst [vmem:[%s15347_s20 + $0x38] sm:$0xff] %v6625_v44 }
 0x5d2   : > { %v6533_v51 = vpop.f32.mrf.mxu2  ;;  %v6582_v14 = vpop.f32.mrf.mxu3 }
 0x5d3   : > { %v6534_v47 = vadd.f32 %v6533_v51, %v6485_v50 }
 0x5d5   : > { %v6583_v42 = vadd.f32 %v6582_v14, %v6534_v47  ;;  %v17583_v47 = vld [vmem:[#allocation129_spill] sm:$0xff] }
 0x5d7   : > { %v6626_v5 = vadd.f32 %v6583_v42, %v17576_v0 }
 0x5d9   : > { %6642 = vst [vmem:[%s15347_s20 + $0x40] sm:$0xff] %v6626_v5  ;;  %v6440_v36 = vpop.f32.mrf.mxu0 }
 0x5da   : > { %v6535_v29 = vpop.f32.mrf.mxu2  ;;  %v6584_v10 = vpop.f32.mrf.mxu3  ;;  %v6441_v27 = vadd.f32 %v15321_v57, %v6440_v36 }
 0x5db   : > { %v6536_v58 = vadd.f32 %v6535_v29, %v6487_v6  ;;  %v6489_v20 = vpop.f32.mrf.mxu1  ;;  %v17586_v29 = vld [vmem:[#allocation90_spill] sm:$0xff] }
 0x5dc   : > { %v6490_v22 = vadd.f32 %v6489_v20, %v6441_v27 }
 0x5dd   : > { %v6585_v54 = vadd.f32 %v6584_v10, %v6536_v58 }
 0x5df   : > { %v6627_v15 = vadd.f32 %v6585_v54, %v17577_v24 }
 0x5e1   : > { %6643 = vst [vmem:[%s15347_s20 + $0x48] sm:$0xff] %v6627_v15  ;;  %v6442_v25 = vpop.f32.mrf.mxu0 }
 0x5e2   : > { %v6443_v33 = vadd.f32 %v15321_v57, %v6442_v25 }
 0x5e3   : > { %v6491_v34 = vpop.f32.mrf.mxu1 }
 0x5e4   : > { %v6492_v53 = vadd.f32 %v6491_v34, %v6443_v33 }
 0x5e7   : > { %v6538_v1 = vpop.f32.mrf.mxu2  ;;  %v6587_v49 = vpop.f32.mrf.mxu3 }
 0x5e8   : > { %v6539_v11 = vadd.f32 %v6538_v1, %v6490_v22 }
 0x5e9   : > { %v6445_v18 = vpop.f32.mrf.mxu0 }
 0x5ea   : > { %v6588_v61 = vadd.f32 %v6587_v49, %v6539_v11  ;;  %v6446_v38 = vadd.f32 %v15321_v57, %v6445_v18 }
 0x5eb   : > { %v6494_v23 = vpop.f32.mrf.mxu1 }
 0x5ec   : > { %v6628_v9 = vadd.f32 %v6588_v61, %v17578_v3  ;;  %v6495_v56 = vadd.f32 %v6494_v23, %v6446_v38 }
 0x5ee   : > { %6644 = vst [vmem:[%s15347_s20 + $0x50] sm:$0xff] %v6628_v9 }
 0x5ef   : > { %v6540_v30 = vpop.f32.mrf.mxu2  ;;  %v6589_v45 = vpop.f32.mrf.mxu3 }
 0x5f0   : > { %v6541_v26 = vadd.f32 %v6540_v30, %v6492_v53 }
 0x5f1   : > { %v6447_v31 = vpop.f32.mrf.mxu0 }
 0x5f2   : > { %v6590_v32 = vadd.f32 %v6589_v45, %v6541_v26  ;;  %v6448_v63 = vadd.f32 %v15321_v57, %v6447_v31 }
 0x5f3   : > { %v6496_v2 = vpop.f32.mrf.mxu1 }
 0x5f4   : > { %v6629_v39 = vadd.f32 %v6590_v32, %v17579_v35  ;;  %v6497_v21 = vadd.f32 %v6496_v2, %v6448_v63 }
 0x5f6   : > { %6645 = vst [vmem:[%s15347_s20 + $0x58] sm:$0xff] %v6629_v39 }
 0x5fa   : > { %v6543_v12 = vpop.f32.mrf.mxu2  ;;  %v6592_v7 = vpop.f32.mrf.mxu3 }
 0x5fb   : > { %v6544_v59 = vadd.f32 %v6543_v12, %v6495_v56 }
 0x5fd   : > { %v6593_v40 = vadd.f32 %v6592_v7, %v6544_v59 }
 0x5ff   : > { %v6630_v48 = vadd.f32 %v6593_v40, %v17581_v8 }
 0x601   : > { %6646 = vst [vmem:[%s15347_s20 + $0x60] sm:$0xff] %v6630_v48 }
 0x602   : > { %v6545_v55 = vpop.f32.mrf.mxu2  ;;  %v6594_v46 = vpop.f32.mrf.mxu3 }
 0x603   : > { %v6546_v41 = vadd.f32 %v6545_v55, %v6497_v21 }
 0x605   : > { %v6595_v17 = vadd.f32 %v6594_v46, %v6546_v41 }
 0x607   : > { %v6631_v60 = vadd.f32 %v6595_v17, %v17582_v13 }
 0x609   : > { %6647 = vst [vmem:[%s15347_s20 + $0x68] sm:$0xff] %v6631_v60 }
 0x625   : > { %v6450_v62 = vpop.f32.mrf.mxu0  ;;  %v6499_v37 = vpop.f32.mrf.mxu1 }
 0x626   : > { %v6451_v28 = vadd.f32 %v15321_v57, %v6450_v62 }
 0x628   : > { %v6500_v19 = vadd.f32 %v6499_v37, %v6451_v28 }
 0x62d   : > { %v6452_v16 = vpop.f32.mrf.mxu0  ;;  %v6501_v43 = vpop.f32.mrf.mxu1 }
 0x62e   : > { %v6453_v51 = vadd.f32 %v15321_v57, %v6452_v16 }
 0x630   : > { %v6502_v0 = vadd.f32 %v6501_v43, %v6453_v51 }
 0x632   : > { %v6548_v44 = vpop.f32.mrf.mxu2  ;;  %v6597_v4 = vpop.f32.mrf.mxu3 }
 0x633   : > { %v6549_v50 = vadd.f32 %v6548_v44, %v6500_v19 }
 0x635   : > { %v6598_v14 = vadd.f32 %v6597_v4, %v6549_v50 }
 0x637   : > { %v6632_v42 = vadd.f32 %v6598_v14, %v17583_v47 }
 0x639   : > { %6648 = vst [vmem:[%s15347_s20 + $0x70] sm:$0xff] %v6632_v42 }
 0x63a   : > { %v6550_v5 = vpop.f32.mrf.mxu2  ;;  %v6599_v6 = vpop.f32.mrf.mxu3 }
 0x63b   : > { %v6551_v52 = vadd.f32 %v6550_v5, %v6502_v0 }
 0x63d   : > { %v6600_v57 = vadd.f32 %v6599_v6, %v6551_v52 }
 0x63f   : > { %v6633_v36 = vadd.f32 %v6600_v57, %v17586_v29 }
 0x641   : > { %6649 = vst [vmem:[%s15347_s20 + $0x78] sm:$0xff] %v6633_v36 }
 0x642   : > { %8085 = shalt.err (!%p8082_p5)
}
 0x643   : > { %s8201_s16 = smov 128   ;;  %s8202_s20 = smov 8  }
 0x644   : > { %7339 = dma.vmem_to_hbm [thread:$0]  (%p8313_p6), %s6666_s27, 2048, %s6668_s21, %s6651_s1, %s8201_s16, %s8201_s16, %s8202_s20  }
 0x645 PF: > { %s17587_s8 = sld [smem:[#allocation16_spill]]  ;;  %p7371_p7 = scmp.ge.s32.totalorder %s8188_s11, 2 }
 0x647   : > { %p7359_p8 = pnand %p7371_p7, %p8319_p10 }
 0x649   : > { %p7360_p9 = pneg %p7359_p8 }
 0x64b   : > { %s6682_s14 = sand.u32 1, %s17587_s8  }
 0x64c   : > { %s6683_s30 = scalar_lea.sflag [#allocation4], %s6682_s14 }
 0x64d   : > { %8143 = dma.done.wait (%p7360_p9), %s6683_s30, 2048  }
 0x64e   : > { %8145 = vsyncadd (%p7360_p9), %s6683_s30, 4294965248  ;;  %s25_s11 = sadd.s32 1, %s8188_s11   ;;  %s17589_s30 = sld [smem:[#allocation18_spill]] }
 0x64f   : > { %p22_p12 = scmp.ge.s32.totalorder %s25_s11, 6   ;;  %s17590_s9 = sld [smem:[#allocation21_spill]] }
 0x650   : > { %s17591_s15 = sld [smem:[#allocation22_spill]]  ;;  %s17592_s24 = smov %s8152_s25 }
 0x651   : > { %s17593_s25 = smov %s8156_s26  ;;  %s17594_s26 = smov %s8385_s12 }
 0x652   : > { %s17595_s27 = smov %s8164_s28  ;;  %s17596_s28 = smov %s8168_s29 }
 0x653   : > { %s17597_s29 = smov %s8382_s22  ;;  %s17598_s8 = smov %s8184_s10 }
 0x654   :  { %24 = sbr.rel (!%p22_p12) target bundleno = 17 (0x11), region = 116 }
 0x656   : > { %s17599_s10 = smov %s17591_s15 }
 0x659   :  { %6689 = vsyncpa [#allocation3], 1 }
 0x65a   :  { %6691 = vsyncpa [#allocation3 + $0x1], 1 }
 0x65b   :  { %6692 = vsyncpa [#allocation6], 1 }
 0x65c   :  { %6693 = vsyncpa [#allocation9], 1 }
 0x65d   :  { %6694 = vsyncpa [#allocation4], 1 }
 0x65e   :  { %6696 = vsyncpa [#allocation4 + $0x1], 1 }

</bundles_post_ra>
